<compile_context>
chip_gen: v7x
topology: tpu7x:2x2x1
jax: 0.10.0
libtpu: 0.0.40
codegen_flags: <defaults>
</compile_context>

<pallas_src>
import functools

import numpy as np
import jax
import jax.numpy as jnp
from jax.experimental import pallas as pl
from jax.experimental.pallas import tpu as pltpu

BN_EPS = 1e-5
LEAKY_SLOPE = 0.2  # nn.LeakyReLU(0.2) in the original model

INPUT_SIZE = (1, 32, 32)
BASE_DEPTH = 16
HIDDEN_SIZE = 32
NUM_PARTS = 10
SCALE = 8
C_IN, H_IN, W_IN = INPUT_SIZE
BH = H_IN // SCALE                      # 4
BW = W_IN // SCALE                      # 4
HIDDEN = HIDDEN_SIZE * NUM_PARTS        # 320
ENC_OUT = BASE_DEPTH * SCALE // 2       # 64

_COMPILER_PARAMS = pltpu.CompilerParams(dimension_semantics=("arbitrary",))


# ----------------------------------------------------------------------------
# Pallas kernels
# ----------------------------------------------------------------------------
def _apply_act(name, x):
    if name == "identity":
        return x
    if name == "relu":
        return jnp.maximum(x, 0.0)
    if name == "leaky_relu":
        return jnp.where(x >= 0, x, LEAKY_SLOPE * x)
    if name == "tanh":
        return jnp.tanh(x)
    raise ValueError(name)


def _matmul_bn_act_kernel(col_ref, w_ref, g_ref, gt_ref, gamma_ref, beta_ref,
                          o_ref, *, act, inv_count):
    """y = col @ w ; training-mode BatchNorm over channel groups ; activation.

    Column layout of y is (group, channel) with channel fastest.  g / gt are the
    (Ncols, C) / (C, Ncols) 0-1 channel-indicator matrices so per-channel stats
    and their expansion back to columns are tiny MXU dots (no lane reshuffles).
    """
    y = jnp.dot(col_ref[...], w_ref[...], preferred_element_type=jnp.float32)
    s = jnp.sum(y, axis=0, keepdims=True)                    # (1, Ncols)
    ss = jnp.sum(y * y, axis=0, keepdims=True)
    ch_s = jnp.dot(s, g_ref[...], preferred_element_type=jnp.float32)    # (1, C)
    ch_ss = jnp.dot(ss, g_ref[...], preferred_element_type=jnp.float32)
    mean = ch_s * inv_count
    var = ch_ss * inv_count - mean * mean                    # biased (PyTorch)
    a = gamma_ref[...] * jax.lax.rsqrt(var + BN_EPS)
    b = beta_ref[...] - mean * a
    a_col = jnp.dot(a, gt_ref[...], preferred_element_type=jnp.float32)  # (1, Ncols)
    b_col = jnp.dot(b, gt_ref[...], preferred_element_type=jnp.float32)
    o_ref[...] = _apply_act(act, y * a_col + b_col)


def _matmul_bias_act_kernel(col_ref, w_ref, b_ref, o_ref, *, act):
    y = jnp.dot(col_ref[...], w_ref[...], preferred_element_type=jnp.float32)
    o_ref[...] = _apply_act(act, y + b_ref[...])


def _heads_reparam_kernel(h_ref, wmu_ref, bmu_ref, wlv_ref, blv_ref, n_ref,
                          mu_ref, var_ref, z_ref):
    """Merged mu / logvar heads + reparameterize epilogue."""
    h = h_ref[...]
    mu = jnp.dot(h, wmu_ref[...], preferred_element_type=jnp.float32) + bmu_ref[...]
    lv = jnp.dot(h, wlv_ref[...], preferred_element_type=jnp.float32) + blv_ref[...]
    mu_ref[...] = mu
    var_ref[...] = jnp.exp(lv)
    z_ref[...] = mu + n_ref[...] * jnp.exp(0.5 * lv)


# ----------------------------------------------------------------------------
# Pallas wrappers (grid=(1,), full-array blocks, no padding anywhere)
# ----------------------------------------------------------------------------
def conv_bn_act(col, w2, gamma, beta, act, groups):
    """col:(M,K) @ w2:(K, groups*C), batch-stat BN over C channels, activation."""
    M, K = col.shape
    ncols = w2.shape[1]
    C = gamma.shape[0]
    inv_count = 1.0 / float(M * groups)
    g = jnp.tile(jnp.eye(C, dtype=jnp.float32), (groups, 1))   # (ncols, C)
    gt = jnp.transpose(g)                                      # (C, ncols)
    return pl.pallas_call(
        functools.partial(_matmul_bn_act_kernel, act=act, inv_count=inv_count),
        out_shape=jax.ShapeDtypeStruct((M, ncols), jnp.float32),
        grid=(1,),
        in_specs=[
            pl.BlockSpec((M, K), lambda i: (0, 0)),
            pl.BlockSpec((K, ncols), lambda i: (0, 0)),
            pl.BlockSpec((ncols, C), lambda i: (0, 0)),
            pl.BlockSpec((C, ncols), lambda i: (0, 0)),
            pl.BlockSpec((1, C), lambda i: (0, 0)),
            pl.BlockSpec((1, C), lambda i: (0, 0)),
        ],
        out_specs=pl.BlockSpec((M, ncols), lambda i: (0, 0)),
        compiler_params=_COMPILER_PARAMS,
    )(col.astype(jnp.bfloat16), w2, g, gt,
      gamma.reshape(1, C).astype(jnp.float32),
      beta.reshape(1, C).astype(jnp.float32))


def conv_bias_act(col, w2, bias2d, act):
    M, K = col.shape
    ncols = w2.shape[1]
    return pl.pallas_call(
        functools.partial(_matmul_bias_act_kernel, act=act),
        out_shape=jax.ShapeDtypeStruct((M, ncols), jnp.float32),
        grid=(1,),
        in_specs=[
            pl.BlockSpec((M, K), lambda i: (0, 0)),
            pl.BlockSpec((K, ncols), lambda i: (0, 0)),
            pl.BlockSpec((1, ncols), lambda i: (0, 0)),
        ],
        out_specs=pl.BlockSpec((M, ncols), lambda i: (0, 0)),
        compiler_params=_COMPILER_PARAMS,
    )(col.astype(jnp.bfloat16), w2, bias2d)


def heads_reparam(h, wmu, bmu, wlv, blv, noise):
    M, K = h.shape
    Hd = wmu.shape[1]
    blk = lambda shape: pl.BlockSpec(shape, lambda i: (0, 0))
    mu, var, z = pl.pallas_call(
        _heads_reparam_kernel,
        out_shape=(jax.ShapeDtypeStruct((M, Hd), jnp.float32),
                   jax.ShapeDtypeStruct((M, Hd), jnp.float32),
                   jax.ShapeDtypeStruct((M, Hd), jnp.float32)),
        grid=(1,),
        in_specs=[blk((M, K)), blk((K, Hd)), blk((1, Hd)),
                  blk((K, Hd)), blk((1, Hd)), blk((M, Hd))],
        out_specs=(blk((M, Hd)), blk((M, Hd)), blk((M, Hd))),
        compiler_params=_COMPILER_PARAMS,
    )(h.astype(jnp.bfloat16), wmu, bmu, wlv, blv, noise.astype(jnp.float32))
    return mu, var, z


# ----------------------------------------------------------------------------
# XLA glue: im2col (NHWC), phase interleave for ConvTranspose
# ----------------------------------------------------------------------------
def im2col_nhwc(x, kh, kw, stride, pad):
    """x: (N,H,W,C) -> ((N*Ho*Wo, kh*kw*C), Ho, Wo) with K ordered (ki, kj, c)."""
    N, H, W, C = x.shape
    xp = jnp.pad(x, ((0, 0), (pad, pad), (pad, pad), (0, 0)))
    Ho = (H + 2 * pad - kh) // stride + 1
    Wo = (W + 2 * pad - kw) // stride + 1
    cols = []
    for i in range(kh):
        for j in range(kw):
            cols.append(xp[:, i:i + stride * Ho:stride, j:j + stride * Wo:stride, :])
    col = jnp.concatenate(cols, axis=-1)
    return col.reshape(N * Ho * Wo, kh * kw * C), Ho, Wo


def phase_interleave(y, N, H, W, cout):
    """(N*H*W, 4*cout) with columns (pi, pj, co) -> NHWC (N, 2H, 2W, cout)."""
    y = y.reshape(N, H, W, 2, 2, cout)
    y = jnp.transpose(y, (0, 1, 3, 2, 4, 5))
    return y.reshape(N, 2 * H, 2 * W, cout)


# ----------------------------------------------------------------------------
# Parameter init (PyTorch layouts) and conversion to matmul layouts
# ----------------------------------------------------------------------------
def init_params(key):
    def nrm(k, shape, std=0.05):
        return std * jax.random.normal(k, shape, dtype=jnp.float32)

    keys = jax.random.split(key, 16)
    p = {}
    # encoder (stand-in for commons.make_encoder 'tinyimage_5layer')
    p["enc1_w"] = nrm(keys[0], (BASE_DEPTH, C_IN, 3, 3))
    p["enc1_g"], p["enc1_b"] = jnp.ones(BASE_DEPTH), jnp.zeros(BASE_DEPTH)
    p["enc2_w"] = nrm(keys[1], (2 * BASE_DEPTH, BASE_DEPTH, 3, 3))
    p["enc2_g"], p["enc2_b"] = jnp.ones(2 * BASE_DEPTH), jnp.zeros(2 * BASE_DEPTH)
    p["enc3_w"] = nrm(keys[2], (ENC_OUT, 2 * BASE_DEPTH, 3, 3))
    p["enc3_g"], p["enc3_b"] = jnp.ones(ENC_OUT), jnp.zeros(ENC_OUT)
    # reduce: Conv2d(enc_out, base_depth, 1, bias=False) + BN + ReLU
    p["red_w"] = nrm(keys[3], (BASE_DEPTH, ENC_OUT, 1, 1))
    p["red_g"], p["red_b"] = jnp.ones(BASE_DEPTH), jnp.zeros(BASE_DEPTH)
    # heads: Conv2d(base_depth, hidden, BH)
    p["mu_w"] = nrm(keys[4], (HIDDEN, BASE_DEPTH, BH, BW))
    p["mu_b"] = nrm(keys[5], (HIDDEN,), 0.01)
    p["lv_w"] = nrm(keys[6], (HIDDEN, BASE_DEPTH, BH, BW))
    p["lv_b"] = nrm(keys[7], (HIDDEN,), 0.01)
    # decoder: ConvTranspose2d(hidden, base_depth, BH, bias=False) + BN + LeakyReLU(0.2)
    p["dec1_w"] = nrm(keys[8], (HIDDEN, BASE_DEPTH, BH, BW))
    p["dec1_g"], p["dec1_b"] = jnp.ones(BASE_DEPTH), jnp.zeros(BASE_DEPTH)
    # stand-in for commons.make_decoder 'tinyimage_5layer' (upsample x8)
    p["dec2_w"] = nrm(keys[9], (BASE_DEPTH, 2 * BASE_DEPTH, 4, 4))
    p["dec2_g"], p["dec2_b"] = jnp.ones(2 * BASE_DEPTH), jnp.zeros(2 * BASE_DEPTH)
    p["dec3_w"] = nrm(keys[10], (2 * BASE_DEPTH, BASE_DEPTH, 4, 4))
    p["dec3_g"], p["dec3_b"] = jnp.ones(BASE_DEPTH), jnp.zeros(BASE_DEPTH)
    p["dec4_w"] = nrm(keys[11], (BASE_DEPTH, C_IN, 4, 4))
    p["dec4_b"] = jnp.zeros((C_IN,), jnp.float32)
    return p


def _conv_w2(w):
    """Conv2d weight (Cout, Cin, kh, kw) -> (kh*kw*Cin, Cout), K order (ki,kj,ci)."""
    cout = w.shape[0]
    return jnp.transpose(w, (2, 3, 1, 0)).reshape(-1, cout)


def _convT_phase_w2(w):
    """ConvTranspose2d(k=4, s=2, p=1) weight (Cin, Cout, 4, 4) ->
    phase-decomposed (3*3*Cin, 2*2*Cout): rows ordered (ti, tj, ci) to match a
    3x3/stride-1/pad-1 im2col of the input, columns ordered (pi, pj, co)."""
    w = np.asarray(w, dtype=np.float32)
    cin, cout = w.shape[0], w.shape[1]
    out = np.zeros((3, 3, cin, 2, 2, cout), np.float32)
    for ti in range(3):
        for tj in range(3):
            for pi in range(2):
                for pj in range(2):
                    ki = pi + 3 - 2 * ti
                    kj = pj + 3 - 2 * tj
                    if 0 <= ki < 4 and 0 <= kj < 4:
                        out[ti, tj, :, pi, pj, :] = w[:, :, ki, kj]
    return jnp.asarray(out.reshape(9 * cin, 4 * cout))


def prepare_params(raw):
    """Convert PyTorch-layout parameters into bf16 matmul layouts (done once)."""
    bf = jnp.bfloat16
    p = {}
    for name in ("enc1", "enc2", "enc3"):
        p[name + "_w2"] = _conv_w2(raw[name + "_w"]).astype(bf)
        p[name + "_g"] = raw[name + "_g"]
        p[name + "_b"] = raw[name + "_b"]
    # reduce (1x1 conv): K order is just ci
    p["red_w2"] = raw["red_w"].reshape(BASE_DEPTH, ENC_OUT).T.astype(bf)
    p["red_g"], p["red_b"] = raw["red_g"], raw["red_b"]
    # heads: (hidden, Cin, BH, BW) -> (BH*BW*Cin, hidden), rows ordered (i, j, ci)
    p["mu_w2"] = jnp.transpose(raw["mu_w"], (2, 3, 1, 0)).reshape(-1, HIDDEN).astype(bf)
    p["mu_b"] = raw["mu_b"].reshape(1, HIDDEN).astype(jnp.float32)
    p["lv_w2"] = jnp.transpose(raw["lv_w"], (2, 3, 1, 0)).reshape(-1, HIDDEN).astype(bf)
    p["lv_b"] = raw["lv_b"].reshape(1, HIDDEN).astype(jnp.float32)
    # dec1: ConvT(hidden, 16, 4) on 1x1 input == linear; cols ordered (i, j, co)
    p["dec1_w2"] = jnp.transpose(raw["dec1_w"], (0, 2, 3, 1)) \
        .reshape(HIDDEN, BH * BW * BASE_DEPTH).astype(bf)
    p["dec1_g"], p["dec1_b"] = raw["dec1_g"], raw["dec1_b"]
    # dec2..dec4: ConvT(k=4, s=2, p=1) -> phase weights
    p["dec2_w2"] = _convT_phase_w2(raw["dec2_w"]).astype(bf)
    p["dec2_g"], p["dec2_b"] = raw["dec2_g"], raw["dec2_b"]
    p["dec3_w2"] = _convT_phase_w2(raw["dec3_w"]).astype(bf)
    p["dec3_g"], p["dec3_b"] = raw["dec3_g"], raw["dec3_b"]
    p["dec4_w2"] = _convT_phase_w2(raw["dec4_w"]).astype(bf)
    # dec4 bias broadcast to the 4 output phases (columns ordered (pi, pj, co))
    p["dec4_bias"] = jnp.tile(raw["dec4_b"], 4).reshape(1, 4 * C_IN).astype(jnp.float32)
    return p


# ----------------------------------------------------------------------------
# Forward
# ----------------------------------------------------------------------------
def vae_forward(params, x, noise):
    """x: (N, C, 32, 32) NCHW.  Returns (recon_x, app_mu, app_var, zeros)."""
    p = params
    N = x.shape[0]
    h = jnp.transpose(x, (0, 2, 3, 1))                             # NHWC

    # ---- encoder ----
    col, Ho, Wo = im2col_nhwc(h, 3, 3, 2, 1)
    h = conv_bn_act(col, p["enc1_w2"], p["enc1_g"], p["enc1_b"], "relu", 1)
    h = h.reshape(N, Ho, Wo, BASE_DEPTH)                           # (N,16,16,16)

    col, Ho, Wo = im2col_nhwc(h, 3, 3, 2, 1)
    h = conv_bn_act(col, p["enc2_w2"], p["enc2_g"], p["enc2_b"], "relu", 1)
    h = h.reshape(N, Ho, Wo, 2 * BASE_DEPTH)                       # (N,8,8,32)

    col, Ho, Wo = im2col_nhwc(h, 3, 3, 2, 1)
    h = conv_bn_act(col, p["enc3_w2"], p["enc3_g"], p["enc3_b"], "relu", 1)
    h = h.reshape(N, Ho, Wo, ENC_OUT)                              # (N,4,4,64)

    # ---- reduce (1x1 conv, no bias) + BN + ReLU ----
    col = h.reshape(N * BH * BW, ENC_OUT)
    h = conv_bn_act(col, p["red_w2"], p["red_g"], p["red_b"], "relu", 1)
    h = h.reshape(N, BH, BW, BASE_DEPTH)                           # (N,4,4,16)

    # ---- merged mu / logvar heads + reparameterize (single kernel) ----
    hf = h.reshape(N, BH * BW * BASE_DEPTH)                        # (N,256) (i,j,c)
    mu, var, z = heads_reparam(hf, p["mu_w2"], p["mu_b"],
                               p["lv_w2"], p["lv_b"], noise)       # (N,320) each

    # ---- decoder ----
    # dec1: ConvT(hidden, 16, 4) on 1x1 == linear; BN over channels (16 spatial groups)
    d = conv_bn_act(z, p["dec1_w2"], p["dec1_g"], p["dec1_b"], "leaky_relu", BH * BW)
    d = d.reshape(N, BH, BW, BASE_DEPTH)                           # (N,4,4,16)

    # dec2: ConvT(16,32,4,s2,p1) via phase decomposition + BN + LeakyReLU
    col, Ho, Wo = im2col_nhwc(d, 3, 3, 1, 1)
    y = conv_bn_act(col, p["dec2_w2"], p["dec2_g"], p["dec2_b"], "leaky_relu", 4)
    d = phase_interleave(y, N, Ho, Wo, 2 * BASE_DEPTH)             # (N,8,8,32)

    # dec3: ConvT(32,16,4,s2,p1) + BN + LeakyReLU
    col, Ho, Wo = im2col_nhwc(d, 3, 3, 1, 1)
    y = conv_bn_act(col, p["dec3_w2"], p["dec3_g"], p["dec3_b"], "leaky_relu", 4)
    d = phase_interleave(y, N, Ho, Wo, BASE_DEPTH)                 # (N,16,16,16)

    # dec4: ConvT(16,1,4,s2,p1) + bias + tanh
    col, Ho, Wo = im2col_nhwc(d, 3, 3, 1, 1)
    y = conv_bias_act(col, p["dec4_w2"], p["dec4_bias"], "tanh")
    d = phase_interleave(y, N, Ho, Wo, C_IN)                       # (N,32,32,1)

    recon_x = jnp.transpose(d, (0, 3, 1, 2))                       # NCHW
    app_mu = mu.reshape(N, HIDDEN, 1, 1)
    app_var = var.reshape(N, HIDDEN, 1, 1)
    return recon_x, app_mu, app_var, jnp.zeros_like(app_mu)


# ----------------------------------------------------------------------------
if __name__ == "__main__":
    key = jax.random.PRNGKey(0)
    k_param, k_x, k_noise = jax.random.split(key, 3)

    batch = 2
    raw_params = init_params(k_param)
    params = prepare_params(raw_params)
    x = jax.random.normal(k_x, (batch, C_IN, H_IN, W_IN), dtype=jnp.float32)
    noise = jax.random.normal(k_noise, (batch, HIDDEN), dtype=jnp.float32)

    fwd = jax.jit(vae_forward)
    recon_x, app_mu, app_var, zeros = fwd(params, x, noise)
    jax.block_until_ready((recon_x, app_mu, app_var, zeros))

    assert recon_x.shape == (batch, C_IN, H_IN, W_IN)
    assert app_mu.shape == (batch, HIDDEN, 1, 1)
    assert app_var.shape == (batch, HIDDEN, 1, 1)
    assert zeros.shape == (batch, HIDDEN, 1, 1)
    assert bool(jnp.all(jnp.isfinite(recon_x)))
    assert bool(jnp.all(app_var > 0))
    print("KERNEL_OK")
</pallas_src>

<mosaic_0001>
module attributes {stable_mosaic.version = 11 : i64} {
  func.func @_matmul_bn_act_kernel(%arg0: i32, %arg1: memref<512x9xbf16, #tpu.memory_space<vmem>>, %arg2: memref<9x16xbf16, #tpu.memory_space<vmem>>, %arg3: memref<16x16xf32, #tpu.memory_space<vmem>>, %arg4: memref<16x16xf32, #tpu.memory_space<vmem>>, %arg5: memref<1x16xf32, #tpu.memory_space<vmem>>, %arg6: memref<1x16xf32, #tpu.memory_space<vmem>>, %arg7: memref<512x16xf32, #tpu.memory_space<vmem>>) attributes {dimension_semantics = [#tpu.dimension_semantics<arbitrary>], iteration_bounds = array<i64: 1>, scalar_prefetch = 0 : i64, scratch_operands = 0 : i64, tpu.core_type = #tpu.core_type<tc>, window_params = [{pipeline_mode = #tpu.pipeline_mode<synchronous>, transform_indices = @transform_0, window_bounds = array<i64: 512, 9>}, {pipeline_mode = #tpu.pipeline_mode<synchronous>, transform_indices = @transform_1, window_bounds = array<i64: 9, 16>}, {pipeline_mode = #tpu.pipeline_mode<synchronous>, transform_indices = @transform_2, window_bounds = array<i64: 16, 16>}, {pipeline_mode = #tpu.pipeline_mode<synchronous>, transform_indices = @transform_3, window_bounds = array<i64: 16, 16>}, {pipeline_mode = #tpu.pipeline_mode<synchronous>, transform_indices = @transform_4, window_bounds = array<i64: 1, 16>}, {pipeline_mode = #tpu.pipeline_mode<synchronous>, transform_indices = @transform_5, window_bounds = array<i64: 1, 16>}, {pipeline_mode = #tpu.pipeline_mode<synchronous>, transform_indices = @transform_6, window_bounds = array<i64: 512, 16>}]} {
    %c0 = arith.constant 0 : index
    %c0_0 = arith.constant 0 : index
    %0 = vector.load %arg1[%c0, %c0_0] : memref<512x9xbf16, #tpu.memory_space<vmem>>, vector<512x9xbf16>
    %c0_1 = arith.constant 0 : index
    %c0_2 = arith.constant 0 : index
    %1 = vector.load %arg2[%c0_1, %c0_2] : memref<9x16xbf16, #tpu.memory_space<vmem>>, vector<9x16xbf16>
    %cst = arith.constant dense<0.000000e+00> : vector<512x16xf32>
    %2 = tpu.matmul %0, %1, %cst {dimension_numbers = #tpu.dot_dimension_numbers<[1], [0], [0], [1], [0, 0, 1, 1], [], []>} : vector<512x9xbf16>, vector<9x16xbf16>, vector<512x16xf32> -> vector<512x16xf32>
    %cst_3 = arith.constant dense<0.000000e+00> : vector<16xf32>
    %3 = vector.multi_reduction <add>, %2, %cst_3 [0] : vector<512x16xf32> to vector<16xf32>
    %4 = vector.shape_cast %3 : vector<16xf32> to vector<1x16xf32>
    %5 = arith.mulf %2, %2 : vector<512x16xf32>
    %cst_4 = arith.constant dense<0.000000e+00> : vector<16xf32>
    %6 = vector.multi_reduction <add>, %5, %cst_4 [0] : vector<512x16xf32> to vector<16xf32>
    %7 = vector.shape_cast %6 : vector<16xf32> to vector<1x16xf32>
    %c0_5 = arith.constant 0 : index
    %c0_6 = arith.constant 0 : index
    %8 = vector.load %arg3[%c0_5, %c0_6] : memref<16x16xf32, #tpu.memory_space<vmem>>, vector<16x16xf32>
    %cst_7 = arith.constant dense<0.000000e+00> : vector<1x16xf32>
    %9 = tpu.matmul %4, %8, %cst_7 {dimension_numbers = #tpu.dot_dimension_numbers<[1], [0], [0], [1], [0, 0, 1, 1], [], []>} : vector<1x16xf32>, vector<16x16xf32>, vector<1x16xf32> -> vector<1x16xf32>
    %c0_8 = arith.constant 0 : index
    %c0_9 = arith.constant 0 : index
    %10 = vector.load %arg3[%c0_8, %c0_9] : memref<16x16xf32, #tpu.memory_space<vmem>>, vector<16x16xf32>
    %cst_10 = arith.constant dense<0.000000e+00> : vector<1x16xf32>
    %11 = tpu.matmul %7, %10, %cst_10 {dimension_numbers = #tpu.dot_dimension_numbers<[1], [0], [0], [1], [0, 0, 1, 1], [], []>} : vector<1x16xf32>, vector<16x16xf32>, vector<1x16xf32> -> vector<1x16xf32>
    %cst_11 = arith.constant 0.001953125 : f32
    %12 = vector.broadcast %cst_11 : f32 to vector<1x16xf32>
    %13 = arith.mulf %9, %12 : vector<1x16xf32>
    %cst_12 = arith.constant 0.001953125 : f32
    %14 = vector.broadcast %cst_12 : f32 to vector<1x16xf32>
    %15 = arith.mulf %11, %14 : vector<1x16xf32>
    %16 = arith.mulf %13, %13 : vector<1x16xf32>
    %17 = arith.subf %15, %16 : vector<1x16xf32>
    %c0_13 = arith.constant 0 : index
    %c0_14 = arith.constant 0 : index
    %18 = vector.load %arg5[%c0_13, %c0_14] : memref<1x16xf32, #tpu.memory_space<vmem>>, vector<1x16xf32>
    %cst_15 = arith.constant 9.99999974E-6 : f32
    %19 = vector.broadcast %cst_15 : f32 to vector<1x16xf32>
    %20 = arith.addf %17, %19 : vector<1x16xf32>
    %21 = math.rsqrt %20 : vector<1x16xf32>
    %22 = arith.mulf %18, %21 : vector<1x16xf32>
    %c0_16 = arith.constant 0 : index
    %c0_17 = arith.constant 0 : index
    %23 = vector.load %arg6[%c0_16, %c0_17] : memref<1x16xf32, #tpu.memory_space<vmem>>, vector<1x16xf32>
    %24 = arith.mulf %13, %22 : vector<1x16xf32>
    %25 = arith.subf %23, %24 : vector<1x16xf32>
    %c0_18 = arith.constant 0 : index
    %c0_19 = arith.constant 0 : index
    %26 = vector.load %arg4[%c0_18, %c0_19] : memref<16x16xf32, #tpu.memory_space<vmem>>, vector<16x16xf32>
    %cst_20 = arith.constant dense<0.000000e+00> : vector<1x16xf32>
    %27 = tpu.matmul %22, %26, %cst_20 {dimension_numbers = #tpu.dot_dimension_numbers<[1], [0], [0], [1], [0, 0, 1, 1], [], []>} : vector<1x16xf32>, vector<16x16xf32>, vector<1x16xf32> -> vector<1x16xf32>
    %c0_21 = arith.constant 0 : index
    %c0_22 = arith.constant 0 : index
    %28 = vector.load %arg4[%c0_21, %c0_22] : memref<16x16xf32, #tpu.memory_space<vmem>>, vector<16x16xf32>
    %cst_23 = arith.constant dense<0.000000e+00> : vector<1x16xf32>
    %29 = tpu.matmul %25, %28, %cst_23 {dimension_numbers = #tpu.dot_dimension_numbers<[1], [0], [0], [1], [0, 0, 1, 1], [], []>} : vector<1x16xf32>, vector<16x16xf32>, vector<1x16xf32> -> vector<1x16xf32>
    %30 = vector.broadcast %27 : vector<1x16xf32> to vector<512x16xf32>
    %31 = arith.mulf %2, %30 : vector<512x16xf32>
    %32 = vector.broadcast %29 : vector<1x16xf32> to vector<512x16xf32>
    %33 = arith.addf %31, %32 : vector<512x16xf32>
    %cst_24 = arith.constant 0.000000e+00 : f32
    %34 = vector.broadcast %cst_24 : f32 to vector<512x16xf32>
    %35 = arith.maximumf %33, %34 : vector<512x16xf32>
    %c0_25 = arith.constant 0 : index
    %c0_26 = arith.constant 0 : index
    %36 = vector.load %arg7[%c0_25, %c0_26] : memref<512x16xf32, #tpu.memory_space<vmem>>, vector<512x16xf32>
    tpu.vector_store %arg7[%c0_25, %c0_26], %35 {strides = array<i32>} : memref<512x16xf32, #tpu.memory_space<vmem>>, vector<512x16xf32>,
    return
  }
  func.func @transform_0(%arg0: i32) -> (i32, i32) {
    %c0_i32 = arith.constant 0 : i32
    %c0_i32_0 = arith.constant 0 : i32
    %c0_i32_1 = arith.constant 0 : i32
    return %c0_i32, %c0_i32_0 : i32, i32
  }
  func.func @transform_1(%arg0: i32) -> (i32, i32) {
    %c0_i32 = arith.constant 0 : i32
    %c0_i32_0 = arith.constant 0 : i32
    %c0_i32_1 = arith.constant 0 : i32
    return %c0_i32, %c0_i32_0 : i32, i32
  }
  func.func @transform_2(%arg0: i32) -> (i32, i32) {
    %c0_i32 = arith.constant 0 : i32
    %c0_i32_0 = arith.constant 0 : i32
    %c0_i32_1 = arith.constant 0 : i32
    return %c0_i32, %c0_i32_0 : i32, i32
  }
  func.func @transform_3(%arg0: i32) -> (i32, i32) {
    %c0_i32 = arith.constant 0 : i32
    %c0_i32_0 = arith.constant 0 : i32
    %c0_i32_1 = arith.constant 0 : i32
    return %c0_i32, %c0_i32_0 : i32, i32
  }
  func.func @transform_4(%arg0: i32) -> (i32, i32) {
    %c0_i32 = arith.constant 0 : i32
    %c0_i32_0 = arith.constant 0 : i32
    %c0_i32_1 = arith.constant 0 : i32
    return %c0_i32, %c0_i32_0 : i32, i32
  }
  func.func @transform_5(%arg0: i32) -> (i32, i32) {
    %c0_i32 = arith.constant 0 : i32
    %c0_i32_0 = arith.constant 0 : i32
    %c0_i32_1 = arith.constant 0 : i32
    return %c0_i32, %c0_i32_0 : i32, i32
  }
  func.func @transform_6(%arg0: i32) -> (i32, i32) {
    %c0_i32 = arith.constant 0 : i32
    %c0_i32_0 = arith.constant 0 : i32
    %c0_i32_1 = arith.constant 0 : i32
    return %c0_i32, %c0_i32_0 : i32, i32
  }
}

module attributes {stable_mosaic.version = 11 : i64} {
  func.func @_matmul_bn_act_kernel(%arg0: i32, %arg1: memref<128x144xbf16, #tpu.memory_space<vmem>>, %arg2: memref<144x32xbf16, #tpu.memory_space<vmem>>, %arg3: memref<32x32xf32, #tpu.memory_space<vmem>>, %arg4: memref<32x32xf32, #tpu.memory_space<vmem>>, %arg5: memref<1x32xf32, #tpu.memory_space<vmem>>, %arg6: memref<1x32xf32, #tpu.memory_space<vmem>>, %arg7: memref<128x32xf32, #tpu.memory_space<vmem>>) attributes {dimension_semantics = [#tpu.dimension_semantics<arbitrary>], iteration_bounds = array<i64: 1>, scalar_prefetch = 0 : i64, scratch_operands = 0 : i64, tpu.core_type = #tpu.core_type<tc>, window_params = [{pipeline_mode = #tpu.pipeline_mode<synchronous>, transform_indices = @transform_0, window_bounds = array<i64: 128, 144>}, {pipeline_mode = #tpu.pipeline_mode<synchronous>, transform_indices = @transform_1, window_bounds = array<i64: 144, 32>}, {pipeline_mode = #tpu.pipeline_mode<synchronous>, transform_indices = @transform_2, window_bounds = array<i64: 32, 32>}, {pipeline_mode = #tpu.pipeline_mode<synchronous>, transform_indices = @transform_3, window_bounds = array<i64: 32, 32>}, {pipeline_mode = #tpu.pipeline_mode<synchronous>, transform_indices = @transform_4, window_bounds = array<i64: 1, 32>}, {pipeline_mode = #tpu.pipeline_mode<synchronous>, transform_indices = @transform_5, window_bounds = array<i64: 1, 32>}, {pipeline_mode = #tpu.pipeline_mode<synchronous>, transform_indices = @transform_6, window_bounds = array<i64: 128, 32>}]} {
    %c0 = arith.constant 0 : index
    %c0_0 = arith.constant 0 : index
    %0 = vector.load %arg1[%c0, %c0_0] : memref<128x144xbf16, #tpu.memory_space<vmem>>, vector<128x144xbf16>
    %c0_1 = arith.constant 0 : index
    %c0_2 = arith.constant 0 : index
    %1 = vector.load %arg2[%c0_1, %c0_2] : memref<144x32xbf16, #tpu.memory_space<vmem>>, vector<144x32xbf16>
    %cst = arith.constant dense<0.000000e+00> : vector<128x32xf32>
    %2 = tpu.matmul %0, %1, %cst {dimension_numbers = #tpu.dot_dimension_numbers<[1], [0], [0], [1], [0, 0, 1, 1], [], []>} : vector<128x144xbf16>, vector<144x32xbf16>, vector<128x32xf32> -> vector<128x32xf32>
    %cst_3 = arith.constant dense<0.000000e+00> : vector<32xf32>
    %3 = vector.multi_reduction <add>, %2, %cst_3 [0] : vector<128x32xf32> to vector<32xf32>
    %4 = vector.shape_cast %3 : vector<32xf32> to vector<1x32xf32>
    %5 = arith.mulf %2, %2 : vector<128x32xf32>
    %cst_4 = arith.constant dense<0.000000e+00> : vector<32xf32>
    %6 = vector.multi_reduction <add>, %5, %cst_4 [0] : vector<128x32xf32> to vector<32xf32>
    %7 = vector.shape_cast %6 : vector<32xf32> to vector<1x32xf32>
    %c0_5 = arith.constant 0 : index
    %c0_6 = arith.constant 0 : index
    %8 = vector.load %arg3[%c0_5, %c0_6] : memref<32x32xf32, #tpu.memory_space<vmem>>, vector<32x32xf32>
    %cst_7 = arith.constant dense<0.000000e+00> : vector<1x32xf32>
    %9 = tpu.matmul %4, %8, %cst_7 {dimension_numbers = #tpu.dot_dimension_numbers<[1], [0], [0], [1], [0, 0, 1, 1], [], []>} : vector<1x32xf32>, vector<32x32xf32>, vector<1x32xf32> -> vector<1x32xf32>
    %c0_8 = arith.constant 0 : index
    %c0_9 = arith.constant 0 : index
    %10 = vector.load %arg3[%c0_8, %c0_9] : memref<32x32xf32, #tpu.memory_space<vmem>>, vector<32x32xf32>
    %cst_10 = arith.constant dense<0.000000e+00> : vector<1x32xf32>
    %11 = tpu.matmul %7, %10, %cst_10 {dimension_numbers = #tpu.dot_dimension_numbers<[1], [0], [0], [1], [0, 0, 1, 1], [], []>} : vector<1x32xf32>, vector<32x32xf32>, vector<1x32xf32> -> vector<1x32xf32>
    %cst_11 = arith.constant 7.812500e-03 : f32
    %12 = vector.broadcast %cst_11 : f32 to vector<1x32xf32>
    %13 = arith.mulf %9, %12 : vector<1x32xf32>
    %cst_12 = arith.constant 7.812500e-03 : f32
    %14 = vector.broadcast %cst_12 : f32 to vector<1x32xf32>
    %15 = arith.mulf %11, %14 : vector<1x32xf32>
    %16 = arith.mulf %13, %13 : vector<1x32xf32>
    %17 = arith.subf %15, %16 : vector<1x32xf32>
    %c0_13 = arith.constant 0 : index
    %c0_14 = arith.constant 0 : index
    %18 = vector.load %arg5[%c0_13, %c0_14] : memref<1x32xf32, #tpu.memory_space<vmem>>, vector<1x32xf32>
    %cst_15 = arith.constant 9.99999974E-6 : f32
    %19 = vector.broadcast %cst_15 : f32 to vector<1x32xf32>
    %20 = arith.addf %17, %19 : vector<1x32xf32>
    %21 = math.rsqrt %20 : vector<1x32xf32>
    %22 = arith.mulf %18, %21 : vector<1x32xf32>
    %c0_16 = arith.constant 0 : index
    %c0_17 = arith.constant 0 : index
    %23 = vector.load %arg6[%c0_16, %c0_17] : memref<1x32xf32, #tpu.memory_space<vmem>>, vector<1x32xf32>
    %24 = arith.mulf %13, %22 : vector<1x32xf32>
    %25 = arith.subf %23, %24 : vector<1x32xf32>
    %c0_18 = arith.constant 0 : index
    %c0_19 = arith.constant 0 : index
    %26 = vector.load %arg4[%c0_18, %c0_19] : memref<32x32xf32, #tpu.memory_space<vmem>>, vector<32x32xf32>
    %cst_20 = arith.constant dense<0.000000e+00> : vector<1x32xf32>
    %27 = tpu.matmul %22, %26, %cst_20 {dimension_numbers = #tpu.dot_dimension_numbers<[1], [0], [0], [1], [0, 0, 1, 1], [], []>} : vector<1x32xf32>, vector<32x32xf32>, vector<1x32xf32> -> vector<1x32xf32>
    %c0_21 = arith.constant 0 : index
    %c0_22 = arith.constant 0 : index
    %28 = vector.load %arg4[%c0_21, %c0_22] : memref<32x32xf32, #tpu.memory_space<vmem>>, vector<32x32xf32>
    %cst_23 = arith.constant dense<0.000000e+00> : vector<1x32xf32>
    %29 = tpu.matmul %25, %28, %cst_23 {dimension_numbers = #tpu.dot_dimension_numbers<[1], [0], [0], [1], [0, 0, 1, 1], [], []>} : vector<1x32xf32>, vector<32x32xf32>, vector<1x32xf32> -> vector<1x32xf32>
    %30 = vector.broadcast %27 : vector<1x32xf32> to vector<128x32xf32>
    %31 = arith.mulf %2, %30 : vector<128x32xf32>
    %32 = vector.broadcast %29 : vector<1x32xf32> to vector<128x32xf32>
    %33 = arith.addf %31, %32 : vector<128x32xf32>
    %cst_24 = arith.constant 0.000000e+00 : f32
    %34 = vector.broadcast %cst_24 : f32 to vector<128x32xf32>
    %35 = arith.maximumf %33, %34 : vector<128x32xf32>
    %c0_25 = arith.constant 0 : index
    %c0_26 = arith.constant 0 : index
    %36 = vector.load %arg7[%c0_25, %c0_26] : memref<128x32xf32, #tpu.memory_space<vmem>>, vector<128x32xf32>
    tpu.vector_store %arg7[%c0_25, %c0_26], %35 {strides = array<i32>} : memref<128x32xf32, #tpu.memory_space<vmem>>, vector<128x32xf32>,
    return
  }
  func.func @transform_0(%arg0: i32) -> (i32, i32) {
    %c0_i32 = arith.constant 0 : i32
    %c0_i32_0 = arith.constant 0 : i32
    %c0_i32_1 = arith.constant 0 : i32
    return %c0_i32, %c0_i32_0 : i32, i32
  }
  func.func @transform_1(%arg0: i32) -> (i32, i32) {
    %c0_i32 = arith.constant 0 : i32
    %c0_i32_0 = arith.constant 0 : i32
    %c0_i32_1 = arith.constant 0 : i32
    return %c0_i32, %c0_i32_0 : i32, i32
  }
  func.func @transform_2(%arg0: i32) -> (i32, i32) {
    %c0_i32 = arith.constant 0 : i32
    %c0_i32_0 = arith.constant 0 : i32
    %c0_i32_1 = arith.constant 0 : i32
    return %c0_i32, %c0_i32_0 : i32, i32
  }
  func.func @transform_3(%arg0: i32) -> (i32, i32) {
    %c0_i32 = arith.constant 0 : i32
    %c0_i32_0 = arith.constant 0 : i32
    %c0_i32_1 = arith.constant 0 : i32
    return %c0_i32, %c0_i32_0 : i32, i32
  }
  func.func @transform_4(%arg0: i32) -> (i32, i32) {
    %c0_i32 = arith.constant 0 : i32
    %c0_i32_0 = arith.constant 0 : i32
    %c0_i32_1 = arith.constant 0 : i32
    return %c0_i32, %c0_i32_0 : i32, i32
  }
  func.func @transform_5(%arg0: i32) -> (i32, i32) {
    %c0_i32 = arith.constant 0 : i32
    %c0_i32_0 = arith.constant 0 : i32
    %c0_i32_1 = arith.constant 0 : i32
    return %c0_i32, %c0_i32_0 : i32, i32
  }
  func.func @transform_6(%arg0: i32) -> (i32, i32) {
    %c0_i32 = arith.constant 0 : i32
    %c0_i32_0 = arith.constant 0 : i32
    %c0_i32_1 = arith.constant 0 : i32
    return %c0_i32, %c0_i32_0 : i32, i32
  }
}

module attributes {stable_mosaic.version = 11 : i64} {
  func.func @_matmul_bn_act_kernel(%arg0: i32, %arg1: memref<32x288xbf16, #tpu.memory_space<vmem>>, %arg2: memref<288x64xbf16, #tpu.memory_space<vmem>>, %arg3: memref<64x64xf32, #tpu.memory_space<vmem>>, %arg4: memref<64x64xf32, #tpu.memory_space<vmem>>, %arg5: memref<1x64xf32, #tpu.memory_space<vmem>>, %arg6: memref<1x64xf32, #tpu.memory_space<vmem>>, %arg7: memref<32x64xf32, #tpu.memory_space<vmem>>) attributes {dimension_semantics = [#tpu.dimension_semantics<arbitrary>], iteration_bounds = array<i64: 1>, scalar_prefetch = 0 : i64, scratch_operands = 0 : i64, tpu.core_type = #tpu.core_type<tc>, window_params = [{pipeline_mode = #tpu.pipeline_mode<synchronous>, transform_indices = @transform_0, window_bounds = array<i64: 32, 288>}, {pipeline_mode = #tpu.pipeline_mode<synchronous>, transform_indices = @transform_1, window_bounds = array<i64: 288, 64>}, {pipeline_mode = #tpu.pipeline_mode<synchronous>, transform_indices = @transform_2, window_bounds = array<i64: 64, 64>}, {pipeline_mode = #tpu.pipeline_mode<synchronous>, transform_indices = @transform_3, window_bounds = array<i64: 64, 64>}, {pipeline_mode = #tpu.pipeline_mode<synchronous>, transform_indices = @transform_4, window_bounds = array<i64: 1, 64>}, {pipeline_mode = #tpu.pipeline_mode<synchronous>, transform_indices = @transform_5, window_bounds = array<i64: 1, 64>}, {pipeline_mode = #tpu.pipeline_mode<synchronous>, transform_indices = @transform_6, window_bounds = array<i64: 32, 64>}]} {
    %c0 = arith.constant 0 : index
    %c0_0 = arith.constant 0 : index
    %0 = vector.load %arg1[%c0, %c0_0] : memref<32x288xbf16, #tpu.memory_space<vmem>>, vector<32x288xbf16>
    %c0_1 = arith.constant 0 : index
    %c0_2 = arith.constant 0 : index
    %1 = vector.load %arg2[%c0_1, %c0_2] : memref<288x64xbf16, #tpu.memory_space<vmem>>, vector<288x64xbf16>
    %cst = arith.constant dense<0.000000e+00> : vector<32x64xf32>
    %2 = tpu.matmul %0, %1, %cst {dimension_numbers = #tpu.dot_dimension_numbers<[1], [0], [0], [1], [0, 0, 1, 1], [], []>} : vector<32x288xbf16>, vector<288x64xbf16>, vector<32x64xf32> -> vector<32x64xf32>
    %cst_3 = arith.constant dense<0.000000e+00> : vector<64xf32>
    %3 = vector.multi_reduction <add>, %2, %cst_3 [0] : vector<32x64xf32> to vector<64xf32>
    %4 = vector.shape_cast %3 : vector<64xf32> to vector<1x64xf32>
    %5 = arith.mulf %2, %2 : vector<32x64xf32>
    %cst_4 = arith.constant dense<0.000000e+00> : vector<64xf32>
    %6 = vector.multi_reduction <add>, %5, %cst_4 [0] : vector<32x64xf32> to vector<64xf32>
    %7 = vector.shape_cast %6 : vector<64xf32> to vector<1x64xf32>
    %c0_5 = arith.constant 0 : index
    %c0_6 = arith.constant 0 : index
    %8 = vector.load %arg3[%c0_5, %c0_6] : memref<64x64xf32, #tpu.memory_space<vmem>>, vector<64x64xf32>
    %cst_7 = arith.constant dense<0.000000e+00> : vector<1x64xf32>
    %9 = tpu.matmul %4, %8, %cst_7 {dimension_numbers = #tpu.dot_dimension_numbers<[1], [0], [0], [1], [0, 0, 1, 1], [], []>} : vector<1x64xf32>, vector<64x64xf32>, vector<1x64xf32> -> vector<1x64xf32>
    %c0_8 = arith.constant 0 : index
    %c0_9 = arith.constant 0 : index
    %10 = vector.load %arg3[%c0_8, %c0_9] : memref<64x64xf32, #tpu.memory_space<vmem>>, vector<64x64xf32>
    %cst_10 = arith.constant dense<0.000000e+00> : vector<1x64xf32>
    %11 = tpu.matmul %7, %10, %cst_10 {dimension_numbers = #tpu.dot_dimension_numbers<[1], [0], [0], [1], [0, 0, 1, 1], [], []>} : vector<1x64xf32>, vector<64x64xf32>, vector<1x64xf32> -> vector<1x64xf32>
    %cst_11 = arith.constant 3.125000e-02 : f32
    %12 = vector.broadcast %cst_11 : f32 to vector<1x64xf32>
    %13 = arith.mulf %9, %12 : vector<1x64xf32>
    %cst_12 = arith.constant 3.125000e-02 : f32
    %14 = vector.broadcast %cst_12 : f32 to vector<1x64xf32>
    %15 = arith.mulf %11, %14 : vector<1x64xf32>
    %16 = arith.mulf %13, %13 : vector<1x64xf32>
    %17 = arith.subf %15, %16 : vector<1x64xf32>
    %c0_13 = arith.constant 0 : index
    %c0_14 = arith.constant 0 : index
    %18 = vector.load %arg5[%c0_13, %c0_14] : memref<1x64xf32, #tpu.memory_space<vmem>>, vector<1x64xf32>
    %cst_15 = arith.constant 9.99999974E-6 : f32
    %19 = vector.broadcast %cst_15 : f32 to vector<1x64xf32>
    %20 = arith.addf %17, %19 : vector<1x64xf32>
    %21 = math.rsqrt %20 : vector<1x64xf32>
    %22 = arith.mulf %18, %21 : vector<1x64xf32>
    %c0_16 = arith.constant 0 : index
    %c0_17 = arith.constant 0 : index
    %23 = vector.load %arg6[%c0_16, %c0_17] : memref<1x64xf32, #tpu.memory_space<vmem>>, vector<1x64xf32>
    %24 = arith.mulf %13, %22 : vector<1x64xf32>
    %25 = arith.subf %23, %24 : vector<1x64xf32>
    %c0_18 = arith.constant 0 : index
    %c0_19 = arith.constant 0 : index
    %26 = vector.load %arg4[%c0_18, %c0_19] : memref<64x64xf32, #tpu.memory_space<vmem>>, vector<64x64xf32>
    %cst_20 = arith.constant dense<0.000000e+00> : vector<1x64xf32>
    %27 = tpu.matmul %22, %26, %cst_20 {dimension_numbers = #tpu.dot_dimension_numbers<[1], [0], [0], [1], [0, 0, 1, 1], [], []>} : vector<1x64xf32>, vector<64x64xf32>, vector<1x64xf32> -> vector<1x64xf32>
    %c0_21 = arith.constant 0 : index
    %c0_22 = arith.constant 0 : index
    %28 = vector.load %arg4[%c0_21, %c0_22] : memref<64x64xf32, #tpu.memory_space<vmem>>, vector<64x64xf32>
    %cst_23 = arith.constant dense<0.000000e+00> : vector<1x64xf32>
    %29 = tpu.matmul %25, %28, %cst_23 {dimension_numbers = #tpu.dot_dimension_numbers<[1], [0], [0], [1], [0, 0, 1, 1], [], []>} : vector<1x64xf32>, vector<64x64xf32>, vector<1x64xf32> -> vector<1x64xf32>
    %30 = vector.broadcast %27 : vector<1x64xf32> to vector<32x64xf32>
    %31 = arith.mulf %2, %30 : vector<32x64xf32>
    %32 = vector.broadcast %29 : vector<1x64xf32> to vector<32x64xf32>
    %33 = arith.addf %31, %32 : vector<32x64xf32>
    %cst_24 = arith.constant 0.000000e+00 : f32
    %34 = vector.broadcast %cst_24 : f32 to vector<32x64xf32>
    %35 = arith.maximumf %33, %34 : vector<32x64xf32>
    %c0_25 = arith.constant 0 : index
    %c0_26 = arith.constant 0 : index
    %36 = vector.load %arg7[%c0_25, %c0_26] : memref<32x64xf32, #tpu.memory_space<vmem>>, vector<32x64xf32>
    tpu.vector_store %arg7[%c0_25, %c0_26], %35 {strides = array<i32>} : memref<32x64xf32, #tpu.memory_space<vmem>>, vector<32x64xf32>,
    return
  }
  func.func @transform_0(%arg0: i32) -> (i32, i32) {
    %c0_i32 = arith.constant 0 : i32
    %c0_i32_0 = arith.constant 0 : i32
    %c0_i32_1 = arith.constant 0 : i32
    return %c0_i32, %c0_i32_0 : i32, i32
  }
  func.func @transform_1(%arg0: i32) -> (i32, i32) {
    %c0_i32 = arith.constant 0 : i32
    %c0_i32_0 = arith.constant 0 : i32
    %c0_i32_1 = arith.constant 0 : i32
    return %c0_i32, %c0_i32_0 : i32, i32
  }
  func.func @transform_2(%arg0: i32) -> (i32, i32) {
    %c0_i32 = arith.constant 0 : i32
    %c0_i32_0 = arith.constant 0 : i32
    %c0_i32_1 = arith.constant 0 : i32
    return %c0_i32, %c0_i32_0 : i32, i32
  }
  func.func @transform_3(%arg0: i32) -> (i32, i32) {
    %c0_i32 = arith.constant 0 : i32
    %c0_i32_0 = arith.constant 0 : i32
    %c0_i32_1 = arith.constant 0 : i32
    return %c0_i32, %c0_i32_0 : i32, i32
  }
  func.func @transform_4(%arg0: i32) -> (i32, i32) {
    %c0_i32 = arith.constant 0 : i32
    %c0_i32_0 = arith.constant 0 : i32
    %c0_i32_1 = arith.constant 0 : i32
    return %c0_i32, %c0_i32_0 : i32, i32
  }
  func.func @transform_5(%arg0: i32) -> (i32, i32) {
    %c0_i32 = arith.constant 0 : i32
    %c0_i32_0 = arith.constant 0 : i32
    %c0_i32_1 = arith.constant 0 : i32
    return %c0_i32, %c0_i32_0 : i32, i32
  }
  func.func @transform_6(%arg0: i32) -> (i32, i32) {
    %c0_i32 = arith.constant 0 : i32
    %c0_i32_0 = arith.constant 0 : i32
    %c0_i32_1 = arith.constant 0 : i32
    return %c0_i32, %c0_i32_0 : i32, i32
  }
}

module attributes {stable_mosaic.version = 11 : i64} {
  func.func @_matmul_bn_act_kernel(%arg0: i32, %arg1: memref<32x64xbf16, #tpu.memory_space<vmem>>, %arg2: memref<64x16xbf16, #tpu.memory_space<vmem>>, %arg3: memref<16x16xf32, #tpu.memory_space<vmem>>, %arg4: memref<16x16xf32, #tpu.memory_space<vmem>>, %arg5: memref<1x16xf32, #tpu.memory_space<vmem>>, %arg6: memref<1x16xf32, #tpu.memory_space<vmem>>, %arg7: memref<32x16xf32, #tpu.memory_space<vmem>>) attributes {dimension_semantics = [#tpu.dimension_semantics<arbitrary>], iteration_bounds = array<i64: 1>, scalar_prefetch = 0 : i64, scratch_operands = 0 : i64, tpu.core_type = #tpu.core_type<tc>, window_params = [{pipeline_mode = #tpu.pipeline_mode<synchronous>, transform_indices = @transform_0, window_bounds = array<i64: 32, 64>}, {pipeline_mode = #tpu.pipeline_mode<synchronous>, transform_indices = @transform_1, window_bounds = array<i64: 64, 16>}, {pipeline_mode = #tpu.pipeline_mode<synchronous>, transform_indices = @transform_2, window_bounds = array<i64: 16, 16>}, {pipeline_mode = #tpu.pipeline_mode<synchronous>, transform_indices = @transform_3, window_bounds = array<i64: 16, 16>}, {pipeline_mode = #tpu.pipeline_mode<synchronous>, transform_indices = @transform_4, window_bounds = array<i64: 1, 16>}, {pipeline_mode = #tpu.pipeline_mode<synchronous>, transform_indices = @transform_5, window_bounds = array<i64: 1, 16>}, {pipeline_mode = #tpu.pipeline_mode<synchronous>, transform_indices = @transform_6, window_bounds = array<i64: 32, 16>}]} {
    %c0 = arith.constant 0 : index
    %c0_0 = arith.constant 0 : index
    %0 = vector.load %arg1[%c0, %c0_0] : memref<32x64xbf16, #tpu.memory_space<vmem>>, vector<32x64xbf16>
    %c0_1 = arith.constant 0 : index
    %c0_2 = arith.constant 0 : index
    %1 = vector.load %arg2[%c0_1, %c0_2] : memref<64x16xbf16, #tpu.memory_space<vmem>>, vector<64x16xbf16>
    %cst = arith.constant dense<0.000000e+00> : vector<32x16xf32>
    %2 = tpu.matmul %0, %1, %cst {dimension_numbers = #tpu.dot_dimension_numbers<[1], [0], [0], [1], [0, 0, 1, 1], [], []>} : vector<32x64xbf16>, vector<64x16xbf16>, vector<32x16xf32> -> vector<32x16xf32>
    %cst_3 = arith.constant dense<0.000000e+00> : vector<16xf32>
    %3 = vector.multi_reduction <add>, %2, %cst_3 [0] : vector<32x16xf32> to vector<16xf32>
    %4 = vector.shape_cast %3 : vector<16xf32> to vector<1x16xf32>
    %5 = arith.mulf %2, %2 : vector<32x16xf32>
    %cst_4 = arith.constant dense<0.000000e+00> : vector<16xf32>
    %6 = vector.multi_reduction <add>, %5, %cst_4 [0] : vector<32x16xf32> to vector<16xf32>
    %7 = vector.shape_cast %6 : vector<16xf32> to vector<1x16xf32>
    %c0_5 = arith.constant 0 : index
    %c0_6 = arith.constant 0 : index
    %8 = vector.load %arg3[%c0_5, %c0_6] : memref<16x16xf32, #tpu.memory_space<vmem>>, vector<16x16xf32>
    %cst_7 = arith.constant dense<0.000000e+00> : vector<1x16xf32>
    %9 = tpu.matmul %4, %8, %cst_7 {dimension_numbers = #tpu.dot_dimension_numbers<[1], [0], [0], [1], [0, 0, 1, 1], [], []>} : vector<1x16xf32>, vector<16x16xf32>, vector<1x16xf32> -> vector<1x16xf32>
    %c0_8 = arith.constant 0 : index
    %c0_9 = arith.constant 0 : index
    %10 = vector.load %arg3[%c0_8, %c0_9] : memref<16x16xf32, #tpu.memory_space<vmem>>, vector<16x16xf32>
    %cst_10 = arith.constant dense<0.000000e+00> : vector<1x16xf32>
    %11 = tpu.matmul %7, %10, %cst_10 {dimension_numbers = #tpu.dot_dimension_numbers<[1], [0], [0], [1], [0, 0, 1, 1], [], []>} : vector<1x16xf32>, vector<16x16xf32>, vector<1x16xf32> -> vector<1x16xf32>
    %cst_11 = arith.constant 3.125000e-02 : f32
    %12 = vector.broadcast %cst_11 : f32 to vector<1x16xf32>
    %13 = arith.mulf %9, %12 : vector<1x16xf32>
    %cst_12 = arith.constant 3.125000e-02 : f32
    %14 = vector.broadcast %cst_12 : f32 to vector<1x16xf32>
    %15 = arith.mulf %11, %14 : vector<1x16xf32>
    %16 = arith.mulf %13, %13 : vector<1x16xf32>
    %17 = arith.subf %15, %16 : vector<1x16xf32>
    %c0_13 = arith.constant 0 : index
    %c0_14 = arith.constant 0 : index
    %18 = vector.load %arg5[%c0_13, %c0_14] : memref<1x16xf32, #tpu.memory_space<vmem>>, vector<1x16xf32>
    %cst_15 = arith.constant 9.99999974E-6 : f32
    %19 = vector.broadcast %cst_15 : f32 to vector<1x16xf32>
    %20 = arith.addf %17, %19 : vector<1x16xf32>
    %21 = math.rsqrt %20 : vector<1x16xf32>
    %22 = arith.mulf %18, %21 : vector<1x16xf32>
    %c0_16 = arith.constant 0 : index
    %c0_17 = arith.constant 0 : index
    %23 = vector.load %arg6[%c0_16, %c0_17] : memref<1x16xf32, #tpu.memory_space<vmem>>, vector<1x16xf32>
    %24 = arith.mulf %13, %22 : vector<1x16xf32>
    %25 = arith.subf %23, %24 : vector<1x16xf32>
    %c0_18 = arith.constant 0 : index
    %c0_19 = arith.constant 0 : index
    %26 = vector.load %arg4[%c0_18, %c0_19] : memref<16x16xf32, #tpu.memory_space<vmem>>, vector<16x16xf32>
    %cst_20 = arith.constant dense<0.000000e+00> : vector<1x16xf32>
    %27 = tpu.matmul %22, %26, %cst_20 {dimension_numbers = #tpu.dot_dimension_numbers<[1], [0], [0], [1], [0, 0, 1, 1], [], []>} : vector<1x16xf32>, vector<16x16xf32>, vector<1x16xf32> -> vector<1x16xf32>
    %c0_21 = arith.constant 0 : index
    %c0_22 = arith.constant 0 : index
    %28 = vector.load %arg4[%c0_21, %c0_22] : memref<16x16xf32, #tpu.memory_space<vmem>>, vector<16x16xf32>
    %cst_23 = arith.constant dense<0.000000e+00> : vector<1x16xf32>
    %29 = tpu.matmul %25, %28, %cst_23 {dimension_numbers = #tpu.dot_dimension_numbers<[1], [0], [0], [1], [0, 0, 1, 1], [], []>} : vector<1x16xf32>, vector<16x16xf32>, vector<1x16xf32> -> vector<1x16xf32>
    %30 = vector.broadcast %27 : vector<1x16xf32> to vector<32x16xf32>
    %31 = arith.mulf %2, %30 : vector<32x16xf32>
    %32 = vector.broadcast %29 : vector<1x16xf32> to vector<32x16xf32>
    %33 = arith.addf %31, %32 : vector<32x16xf32>
    %cst_24 = arith.constant 0.000000e+00 : f32
    %34 = vector.broadcast %cst_24 : f32 to vector<32x16xf32>
    %35 = arith.maximumf %33, %34 : vector<32x16xf32>
    %c0_25 = arith.constant 0 : index
    %c0_26 = arith.constant 0 : index
    %36 = vector.load %arg7[%c0_25, %c0_26] : memref<32x16xf32, #tpu.memory_space<vmem>>, vector<32x16xf32>
    tpu.vector_store %arg7[%c0_25, %c0_26], %35 {strides = array<i32>} : memref<32x16xf32, #tpu.memory_space<vmem>>, vector<32x16xf32>,
    return
  }
  func.func @transform_0(%arg0: i32) -> (i32, i32) {
    %c0_i32 = arith.constant 0 : i32
    %c0_i32_0 = arith.constant 0 : i32
    %c0_i32_1 = arith.constant 0 : i32
    return %c0_i32, %c0_i32_0 : i32, i32
  }
  func.func @transform_1(%arg0: i32) -> (i32, i32) {
    %c0_i32 = arith.constant 0 : i32
    %c0_i32_0 = arith.constant 0 : i32
    %c0_i32_1 = arith.constant 0 : i32
    return %c0_i32, %c0_i32_0 : i32, i32
  }
  func.func @transform_2(%arg0: i32) -> (i32, i32) {
    %c0_i32 = arith.constant 0 : i32
    %c0_i32_0 = arith.constant 0 : i32
    %c0_i32_1 = arith.constant 0 : i32
    return %c0_i32, %c0_i32_0 : i32, i32
  }
  func.func @transform_3(%arg0: i32) -> (i32, i32) {
    %c0_i32 = arith.constant 0 : i32
    %c0_i32_0 = arith.constant 0 : i32
    %c0_i32_1 = arith.constant 0 : i32
    return %c0_i32, %c0_i32_0 : i32, i32
  }
  func.func @transform_4(%arg0: i32) -> (i32, i32) {
    %c0_i32 = arith.constant 0 : i32
    %c0_i32_0 = arith.constant 0 : i32
    %c0_i32_1 = arith.constant 0 : i32
    return %c0_i32, %c0_i32_0 : i32, i32
  }
  func.func @transform_5(%arg0: i32) -> (i32, i32) {
    %c0_i32 = arith.constant 0 : i32
    %c0_i32_0 = arith.constant 0 : i32
    %c0_i32_1 = arith.constant 0 : i32
    return %c0_i32, %c0_i32_0 : i32, i32
  }
  func.func @transform_6(%arg0: i32) -> (i32, i32) {
    %c0_i32 = arith.constant 0 : i32
    %c0_i32_0 = arith.constant 0 : i32
    %c0_i32_1 = arith.constant 0 : i32
    return %c0_i32, %c0_i32_0 : i32, i32
  }
}

module attributes {stable_mosaic.version = 11 : i64} {
  func.func @_heads_reparam_kernel(%arg0: i32, %arg1: memref<2x256xbf16, #tpu.memory_space<vmem>>, %arg2: memref<256x320xbf16, #tpu.memory_space<vmem>>, %arg3: memref<1x320xf32, #tpu.memory_space<vmem>>, %arg4: memref<256x320xbf16, #tpu.memory_space<vmem>>, %arg5: memref<1x320xf32, #tpu.memory_space<vmem>>, %arg6: memref<2x320xf32, #tpu.memory_space<vmem>>, %arg7: memref<2x320xf32, #tpu.memory_space<vmem>>, %arg8: memref<2x320xf32, #tpu.memory_space<vmem>>, %arg9: memref<2x320xf32, #tpu.memory_space<vmem>>) attributes {dimension_semantics = [#tpu.dimension_semantics<arbitrary>], iteration_bounds = array<i64: 1>, scalar_prefetch = 0 : i64, scratch_operands = 0 : i64, tpu.core_type = #tpu.core_type<tc>, window_params = [{pipeline_mode = #tpu.pipeline_mode<synchronous>, transform_indices = @transform_0, window_bounds = array<i64: 2, 256>}, {pipeline_mode = #tpu.pipeline_mode<synchronous>, transform_indices = @transform_1, window_bounds = array<i64: 256, 320>}, {pipeline_mode = #tpu.pipeline_mode<synchronous>, transform_indices = @transform_2, window_bounds = array<i64: 1, 320>}, {pipeline_mode = #tpu.pipeline_mode<synchronous>, transform_indices = @transform_3, window_bounds = array<i64: 256, 320>}, {pipeline_mode = #tpu.pipeline_mode<synchronous>, transform_indices = @transform_4, window_bounds = array<i64: 1, 320>}, {pipeline_mode = #tpu.pipeline_mode<synchronous>, transform_indices = @transform_5, window_bounds = array<i64: 2, 320>}, {pipeline_mode = #tpu.pipeline_mode<synchronous>, transform_indices = @transform_6, window_bounds = array<i64: 2, 320>}, {pipeline_mode = #tpu.pipeline_mode<synchronous>, transform_indices = @transform_7, window_bounds = array<i64: 2, 320>}, {pipeline_mode = #tpu.pipeline_mode<synchronous>, transform_indices = @transform_8, window_bounds = array<i64: 2, 320>}]} {
    %c0 = arith.constant 0 : index
    %c0_0 = arith.constant 0 : index
    %0 = vector.load %arg1[%c0, %c0_0] : memref<2x256xbf16, #tpu.memory_space<vmem>>, vector<2x256xbf16>
    %c0_1 = arith.constant 0 : index
    %c0_2 = arith.constant 0 : index
    %1 = vector.load %arg2[%c0_1, %c0_2] : memref<256x320xbf16, #tpu.memory_space<vmem>>, vector<256x320xbf16>
    %cst = arith.constant dense<0.000000e+00> : vector<2x320xf32>
    %2 = tpu.matmul %0, %1, %cst {dimension_numbers = #tpu.dot_dimension_numbers<[1], [0], [0], [1], [0, 0, 1, 1], [], []>} : vector<2x256xbf16>, vector<256x320xbf16>, vector<2x320xf32> -> vector<2x320xf32>
    %c0_3 = arith.constant 0 : index
    %c0_4 = arith.constant 0 : index
    %3 = vector.load %arg3[%c0_3, %c0_4] : memref<1x320xf32, #tpu.memory_space<vmem>>, vector<1x320xf32>
    %4 = vector.broadcast %3 : vector<1x320xf32> to vector<2x320xf32>
    %5 = arith.addf %2, %4 : vector<2x320xf32>
    %c0_5 = arith.constant 0 : index
    %c0_6 = arith.constant 0 : index
    %6 = vector.load %arg4[%c0_5, %c0_6] : memref<256x320xbf16, #tpu.memory_space<vmem>>, vector<256x320xbf16>
    %cst_7 = arith.constant dense<0.000000e+00> : vector<2x320xf32>
    %7 = tpu.matmul %0, %6, %cst_7 {dimension_numbers = #tpu.dot_dimension_numbers<[1], [0], [0], [1], [0, 0, 1, 1], [], []>} : vector<2x256xbf16>, vector<256x320xbf16>, vector<2x320xf32> -> vector<2x320xf32>
    %c0_8 = arith.constant 0 : index
    %c0_9 = arith.constant 0 : index
    %8 = vector.load %arg5[%c0_8, %c0_9] : memref<1x320xf32, #tpu.memory_space<vmem>>, vector<1x320xf32>
    %9 = vector.broadcast %8 : vector<1x320xf32> to vector<2x320xf32>
    %10 = arith.addf %7, %9 : vector<2x320xf32>
    %c0_10 = arith.constant 0 : index
    %c0_11 = arith.constant 0 : index
    %11 = vector.load %arg7[%c0_10, %c0_11] : memref<2x320xf32, #tpu.memory_space<vmem>>, vector<2x320xf32>
    tpu.vector_store %arg7[%c0_10, %c0_11], %5 {strides = array<i32>} : memref<2x320xf32, #tpu.memory_space<vmem>>, vector<2x320xf32>,
    %12 = math.exp %10 : vector<2x320xf32>
    %c0_12 = arith.constant 0 : index
    %c0_13 = arith.constant 0 : index
    %13 = vector.load %arg8[%c0_12, %c0_13] : memref<2x320xf32, #tpu.memory_space<vmem>>, vector<2x320xf32>
    tpu.vector_store %arg8[%c0_12, %c0_13], %12 {strides = array<i32>} : memref<2x320xf32, #tpu.memory_space<vmem>>, vector<2x320xf32>,
    %c0_14 = arith.constant 0 : index
    %c0_15 = arith.constant 0 : index
    %14 = vector.load %arg6[%c0_14, %c0_15] : memref<2x320xf32, #tpu.memory_space<vmem>>, vector<2x320xf32>
    %cst_16 = arith.constant 5.000000e-01 : f32
    %15 = vector.broadcast %cst_16 : f32 to vector<2x320xf32>
    %16 = arith.mulf %15, %10 : vector<2x320xf32>
    %17 = math.exp %16 : vector<2x320xf32>
    %18 = arith.mulf %14, %17 : vector<2x320xf32>
    %19 = arith.addf %5, %18 : vector<2x320xf32>
    %c0_17 = arith.constant 0 : index
    %c0_18 = arith.constant 0 : index
    %20 = vector.load %arg9[%c0_17, %c0_18] : memref<2x320xf32, #tpu.memory_space<vmem>>, vector<2x320xf32>
    tpu.vector_store %arg9[%c0_17, %c0_18], %19 {strides = array<i32>} : memref<2x320xf32, #tpu.memory_space<vmem>>, vector<2x320xf32>,
    return
  }
  func.func @transform_0(%arg0: i32) -> (i32, i32) {
    %c0_i32 = arith.constant 0 : i32
    %c0_i32_0 = arith.constant 0 : i32
    %c0_i32_1 = arith.constant 0 : i32
    return %c0_i32, %c0_i32_0 : i32, i32
  }
  func.func @transform_1(%arg0: i32) -> (i32, i32) {
    %c0_i32 = arith.constant 0 : i32
    %c0_i32_0 = arith.constant 0 : i32
    %c0_i32_1 = arith.constant 0 : i32
    return %c0_i32, %c0_i32_0 : i32, i32
  }
  func.func @transform_2(%arg0: i32) -> (i32, i32) {
    %c0_i32 = arith.constant 0 : i32
    %c0_i32_0 = arith.constant 0 : i32
    %c0_i32_1 = arith.constant 0 : i32
    return %c0_i32, %c0_i32_0 : i32, i32
  }
  func.func @transform_3(%arg0: i32) -> (i32, i32) {
    %c0_i32 = arith.constant 0 : i32
    %c0_i32_0 = arith.constant 0 : i32
    %c0_i32_1 = arith.constant 0 : i32
    return %c0_i32, %c0_i32_0 : i32, i32
  }
  func.func @transform_4(%arg0: i32) -> (i32, i32) {
    %c0_i32 = arith.constant 0 : i32
    %c0_i32_0 = arith.constant 0 : i32
    %c0_i32_1 = arith.constant 0 : i32
    return %c0_i32, %c0_i32_0 : i32, i32
  }
  func.func @transform_5(%arg0: i32) -> (i32, i32) {
    %c0_i32 = arith.constant 0 : i32
    %c0_i32_0 = arith.constant 0 : i32
    %c0_i32_1 = arith.constant 0 : i32
    return %c0_i32, %c0_i32_0 : i32, i32
  }
  func.func @transform_6(%arg0: i32) -> (i32, i32) {
    %c0_i32 = arith.constant 0 : i32
    %c0_i32_0 = arith.constant 0 : i32
    %c0_i32_1 = arith.constant 0 : i32
    return %c0_i32, %c0_i32_0 : i32, i32
  }
  func.func @transform_7(%arg0: i32) -> (i32, i32) {
    %c0_i32 = arith.constant 0 : i32
    %c0_i32_0 = arith.constant 0 : i32
    %c0_i32_1 = arith.constant 0 : i32
    return %c0_i32, %c0_i32_0 : i32, i32
  }
  func.func @transform_8(%arg0: i32) -> (i32, i32) {
    %c0_i32 = arith.constant 0 : i32
    %c0_i32_0 = arith.constant 0 : i32
    %c0_i32_1 = arith.constant 0 : i32
    return %c0_i32, %c0_i32_0 : i32, i32
  }
}

module attributes {stable_mosaic.version = 11 : i64} {
  func.func @_matmul_bn_act_kernel(%arg0: i32, %arg1: memref<2x320xbf16, #tpu.memory_space<vmem>>, %arg2: memref<320x256xbf16, #tpu.memory_space<vmem>>, %arg3: memref<256x16xf32, #tpu.memory_space<vmem>>, %arg4: memref<16x256xf32, #tpu.memory_space<vmem>>, %arg5: memref<1x16xf32, #tpu.memory_space<vmem>>, %arg6: memref<1x16xf32, #tpu.memory_space<vmem>>, %arg7: memref<2x256xf32, #tpu.memory_space<vmem>>) attributes {dimension_semantics = [#tpu.dimension_semantics<arbitrary>], iteration_bounds = array<i64: 1>, scalar_prefetch = 0 : i64, scratch_operands = 0 : i64, tpu.core_type = #tpu.core_type<tc>, window_params = [{pipeline_mode = #tpu.pipeline_mode<synchronous>, transform_indices = @transform_0, window_bounds = array<i64: 2, 320>}, {pipeline_mode = #tpu.pipeline_mode<synchronous>, transform_indices = @transform_1, window_bounds = array<i64: 320, 256>}, {pipeline_mode = #tpu.pipeline_mode<synchronous>, transform_indices = @transform_2, window_bounds = array<i64: 256, 16>}, {pipeline_mode = #tpu.pipeline_mode<synchronous>, transform_indices = @transform_3, window_bounds = array<i64: 16, 256>}, {pipeline_mode = #tpu.pipeline_mode<synchronous>, transform_indices = @transform_4, window_bounds = array<i64: 1, 16>}, {pipeline_mode = #tpu.pipeline_mode<synchronous>, transform_indices = @transform_5, window_bounds = array<i64: 1, 16>}, {pipeline_mode = #tpu.pipeline_mode<synchronous>, transform_indices = @transform_6, window_bounds = array<i64: 2, 256>}]} {
    %c0 = arith.constant 0 : index
    %c0_0 = arith.constant 0 : index
    %0 = vector.load %arg1[%c0, %c0_0] : memref<2x320xbf16, #tpu.memory_space<vmem>>, vector<2x320xbf16>
    %c0_1 = arith.constant 0 : index
    %c0_2 = arith.constant 0 : index
    %1 = vector.load %arg2[%c0_1, %c0_2] : memref<320x256xbf16, #tpu.memory_space<vmem>>, vector<320x256xbf16>
    %cst = arith.constant dense<0.000000e+00> : vector<2x256xf32>
    %2 = tpu.matmul %0, %1, %cst {dimension_numbers = #tpu.dot_dimension_numbers<[1], [0], [0], [1], [0, 0, 1, 1], [], []>} : vector<2x320xbf16>, vector<320x256xbf16>, vector<2x256xf32> -> vector<2x256xf32>
    %cst_3 = arith.constant dense<0.000000e+00> : vector<256xf32>
    %3 = vector.multi_reduction <add>, %2, %cst_3 [0] : vector<2x256xf32> to vector<256xf32>
    %4 = vector.shape_cast %3 : vector<256xf32> to vector<1x256xf32>
    %5 = arith.mulf %2, %2 : vector<2x256xf32>
    %cst_4 = arith.constant dense<0.000000e+00> : vector<256xf32>
    %6 = vector.multi_reduction <add>, %5, %cst_4 [0] : vector<2x256xf32> to vector<256xf32>
    %7 = vector.shape_cast %6 : vector<256xf32> to vector<1x256xf32>
    %c0_5 = arith.constant 0 : index
    %c0_6 = arith.constant 0 : index
    %8 = vector.load %arg3[%c0_5, %c0_6] : memref<256x16xf32, #tpu.memory_space<vmem>>, vector<256x16xf32>
    %cst_7 = arith.constant dense<0.000000e+00> : vector<1x16xf32>
    %9 = tpu.matmul %4, %8, %cst_7 {dimension_numbers = #tpu.dot_dimension_numbers<[1], [0], [0], [1], [0, 0, 1, 1], [], []>} : vector<1x256xf32>, vector<256x16xf32>, vector<1x16xf32> -> vector<1x16xf32>
    %c0_8 = arith.constant 0 : index
    %c0_9 = arith.constant 0 : index
    %10 = vector.load %arg3[%c0_8, %c0_9] : memref<256x16xf32, #tpu.memory_space<vmem>>, vector<256x16xf32>
    %cst_10 = arith.constant dense<0.000000e+00> : vector<1x16xf32>
    %11 = tpu.matmul %7, %10, %cst_10 {dimension_numbers = #tpu.dot_dimension_numbers<[1], [0], [0], [1], [0, 0, 1, 1], [], []>} : vector<1x256xf32>, vector<256x16xf32>, vector<1x16xf32> -> vector<1x16xf32>
    %cst_11 = arith.constant 3.125000e-02 : f32
    %12 = vector.broadcast %cst_11 : f32 to vector<1x16xf32>
    %13 = arith.mulf %9, %12 : vector<1x16xf32>
    %cst_12 = arith.constant 3.125000e-02 : f32
    %14 = vector.broadcast %cst_12 : f32 to vector<1x16xf32>
    %15 = arith.mulf %11, %14 : vector<1x16xf32>
    %16 = arith.mulf %13, %13 : vector<1x16xf32>
    %17 = arith.subf %15, %16 : vector<1x16xf32>
    %c0_13 = arith.constant 0 : index
    %c0_14 = arith.constant 0 : index
    %18 = vector.load %arg5[%c0_13, %c0_14] : memref<1x16xf32, #tpu.memory_space<vmem>>, vector<1x16xf32>
    %cst_15 = arith.constant 9.99999974E-6 : f32
    %19 = vector.broadcast %cst_15 : f32 to vector<1x16xf32>
    %20 = arith.addf %17, %19 : vector<1x16xf32>
    %21 = math.rsqrt %20 : vector<1x16xf32>
    %22 = arith.mulf %18, %21 : vector<1x16xf32>
    %c0_16 = arith.constant 0 : index
    %c0_17 = arith.constant 0 : index
    %23 = vector.load %arg6[%c0_16, %c0_17] : memref<1x16xf32, #tpu.memory_space<vmem>>, vector<1x16xf32>
    %24 = arith.mulf %13, %22 : vector<1x16xf32>
    %25 = arith.subf %23, %24 : vector<1x16xf32>
    %c0_18 = arith.constant 0 : index
    %c0_19 = arith.constant 0 : index
    %26 = vector.load %arg4[%c0_18, %c0_19] : memref<16x256xf32, #tpu.memory_space<vmem>>, vector<16x256xf32>
    %cst_20 = arith.constant dense<0.000000e+00> : vector<1x256xf32>
    %27 = tpu.matmul %22, %26, %cst_20 {dimension_numbers = #tpu.dot_dimension_numbers<[1], [0], [0], [1], [0, 0, 1, 1], [], []>} : vector<1x16xf32>, vector<16x256xf32>, vector<1x256xf32> -> vector<1x256xf32>
    %c0_21 = arith.constant 0 : index
    %c0_22 = arith.constant 0 : index
    %28 = vector.load %arg4[%c0_21, %c0_22] : memref<16x256xf32, #tpu.memory_space<vmem>>, vector<16x256xf32>
    %cst_23 = arith.constant dense<0.000000e+00> : vector<1x256xf32>
    %29 = tpu.matmul %25, %28, %cst_23 {dimension_numbers = #tpu.dot_dimension_numbers<[1], [0], [0], [1], [0, 0, 1, 1], [], []>} : vector<1x16xf32>, vector<16x256xf32>, vector<1x256xf32> -> vector<1x256xf32>
    %30 = vector.broadcast %27 : vector<1x256xf32> to vector<2x256xf32>
    %31 = arith.mulf %2, %30 : vector<2x256xf32>
    %32 = vector.broadcast %29 : vector<1x256xf32> to vector<2x256xf32>
    %33 = arith.addf %31, %32 : vector<2x256xf32>
    %cst_24 = arith.constant 0.000000e+00 : f32
    %34 = vector.broadcast %cst_24 : f32 to vector<2x256xf32>
    %35 = arith.cmpf oge, %33, %34 : vector<2x256xf32>
    %cst_25 = arith.constant 2.000000e-01 : f32
    %36 = vector.broadcast %cst_25 : f32 to vector<2x256xf32>
    %37 = arith.mulf %36, %33 : vector<2x256xf32>
    %38 = arith.select %35, %33, %37 : vector<2x256xi1>, vector<2x256xf32>
    %c0_26 = arith.constant 0 : index
    %c0_27 = arith.constant 0 : index
    %39 = vector.load %arg7[%c0_26, %c0_27] : memref<2x256xf32, #tpu.memory_space<vmem>>, vector<2x256xf32>
    tpu.vector_store %arg7[%c0_26, %c0_27], %38 {strides = array<i32>} : memref<2x256xf32, #tpu.memory_space<vmem>>, vector<2x256xf32>,
    return
  }
  func.func @transform_0(%arg0: i32) -> (i32, i32) {
    %c0_i32 = arith.constant 0 : i32
    %c0_i32_0 = arith.constant 0 : i32
    %c0_i32_1 = arith.constant 0 : i32
    return %c0_i32, %c0_i32_0 : i32, i32
  }
  func.func @transform_1(%arg0: i32) -> (i32, i32) {
    %c0_i32 = arith.constant 0 : i32
    %c0_i32_0 = arith.constant 0 : i32
    %c0_i32_1 = arith.constant 0 : i32
    return %c0_i32, %c0_i32_0 : i32, i32
  }
  func.func @transform_2(%arg0: i32) -> (i32, i32) {
    %c0_i32 = arith.constant 0 : i32
    %c0_i32_0 = arith.constant 0 : i32
    %c0_i32_1 = arith.constant 0 : i32
    return %c0_i32, %c0_i32_0 : i32, i32
  }
  func.func @transform_3(%arg0: i32) -> (i32, i32) {
    %c0_i32 = arith.constant 0 : i32
    %c0_i32_0 = arith.constant 0 : i32
    %c0_i32_1 = arith.constant 0 : i32
    return %c0_i32, %c0_i32_0 : i32, i32
  }
  func.func @transform_4(%arg0: i32) -> (i32, i32) {
    %c0_i32 = arith.constant 0 : i32
    %c0_i32_0 = arith.constant 0 : i32
    %c0_i32_1 = arith.constant 0 : i32
    return %c0_i32, %c0_i32_0 : i32, i32
  }
  func.func @transform_5(%arg0: i32) -> (i32, i32) {
    %c0_i32 = arith.constant 0 : i32
    %c0_i32_0 = arith.constant 0 : i32
    %c0_i32_1 = arith.constant 0 : i32
    return %c0_i32, %c0_i32_0 : i32, i32
  }
  func.func @transform_6(%arg0: i32) -> (i32, i32) {
    %c0_i32 = arith.constant 0 : i32
    %c0_i32_0 = arith.constant 0 : i32
    %c0_i32_1 = arith.constant 0 : i32
    return %c0_i32, %c0_i32_0 : i32, i32
  }
}

module attributes {stable_mosaic.version = 11 : i64} {
  func.func @_matmul_bn_act_kernel(%arg0: i32, %arg1: memref<32x144xbf16, #tpu.memory_space<vmem>>, %arg2: memref<144x128xbf16, #tpu.memory_space<vmem>>, %arg3: memref<128x32xf32, #tpu.memory_space<vmem>>, %arg4: memref<32x128xf32, #tpu.memory_space<vmem>>, %arg5: memref<1x32xf32, #tpu.memory_space<vmem>>, %arg6: memref<1x32xf32, #tpu.memory_space<vmem>>, %arg7: memref<32x128xf32, #tpu.memory_space<vmem>>) attributes {dimension_semantics = [#tpu.dimension_semantics<arbitrary>], iteration_bounds = array<i64: 1>, scalar_prefetch = 0 : i64, scratch_operands = 0 : i64, tpu.core_type = #tpu.core_type<tc>, window_params = [{pipeline_mode = #tpu.pipeline_mode<synchronous>, transform_indices = @transform_0, window_bounds = array<i64: 32, 144>}, {pipeline_mode = #tpu.pipeline_mode<synchronous>, transform_indices = @transform_1, window_bounds = array<i64: 144, 128>}, {pipeline_mode = #tpu.pipeline_mode<synchronous>, transform_indices = @transform_2, window_bounds = array<i64: 128, 32>}, {pipeline_mode = #tpu.pipeline_mode<synchronous>, transform_indices = @transform_3, window_bounds = array<i64: 32, 128>}, {pipeline_mode = #tpu.pipeline_mode<synchronous>, transform_indices = @transform_4, window_bounds = array<i64: 1, 32>}, {pipeline_mode = #tpu.pipeline_mode<synchronous>, transform_indices = @transform_5, window_bounds = array<i64: 1, 32>}, {pipeline_mode = #tpu.pipeline_mode<synchronous>, transform_indices = @transform_6, window_bounds = array<i64: 32, 128>}]} {
    %c0 = arith.constant 0 : index
    %c0_0 = arith.constant 0 : index
    %0 = vector.load %arg1[%c0, %c0_0] : memref<32x144xbf16, #tpu.memory_space<vmem>>, vector<32x144xbf16>
    %c0_1 = arith.constant 0 : index
    %c0_2 = arith.constant 0 : index
    %1 = vector.load %arg2[%c0_1, %c0_2] : memref<144x128xbf16, #tpu.memory_space<vmem>>, vector<144x128xbf16>
    %cst = arith.constant dense<0.000000e+00> : vector<32x128xf32>
    %2 = tpu.matmul %0, %1, %cst {dimension_numbers = #tpu.dot_dimension_numbers<[1], [0], [0], [1], [0, 0, 1, 1], [], []>} : vector<32x144xbf16>, vector<144x128xbf16>, vector<32x128xf32> -> vector<32x128xf32>
    %cst_3 = arith.constant dense<0.000000e+00> : vector<128xf32>
    %3 = vector.multi_reduction <add>, %2, %cst_3 [0] : vector<32x128xf32> to vector<128xf32>
    %4 = vector.shape_cast %3 : vector<128xf32> to vector<1x128xf32>
    %5 = arith.mulf %2, %2 : vector<32x128xf32>
    %cst_4 = arith.constant dense<0.000000e+00> : vector<128xf32>
    %6 = vector.multi_reduction <add>, %5, %cst_4 [0] : vector<32x128xf32> to vector<128xf32>
    %7 = vector.shape_cast %6 : vector<128xf32> to vector<1x128xf32>
    %c0_5 = arith.constant 0 : index
    %c0_6 = arith.constant 0 : index
    %8 = vector.load %arg3[%c0_5, %c0_6] : memref<128x32xf32, #tpu.memory_space<vmem>>, vector<128x32xf32>
    %cst_7 = arith.constant dense<0.000000e+00> : vector<1x32xf32>
    %9 = tpu.matmul %4, %8, %cst_7 {dimension_numbers = #tpu.dot_dimension_numbers<[1], [0], [0], [1], [0, 0, 1, 1], [], []>} : vector<1x128xf32>, vector<128x32xf32>, vector<1x32xf32> -> vector<1x32xf32>
    %c0_8 = arith.constant 0 : index
    %c0_9 = arith.constant 0 : index
    %10 = vector.load %arg3[%c0_8, %c0_9] : memref<128x32xf32, #tpu.memory_space<vmem>>, vector<128x32xf32>
    %cst_10 = arith.constant dense<0.000000e+00> : vector<1x32xf32>
    %11 = tpu.matmul %7, %10, %cst_10 {dimension_numbers = #tpu.dot_dimension_numbers<[1], [0], [0], [1], [0, 0, 1, 1], [], []>} : vector<1x128xf32>, vector<128x32xf32>, vector<1x32xf32> -> vector<1x32xf32>
    %cst_11 = arith.constant 7.812500e-03 : f32
    %12 = vector.broadcast %cst_11 : f32 to vector<1x32xf32>
    %13 = arith.mulf %9, %12 : vector<1x32xf32>
    %cst_12 = arith.constant 7.812500e-03 : f32
    %14 = vector.broadcast %cst_12 : f32 to vector<1x32xf32>
    %15 = arith.mulf %11, %14 : vector<1x32xf32>
    %16 = arith.mulf %13, %13 : vector<1x32xf32>
    %17 = arith.subf %15, %16 : vector<1x32xf32>
    %c0_13 = arith.constant 0 : index
    %c0_14 = arith.constant 0 : index
    %18 = vector.load %arg5[%c0_13, %c0_14] : memref<1x32xf32, #tpu.memory_space<vmem>>, vector<1x32xf32>
    %cst_15 = arith.constant 9.99999974E-6 : f32
    %19 = vector.broadcast %cst_15 : f32 to vector<1x32xf32>
    %20 = arith.addf %17, %19 : vector<1x32xf32>
    %21 = math.rsqrt %20 : vector<1x32xf32>
    %22 = arith.mulf %18, %21 : vector<1x32xf32>
    %c0_16 = arith.constant 0 : index
    %c0_17 = arith.constant 0 : index
    %23 = vector.load %arg6[%c0_16, %c0_17] : memref<1x32xf32, #tpu.memory_space<vmem>>, vector<1x32xf32>
    %24 = arith.mulf %13, %22 : vector<1x32xf32>
    %25 = arith.subf %23, %24 : vector<1x32xf32>
    %c0_18 = arith.constant 0 : index
    %c0_19 = arith.constant 0 : index
    %26 = vector.load %arg4[%c0_18, %c0_19] : memref<32x128xf32, #tpu.memory_space<vmem>>, vector<32x128xf32>
    %cst_20 = arith.constant dense<0.000000e+00> : vector<1x128xf32>
    %27 = tpu.matmul %22, %26, %cst_20 {dimension_numbers = #tpu.dot_dimension_numbers<[1], [0], [0], [1], [0, 0, 1, 1], [], []>} : vector<1x32xf32>, vector<32x128xf32>, vector<1x128xf32> -> vector<1x128xf32>
    %c0_21 = arith.constant 0 : index
    %c0_22 = arith.constant 0 : index
    %28 = vector.load %arg4[%c0_21, %c0_22] : memref<32x128xf32, #tpu.memory_space<vmem>>, vector<32x128xf32>
    %cst_23 = arith.constant dense<0.000000e+00> : vector<1x128xf32>
    %29 = tpu.matmul %25, %28, %cst_23 {dimension_numbers = #tpu.dot_dimension_numbers<[1], [0], [0], [1], [0, 0, 1, 1], [], []>} : vector<1x32xf32>, vector<32x128xf32>, vector<1x128xf32> -> vector<1x128xf32>
    %30 = vector.broadcast %27 : vector<1x128xf32> to vector<32x128xf32>
    %31 = arith.mulf %2, %30 : vector<32x128xf32>
    %32 = vector.broadcast %29 : vector<1x128xf32> to vector<32x128xf32>
    %33 = arith.addf %31, %32 : vector<32x128xf32>
    %cst_24 = arith.constant 0.000000e+00 : f32
    %34 = vector.broadcast %cst_24 : f32 to vector<32x128xf32>
    %35 = arith.cmpf oge, %33, %34 : vector<32x128xf32>
    %cst_25 = arith.constant 2.000000e-01 : f32
    %36 = vector.broadcast %cst_25 : f32 to vector<32x128xf32>
    %37 = arith.mulf %36, %33 : vector<32x128xf32>
    %38 = arith.select %35, %33, %37 : vector<32x128xi1>, vector<32x128xf32>
    %c0_26 = arith.constant 0 : index
    %c0_27 = arith.constant 0 : index
    %39 = vector.load %arg7[%c0_26, %c0_27] : memref<32x128xf32, #tpu.memory_space<vmem>>, vector<32x128xf32>
    tpu.vector_store %arg7[%c0_26, %c0_27], %38 {strides = array<i32>} : memref<32x128xf32, #tpu.memory_space<vmem>>, vector<32x128xf32>,
    return
  }
  func.func @transform_0(%arg0: i32) -> (i32, i32) {
    %c0_i32 = arith.constant 0 : i32
    %c0_i32_0 = arith.constant 0 : i32
    %c0_i32_1 = arith.constant 0 : i32
    return %c0_i32, %c0_i32_0 : i32, i32
  }
  func.func @transform_1(%arg0: i32) -> (i32, i32) {
    %c0_i32 = arith.constant 0 : i32
    %c0_i32_0 = arith.constant 0 : i32
    %c0_i32_1 = arith.constant 0 : i32
    return %c0_i32, %c0_i32_0 : i32, i32
  }
  func.func @transform_2(%arg0: i32) -> (i32, i32) {
    %c0_i32 = arith.constant 0 : i32
    %c0_i32_0 = arith.constant 0 : i32
    %c0_i32_1 = arith.constant 0 : i32
    return %c0_i32, %c0_i32_0 : i32, i32
  }
  func.func @transform_3(%arg0: i32) -> (i32, i32) {
    %c0_i32 = arith.constant 0 : i32
    %c0_i32_0 = arith.constant 0 : i32
    %c0_i32_1 = arith.constant 0 : i32
    return %c0_i32, %c0_i32_0 : i32, i32
  }
  func.func @transform_4(%arg0: i32) -> (i32, i32) {
    %c0_i32 = arith.constant 0 : i32
    %c0_i32_0 = arith.constant 0 : i32
    %c0_i32_1 = arith.constant 0 : i32
    return %c0_i32, %c0_i32_0 : i32, i32
  }
  func.func @transform_5(%arg0: i32) -> (i32, i32) {
    %c0_i32 = arith.constant 0 : i32
    %c0_i32_0 = arith.constant 0 : i32
    %c0_i32_1 = arith.constant 0 : i32
    return %c0_i32, %c0_i32_0 : i32, i32
  }
  func.func @transform_6(%arg0: i32) -> (i32, i32) {
    %c0_i32 = arith.constant 0 : i32
    %c0_i32_0 = arith.constant 0 : i32
    %c0_i32_1 = arith.constant 0 : i32
    return %c0_i32, %c0_i32_0 : i32, i32
  }
}

module attributes {stable_mosaic.version = 11 : i64} {
  func.func @_matmul_bn_act_kernel(%arg0: i32, %arg1: memref<128x288xbf16, #tpu.memory_space<vmem>>, %arg2: memref<288x64xbf16, #tpu.memory_space<vmem>>, %arg3: memref<64x16xf32, #tpu.memory_space<vmem>>, %arg4: memref<16x64xf32, #tpu.memory_space<vmem>>, %arg5: memref<1x16xf32, #tpu.memory_space<vmem>>, %arg6: memref<1x16xf32, #tpu.memory_space<vmem>>, %arg7: memref<128x64xf32, #tpu.memory_space<vmem>>) attributes {dimension_semantics = [#tpu.dimension_semantics<arbitrary>], iteration_bounds = array<i64: 1>, scalar_prefetch = 0 : i64, scratch_operands = 0 : i64, tpu.core_type = #tpu.core_type<tc>, window_params = [{pipeline_mode = #tpu.pipeline_mode<synchronous>, transform_indices = @transform_0, window_bounds = array<i64: 128, 288>}, {pipeline_mode = #tpu.pipeline_mode<synchronous>, transform_indices = @transform_1, window_bounds = array<i64: 288, 64>}, {pipeline_mode = #tpu.pipeline_mode<synchronous>, transform_indices = @transform_2, window_bounds = array<i64: 64, 16>}, {pipeline_mode = #tpu.pipeline_mode<synchronous>, transform_indices = @transform_3, window_bounds = array<i64: 16, 64>}, {pipeline_mode = #tpu.pipeline_mode<synchronous>, transform_indices = @transform_4, window_bounds = array<i64: 1, 16>}, {pipeline_mode = #tpu.pipeline_mode<synchronous>, transform_indices = @transform_5, window_bounds = array<i64: 1, 16>}, {pipeline_mode = #tpu.pipeline_mode<synchronous>, transform_indices = @transform_6, window_bounds = array<i64: 128, 64>}]} {
    %c0 = arith.constant 0 : index
    %c0_0 = arith.constant 0 : index
    %0 = vector.load %arg1[%c0, %c0_0] : memref<128x288xbf16, #tpu.memory_space<vmem>>, vector<128x288xbf16>
    %c0_1 = arith.constant 0 : index
    %c0_2 = arith.constant 0 : index
    %1 = vector.load %arg2[%c0_1, %c0_2] : memref<288x64xbf16, #tpu.memory_space<vmem>>, vector<288x64xbf16>
    %cst = arith.constant dense<0.000000e+00> : vector<128x64xf32>
    %2 = tpu.matmul %0, %1, %cst {dimension_numbers = #tpu.dot_dimension_numbers<[1], [0], [0], [1], [0, 0, 1, 1], [], []>} : vector<128x288xbf16>, vector<288x64xbf16>, vector<128x64xf32> -> vector<128x64xf32>
    %cst_3 = arith.constant dense<0.000000e+00> : vector<64xf32>
    %3 = vector.multi_reduction <add>, %2, %cst_3 [0] : vector<128x64xf32> to vector<64xf32>
    %4 = vector.shape_cast %3 : vector<64xf32> to vector<1x64xf32>
    %5 = arith.mulf %2, %2 : vector<128x64xf32>
    %cst_4 = arith.constant dense<0.000000e+00> : vector<64xf32>
    %6 = vector.multi_reduction <add>, %5, %cst_4 [0] : vector<128x64xf32> to vector<64xf32>
    %7 = vector.shape_cast %6 : vector<64xf32> to vector<1x64xf32>
    %c0_5 = arith.constant 0 : index
    %c0_6 = arith.constant 0 : index
    %8 = vector.load %arg3[%c0_5, %c0_6] : memref<64x16xf32, #tpu.memory_space<vmem>>, vector<64x16xf32>
    %cst_7 = arith.constant dense<0.000000e+00> : vector<1x16xf32>
    %9 = tpu.matmul %4, %8, %cst_7 {dimension_numbers = #tpu.dot_dimension_numbers<[1], [0], [0], [1], [0, 0, 1, 1], [], []>} : vector<1x64xf32>, vector<64x16xf32>, vector<1x16xf32> -> vector<1x16xf32>
    %c0_8 = arith.constant 0 : index
    %c0_9 = arith.constant 0 : index
    %10 = vector.load %arg3[%c0_8, %c0_9] : memref<64x16xf32, #tpu.memory_space<vmem>>, vector<64x16xf32>
    %cst_10 = arith.constant dense<0.000000e+00> : vector<1x16xf32>
    %11 = tpu.matmul %7, %10, %cst_10 {dimension_numbers = #tpu.dot_dimension_numbers<[1], [0], [0], [1], [0, 0, 1, 1], [], []>} : vector<1x64xf32>, vector<64x16xf32>, vector<1x16xf32> -> vector<1x16xf32>
    %cst_11 = arith.constant 0.001953125 : f32
    %12 = vector.broadcast %cst_11 : f32 to vector<1x16xf32>
    %13 = arith.mulf %9, %12 : vector<1x16xf32>
    %cst_12 = arith.constant 0.001953125 : f32
    %14 = vector.broadcast %cst_12 : f32 to vector<1x16xf32>
    %15 = arith.mulf %11, %14 : vector<1x16xf32>
    %16 = arith.mulf %13, %13 : vector<1x16xf32>
    %17 = arith.subf %15, %16 : vector<1x16xf32>
    %c0_13 = arith.constant 0 : index
    %c0_14 = arith.constant 0 : index
    %18 = vector.load %arg5[%c0_13, %c0_14] : memref<1x16xf32, #tpu.memory_space<vmem>>, vector<1x16xf32>
    %cst_15 = arith.constant 9.99999974E-6 : f32
    %19 = vector.broadcast %cst_15 : f32 to vector<1x16xf32>
    %20 = arith.addf %17, %19 : vector<1x16xf32>
    %21 = math.rsqrt %20 : vector<1x16xf32>
    %22 = arith.mulf %18, %21 : vector<1x16xf32>
    %c0_16 = arith.constant 0 : index
    %c0_17 = arith.constant 0 : index
    %23 = vector.load %arg6[%c0_16, %c0_17] : memref<1x16xf32, #tpu.memory_space<vmem>>, vector<1x16xf32>
    %24 = arith.mulf %13, %22 : vector<1x16xf32>
    %25 = arith.subf %23, %24 : vector<1x16xf32>
    %c0_18 = arith.constant 0 : index
    %c0_19 = arith.constant 0 : index
    %26 = vector.load %arg4[%c0_18, %c0_19] : memref<16x64xf32, #tpu.memory_space<vmem>>, vector<16x64xf32>
    %cst_20 = arith.constant dense<0.000000e+00> : vector<1x64xf32>
    %27 = tpu.matmul %22, %26, %cst_20 {dimension_numbers = #tpu.dot_dimension_numbers<[1], [0], [0], [1], [0, 0, 1, 1], [], []>} : vector<1x16xf32>, vector<16x64xf32>, vector<1x64xf32> -> vector<1x64xf32>
    %c0_21 = arith.constant 0 : index
    %c0_22 = arith.constant 0 : index
    %28 = vector.load %arg4[%c0_21, %c0_22] : memref<16x64xf32, #tpu.memory_space<vmem>>, vector<16x64xf32>
    %cst_23 = arith.constant dense<0.000000e+00> : vector<1x64xf32>
    %29 = tpu.matmul %25, %28, %cst_23 {dimension_numbers = #tpu.dot_dimension_numbers<[1], [0], [0], [1], [0, 0, 1, 1], [], []>} : vector<1x16xf32>, vector<16x64xf32>, vector<1x64xf32> -> vector<1x64xf32>
    %30 = vector.broadcast %27 : vector<1x64xf32> to vector<128x64xf32>
    %31 = arith.mulf %2, %30 : vector<128x64xf32>
    %32 = vector.broadcast %29 : vector<1x64xf32> to vector<128x64xf32>
    %33 = arith.addf %31, %32 : vector<128x64xf32>
    %cst_24 = arith.constant 0.000000e+00 : f32
    %34 = vector.broadcast %cst_24 : f32 to vector<128x64xf32>
    %35 = arith.cmpf oge, %33, %34 : vector<128x64xf32>
    %cst_25 = arith.constant 2.000000e-01 : f32
    %36 = vector.broadcast %cst_25 : f32 to vector<128x64xf32>
    %37 = arith.mulf %36, %33 : vector<128x64xf32>
    %38 = arith.select %35, %33, %37 : vector<128x64xi1>, vector<128x64xf32>
    %c0_26 = arith.constant 0 : index
    %c0_27 = arith.constant 0 : index
    %39 = vector.load %arg7[%c0_26, %c0_27] : memref<128x64xf32, #tpu.memory_space<vmem>>, vector<128x64xf32>
    tpu.vector_store %arg7[%c0_26, %c0_27], %38 {strides = array<i32>} : memref<128x64xf32, #tpu.memory_space<vmem>>, vector<128x64xf32>,
    return
  }
  func.func @transform_0(%arg0: i32) -> (i32, i32) {
    %c0_i32 = arith.constant 0 : i32
    %c0_i32_0 = arith.constant 0 : i32
    %c0_i32_1 = arith.constant 0 : i32
    return %c0_i32, %c0_i32_0 : i32, i32
  }
  func.func @transform_1(%arg0: i32) -> (i32, i32) {
    %c0_i32 = arith.constant 0 : i32
    %c0_i32_0 = arith.constant 0 : i32
    %c0_i32_1 = arith.constant 0 : i32
    return %c0_i32, %c0_i32_0 : i32, i32
  }
  func.func @transform_2(%arg0: i32) -> (i32, i32) {
    %c0_i32 = arith.constant 0 : i32
    %c0_i32_0 = arith.constant 0 : i32
    %c0_i32_1 = arith.constant 0 : i32
    return %c0_i32, %c0_i32_0 : i32, i32
  }
  func.func @transform_3(%arg0: i32) -> (i32, i32) {
    %c0_i32 = arith.constant 0 : i32
    %c0_i32_0 = arith.constant 0 : i32
    %c0_i32_1 = arith.constant 0 : i32
    return %c0_i32, %c0_i32_0 : i32, i32
  }
  func.func @transform_4(%arg0: i32) -> (i32, i32) {
    %c0_i32 = arith.constant 0 : i32
    %c0_i32_0 = arith.constant 0 : i32
    %c0_i32_1 = arith.constant 0 : i32
    return %c0_i32, %c0_i32_0 : i32, i32
  }
  func.func @transform_5(%arg0: i32) -> (i32, i32) {
    %c0_i32 = arith.constant 0 : i32
    %c0_i32_0 = arith.constant 0 : i32
    %c0_i32_1 = arith.constant 0 : i32
    return %c0_i32, %c0_i32_0 : i32, i32
  }
  func.func @transform_6(%arg0: i32) -> (i32, i32) {
    %c0_i32 = arith.constant 0 : i32
    %c0_i32_0 = arith.constant 0 : i32
    %c0_i32_1 = arith.constant 0 : i32
    return %c0_i32, %c0_i32_0 : i32, i32
  }
}

module attributes {stable_mosaic.version = 11 : i64} {
  func.func @_matmul_bias_act_kernel(%arg0: i32, %arg1: memref<512x144xbf16, #tpu.memory_space<vmem>>, %arg2: memref<144x4xbf16, #tpu.memory_space<vmem>>, %arg3: memref<1x4xf32, #tpu.memory_space<vmem>>, %arg4: memref<512x4xf32, #tpu.memory_space<vmem>>) attributes {dimension_semantics = [#tpu.dimension_semantics<arbitrary>], iteration_bounds = array<i64: 1>, scalar_prefetch = 0 : i64, scratch_operands = 0 : i64, tpu.core_type = #tpu.core_type<tc>, window_params = [{pipeline_mode = #tpu.pipeline_mode<synchronous>, transform_indices = @transform_0, window_bounds = array<i64: 512, 144>}, {pipeline_mode = #tpu.pipeline_mode<synchronous>, transform_indices = @transform_1, window_bounds = array<i64: 144, 4>}, {pipeline_mode = #tpu.pipeline_mode<synchronous>, transform_indices = @transform_2, window_bounds = array<i64: 1, 4>}, {pipeline_mode = #tpu.pipeline_mode<synchronous>, transform_indices = @transform_3, window_bounds = array<i64: 512, 4>}]} {
    %c0 = arith.constant 0 : index
    %c0_0 = arith.constant 0 : index
    %0 = vector.load %arg1[%c0, %c0_0] : memref<512x144xbf16, #tpu.memory_space<vmem>>, vector<512x144xbf16>
    %c0_1 = arith.constant 0 : index
    %c0_2 = arith.constant 0 : index
    %1 = vector.load %arg2[%c0_1, %c0_2] : memref<144x4xbf16, #tpu.memory_space<vmem>>, vector<144x4xbf16>
    %cst = arith.constant dense<0.000000e+00> : vector<512x4xf32>
    %2 = tpu.matmul %0, %1, %cst {dimension_numbers = #tpu.dot_dimension_numbers<[1], [0], [0], [1], [0, 0, 1, 1], [], []>} : vector<512x144xbf16>, vector<144x4xbf16>, vector<512x4xf32> -> vector<512x4xf32>
    %c0_3 = arith.constant 0 : index
    %c0_4 = arith.constant 0 : index
    %3 = vector.load %arg3[%c0_3, %c0_4] : memref<1x4xf32, #tpu.memory_space<vmem>>, vector<1x4xf32>
    %4 = vector.broadcast %3 : vector<1x4xf32> to vector<512x4xf32>
    %5 = arith.addf %2, %4 : vector<512x4xf32>
    %6 = math.tanh %5 : vector<512x4xf32>
    %c0_5 = arith.constant 0 : index
    %c0_6 = arith.constant 0 : index
    %7 = vector.load %arg4[%c0_5, %c0_6] : memref<512x4xf32, #tpu.memory_space<vmem>>, vector<512x4xf32>
    tpu.vector_store %arg4[%c0_5, %c0_6], %6 {strides = array<i32>} : memref<512x4xf32, #tpu.memory_space<vmem>>, vector<512x4xf32>,
    return
  }
  func.func @transform_0(%arg0: i32) -> (i32, i32) {
    %c0_i32 = arith.constant 0 : i32
    %c0_i32_0 = arith.constant 0 : i32
    %c0_i32_1 = arith.constant 0 : i32
    return %c0_i32, %c0_i32_0 : i32, i32
  }
  func.func @transform_1(%arg0: i32) -> (i32, i32) {
    %c0_i32 = arith.constant 0 : i32
    %c0_i32_0 = arith.constant 0 : i32
    %c0_i32_1 = arith.constant 0 : i32
    return %c0_i32, %c0_i32_0 : i32, i32
  }
  func.func @transform_2(%arg0: i32) -> (i32, i32) {
    %c0_i32 = arith.constant 0 : i32
    %c0_i32_0 = arith.constant 0 : i32
    %c0_i32_1 = arith.constant 0 : i32
    return %c0_i32, %c0_i32_0 : i32, i32
  }
  func.func @transform_3(%arg0: i32) -> (i32, i32) {
    %c0_i32 = arith.constant 0 : i32
    %c0_i32_0 = arith.constant 0 : i32
    %c0_i32_1 = arith.constant 0 : i32
    return %c0_i32, %c0_i32_0 : i32, i32
  }
}

</mosaic_0001>

<bundles_post_ra>
// kernel: vae_forward.10
= control target key start
LH: loop header
LB: loop body
LE: loop exit
PB: predicated region body
PF: predicated region fallthrough
CT: control target
= control target key end

     0   :  { %v966_v0 = vmov 0   ;;  %vm184_vm0 = vcmask 130048   ;;  %v967_v29 = vmov 0.0|0.0   ;;  %vm968_vm1 = vmmov 0   ;;  %s1338_s1 = inlined_call_operand.vmem [shape: bf16[144,32], index: 1, kind: input, shape index: {}]   ;;  %s1339_s0 = inlined_call_operand.vmem [shape: bf16[128,144], index: 0, kind: input, shape index: {}]   ;;  %s1340_s2 = inlined_call_operand.vmem [shape: f32[32,32], index: 2, kind: input, shape index: {}]   ;;  %s1341_s3 = inlined_call_operand.vmem [shape: f32[32,32], index: 3, kind: input, shape index: {}]   ;;  %s1342_s4 = inlined_call_operand.vmem [shape: f32[1,32], index: 4, kind: input, shape index: {}]   ;;  %s1343_s5 = inlined_call_operand.vmem [shape: f32[1,32], index: 5, kind: input, shape index: {}]   ;;  %s1344_s6 = inlined_call_operand.vmem [shape: f32[128,32], index: 6, kind: output, shape index: {}]  }
   0x1   :  { %209 = vmatprep.subr.bf16.mxu0 %v966_v0  ;;  %v931_v1 = vld [vmem:[%s1338_s1] sm:$0xff]   ;;  %909 = vmatprep.subr.bf16.mxu1 %v966_v0  ;;  %v932_v2 = vld [vmem:[%s1338_s1 + $0x8] sm:$0xff]   ;;  %v933_v3 = vld [vmem:[%s1338_s1 + $0x10] sm:$0xff]   ;;  %v969_v33 = vmov 0.0   ;;  %vm306_vm2 = vcmask 261120  }
   0x2   :  { %210 = vmatpush1.bf16.msra.mxu0 %v931_v1  ;;  %918 = vmatpush1.bf16.msra.mxu1 %v931_v1  ;;  %v934_v4 = vld [vmem:[%s1338_s1 + $0x18] sm:$0xff]   ;;  %v942_v5 = vld [vmem:[%s1339_s0 + $0x4] ss:$8 sps:$4 sm:$0xff]   ;;  %v937_v9 = vld [vmem:[%s1338_s1 + $0x30] sm:$0xff]  }
   0x3   :  { %211 = vmatprep.subr.bf16.mxu0 %v966_v0  ;;  %910 = vmatprep.subr.bf16.mxu1 %v966_v0  ;;  %v935_v6 = vld [vmem:[%s1338_s1 + $0x20] sm:$0xff]   ;;  %v936_v8 = vld [vmem:[%s1338_s1 + $0x28] sm:$0xff]   ;;  %v938_v10 = vld [vmem:[%s1338_s1 + $0x38] sm:$0xff]  }
   0x4   :  { %809 = vmatprep.mubr.msk.bf16.mxu0 %vm184_vm0, %v942_v5  ;;  %v957_v7 = vld [vmem:[%s1339_s0 + $0x64] ss:$8 sps:$4 sm:$0xff]   ;;  %v940_v12 = vld [vmem:[%s1339_s0] ss:$8 sps:$4 sm:$0xff]   ;;  %v943_v14 = vld [vmem:[%s1339_s0 + $0x14] ss:$8 sps:$4 sm:$0xff]  }
   0x5   :  { %815 = vmatprep.mubr.msk.bf16.mxu1 %vm184_vm0, %v957_v7  ;;  %v939_v11 = vld [vmem:[%s1338_s1 + $0x40] sm:$0xff]   ;;  %v961_v15 = vld [vmem:[%s1339_s0 + $0x74] ss:$8 sps:$4 sm:$0xff]   ;;  %v945_v16 = vld [vmem:[%s1339_s0 + $0x10] ss:$8 sps:$4 sm:$0xff]  }
   0x6   :  { %212 = vmatpush1.bf16.msra.mxu0 %v932_v2  ;;  %919 = vmatpush1.bf16.msra.mxu1 %v932_v2  ;;  %v955_v13 = vld [vmem:[%s1339_s0 + $0x60] ss:$8 sps:$4 sm:$0xff]   ;;  %v963_v17 = vld [vmem:[%s1339_s0 + $0x70] ss:$8 sps:$4 sm:$0xff]   ;;  %v946_v18 = vld [vmem:[%s1339_s0 + $0x24] ss:$8 sps:$4 sm:$0xff]  }
   0x7   :  { %213 = vmatprep.subr.bf16.mxu0 %v966_v0  ;;  %911 = vmatprep.subr.bf16.mxu1 %v966_v0  ;;  %v948_v19 = vld [vmem:[%s1339_s0 + $0x20] ss:$8 sps:$4 sm:$0xff]   ;;  %v949_v20 = vld [vmem:[%s1339_s0 + $0x34] ss:$8 sps:$4 sm:$0xff]   ;;  %v951_v21 = vld [vmem:[%s1339_s0 + $0x30] ss:$8 sps:$4 sm:$0xff]  }
   0x8   :  { %v952_v22 = vld [vmem:[%s1339_s0 + $0x44] ss:$8 sps:$4 sm:$0xff]   ;;  %v954_v23 = vld [vmem:[%s1339_s0 + $0x40] ss:$8 sps:$4 sm:$0xff]   ;;  %v958_v24 = vld [vmem:[%s1339_s0 + $0x54] ss:$8 sps:$4 sm:$0xff]  }
   0x9   :  { %v960_v25 = vld [vmem:[%s1339_s0 + $0x50] ss:$8 sps:$4 sm:$0xff]   ;;  %v397_v26 = vld [vmem:[%s1340_s2] sm:$0xff]  ;;  %v398_v27 = vld [vmem:[%s1340_s2 + $0x8] sm:$0xff] }
   0xa   :  { %214 = vmatpush1.bf16.msra.mxu0 %v933_v3  ;;  %920 = vmatpush1.bf16.msra.mxu1 %v933_v3  ;;  %v1094_v28 = vpack.c.bf16 %v398_v27, %v397_v26  ;;  %v399_v30 = vld [vmem:[%s1340_s2 + $0x10] sm:$0xff]  ;;  %v400_v31 = vld [vmem:[%s1340_s2 + $0x18] sm:$0xff] }
   0xb   :  { %215 = vmatprep.subr.bf16.mxu0 %v966_v0  ;;  %912 = vmatprep.subr.bf16.mxu1 %v966_v0  ;;  %v1105_v32 = vpack.c.bf16 %v400_v31, %v399_v30 }
   0xe   :  { %216 = vmatpush1.bf16.msra.mxu0 %v934_v4  ;;  %921 = vmatpush1.bf16.msra.mxu1 %v934_v4 }
   0xf   :  { %217 = vmatprep.subr.bf16.mxu0 %v966_v0  ;;  %913 = vmatprep.subr.bf16.mxu1 %v966_v0 }
  0x12   :  { %218 = vmatpush1.bf16.msra.mxu0 %v935_v6  ;;  %922 = vmatpush1.bf16.msra.mxu1 %v935_v6 }
  0x13   :  { %219 = vmatprep.subr.bf16.mxu0 %v966_v0  ;;  %914 = vmatprep.subr.bf16.mxu1 %v966_v0 }
  0x16   :  { %220 = vmatpush1.bf16.msra.mxu0 %v936_v8  ;;  %923 = vmatpush1.bf16.msra.mxu1 %v936_v8 }
  0x17   :  { %221 = vmatprep.subr.bf16.mxu0 %v966_v0  ;;  %915 = vmatprep.subr.bf16.mxu1 %v966_v0 }
  0x1a   :  { %222 = vmatpush1.bf16.msra.mxu0 %v937_v9  ;;  %924 = vmatpush1.bf16.msra.mxu1 %v937_v9 }
  0x1b   :  { %223 = vmatprep.subr.bf16.mxu0 %v966_v0  ;;  %916 = vmatprep.subr.bf16.mxu1 %v966_v0 }
  0x1e   :  { %224 = vmatpush1.bf16.msra.mxu0 %v938_v10  ;;  %925 = vmatpush1.bf16.msra.mxu1 %v938_v10 }
  0x1f   :  { %225 = vmatprep.subr.bf16.mxu0 %v966_v0  ;;  %917 = vmatprep.subr.bf16.mxu1 %v966_v0 }
  0x22   :  { %226 = vmatpush1.bf16.msra.mxu0 %v939_v11  ;;  %926 = vmatpush1.bf16.msra.mxu1 %v939_v11 }
  0x23   :  { %885 = vmatprep.subr.bf16.mxu1 %v967_v29 }
  0x25   :  { %242 = vmatmul.mubr.bf16.vlgmr.msra.gmra.mrb[0].mxu0 %v940_v12  ;;  %290 = vmatmul.mubr.bf16.vlgmr.msra.gmra.mrb[0].mxu1 %v955_v13 }
  0x26   :  { %810 = vmatprep.mubr.msk.bf16.mxu0 %vm184_vm0, %v943_v14  ;;  %816 = vmatprep.mubr.msk.bf16.mxu1 %vm184_vm0, %v961_v15 }
  0x27   :  { %887 = vmatpush3.bf16.msra.mxu1 %v1094_v28 }
  0x28   :  { %888 = vmatprep.subr.bf16.mxu1 %v967_v29 }
  0x2b   :  { %890 = vmatpush3.bf16.msra.mxu1 %v1105_v32 }
  0x2c   :  { %891 = vmatprep.subr.bf16.mxu1 %v967_v29 }
  0x2d   :  { %250 = vmatmul.mubr.bf16.gmra.mrb[4].mxu0 %v945_v16  ;;  %298 = vmatmul.mubr.bf16.gmra.mrb[4].mxu1 %v963_v17 }
  0x2e   :  { %811 = vmatprep.mubr.msk.bf16.mxu0 %vm184_vm0, %v946_v18  ;;  %849 = vmatprep.mubr.msk.f32.mxu1 %vm968_vm1, %v969_v33 }
  0x35   :  { %258 = vmatmul.mubr.bf16.gmra.mrb[8].mxu0 %v948_v19 }
  0x36   :  { %812 = vmatprep.mubr.msk.bf16.mxu0 %vm184_vm0, %v949_v20 }
  0x3d   :  { %266 = vmatmul.mubr.bf16.gmra.mrb[12].mxu0 %v951_v21 }
  0x3e   :  { %813 = vmatprep.mubr.msk.bf16.mxu0 %vm184_vm0, %v952_v22 }
  0x45   :  { %274 = vmatmul.mubr.bf16.gmra.mrb[16].mxu0 %v954_v23 }
  0x46   :  { %814 = vmatprep.mubr.msk.bf16.mxu0 %vm184_vm0, %v958_v24 }
  0x4d   :  { %282 = vmatmul.mubr.bf16.gmra.mrb[20].mxu0 %v960_v25 }
  0xf8   :  { %v1111_v34 = vpop.f32.mrb[0].mxu0  ;;  %v1113_v35 = vpop.f32.mrb[0].mxu1 }
  0xf9   :  { %v344_v36 = vmul.f32 %v1111_v34, %v1111_v34  ;;  %v245_v37 = vpop.f32.mrb[1].mxu0  ;;  %v293_v38 = vpop.f32.mrb[1].mxu1  ;;  %v307_v41 = vsel %vm306_vm2, %v1111_v34, 0.0 }
  0xfa   :  { %v1117_v39 = vpop.f32.mrb[2].mxu0  ;;  %v1119_v40 = vpop.f32.mrb[2].mxu1 }
  0xfb   :  { %v308_v42 = vsel %vm306_vm2, %v1117_v39, 0.0  ;;  %v345_v43 = vmul.f32 %v1117_v39, %v1117_v39  ;;  %v248_v44 = vpop.f32.mrb[3].mxu0  ;;  %v296_v45 = vpop.f32.mrb[3].mxu1  ;;  %v360_v47 = vsel %vm306_vm2, %v344_v36, 0.0 }
  0xfc   :  { %v309_v46 = vadd.f32 %v308_v42, %v307_v41 }
  0xfd   :  { %v361_v48 = vsel %vm306_vm2, %v345_v43, 0.0 }
  0xfe   :  { %v362_v49 = vadd.f32 %v361_v48, %v360_v47 }
 0x100   :  { %v1129_v50 = vpop.f32.mrb[4].mxu0  ;;  %v1131_v51 = vpop.f32.mrb[4].mxu1 }
 0x101   :  { %v310_v52 = vsel %vm306_vm2, %v1129_v50, 0.0  ;;  %v346_v53 = vmul.f32 %v1129_v50, %v1129_v50  ;;  %v253_v54 = vpop.f32.mrb[5].mxu0  ;;  %v301_v55 = vpop.f32.mrb[5].mxu1 }
 0x102   :  { %v311_v56 = vadd.f32 %v310_v52, %v309_v46  ;;  %v1137_v57 = vpop.f32.mrb[6].mxu0  ;;  %v1139_v58 = vpop.f32.mrb[6].mxu1 }
 0x103   :  { %v363_v59 = vsel %vm306_vm2, %v346_v53, 0.0  ;;  %v312_v60 = vsel %vm306_vm2, %v1137_v57, 0.0  ;;  %v347_v61 = vmul.f32 %v1137_v57, %v1137_v57  ;;  %v256_v62 = vpop.f32.mrb[7].mxu0  ;;  %v304_v63 = vpop.f32.mrb[7].mxu1 }
 0x104   :  { %v364_v0 = vadd.f32 %v363_v59, %v362_v49  ;;  %v313_v1 = vadd.f32 %v312_v60, %v311_v56 }
 0x105   :  { %v365_v2 = vsel %vm306_vm2, %v347_v61, 0.0 }
 0x106   :  { %v366_v3 = vadd.f32 %v365_v2, %v364_v0  ;;  %v356_v0 = vmul.f32 %v1113_v35, %v1113_v35 }
 0x108   :  { %v1147_v4 = vpop.f32.mrb[8].mxu0 }
 0x109   :  { %v314_v5 = vsel %vm306_vm2, %v1147_v4, 0.0  ;;  %v348_v6 = vmul.f32 %v1147_v4, %v1147_v4  ;;  %v261_v7 = vpop.f32.mrb[9].mxu0 }
 0x10a   :  { %v315_v8 = vadd.f32 %v314_v5, %v313_v1  ;;  %v1153_v9 = vpop.f32.mrb[10].mxu0 }
 0x10b   :  { %v367_v10 = vsel %vm306_vm2, %v348_v6, 0.0  ;;  %v316_v11 = vsel %vm306_vm2, %v1153_v9, 0.0  ;;  %v349_v12 = vmul.f32 %v1153_v9, %v1153_v9  ;;  %v264_v13 = vpop.f32.mrb[11].mxu0 }
 0x10c   :  { %v368_v14 = vadd.f32 %v367_v10, %v366_v3  ;;  %v317_v15 = vadd.f32 %v316_v11, %v315_v8  ;;  %v330_v8 = vsel %vm306_vm2, %v1113_v35, 0.0  ;;  %v357_v10 = vmul.f32 %v1119_v40, %v1119_v40 }
 0x10d   :  { %v369_v16 = vsel %vm306_vm2, %v349_v12, 0.0  ;;  %v358_v12 = vmul.f32 %v1131_v51, %v1131_v51 }
 0x10e   :  { %v370_v17 = vadd.f32 %v369_v16, %v368_v14  ;;  %v332_v16 = vsel %vm306_vm2, %v1119_v40, 0.0 }
 0x110   :  { %v1161_v18 = vpop.f32.mrb[12].mxu0 }
 0x111   :  { %v318_v19 = vsel %vm306_vm2, %v1161_v18, 0.0  ;;  %v350_v20 = vmul.f32 %v1161_v18, %v1161_v18  ;;  %v269_v21 = vpop.f32.mrb[13].mxu0 }
 0x112   :  { %v319_v22 = vadd.f32 %v318_v19, %v317_v15  ;;  %v1167_v23 = vpop.f32.mrb[14].mxu0  ;;  %v383_v15 = vsel %vm306_vm2, %v356_v0, 0.0  ;;  %v385_v21 = vsel %vm306_vm2, %v357_v10, 0.0 }
 0x113   :  { %v371_v24 = vsel %vm306_vm2, %v350_v20, 0.0  ;;  %v320_v25 = vsel %vm306_vm2, %v1167_v23, 0.0  ;;  %v351_v26 = vmul.f32 %v1167_v23, %v1167_v23  ;;  %v272_v27 = vpop.f32.mrb[15].mxu0 }
 0x114   :  { %v372_v30 = vadd.f32 %v371_v24, %v370_v17  ;;  %v321_v31 = vadd.f32 %v320_v25, %v319_v22  ;;  %v334_v17 = vsel %vm306_vm2, %v1131_v51, 0.0  ;;  %v387_v22 = vsel %vm306_vm2, %v358_v12, 0.0 }
 0x115   :  { %v373_v36 = vsel %vm306_vm2, %v351_v26, 0.0  ;;  %v359_v24 = vmul.f32 %v1139_v58, %v1139_v58  ;;  %v336_v27 = vsel %vm306_vm2, %v1139_v58, 0.0 }
 0x116   :  { %v374_v37 = vadd.f32 %v373_v36, %v372_v30 }
 0x117   :  { %v389_v36 = vsel %vm306_vm2, %v359_v24, 0.0 }
 0x118   :  { %v1175_v38 = vpop.f32.mrb[16].mxu0 }
 0x119   :  { %v322_v41 = vsel %vm306_vm2, %v1175_v38, 0.0  ;;  %v352_v42 = vmul.f32 %v1175_v38, %v1175_v38  ;;  %v277_v43 = vpop.f32.mrb[17].mxu0 }
 0x11a   :  { %v323_v44 = vadd.f32 %v322_v41, %v321_v31  ;;  %v1181_v45 = vpop.f32.mrb[18].mxu0 }
 0x11b   :  { %v375_v46 = vsel %vm306_vm2, %v352_v42, 0.0  ;;  %v324_v47 = vsel %vm306_vm2, %v1181_v45, 0.0  ;;  %v353_v48 = vmul.f32 %v1181_v45, %v1181_v45  ;;  %v280_v49 = vpop.f32.mrb[19].mxu0 }
 0x11c   :  { %v376_v52 = vadd.f32 %v375_v46, %v374_v37  ;;  %v325_v53 = vadd.f32 %v324_v47, %v323_v44 }
 0x11d   :  { %v377_v54 = vsel %vm306_vm2, %v353_v48, 0.0 }
 0x11e   :  { %v378_v55 = vadd.f32 %v377_v54, %v376_v52 }
 0x120   :  { %v1189_v56 = vpop.f32.mrb[20].mxu0 }
 0x121   :  { %v326_v59 = vsel %vm306_vm2, %v1189_v56, 0.0  ;;  %v354_v60 = vmul.f32 %v1189_v56, %v1189_v56  ;;  %v285_v61 = vpop.f32.mrb[21].mxu0 }
 0x122   :  { %v327_v62 = vadd.f32 %v326_v59, %v325_v53  ;;  %v1195_v63 = vpop.f32.mrb[22].mxu0  ;;  %v559_v59 = vld [vmem:[%s1341_s3 + $0x8] sm:$0xff]  ;;  %v561_v61 = vld [vmem:[%s1341_s3 + $0x18] sm:$0xff] }
 0x123   :  { %v379_v1 = vsel %vm306_vm2, %v354_v60, 0.0  ;;  %v328_v2 = vsel %vm306_vm2, %v1195_v63, 0.0  ;;  %v355_v3 = vmul.f32 %v1195_v63, %v1195_v63  ;;  %v288_v5 = vpop.f32.mrb[23].mxu0 }
 0x124   :  { %v380_v6 = vadd.f32 %v379_v1, %v378_v55  ;;  %v329_v7 = vadd.f32 %v328_v2, %v327_v62 }
 0x125   :  { %v381_v11 = vsel %vm306_vm2, %v355_v3, 0.0 }
 0x126   :  { %v331_v13 = vadd.f32 %v330_v8, %v329_v7  ;;  %v382_v14 = vadd.f32 %v381_v11, %v380_v6  ;;  %v551_v11 = vld [vmem:[%s1342_s4] sm:$0x1] }
 0x128   :  { %v384_v19 = vadd.f32 %v383_v15, %v382_v14  ;;  %v333_v20 = vadd.f32 %v332_v16, %v331_v13  ;;  %v555_v15 = vld [vmem:[%s1343_s5] sm:$0x1] }
 0x12a   :  { %v335_v25 = vadd.f32 %v334_v17, %v333_v20  ;;  %v386_v26 = vadd.f32 %v385_v21, %v384_v19  ;;  %v708_v17 = vlaneseq }
 0x12c   :  { %v388_v30 = vadd.f32 %v387_v22, %v386_v26  ;;  %v337_v31 = vadd.f32 %v336_v27, %v335_v25  ;;  %v709_v19 = vshrl.u32 %v708_v17, 7 }
 0x12e   :  { %v338_v37 = vrot.slane %v337_v31, 4  ;;  %v390_v41 = vadd.f32 %v389_v36, %v388_v30  ;;  %v710_v20 = vsub.s32 0, %v709_v19 }
 0x130   :  { %v339_v42 = vadd.f32 %v338_v37, %v337_v31  ;;  %v391_v43 = vrot.slane %v390_v41, 4 }
 0x132   :  { %v340_v44 = vrot.slane %v339_v42, 2  ;;  %v392_v46 = vadd.f32 %v391_v43, %v390_v41 }
 0x134   :  { %v341_v47 = vadd.f32 %v340_v44, %v339_v42  ;;  %v393_v48 = vrot.slane %v392_v46, 2 }
 0x136   :  { %v342_v49 = vrot.slane %v341_v47, 1  ;;  %v394_v53 = vadd.f32 %v393_v48, %v392_v46 }
 0x138   :  { %v343_v52 = vadd.f32 %v342_v49, %v341_v47  ;;  %v395_v54 = vrot.slane %v394_v53, 1 }
 0x13a   :  { %850 = vmatmul.mubr.msk.f32.vlgmr.msra.gmra.mrb[8].mxu1 %vm306_vm2, %v343_v52  ;;  %v396_v55 = vadd.f32 %v395_v54, %v394_v53 }
 0x13b   :  { %893 = vmatpush3.bf16.msra.mxu1 %v1094_v28  ;;  %860 = vmatprep.mubr.msk.f32.mxu1 %vm968_vm1, %v969_v33  ;;  %v558_v28 = vld [vmem:[%s1341_s3] sm:$0xff] }
 0x13c   :  { %894 = vmatprep.subr.bf16.mxu1 %v967_v29  ;;  %v898_v60 = vpack.c.bf16 %v559_v59, %v558_v28 }
 0x13f   :  { %896 = vmatpush3.bf16.msra.mxu1 %v1105_v32  ;;  %v560_v32 = vld [vmem:[%s1341_s3 + $0x10] sm:$0xff] }
 0x140   :  { %897 = vmatprep.subr.bf16.mxu1 %v967_v29  ;;  %v901_v62 = vpack.c.bf16 %v561_v61, %v560_v32 }
 0x142   :  { %861 = vmatmul.mubr.msk.f32.vlgmr.msra.gmra.mrb[10].mxu1 %vm306_vm2, %v396_v55 }
 0x143   :  { %871 = vmatprep.mubr.msk.f32.mxu1 %vm968_vm1, %v969_v33  ;;  %899 = vmatpush3.bf16.msra.mxu1 %v898_v60 }
 0x144   :  { %900 = vmatprep.subr.bf16.mxu1 %v967_v29 }
 0x147   :  { %902 = vmatpush3.bf16.msra.mxu1 %v901_v62 }
 0x148   :  { %903 = vmatprep.subr.bf16.mxu1 %v967_v29 }
 0x20d   :  { %v470_v0 = vpop.f32.mrb[8].mxu1 }
 0x20e   :  { %v851_v1 = vpop.f32.mrb[9].mxu1  ;;  %v547_v2 = vmul.f32 0.0078125, %v470_v0 }
 0x210   :  { %v549_v5 = vmul.f32 %v547_v2, %v547_v2 }
 0x215   :  { %v543_v3 = vpop.f32.mrb[10].mxu1 }
 0x216   :  { %v548_v6 = vmul.f32 0.0078125, %v543_v3  ;;  %v862_v7 = vpop.f32.mrb[11].mxu1 }
 0x218   :  { %v550_v8 = vsub.f32 %v548_v6, %v549_v5 }
 0x21a   :  { %v552_v10 = vadd.f32 1e-05, %v550_v8 }
 0x21c   :  { %964 = vrsqrt.f32 %v552_v10 }
 0x226   :  { %v965_v12 = vpop.eup %964 }
 0x227   :  { %v554_v13 = vmul.f32 %v965_v12, %v551_v11 }
 0x229   :  { %872 = vmatmul.mubr.msk.f32.vlgmr.msra.gmra.mrb[12].mxu1 %vm306_vm2, %v554_v13  ;;  %v556_v14 = vmul.f32 %v554_v13, %v547_v2 }
 0x22a   :  { %905 = vmatpush3.bf16.msra.mxu1 %v898_v60  ;;  %882 = vmatprep.mubr.msk.f32.mxu1 %vm968_vm1, %v969_v33 }
 0x22b   :  { %906 = vmatprep.subr.bf16.mxu1 %v967_v29  ;;  %v557_v16 = vsub.f32 %v555_v15, %v556_v14 }
 0x22e   :  { %908 = vmatpush3.bf16.msra.mxu1 %v901_v62 }
 0x231   :  { %883 = vmatmul.mubr.msk.f32.vlgmr.msra.gmra.mrb[14].mxu1 %vm306_vm2, %v557_v16 }
 0x2fc   :  { %v631_v21 = vpop.f32.mrb[12].mxu1 }
 0x2fd   :  { %v711_v22 = vrot.slane %v631_v21, %v710_v20  ;;  %v873_v24 = vpop.f32.mrb[13].mxu1 }
 0x2ff   :  { %v712_v25 = vmul.f32 %v711_v22, %v1111_v34  ;;  %v713_v33 = vmul.f32 %v711_v22, %v1117_v39  ;;  %v714_v29 = vmul.f32 %v711_v22, %v1129_v50  ;;  %v715_v26 = vmul.f32 %v711_v22, %v1137_v57 }
 0x300   :  { %v716_v27 = vmul.f32 %v711_v22, %v1147_v4  ;;  %v717_v30 = vmul.f32 %v711_v22, %v1153_v9  ;;  %v718_v31 = vmul.f32 %v711_v22, %v1161_v18  ;;  %v719_v36 = vmul.f32 %v711_v22, %v1167_v23 }
 0x301   :  { %v720_v37 = vmul.f32 %v711_v22, %v1175_v38  ;;  %v721_v41 = vmul.f32 %v711_v22, %v1181_v45  ;;  %v722_v34 = vmul.f32 %v711_v22, %v1189_v56  ;;  %v723_v39 = vmul.f32 %v711_v22, %v1195_v63 }
 0x302   :  { %v724_v50 = vmul.f32 %v711_v22, %v1113_v35  ;;  %v725_v57 = vmul.f32 %v711_v22, %v1119_v40  ;;  %v726_v4 = vmul.f32 %v711_v22, %v1131_v51  ;;  %v727_v9 = vmul.f32 %v711_v22, %v1139_v58 }
 0x304   :  { %v704_v42 = vpop.f32.mrb[14].mxu1 }
 0x305   :  { %v731_v18 = vrot.slane %v704_v42, %v710_v20  ;;  %v884_v43 = vpop.f32.mrb[15].mxu1 }
 0x307   :  { %v732_v23 = vadd.f32 %v731_v18, %v712_v25  ;;  %v733_v44 = vadd.f32 %v731_v18, %v713_v33  ;;  %v734_v38 = vadd.f32 %v731_v18, %v714_v29  ;;  %v735_v46 = vadd.f32 %v731_v18, %v715_v26 }
 0x308   :  { %v736_v45 = vadd.f32 %v731_v18, %v716_v27  ;;  %v737_v47 = vadd.f32 %v731_v18, %v717_v30  ;;  %v738_v56 = vadd.f32 %v731_v18, %v718_v31  ;;  %v739_v48 = vadd.f32 %v731_v18, %v719_v36 }
 0x309   :  { %v740_v63 = vadd.f32 %v731_v18, %v720_v37  ;;  %v741_v49 = vadd.f32 %v731_v18, %v721_v41  ;;  %v742_v35 = vadd.f32 %v731_v18, %v722_v34  ;;  %v743_v52 = vadd.f32 %v731_v18, %v723_v39 }
 0x30a   :  { %v744_v40 = vadd.f32 %v731_v18, %v724_v50  ;;  %v745_v53 = vadd.f32 %v731_v18, %v725_v57  ;;  %v746_v51 = vadd.f32 %v731_v18, %v726_v4  ;;  %v747_v54 = vadd.f32 %v731_v18, %v727_v9 }
 0x30b   :  { %v748_v58 = vmax.f32 %v732_v23, 0.0  ;;  %v749_v55 = vmax.f32 %v733_v44, 0.0  ;;  %v750_v28 = vmax.f32 %v734_v38, 0.0  ;;  %v751_v59 = vmax.f32 %v735_v46, 0.0 }
 0x30c   :  { %v752_v32 = vmax.f32 %v736_v45, 0.0  ;;  %v753_v60 = vmax.f32 %v737_v47, 0.0  ;;  %v754_v61 = vmax.f32 %v738_v56, 0.0  ;;  %v755_v62 = vmax.f32 %v739_v48, 0.0 }
 0x30d   :  { %v756_v0 = vmax.f32 %v740_v63, 0.0  ;;  %v757_v1 = vmax.f32 %v741_v49, 0.0  ;;  %v758_v2 = vmax.f32 %v742_v35, 0.0  ;;  %v759_v3 = vmax.f32 %v743_v52, 0.0  ;;  %764 = vst.msk [vmem:[%s1344_s6] sm:$0xff] %vm306_vm2, %v748_v58  ;;  %765 = vst.msk [vmem:[%s1344_s6 + $0x8] sm:$0xff] %vm306_vm2, %v749_v55 }
 0x30e   :  { %766 = vst.msk [vmem:[%s1344_s6 + $0x10] sm:$0xff] %vm306_vm2, %v750_v28  ;;  %767 = vst.msk [vmem:[%s1344_s6 + $0x18] sm:$0xff] %vm306_vm2, %v751_v59  ;;  %v760_v5 = vmax.f32 %v744_v40, 0.0  ;;  %v761_v6 = vmax.f32 %v745_v53, 0.0  ;;  %v762_v7 = vmax.f32 %v746_v51, 0.0  ;;  %v763_v8 = vmax.f32 %v747_v54, 0.0 }
 0x30f   :  { %768 = vst.msk [vmem:[%s1344_s6 + $0x20] sm:$0xff] %vm306_vm2, %v752_v32  ;;  %769 = vst.msk [vmem:[%s1344_s6 + $0x28] sm:$0xff] %vm306_vm2, %v753_v60 }
 0x310   :  { %770 = vst.msk [vmem:[%s1344_s6 + $0x30] sm:$0xff] %vm306_vm2, %v754_v61  ;;  %771 = vst.msk [vmem:[%s1344_s6 + $0x38] sm:$0xff] %vm306_vm2, %v755_v62 }
 0x311   :  { %772 = vst.msk [vmem:[%s1344_s6 + $0x40] sm:$0xff] %vm306_vm2, %v756_v0  ;;  %773 = vst.msk [vmem:[%s1344_s6 + $0x48] sm:$0xff] %vm306_vm2, %v757_v1 }
 0x312   :  { %774 = vst.msk [vmem:[%s1344_s6 + $0x50] sm:$0xff] %vm306_vm2, %v758_v2  ;;  %775 = vst.msk [vmem:[%s1344_s6 + $0x58] sm:$0xff] %vm306_vm2, %v759_v3 }
 0x313   :  { %776 = vst.msk [vmem:[%s1344_s6 + $0x60] sm:$0xff] %vm306_vm2, %v760_v5  ;;  %777 = vst.msk [vmem:[%s1344_s6 + $0x68] sm:$0xff] %vm306_vm2, %v761_v6 }
 0x314   :  { %778 = vst.msk [vmem:[%s1344_s6 + $0x70] sm:$0xff] %vm306_vm2, %v762_v7  ;;  %779 = vst.msk [vmem:[%s1344_s6 + $0x78] sm:$0xff] %vm306_vm2, %v763_v8 }

// kernel: vae_forward.9
= control target key start
LH: loop header
LB: loop body
LE: loop exit
PB: predicated region body
PF: predicated region fallthrough
CT: control target
= control target key end

     0   :  { %vm352_vm0 = vcmask 1043456   ;;  %vm353_vm1 = vcmask 1044480   ;;  %vm255_vm2 = vcmask 72704   ;;  %v1815_v1 = vmov 65535   ;;  %s3314_s1 = inlined_call_operand.vmem [shape: bf16[9,16], index: 1, kind: input, shape index: {}]   ;;  %s3315_s0 = inlined_call_operand.vmem [shape: bf16[512,9], index: 0, kind: input, shape index: {}]   ;;  %s3316_s2 = inlined_call_operand.vmem [shape: f32[16,16], index: 2, kind: input, shape index: {}]   ;;  %s3317_s3 = inlined_call_operand.vmem [shape: f32[16,16], index: 3, kind: input, shape index: {}]   ;;  %s3318_s4 = inlined_call_operand.vmem [shape: f32[1,16], index: 4, kind: input, shape index: {}]   ;;  %s3319_s5 = inlined_call_operand.vmem [shape: f32[1,16], index: 5, kind: input, shape index: {}]   ;;  %s3320_s6 = inlined_call_operand.vmem [shape: f32[512,16], index: 6, kind: output, shape index: {}]  }
   0x1   :  { %v1780_v0 = vld [vmem:[%s3314_s1] sm:$0x1f]   ;;  %v354_v2 = vsel %vm352_vm0, 4294967295, %v1815_v1  ;;  %v1782_v6 = vld [vmem:[%s3315_s0 + $0x8] sm:$0xff]   ;;  %v1783_v7 = vld [vmem:[%s3315_s0 + $0x10] sm:$0xff]   ;;  %v3321_v37 = vmov 0.0|0.0  }
   0x2   :  { %v1781_v3 = vld [vmem:[%s3315_s0] sm:$0xff]   ;;  %v355_v4 = vsel %vm353_vm1, %v354_v2, 0  ;;  %v1784_v8 = vld [vmem:[%s3315_s0 + $0x18] sm:$0xff]   ;;  %v1786_v10 = vld [vmem:[%s3315_s0 + $0x28] sm:$0xff]   ;;  %vm648_vm3 = vcmask 130048   ;;  %vm1817_vm4 = vmmov 0  }
   0x3   :  { %v357_v5 = vand.u32 %v1780_v0, %v355_v4  ;;  %1670 = vmatprep.mubr.msk.bf16.mxu0 %vm255_vm2, %v1781_v3  ;;  %v1785_v9 = vld [vmem:[%s3315_s0 + $0x20] sm:$0xff]   ;;  %v1799_v11 = vld [vmem:[%s3315_s0 + $0x90] sm:$0xff]   ;;  %v1800_v12 = vld [vmem:[%s3315_s0 + $0x98] sm:$0xff]  }
   0x4   :  { %1706 = vmatprep.mubr.msk.bf16.mxu1 %vm255_vm2, %v1799_v11  ;;  %v1801_v13 = vld [vmem:[%s3315_s0 + $0xa0] sm:$0xff]   ;;  %v1787_v14 = vld [vmem:[%s3315_s0 + $0x30] sm:$0xff]   ;;  %v1802_v15 = vld [vmem:[%s3315_s0 + $0xa8] sm:$0xff]  }
   0x5   :  { %1668 = vmatprep.subr.bf16.mxu0 %v357_v5  ;;  %1774 = vmatprep.subr.bf16.mxu1 %v357_v5  ;;  %v1803_v16 = vld [vmem:[%s3315_s0 + $0xb0] sm:$0xff]   ;;  %v1788_v17 = vld [vmem:[%s3315_s0 + $0x38] sm:$0xff]   ;;  %v1789_v18 = vld [vmem:[%s3315_s0 + $0x40] sm:$0xff]  }
   0x6   :  { %1669 = vmatpush3.bf16.msra.mxu0 %v357_v5  ;;  %1775 = vmatpush3.bf16.msra.mxu1 %v357_v5  ;;  %v1804_v19 = vld [vmem:[%s3315_s0 + $0xb8] sm:$0xff]   ;;  %v1805_v20 = vld [vmem:[%s3315_s0 + $0xc0] sm:$0xff]   ;;  %v1790_v21 = vld [vmem:[%s3315_s0 + $0x48] sm:$0xff]  }
   0x7   :  { %v1791_v22 = vld [vmem:[%s3315_s0 + $0x50] sm:$0xff]   ;;  %v1806_v23 = vld [vmem:[%s3315_s0 + $0xc8] sm:$0xff]   ;;  %v1792_v25 = vld [vmem:[%s3315_s0 + $0x58] sm:$0xff]   ;;  %1762 = vmatprep.subr.bf16.mxu1 %v3321_v37 }
   0x8   :  { %v1807_v24 = vld [vmem:[%s3315_s0 + $0xd0] sm:$0xff]   ;;  %v1793_v26 = vld [vmem:[%s3315_s0 + $0x60] sm:$0xff]   ;;  %v1808_v27 = vld [vmem:[%s3315_s0 + $0xd8] sm:$0xff]  }
   0x9   :  { %1671 = vmatmul.mubr.msk.bf16.vlgmr.msra.gmra.mrb[0].mxu0 %vm255_vm2, %v1782_v6  ;;  %1707 = vmatmul.mubr.msk.bf16.vlgmr.msra.gmra.mrb[0].mxu1 %vm255_vm2, %v1800_v12  ;;  %v1809_v28 = vld [vmem:[%s3315_s0 + $0xe0] sm:$0xff]   ;;  %v1794_v29 = vld [vmem:[%s3315_s0 + $0x68] sm:$0xff]   ;;  %v1795_v30 = vld [vmem:[%s3315_s0 + $0x70] sm:$0xff]  }
   0xa   :  { %1674 = vmatprep.mubr.msk.bf16.mxu0 %vm255_vm2, %v1783_v7  ;;  %1710 = vmatprep.mubr.msk.bf16.mxu1 %vm255_vm2, %v1801_v13  ;;  %v1810_v31 = vld [vmem:[%s3315_s0 + $0xe8] sm:$0xff]   ;;  %v1811_v32 = vld [vmem:[%s3315_s0 + $0xf0] sm:$0xff]   ;;  %v1796_v33 = vld [vmem:[%s3315_s0 + $0x78] sm:$0xff]  }
   0xb   :  { %v1797_v34 = vld [vmem:[%s3315_s0 + $0x80] sm:$0xff]   ;;  %v1812_v35 = vld [vmem:[%s3315_s0 + $0xf8] sm:$0xff]   ;;  %v1798_v36 = vld [vmem:[%s3315_s0 + $0x88] sm:$0xff]  }
   0xc   :  { %v979_v38 = vld [vmem:[%s3316_s2] sm:$0xff]  ;;  %v980_v39 = vld [vmem:[%s3316_s2 + $0x8] sm:$0xff] }
   0xd   :  { %v1992_v40 = vpack.c.bf16 %v980_v39, %v979_v38 }
   0xf   :  { %1764 = vmatpush3.bf16.msra.mxu1 %v1992_v40 }
  0x10   :  { %1765 = vmatprep.subr.bf16.mxu1 %v3321_v37 }
  0x11   :  { %1675 = vmatmul.mubr.msk.bf16.gmra.mrb[4].mxu0 %vm255_vm2, %v1784_v8  ;;  %1711 = vmatmul.mubr.msk.bf16.gmra.mrb[4].mxu1 %vm255_vm2, %v1802_v15 }
  0x12   :  { %1678 = vmatprep.mubr.msk.bf16.mxu0 %vm255_vm2, %v1785_v9  ;;  %1714 = vmatprep.mubr.msk.bf16.mxu1 %vm255_vm2, %v1803_v16 }
  0x19   :  { %1679 = vmatmul.mubr.msk.bf16.gmra.mrb[8].mxu0 %vm255_vm2, %v1786_v10  ;;  %1715 = vmatmul.mubr.msk.bf16.gmra.mrb[8].mxu1 %vm255_vm2, %v1804_v19 }
  0x1a   :  { %1682 = vmatprep.mubr.msk.bf16.mxu0 %vm255_vm2, %v1787_v14  ;;  %1718 = vmatprep.mubr.msk.bf16.mxu1 %vm255_vm2, %v1805_v20 }
  0x21   :  { %1683 = vmatmul.mubr.msk.bf16.gmra.mrb[12].mxu0 %vm255_vm2, %v1788_v17  ;;  %1719 = vmatmul.mubr.msk.bf16.gmra.mrb[12].mxu1 %vm255_vm2, %v1806_v23  ;;  %v3323_v17 = vmov 0.0  }
  0x22   :  { %1686 = vmatprep.mubr.msk.bf16.mxu0 %vm255_vm2, %v1789_v18  ;;  %1722 = vmatprep.mubr.msk.bf16.mxu1 %vm255_vm2, %v1807_v24 }
  0x29   :  { %1687 = vmatmul.mubr.msk.bf16.gmra.mrb[16].mxu0 %vm255_vm2, %v1790_v21  ;;  %1723 = vmatmul.mubr.msk.bf16.gmra.mrb[16].mxu1 %vm255_vm2, %v1808_v27 }
  0x2a   :  { %1690 = vmatprep.mubr.msk.bf16.mxu0 %vm255_vm2, %v1791_v22  ;;  %1726 = vmatprep.mubr.msk.bf16.mxu1 %vm255_vm2, %v1809_v28 }
  0x31   :  { %1691 = vmatmul.mubr.msk.bf16.gmra.mrb[20].mxu0 %vm255_vm2, %v1792_v25  ;;  %1727 = vmatmul.mubr.msk.bf16.gmra.mrb[20].mxu1 %vm255_vm2, %v1810_v31 }
  0x32   :  { %1694 = vmatprep.mubr.msk.bf16.mxu0 %vm255_vm2, %v1793_v26  ;;  %1730 = vmatprep.mubr.msk.bf16.mxu1 %vm255_vm2, %v1811_v32 }
  0x39   :  { %1695 = vmatmul.mubr.msk.bf16.gmra.mrb[24].mxu0 %vm255_vm2, %v1794_v29  ;;  %1731 = vmatmul.mubr.msk.bf16.gmra.mrb[24].mxu1 %vm255_vm2, %v1812_v35 }
  0x3a   :  { %1698 = vmatprep.mubr.msk.bf16.mxu0 %vm255_vm2, %v1795_v30  ;;  %1738 = vmatprep.mubr.msk.f32.mxu1 %vm1817_vm4, %v3323_v17 }
  0x41   :  { %1699 = vmatmul.mubr.msk.bf16.gmra.mrb[28].mxu0 %vm255_vm2, %v1796_v33 }
  0x42   :  { %1702 = vmatprep.mubr.msk.bf16.mxu0 %vm255_vm2, %v1797_v34 }
  0x49   :  { %1703 = vmatmul.mubr.msk.bf16.gmra.mrb[32].mxu0 %vm255_vm2, %v1798_v36 }
  0xdc   :  { %v1996_v41 = vpop.f32.mrb[0].mxu0  ;;  %v2043_v12 = vpop.f32.mrb[0].mxu1 }
  0xdd   :  { %v1998_v42 = vpop.f32.mrb[1].mxu0  ;;  %v784_v46 = vmul.f32 %v1996_v41, %v1996_v41  ;;  %v652_v51 = vsel %vm648_vm3, %v1996_v41, 0.0  ;;  %v2050_v16 = vpop.f32.mrb[1].mxu1 }
  0xde   :  { %v782_v43 = vmul.f32 %v1998_v42, %v1998_v42  ;;  %v2002_v44 = vpop.f32.mrb[2].mxu0  ;;  %v649_v47 = vsel %vm648_vm3, %v1998_v42, 0.0  ;;  %v2054_v20 = vpop.f32.mrb[2].mxu1 }
  0xdf   :  { %v2004_v45 = vpop.f32.mrb[3].mxu0  ;;  %v785_v53 = vmul.f32 %v2002_v44, %v2002_v44  ;;  %v849_v57 = vsel %vm648_vm3, %v784_v46, 0.0  ;;  %v654_v58 = vsel %vm648_vm3, %v2002_v44, 0.0  ;;  %v2061_v24 = vpop.f32.mrb[3].mxu1 }
  0xe0   :  { %v650_v48 = vsel %vm648_vm3, %v2004_v45, 0.0  ;;  %v783_v49 = vmul.f32 %v2004_v45, %v2004_v45  ;;  %v846_v52 = vsel %vm648_vm3, %v782_v43, 0.0 }
  0xe1   :  { %v651_v50 = vadd.f32 %v650_v48, %v649_v47  ;;  %v851_v63 = vsel %vm648_vm3, %v785_v53, 0.0 }
  0xe2   :  { %v847_v54 = vsel %vm648_vm3, %v783_v49, 0.0 }
  0xe3   :  { %v653_v55 = vadd.f32 %v652_v51, %v651_v50  ;;  %v848_v56 = vadd.f32 %v847_v54, %v846_v52 }
  0xe4   :  { %v2023_v59 = vpop.f32.mrb[4].mxu0  ;;  %v2081_v47 = vpop.f32.mrb[4].mxu1 }
  0xe5   :  { %v850_v60 = vadd.f32 %v849_v57, %v848_v56  ;;  %v2025_v61 = vpop.f32.mrb[5].mxu0  ;;  %v655_v62 = vadd.f32 %v654_v58, %v653_v55  ;;  %v788_v6 = vmul.f32 %v2023_v59, %v2023_v59  ;;  %v660_v13 = vsel %vm648_vm3, %v2023_v59, 0.0  ;;  %v2088_v51 = vpop.f32.mrb[5].mxu1 }
  0xe6   :  { %v656_v0 = vsel %vm648_vm3, %v2025_v61, 0.0  ;;  %v786_v1 = vmul.f32 %v2025_v61, %v2025_v61  ;;  %v2032_v2 = vpop.f32.mrb[6].mxu0  ;;  %v2090_v54 = vpop.f32.mrb[6].mxu1 }
  0xe7   :  { %v657_v3 = vadd.f32 %v656_v0, %v655_v62  ;;  %v852_v4 = vadd.f32 %v851_v63, %v850_v60  ;;  %v2034_v5 = vpop.f32.mrb[7].mxu0  ;;  %v789_v14 = vmul.f32 %v2032_v2, %v2032_v2  ;;  %v857_v21 = vsel %vm648_vm3, %v788_v6, 0.0  ;;  %v2097_v58 = vpop.f32.mrb[7].mxu1 }
  0xe8   :  { %v853_v7 = vsel %vm648_vm3, %v786_v1, 0.0  ;;  %v658_v8 = vsel %vm648_vm3, %v2034_v5, 0.0  ;;  %v787_v9 = vmul.f32 %v2034_v5, %v2034_v5  ;;  %v662_v22 = vsel %vm648_vm3, %v2032_v2, 0.0 }
  0xe9   :  { %v854_v10 = vadd.f32 %v853_v7, %v852_v4  ;;  %v659_v11 = vadd.f32 %v658_v8, %v657_v3  ;;  %v859_v28 = vsel %vm648_vm3, %v789_v14, 0.0 }
  0xea   :  { %v855_v15 = vsel %vm648_vm3, %v787_v9, 0.0 }
  0xeb   :  { %v661_v18 = vadd.f32 %v660_v13, %v659_v11  ;;  %v856_v19 = vadd.f32 %v855_v15, %v854_v10 }
  0xec   :  { %v2059_v23 = vpop.f32.mrb[8].mxu0 }
  0xed   :  { %v858_v25 = vadd.f32 %v857_v21, %v856_v19  ;;  %v2063_v26 = vpop.f32.mrb[9].mxu0  ;;  %v663_v27 = vadd.f32 %v662_v22, %v661_v18  ;;  %v792_v35 = vmul.f32 %v2059_v23, %v2059_v23  ;;  %v668_v48 = vsel %vm648_vm3, %v2059_v23, 0.0  ;;  %v2117_v18 = vpop.f32.mrb[8].mxu1 }
  0xee   :  { %v664_v29 = vsel %vm648_vm3, %v2063_v26, 0.0  ;;  %v790_v30 = vmul.f32 %v2063_v26, %v2063_v26  ;;  %v2070_v31 = vpop.f32.mrb[10].mxu0 }
  0xef   :  { %v665_v32 = vadd.f32 %v664_v29, %v663_v27  ;;  %v860_v33 = vadd.f32 %v859_v28, %v858_v25  ;;  %v2072_v34 = vpop.f32.mrb[11].mxu0  ;;  %v793_v49 = vmul.f32 %v2070_v31, %v2070_v31  ;;  %v865_v55 = vsel %vm648_vm3, %v792_v35, 0.0  ;;  %v2124_v25 = vpop.f32.mrb[9].mxu1 }
  0xf0   :  { %v861_v36 = vsel %vm648_vm3, %v790_v30, 0.0  ;;  %v666_v38 = vsel %vm648_vm3, %v2072_v34, 0.0  ;;  %v791_v39 = vmul.f32 %v2072_v34, %v2072_v34  ;;  %v670_v56 = vsel %vm648_vm3, %v2070_v31, 0.0  ;;  %v2126_v29 = vpop.f32.mrb[10].mxu1 }
  0xf1   :  { %v862_v43 = vadd.f32 %v861_v36, %v860_v33  ;;  %v667_v46 = vadd.f32 %v666_v38, %v665_v32  ;;  %v867_v0 = vsel %vm648_vm3, %v793_v49, 0.0  ;;  %v2133_v35 = vpop.f32.mrb[11].mxu1 }
  0xf2   :  { %v863_v50 = vsel %vm648_vm3, %v791_v39, 0.0 }
  0xf3   :  { %v669_v52 = vadd.f32 %v668_v48, %v667_v46  ;;  %v864_v53 = vadd.f32 %v863_v50, %v862_v43 }
  0xf4   :  { %v2095_v57 = vpop.f32.mrb[12].mxu0 }
  0xf5   :  { %v866_v60 = vadd.f32 %v865_v55, %v864_v53  ;;  %v2099_v62 = vpop.f32.mrb[13].mxu0  ;;  %v671_v63 = vadd.f32 %v670_v56, %v669_v52  ;;  %v796_v9 = vmul.f32 %v2095_v57, %v2095_v57  ;;  %v676_v19 = vsel %vm648_vm3, %v2095_v57, 0.0 }
  0xf6   :  { %v672_v1 = vsel %vm648_vm3, %v2099_v62, 0.0  ;;  %v794_v3 = vmul.f32 %v2099_v62, %v2099_v62  ;;  %v2106_v4 = vpop.f32.mrb[14].mxu0 }
  0xf7   :  { %v673_v6 = vadd.f32 %v672_v1, %v671_v63  ;;  %v868_v7 = vadd.f32 %v867_v0, %v866_v60  ;;  %v2108_v8 = vpop.f32.mrb[15].mxu0  ;;  %v797_v21 = vmul.f32 %v2106_v4, %v2106_v4  ;;  %v873_v30 = vsel %vm648_vm3, %v796_v9, 0.0 }
  0xf8   :  { %v869_v10 = vsel %vm648_vm3, %v794_v3, 0.0  ;;  %v674_v11 = vsel %vm648_vm3, %v2108_v8, 0.0  ;;  %v795_v13 = vmul.f32 %v2108_v8, %v2108_v8  ;;  %v678_v32 = vsel %vm648_vm3, %v2106_v4, 0.0  ;;  %v2153_v3 = vpop.f32.mrb[12].mxu1 }
  0xf9   :  { %v870_v14 = vadd.f32 %v869_v10, %v868_v7  ;;  %v675_v15 = vadd.f32 %v674_v11, %v673_v6  ;;  %v875_v43 = vsel %vm648_vm3, %v797_v21, 0.0  ;;  %v2160_v10 = vpop.f32.mrb[13].mxu1 }
  0xfa   :  { %v871_v22 = vsel %vm648_vm3, %v795_v13, 0.0 }
  0xfb   :  { %v677_v27 = vadd.f32 %v676_v19, %v675_v15  ;;  %v872_v28 = vadd.f32 %v871_v22, %v870_v14  ;;  %v2162_v14 = vpop.f32.mrb[14].mxu1 }
  0xfc   :  { %v2131_v33 = vpop.f32.mrb[16].mxu0  ;;  %v2169_v22 = vpop.f32.mrb[15].mxu1 }
  0xfd   :  { %3349 = vst [vmem:[#allocation2_spill] sm:$0xff] %v2131_v33  ;;  %v874_v36 = vadd.f32 %v873_v30, %v872_v28  ;;  %v2135_v38 = vpop.f32.mrb[17].mxu0  ;;  %v679_v39 = vadd.f32 %v678_v32, %v677_v27  ;;  %v800_v55 = vmul.f32 %v2131_v33, %v2131_v33  ;;  %v684_v6 = vsel %vm648_vm3, %v2131_v33, 0.0 }
  0xfe   :  { %3350 = vst [vmem:[#allocation3_spill] sm:$0xff] %v2135_v38  ;;  %v680_v46 = vsel %vm648_vm3, %v2135_v38, 0.0  ;;  %v798_v48 = vmul.f32 %v2135_v38, %v2135_v38  ;;  %v2142_v49 = vpop.f32.mrb[18].mxu0 }
  0xff   :  { %3351 = vst [vmem:[#allocation4_spill] sm:$0xff] %v2142_v49  ;;  %v681_v50 = vadd.f32 %v680_v46, %v679_v39  ;;  %v876_v52 = vadd.f32 %v875_v43, %v874_v36  ;;  %v2144_v53 = vpop.f32.mrb[19].mxu0  ;;  %v801_v7 = vmul.f32 %v2142_v49, %v2142_v49  ;;  %v881_v15 = vsel %vm648_vm3, %v800_v55, 0.0 }
 0x100   :  { %3352 = vst [vmem:[#allocation5_spill] sm:$0xff] %v2144_v53  ;;  %v877_v56 = vsel %vm648_vm3, %v798_v48, 0.0  ;;  %v682_v60 = vsel %vm648_vm3, %v2144_v53, 0.0  ;;  %v799_v63 = vmul.f32 %v2144_v53, %v2144_v53  ;;  %v686_v19 = vsel %vm648_vm3, %v2142_v49, 0.0 }
 0x101   :  { %v878_v0 = vadd.f32 %v877_v56, %v876_v52  ;;  %v683_v1 = vadd.f32 %v682_v60, %v681_v50  ;;  %v883_v32 = vsel %vm648_vm3, %v801_v7, 0.0 }
 0x102   :  { %v879_v9 = vsel %vm648_vm3, %v799_v63, 0.0 }
 0x103   :  { %v685_v11 = vadd.f32 %v684_v6, %v683_v1  ;;  %v880_v13 = vadd.f32 %v879_v9, %v878_v0  ;;  %v2189_v1 = vpop.f32.mrb[16].mxu1 }
 0x104   :  { %v2167_v21 = vpop.f32.mrb[20].mxu0 }
 0x105   :  { %3353 = vst [vmem:[#allocation6_spill] sm:$0xff] %v2167_v21  ;;  %v882_v27 = vadd.f32 %v881_v15, %v880_v13  ;;  %v2171_v28 = vpop.f32.mrb[21].mxu0  ;;  %v687_v30 = vadd.f32 %v686_v19, %v685_v11  ;;  %v804_v52 = vmul.f32 %v2167_v21, %v2167_v21  ;;  %v692_v6 = vsel %vm648_vm3, %v2167_v21, 0.0  ;;  %v2196_v11 = vpop.f32.mrb[17].mxu1 }
 0x106   :  { %3354 = vst [vmem:[#allocation7_spill] sm:$0xff] %v2171_v28  ;;  %v688_v36 = vsel %vm648_vm3, %v2171_v28, 0.0  ;;  %v802_v39 = vmul.f32 %v2171_v28, %v2171_v28  ;;  %v2178_v43 = vpop.f32.mrb[22].mxu0  ;;  %v2198_v19 = vpop.f32.mrb[18].mxu1 }
 0x107   :  { %3355 = vst [vmem:[#allocation8_spill] sm:$0xff] %v2178_v43  ;;  %v689_v46 = vadd.f32 %v688_v36, %v687_v30  ;;  %v884_v48 = vadd.f32 %v883_v32, %v882_v27  ;;  %v2180_v50 = vpop.f32.mrb[23].mxu0  ;;  %v805_v7 = vmul.f32 %v2178_v43, %v2178_v43  ;;  %v889_v27 = vsel %vm648_vm3, %v804_v52, 0.0  ;;  %v2205_v36 = vpop.f32.mrb[19].mxu1 }
 0x108   :  { %3356 = vst [vmem:[#allocation9_spill] sm:$0xff] %v2180_v50  ;;  %v885_v55 = vsel %vm648_vm3, %v802_v39, 0.0  ;;  %v690_v56 = vsel %vm648_vm3, %v2180_v50, 0.0  ;;  %v803_v60 = vmul.f32 %v2180_v50, %v2180_v50  ;;  %v694_v30 = vsel %vm648_vm3, %v2178_v43, 0.0  ;;  %v2225_v37 = vpop.f32.mrb[20].mxu1 }
 0x109   :  { %v886_v63 = vadd.f32 %v885_v55, %v884_v48  ;;  %v691_v0 = vadd.f32 %v690_v56, %v689_v46  ;;  %v891_v55 = vsel %vm648_vm3, %v805_v7, 0.0 }
 0x10a   :  { %v887_v9 = vsel %vm648_vm3, %v803_v60, 0.0 }
 0x10b   :  { %v693_v13 = vadd.f32 %v692_v6, %v691_v0  ;;  %v888_v15 = vadd.f32 %v887_v9, %v886_v63 }
 0x10c   :  { %v2203_v32 = vpop.f32.mrb[24].mxu0 }
 0x10d   :  { %3357 = vst [vmem:[#allocation10_spill] sm:$0xff] %v2203_v32  ;;  %v890_v39 = vadd.f32 %v889_v27, %v888_v15  ;;  %v2207_v46 = vpop.f32.mrb[25].mxu0  ;;  %v695_v48 = vadd.f32 %v694_v30, %v693_v13  ;;  %v808_v9 = vmul.f32 %v2203_v32, %v2203_v32 }
 0x10e   :  { %3358 = vst [vmem:[#allocation11_spill] sm:$0xff] %v2207_v46  ;;  %v696_v56 = vsel %vm648_vm3, %v2207_v46, 0.0  ;;  %v806_v60 = vmul.f32 %v2207_v46, %v2207_v46  ;;  %v2214_v52 = vpop.f32.mrb[26].mxu0 }
 0x10f   :  { %3359 = vst [vmem:[#allocation12_spill] sm:$0xff] %v2214_v52  ;;  %v697_v63 = vadd.f32 %v696_v56, %v695_v48  ;;  %v892_v0 = vadd.f32 %v891_v55, %v890_v39  ;;  %v2216_v6 = vpop.f32.mrb[27].mxu0  ;;  %v700_v39 = vsel %vm648_vm3, %v2203_v32, 0.0  ;;  %v809_v48 = vmul.f32 %v2214_v52, %v2214_v52  ;;  %v2232_v56 = vpop.f32.mrb[21].mxu1 }
 0x110   :  { %3360 = vst [vmem:[#allocation13_spill] sm:$0xff] %v2216_v6  ;;  %v893_v15 = vsel %vm648_vm3, %v806_v60, 0.0  ;;  %v698_v7 = vsel %vm648_vm3, %v2216_v6, 0.0  ;;  %v807_v13 = vmul.f32 %v2216_v6, %v2216_v6  ;;  %v2234_v46 = vpop.f32.mrb[22].mxu1  ;;  %v897_v6 = vsel %vm648_vm3, %v808_v9, 0.0 }
 0x111   :  { %v894_v27 = vadd.f32 %v893_v15, %v892_v0  ;;  %v699_v30 = vadd.f32 %v698_v7, %v697_v63  ;;  %3361 = vst [vmem:[#allocation14_spill] sm:$0xff] %v2234_v46  ;;  %v702_v63 = vsel %vm648_vm3, %v2214_v52, 0.0  ;;  %v2241_v15 = vpop.f32.mrb[23].mxu1 }
 0x112   :  { %v895_v55 = vsel %vm648_vm3, %v807_v13, 0.0  ;;  %v899_v13 = vsel %vm648_vm3, %v809_v48, 0.0 }
 0x113   :  { %v701_v60 = vadd.f32 %v700_v39, %v699_v30  ;;  %v896_v17 = vadd.f32 %v895_v55, %v894_v27 }
 0x114   :  { %v2239_v0 = vpop.f32.mrb[28].mxu0 }
 0x115   :  { %3362 = vst [vmem:[#allocation15_spill] sm:$0xff] %v2239_v0  ;;  %v898_v7 = vadd.f32 %v897_v6, %v896_v17  ;;  %v2243_v32 = vpop.f32.mrb[29].mxu0  ;;  %v703_v43 = vadd.f32 %v702_v63, %v701_v60  ;;  %v812_v17 = vmul.f32 %v2239_v0, %v2239_v0 }
 0x116   :  { %3363 = vst [vmem:[#allocation16_spill] sm:$0xff] %v2243_v32  ;;  %v704_v27 = vsel %vm648_vm3, %v2243_v32, 0.0  ;;  %v810_v30 = vmul.f32 %v2243_v32, %v2243_v32  ;;  %v2250_v9 = vpop.f32.mrb[30].mxu0  ;;  %v2261_v32 = vpop.f32.mrb[24].mxu1 }
 0x117   :  { %3364 = vst [vmem:[#allocation17_spill] sm:$0xff] %v2250_v9  ;;  %v705_v39 = vadd.f32 %v704_v27, %v703_v43  ;;  %v900_v55 = vadd.f32 %v899_v13, %v898_v7  ;;  %v2252_v52 = vpop.f32.mrb[31].mxu0  ;;  %3366 = vst [vmem:[#allocation19_spill] sm:$0xff] %v2261_v32  ;;  %v708_v43 = vsel %vm648_vm3, %v2239_v0, 0.0  ;;  %v813_v7 = vmul.f32 %v2250_v9, %v2250_v9  ;;  %v2268_v27 = vpop.f32.mrb[25].mxu1 }
 0x118   :  { %3365 = vst [vmem:[#allocation18_spill] sm:$0xff] %v2252_v52  ;;  %v901_v6 = vsel %vm648_vm3, %v810_v30, 0.0  ;;  %v706_v48 = vsel %vm648_vm3, %v2252_v52, 0.0  ;;  %v811_v60 = vmul.f32 %v2252_v52, %v2252_v52  ;;  %3367 = vst [vmem:[#allocation20_spill] sm:$0xff] %v2268_v27  ;;  %v2270_v28 = vpop.f32.mrb[26].mxu1  ;;  %v905_v52 = vsel %vm648_vm3, %v812_v17, 0.0 }
 0x119   :  { %v902_v63 = vadd.f32 %v901_v6, %v900_v55  ;;  %v707_v21 = vadd.f32 %v706_v48, %v705_v39  ;;  %v710_v39 = vsel %vm648_vm3, %v2250_v9, 0.0  ;;  %v2277_v6 = vpop.f32.mrb[27].mxu1 }
 0x11a   :  { %v903_v13 = vsel %vm648_vm3, %v811_v60, 0.0  ;;  %3369 = vst [vmem:[#allocation22_spill] sm:$0xff] %v2277_v6  ;;  %v907_v60 = vsel %vm648_vm3, %v813_v7, 0.0 }
 0x11b   :  { %v709_v30 = vadd.f32 %v708_v43, %v707_v21  ;;  %v904_v50 = vadd.f32 %v903_v13, %v902_v63 }
 0x11c   :  { %v2275_v55 = vpop.f32.mrb[32].mxu0 }
 0x11d   :  { %3368 = vst [vmem:[#allocation21_spill] sm:$0xff] %v2275_v55  ;;  %v906_v48 = vadd.f32 %v905_v52, %v904_v50  ;;  %v2279_v0 = vpop.f32.mrb[33].mxu0  ;;  %v711_v49 = vadd.f32 %v710_v39, %v709_v30  ;;  %v816_v50 = vmul.f32 %v2275_v55, %v2275_v55 }
 0x11e   :  { %3370 = vst [vmem:[#allocation23_spill] sm:$0xff] %v2279_v0  ;;  %v712_v21 = vsel %vm648_vm3, %v2279_v0, 0.0  ;;  %v814_v63 = vmul.f32 %v2279_v0, %v2279_v0  ;;  %v2286_v17 = vpop.f32.mrb[34].mxu0  ;;  %v716_v0 = vsel %vm648_vm3, %v2275_v55, 0.0 }
 0x11f   :  { %v713_v43 = vadd.f32 %v712_v21, %v711_v49  ;;  %v908_v13 = vadd.f32 %v907_v60, %v906_v48  ;;  %v2288_v9 = vpop.f32.mrb[35].mxu0  ;;  %v817_v49 = vmul.f32 %v2286_v17, %v2286_v17  ;;  %v818_v60 = vmul.f32 %v2050_v16, %v2050_v16 }
 0x120   :  { %3371 = vst [vmem:[#allocation24_spill] sm:$0xff] %v2288_v9  ;;  %v909_v52 = vsel %vm648_vm3, %v814_v63, 0.0  ;;  %v714_v7 = vsel %vm648_vm3, %v2288_v9, 0.0  ;;  %v815_v30 = vmul.f32 %v2288_v9, %v2288_v9  ;;  %v913_v53 = vsel %vm648_vm3, %v816_v50, 0.0 }
 0x121   :  { %v910_v39 = vadd.f32 %v909_v52, %v908_v13  ;;  %v715_v33 = vadd.f32 %v714_v7, %v713_v43  ;;  %v718_v9 = vsel %vm648_vm3, %v2286_v17, 0.0  ;;  %v720_v43 = vsel %vm648_vm3, %v2050_v16, 0.0 }
 0x122   :  { %v911_v48 = vsel %vm648_vm3, %v815_v30, 0.0  ;;  %v915_v7 = vsel %vm648_vm3, %v817_v49, 0.0  ;;  %v917_v55 = vsel %vm648_vm3, %v818_v60, 0.0  ;;  %v819_v30 = vmul.f32 %v2061_v24, %v2061_v24 }
 0x123   :  { %v717_v21 = vadd.f32 %v716_v0, %v715_v33  ;;  %v912_v63 = vadd.f32 %v911_v48, %v910_v39  ;;  %v820_v0 = vmul.f32 %v2043_v12, %v2043_v12  ;;  %v722_v50 = vsel %vm648_vm3, %v2061_v24, 0.0 }
 0x124   :  { %v919_v49 = vsel %vm648_vm3, %v819_v30, 0.0  ;;  %v822_v60 = vmul.f32 %v2088_v51, %v2088_v51  ;;  %v823_v30 = vmul.f32 %v2097_v58, %v2097_v58 }
 0x125   :  { %v914_v13 = vadd.f32 %v913_v53, %v912_v63  ;;  %v719_v52 = vadd.f32 %v718_v9, %v717_v21  ;;  %v724_v53 = vsel %vm648_vm3, %v2043_v12, 0.0  ;;  %v821_v9 = vmul.f32 %v2054_v20, %v2054_v20 }
 0x127   :  { %v721_v38 = vadd.f32 %v720_v43, %v719_v52  ;;  %v916_v33 = vadd.f32 %v915_v7, %v914_v13  ;;  %v921_v43 = vsel %vm648_vm3, %v820_v0, 0.0  ;;  %v726_v13 = vsel %vm648_vm3, %v2054_v20, 0.0 }
 0x128   :  { %v923_v7 = vsel %vm648_vm3, %v821_v9, 0.0  ;;  %v824_v0 = vmul.f32 %v2081_v47, %v2081_v47  ;;  %v825_v9 = vmul.f32 %v2090_v54, %v2090_v54 }
 0x129   :  { %v918_v39 = vadd.f32 %v917_v55, %v916_v33  ;;  %v723_v48 = vadd.f32 %v722_v50, %v721_v38  ;;  %v728_v38 = vsel %vm648_vm3, %v2088_v51, 0.0  ;;  %v925_v33 = vsel %vm648_vm3, %v822_v60, 0.0 }
 0x12a   :  { %v927_v60 = vsel %vm648_vm3, %v823_v30, 0.0  ;;  %v827_v30 = vmul.f32 %v2133_v35, %v2133_v35 }
 0x12b   :  { %v725_v21 = vadd.f32 %v724_v53, %v723_v48  ;;  %v920_v63 = vadd.f32 %v919_v49, %v918_v39  ;;  %v730_v39 = vsel %vm648_vm3, %v2097_v58, 0.0 }
 0x12d   :  { %v922_v55 = vadd.f32 %v921_v43, %v920_v63  ;;  %v727_v52 = vadd.f32 %v726_v13, %v725_v21  ;;  %v732_v21 = vsel %vm648_vm3, %v2081_v47, 0.0  ;;  %v826_v63 = vmul.f32 %v2124_v25, %v2124_v25 }
 0x12f   :  { %v729_v50 = vadd.f32 %v728_v38, %v727_v52  ;;  %v924_v48 = vadd.f32 %v923_v7, %v922_v55  ;;  %v929_v38 = vsel %vm648_vm3, %v824_v0, 0.0  ;;  %v734_v55 = vsel %vm648_vm3, %v2090_v54, 0.0 }
 0x130   :  { %v736_v52 = vsel %vm648_vm3, %v2124_v25, 0.0  ;;  %v828_v0 = vmul.f32 %v2117_v18, %v2117_v18 }
 0x131   :  { %v926_v53 = vadd.f32 %v925_v33, %v924_v48  ;;  %v731_v49 = vadd.f32 %v730_v39, %v729_v50  ;;  %v931_v50 = vsel %vm648_vm3, %v825_v9, 0.0  ;;  %v933_v48 = vsel %vm648_vm3, %v826_v63, 0.0 }
 0x132   :  { %v829_v9 = vmul.f32 %v2126_v29, %v2126_v29  ;;  %v935_v63 = vsel %vm648_vm3, %v827_v30, 0.0  ;;  %v831_v30 = vmul.f32 %v2169_v22, %v2169_v22 }
 0x133   :  { %v733_v43 = vadd.f32 %v732_v21, %v731_v49  ;;  %v928_v13 = vadd.f32 %v927_v60, %v926_v53  ;;  %v738_v53 = vsel %vm648_vm3, %v2133_v35, 0.0 }
 0x135   :  { %v930_v7 = vadd.f32 %v929_v38, %v928_v13  ;;  %v735_v33 = vadd.f32 %v734_v55, %v733_v43  ;;  %v740_v43 = vsel %vm648_vm3, %v2117_v18, 0.0  ;;  %v830_v13 = vmul.f32 %v2160_v10, %v2160_v10 }
 0x137   :  { %v737_v39 = vadd.f32 %v736_v52, %v735_v33  ;;  %v932_v49 = vadd.f32 %v931_v50, %v930_v7  ;;  %v937_v52 = vsel %vm648_vm3, %v828_v0, 0.0  ;;  %v742_v7 = vsel %vm648_vm3, %v2126_v29, 0.0 }
 0x138   :  { %v744_v33 = vsel %vm648_vm3, %v2160_v10, 0.0  ;;  %v832_v0 = vmul.f32 %v2153_v3, %v2153_v3 }
 0x139   :  { %v934_v21 = vadd.f32 %v933_v48, %v932_v49  ;;  %v739_v60 = vadd.f32 %v738_v53, %v737_v39  ;;  %v939_v39 = vsel %vm648_vm3, %v829_v9, 0.0  ;;  %v941_v49 = vsel %vm648_vm3, %v830_v13, 0.0 }
 0x13a   :  { %v833_v9 = vmul.f32 %v2162_v14, %v2162_v14  ;;  %v943_v13 = vsel %vm648_vm3, %v831_v30, 0.0  ;;  %v835_v30 = vmul.f32 %v2205_v36, %v2205_v36 }
 0x13b   :  { %v741_v38 = vadd.f32 %v740_v43, %v739_v60  ;;  %v936_v55 = vadd.f32 %v935_v63, %v934_v21  ;;  %v746_v21 = vsel %vm648_vm3, %v2169_v22, 0.0 }
 0x13d   :  { %v938_v50 = vadd.f32 %v937_v52, %v936_v55  ;;  %v743_v48 = vadd.f32 %v742_v7, %v741_v38  ;;  %v748_v38 = vsel %vm648_vm3, %v2153_v3, 0.0  ;;  %v834_v55 = vmul.f32 %v2196_v11, %v2196_v11 }
 0x13f   :  { %v745_v53 = vadd.f32 %v744_v33, %v743_v48  ;;  %v940_v60 = vadd.f32 %v939_v39, %v938_v50  ;;  %v945_v33 = vsel %vm648_vm3, %v832_v0, 0.0  ;;  %v750_v50 = vsel %vm648_vm3, %v2162_v14, 0.0 }
 0x140   :  { %v752_v48 = vsel %vm648_vm3, %v2196_v11, 0.0  ;;  %v836_v0 = vmul.f32 %v2189_v1, %v2189_v1 }
 0x141   :  { %v942_v43 = vadd.f32 %v941_v49, %v940_v60  ;;  %v747_v63 = vadd.f32 %v746_v21, %v745_v53  ;;  %v947_v53 = vsel %vm648_vm3, %v833_v9, 0.0  ;;  %v949_v60 = vsel %vm648_vm3, %v834_v55, 0.0 }
 0x142   :  { %v837_v9 = vmul.f32 %v2198_v19, %v2198_v19  ;;  %v951_v55 = vsel %vm648_vm3, %v835_v30, 0.0  ;;  %v839_v30 = vmul.f32 %v2241_v15, %v2241_v15 }
 0x143   :  { %v749_v52 = vadd.f32 %v748_v38, %v747_v63  ;;  %v944_v7 = vadd.f32 %v943_v13, %v942_v43  ;;  %v754_v43 = vsel %vm648_vm3, %v2205_v36, 0.0 }
 0x145   :  { %v946_v39 = vadd.f32 %v945_v33, %v944_v7  ;;  %v751_v49 = vadd.f32 %v750_v50, %v749_v52  ;;  %v756_v52 = vsel %vm648_vm3, %v2189_v1, 0.0  ;;  %v838_v7 = vmul.f32 %v2232_v56, %v2232_v56 }
 0x147   :  { %v753_v21 = vadd.f32 %v752_v48, %v751_v49  ;;  %v948_v63 = vadd.f32 %v947_v53, %v946_v39  ;;  %v953_v48 = vsel %vm648_vm3, %v836_v0, 0.0  ;;  %v758_v39 = vsel %vm648_vm3, %v2198_v19, 0.0 }
 0x148   :  { %v760_v49 = vsel %vm648_vm3, %v2232_v56, 0.0  ;;  %v840_v0 = vmul.f32 %v2225_v37, %v2225_v37 }
 0x149   :  { %v950_v38 = vadd.f32 %v949_v60, %v948_v63  ;;  %v755_v13 = vadd.f32 %v754_v43, %v753_v21  ;;  %v955_v21 = vsel %vm648_vm3, %v837_v9, 0.0  ;;  %v957_v63 = vsel %vm648_vm3, %v838_v7, 0.0 }
 0x14a   :  { %v841_v9 = vmul.f32 %v2234_v46, %v2234_v46  ;;  %v959_v7 = vsel %vm648_vm3, %v839_v30, 0.0  ;;  %v843_v30 = vmul.f32 %v2277_v6, %v2277_v6 }
 0x14b   :  { %v757_v33 = vadd.f32 %v756_v52, %v755_v13  ;;  %v952_v50 = vadd.f32 %v951_v55, %v950_v38  ;;  %v762_v38 = vsel %vm648_vm3, %v2241_v15, 0.0 }
 0x14d   :  { %v954_v53 = vadd.f32 %v953_v48, %v952_v50  ;;  %v759_v60 = vadd.f32 %v758_v39, %v757_v33  ;;  %v764_v33 = vsel %vm648_vm3, %v2225_v37, 0.0  ;;  %v842_v50 = vmul.f32 %v2268_v27, %v2268_v27 }
 0x14f   :  { %v761_v43 = vadd.f32 %v760_v49, %v759_v60  ;;  %v956_v13 = vadd.f32 %v955_v21, %v954_v53  ;;  %v961_v49 = vsel %vm648_vm3, %v840_v0, 0.0  ;;  %v766_v53 = vsel %vm648_vm3, %v2234_v46, 0.0 }
 0x150   :  { %v768_v60 = vsel %vm648_vm3, %v2268_v27, 0.0  ;;  %v844_v0 = vmul.f32 %v2261_v32, %v2261_v32 }
 0x151   :  { %v958_v52 = vadd.f32 %v957_v63, %v956_v13  ;;  %v763_v55 = vadd.f32 %v762_v38, %v761_v43  ;;  %v963_v43 = vsel %vm648_vm3, %v841_v9, 0.0  ;;  %v965_v13 = vsel %vm648_vm3, %v842_v50, 0.0 }
 0x152   :  { %v845_v9 = vmul.f32 %v2270_v28, %v2270_v28  ;;  %v967_v50 = vsel %vm648_vm3, %v843_v30, 0.0 }
 0x153   :  { %v765_v48 = vadd.f32 %v764_v33, %v763_v55  ;;  %v960_v39 = vadd.f32 %v959_v7, %v958_v52  ;;  %v770_v52 = vsel %vm648_vm3, %v2277_v6, 0.0 }
 0x155   :  { %v962_v21 = vadd.f32 %v961_v49, %v960_v39  ;;  %v767_v63 = vadd.f32 %v766_v53, %v765_v48  ;;  %v772_v48 = vsel %vm648_vm3, %v2261_v32, 0.0  ;;  %v969_v53 = vsel %vm648_vm3, %v844_v0, 0.0 }
 0x156   :  { %v3372_v0 = vmov 0.0  }
 0x157   :  { %v769_v38 = vadd.f32 %v768_v60, %v767_v63  ;;  %v964_v55 = vadd.f32 %v963_v43, %v962_v21  ;;  %v774_v60 = vsel %vm648_vm3, %v2270_v28, 0.0  ;;  %v971_v43 = vsel %vm648_vm3, %v845_v9, 0.0 }
 0x159   :  { %v966_v33 = vadd.f32 %v965_v13, %v964_v55  ;;  %v771_v7 = vadd.f32 %v770_v52, %v769_v38 }
 0x15b   :  { %v773_v39 = vadd.f32 %v772_v48, %v771_v7  ;;  %v968_v49 = vadd.f32 %v967_v50, %v966_v33  ;;  %v3373_v50 = vmov 0.0|0.0  }
 0x15d   :  { %v775_v21 = vadd.f32 %v774_v60, %v773_v39  ;;  %v970_v63 = vadd.f32 %v969_v53, %v968_v49 }
 0x15f   :  { %v776_v13 = vrot.slane %v775_v21, 4  ;;  %v972_v38 = vadd.f32 %v971_v43, %v970_v63 }
 0x161   :  { %v777_v55 = vadd.f32 %v776_v13, %v775_v21  ;;  %v973_v52 = vrot.slane %v972_v38, 4  ;;  %v1131_v13 = vld [vmem:[%s3318_s4] sm:$0x1] }
 0x163   :  { %v778_v32 = vrot.slane %v777_v55, 2  ;;  %v974_v6 = vadd.f32 %v973_v52, %v972_v38  ;;  %v1135_v52 = vld [vmem:[%s3319_s5] sm:$0x1] }
 0x165   :  { %v779_v27 = vadd.f32 %v778_v32, %v777_v55  ;;  %v975_v46 = vrot.slane %v974_v6, 2  ;;  %v1138_v32 = vld [vmem:[%s3317_s3] sm:$0xff] }
 0x167   :  { %v780_v30 = vrot.slane %v779_v27, 1  ;;  %v976_v7 = vadd.f32 %v975_v46, %v974_v6  ;;  %v1139_v46 = vld [vmem:[%s3317_s3 + $0x8] sm:$0xff] }
 0x169   :  { %v781_v33 = vadd.f32 %v780_v30, %v779_v27  ;;  %v977_v48 = vrot.slane %v976_v7, 1 }
 0x16b   :  { %1739 = vmatmul.mubr.msk.f32.vlgmr.msra.gmra.mrb[28].mxu1 %vm648_vm3, %v781_v33  ;;  %v978_v9 = vadd.f32 %v977_v48, %v976_v7  ;;  %v1286_v33 = vlaneseq }
 0x16c   :  { %1767 = vmatpush3.bf16.msra.mxu1 %v1992_v40  ;;  %1745 = vmatprep.mubr.msk.f32.mxu1 %vm1817_vm4, %v3372_v0  ;;  %v1769_v40 = vpack.c.bf16 %v1139_v46, %v1138_v32 }
 0x16d   :  { %1768 = vmatprep.subr.bf16.mxu1 %v3373_v50  ;;  %v2471_v48 = vshrl.u32 %v1286_v33, 7 }
 0x16f   :  { %1746 = vmatmul.mubr.msk.f32.vlgmr.msra.gmra.mrb[30].mxu1 %vm648_vm3, %v978_v9  ;;  %v3348_v9 = vsub.s32 0, %v2471_v48 }
 0x170   :  { %1752 = vmatprep.mubr.msk.f32.mxu1 %vm1817_vm4, %v3372_v0  ;;  %1770 = vmatpush3.bf16.msra.mxu1 %v1769_v40 }
 0x171   :  { %1771 = vmatprep.subr.bf16.mxu1 %v3373_v50 }
 0x23e   :  { %v1050_v27 = vpop.f32.mrb[28].mxu1 }
 0x23f   :  { %v1127_v6 = vmul.f32 0.001953125, %v1050_v27  ;;  %v1740_v39 = vpop.f32.mrb[29].mxu1 }
 0x241   :  { %v1129_v53 = vmul.f32 %v1127_v6, %v1127_v6 }
 0x242   :  { %v1123_v49 = vpop.f32.mrb[30].mxu1 }
 0x243   :  { %v1128_v60 = vmul.f32 0.001953125, %v1123_v49  ;;  %v1747_v21 = vpop.f32.mrb[31].mxu1 }
 0x244   :  { %v3375_v21 = vld [vmem:[#allocation5_spill] sm:$0xff] }
 0x245   :  { %v1130_v63 = vsub.f32 %v1128_v60, %v1129_v53  ;;  %v3374_v60 = vld [vmem:[#allocation3_spill] sm:$0xff] }
 0x247   :  { %v1132_v43 = vadd.f32 1e-05, %v1130_v63  ;;  %v3376_v63 = vld [vmem:[#allocation2_spill] sm:$0xff] }
 0x249   :  { %1813 = vrsqrt.f32 %v1132_v43  ;;  %v3377_v43 = vld [vmem:[#allocation4_spill] sm:$0xff] }
 0x253   :  { %v1814_v38 = vpop.eup %1813 }
 0x254   :  { %v1134_v55 = vmul.f32 %v1814_v38, %v1131_v13  ;;  %v3378_v13 = vld [vmem:[#allocation7_spill] sm:$0xff]  ;;  %v3379_v38 = vld [vmem:[#allocation9_spill] sm:$0xff] }
 0x256   :  { %1753 = vmatmul.mubr.msk.f32.vlgmr.msra.gmra.mrb[32].mxu1 %vm648_vm3, %v1134_v55  ;;  %v1136_v30 = vmul.f32 %v1134_v55, %v1127_v6 }
 0x257   :  { %1773 = vmatpush3.bf16.msra.mxu1 %v1769_v40  ;;  %1759 = vmatprep.mubr.msk.f32.mxu1 %vm1817_vm4, %v3372_v0 }
 0x258   :  { %v1137_v7 = vsub.f32 %v1135_v52, %v1136_v30  ;;  %v3380_v52 = vld [vmem:[#allocation6_spill] sm:$0xff] }
 0x25a   :  { %1760 = vmatmul.mubr.msk.f32.vlgmr.msra.gmra.mrb[34].mxu1 %vm648_vm3, %v1137_v7  ;;  %v3381_v7 = vld [vmem:[#allocation8_spill] sm:$0xff] }
 0x329   :  { %v1209_v50 = vpop.f32.mrb[32].mxu1 }
 0x32a   :  { %v2476_v32 = vrot.slane %v1209_v50, %v3348_v9  ;;  %v1754_v46 = vpop.f32.mrb[33].mxu1  ;;  %v3382_v50 = vld [vmem:[#allocation11_spill] sm:$0xff] }
 0x32b   :  { %v3392_v9 = vld [vmem:[#allocation15_spill] sm:$0xff] }
 0x32c   :  { %v2480_v40 = vmul.f32 %v2476_v32, %v1998_v42  ;;  %v2484_v0 = vmul.f32 %v2476_v32, %v2004_v45  ;;  %v2488_v27 = vmul.f32 %v1996_v41, %v2476_v32  ;;  %v2492_v6 = vmul.f32 %v2002_v44, %v2476_v32 }
 0x32d   :  { %v2496_v39 = vmul.f32 %v2476_v32, %v2025_v61  ;;  %v2500_v42 = vmul.f32 %v2476_v32, %v2034_v5  ;;  %v2504_v45 = vmul.f32 %v2023_v59, %v2476_v32  ;;  %v2508_v41 = vmul.f32 %v2032_v2, %v2476_v32  ;;  %v1282_v49 = vpop.f32.mrb[34].mxu1 }
 0x32e   :  { %v2512_v44 = vmul.f32 %v2476_v32, %v2063_v26  ;;  %v2516_v61 = vmul.f32 %v2476_v32, %v2072_v34  ;;  %v2520_v5 = vmul.f32 %v2059_v23, %v2476_v32  ;;  %v2524_v59 = vmul.f32 %v2070_v31, %v2476_v32  ;;  %v1761_v53 = vpop.f32.mrb[35].mxu1 }
 0x32f   :  { %v2528_v2 = vmul.f32 %v2476_v32, %v2099_v62  ;;  %v2532_v26 = vmul.f32 %v2476_v32, %v2108_v8  ;;  %v2536_v34 = vmul.f32 %v2095_v57, %v2476_v32  ;;  %v2540_v23 = vmul.f32 %v2106_v4, %v2476_v32  ;;  %v3383_v53 = vld [vmem:[#allocation13_spill] sm:$0xff] }
 0x330   :  { %v2544_v31 = vmul.f32 %v2476_v32, %v3374_v60  ;;  %v2548_v62 = vmul.f32 %v2476_v32, %v3375_v21  ;;  %v2552_v8 = vmul.f32 %v3376_v63, %v2476_v32  ;;  %v2556_v57 = vmul.f32 %v3377_v43, %v2476_v32  ;;  %v3385_v21 = vld [vmem:[#allocation10_spill] sm:$0xff]  ;;  %v3387_v43 = vld [vmem:[#allocation12_spill] sm:$0xff] }
 0x331   :  { %v2560_v4 = vmul.f32 %v2476_v32, %v3378_v13  ;;  %v2564_v55 = vmul.f32 %v2476_v32, %v3379_v38  ;;  %v2568_v30 = vmul.f32 %v3380_v52, %v2476_v32  ;;  %v2572_v33 = vmul.f32 %v3381_v7, %v2476_v32  ;;  %v3389_v38 = vld [vmem:[#allocation16_spill] sm:$0xff]  ;;  %v3391_v7 = vld [vmem:[#allocation18_spill] sm:$0xff] }
 0x332   :  { %v2576_v46 = vmul.f32 %v2476_v32, %v3382_v50  ;;  %v2580_v60 = vmul.f32 %v2476_v32, %v3383_v53  ;;  %v2584_v63 = vmul.f32 %v3385_v21, %v2476_v32  ;;  %v2588_v13 = vmul.f32 %v3387_v43, %v2476_v32 }
 0x333   :  { %v2592_v52 = vmul.f32 %v2476_v32, %v3389_v38  ;;  %v2596_v50 = vmul.f32 %v2476_v32, %v3391_v7  ;;  %v2600_v53 = vmul.f32 %v3392_v9, %v2476_v32  ;;  %v2620_v9 = vmul.f32 %v2286_v17, %v2476_v32 }
 0x334   :  { %3384 = vst [vmem:[#allocation3_spill] sm:$0xff] %v2580_v60  ;;  %3386 = vst [vmem:[#allocation5_spill] sm:$0xff] %v2584_v63  ;;  %v3393_v60 = vld [vmem:[#allocation17_spill] sm:$0xff]  ;;  %v3394_v63 = vld [vmem:[#allocation23_spill] sm:$0xff]  ;;  %v2640_v17 = vmul.f32 %v2476_v32, %v2088_v51  ;;  %v2660_v51 = vmul.f32 %v2476_v32, %v2133_v35  ;;  %v2680_v35 = vmul.f32 %v2153_v3, %v2476_v32 }
 0x335   :  { %3388 = vst [vmem:[#allocation2_spill] sm:$0xff] %v2588_v13  ;;  %3390 = vst [vmem:[#allocation4_spill] sm:$0xff] %v2592_v52  ;;  %v2604_v21 = vmul.f32 %v3393_v60, %v2476_v32  ;;  %v2608_v43 = vmul.f32 %v2476_v32, %v3394_v63  ;;  %v3395_v13 = vld [vmem:[#allocation24_spill] sm:$0xff]  ;;  %v3396_v52 = vld [vmem:[#allocation21_spill] sm:$0xff]  ;;  %v2624_v60 = vmul.f32 %v2476_v32, %v2050_v16 }
 0x336   :  { %v2612_v38 = vmul.f32 %v2476_v32, %v3395_v13  ;;  %v2616_v7 = vmul.f32 %v3396_v52, %v2476_v32  ;;  %v2628_v63 = vmul.f32 %v2476_v32, %v2061_v24  ;;  %v2632_v13 = vmul.f32 %v2043_v12, %v2476_v32 }
 0x337   :  { %v2636_v52 = vmul.f32 %v2054_v20, %v2476_v32  ;;  %v2644_v16 = vmul.f32 %v2476_v32, %v2097_v58  ;;  %v2648_v24 = vmul.f32 %v2081_v47, %v2476_v32  ;;  %v2652_v12 = vmul.f32 %v2090_v54, %v2476_v32 }
 0x338   :  { %v2656_v20 = vmul.f32 %v2476_v32, %v2124_v25  ;;  %v2664_v58 = vmul.f32 %v2117_v18, %v2476_v32  ;;  %v2668_v47 = vmul.f32 %v2126_v29, %v2476_v32  ;;  %v2672_v54 = vmul.f32 %v2476_v32, %v2160_v10 }
 0x339   :  { %v2676_v25 = vmul.f32 %v2476_v32, %v2169_v22  ;;  %v2684_v18 = vmul.f32 %v2162_v14, %v2476_v32  ;;  %v2688_v29 = vmul.f32 %v2476_v32, %v2196_v11  ;;  %v2692_v10 = vmul.f32 %v2476_v32, %v2205_v36 }
 0x33a   :  { %v2696_v22 = vmul.f32 %v2189_v1, %v2476_v32  ;;  %v2700_v3 = vmul.f32 %v2198_v19, %v2476_v32  ;;  %v2704_v14 = vmul.f32 %v2476_v32, %v2232_v56  ;;  %v2708_v11 = vmul.f32 %v2476_v32, %v2241_v15 }
 0x33b   :  { %3397 = vst [vmem:[#allocation7_spill] sm:$0xff] %v2692_v10  ;;  %v2712_v36 = vmul.f32 %v2225_v37, %v2476_v32  ;;  %v3402_v10 = vld [vmem:[#allocation14_spill] sm:$0xff]  ;;  %v2732_v37 = vmul.f32 %v2270_v28, %v2476_v32 }
 0x33c   :  { %3398 = vst [vmem:[#allocation9_spill] sm:$0xff] %v2696_v22  ;;  %3399 = vst [vmem:[#allocation6_spill] sm:$0xff] %v2700_v3  ;;  %v2716_v1 = vmul.f32 %v3402_v10, %v2476_v32  ;;  %v3403_v22 = vld [vmem:[#allocation20_spill] sm:$0xff]  ;;  %v3404_v3 = vld [vmem:[#allocation22_spill] sm:$0xff] }
 0x33d   :  { %3400 = vst [vmem:[#allocation8_spill] sm:$0xff] %v2704_v14  ;;  %3401 = vst [vmem:[#allocation11_spill] sm:$0xff] %v2712_v36  ;;  %v2720_v19 = vmul.f32 %v2476_v32, %v3403_v22  ;;  %v2724_v56 = vmul.f32 %v2476_v32, %v3404_v3  ;;  %v3405_v14 = vld [vmem:[#allocation19_spill] sm:$0xff]  ;;  %v3406_v36 = vsub.s32 0, %v2471_v48 }
 0x33e   :  { %v2728_v15 = vmul.f32 %v3405_v14, %v2476_v32 }
 0x33f   :  { %v2736_v10 = vrot.slane %v1282_v49, %v3406_v36  ;;  %v3410_v36 = vld [vmem:[#allocation2_spill] sm:$0xff] }
 0x341   :  { %v2740_v22 = vadd.f32 %v2736_v10, %v2480_v40  ;;  %v2744_v3 = vadd.f32 %v2736_v10, %v2484_v0  ;;  %v2748_v14 = vadd.f32 %v2736_v10, %v2488_v27  ;;  %v2752_v28 = vadd.f32 %v2736_v10, %v2492_v6 }
 0x342   :  { %v2756_v48 = vadd.f32 %v2736_v10, %v2496_v39  ;;  %v2760_v32 = vadd.f32 %v2736_v10, %v2500_v42  ;;  %v2764_v40 = vadd.f32 %v2736_v10, %v2504_v45  ;;  %v2768_v0 = vadd.f32 %v2736_v10, %v2508_v41 }
 0x343   :  { %v2772_v27 = vadd.f32 %v2736_v10, %v2512_v44  ;;  %v2776_v6 = vadd.f32 %v2736_v10, %v2516_v61  ;;  %v2780_v39 = vadd.f32 %v2736_v10, %v2520_v5  ;;  %v2784_v42 = vadd.f32 %v2736_v10, %v2524_v59 }
 0x344   :  { %v2788_v45 = vadd.f32 %v2736_v10, %v2528_v2  ;;  %v2792_v41 = vadd.f32 %v2736_v10, %v2532_v26  ;;  %v2796_v49 = vadd.f32 %v2736_v10, %v2536_v34  ;;  %v2800_v44 = vadd.f32 %v2736_v10, %v2540_v23 }
 0x345   :  { %v2804_v61 = vadd.f32 %v2736_v10, %v2544_v31  ;;  %v2808_v5 = vadd.f32 %v2736_v10, %v2548_v62  ;;  %v2812_v59 = vadd.f32 %v2736_v10, %v2552_v8  ;;  %v2816_v2 = vadd.f32 %v2736_v10, %v2556_v57  ;;  %v3408_v8 = vld [vmem:[#allocation3_spill] sm:$0xff] }
 0x346   :  { %v2820_v26 = vadd.f32 %v2736_v10, %v2560_v4  ;;  %v2824_v34 = vadd.f32 %v2736_v10, %v2564_v55  ;;  %v2828_v23 = vadd.f32 %v2736_v10, %v2568_v30  ;;  %v2832_v31 = vadd.f32 %v2736_v10, %v2572_v33  ;;  %v3409_v4 = vld [vmem:[#allocation5_spill] sm:$0xff] }
 0x347   :  { %v2836_v62 = vadd.f32 %v2736_v10, %v2576_v46  ;;  %v2840_v57 = vadd.f32 %v2736_v10, %v3408_v8  ;;  %v2844_v55 = vadd.f32 %v2736_v10, %v3409_v4  ;;  %v2848_v30 = vadd.f32 %v2736_v10, %v3410_v36 }
 0x348   :  { %3407 = vst [vmem:[#allocation13_spill] sm:$0xff] %v2828_v23  ;;  %v3411_v23 = vld [vmem:[#allocation4_spill] sm:$0xff]  ;;  %v2856_v46 = vadd.f32 %v2736_v10, %v2596_v50  ;;  %v2860_v8 = vadd.f32 %v2736_v10, %v2600_v53  ;;  %v2864_v4 = vadd.f32 %v2736_v10, %v2604_v21  ;;  %v2868_v36 = vadd.f32 %v2736_v10, %v2608_v43 }
 0x349   :  { %v2852_v33 = vadd.f32 %v2736_v10, %v3411_v23  ;;  %v2872_v23 = vadd.f32 %v2736_v10, %v2612_v38  ;;  %v2876_v50 = vadd.f32 %v2736_v10, %v2616_v7  ;;  %v2880_v53 = vadd.f32 %v2736_v10, %v2620_v9 }
 0x34a   :  { %v2884_v21 = vadd.f32 %v2736_v10, %v2624_v60  ;;  %v2888_v43 = vadd.f32 %v2736_v10, %v2628_v63  ;;  %v2892_v38 = vadd.f32 %v2736_v10, %v2632_v13  ;;  %v2896_v7 = vadd.f32 %v2736_v10, %v2636_v52 }
 0x34b   :  { %v2900_v9 = vadd.f32 %v2736_v10, %v2640_v17  ;;  %v2904_v60 = vadd.f32 %v2736_v10, %v2644_v16  ;;  %v2908_v63 = vadd.f32 %v2736_v10, %v2648_v24  ;;  %v2912_v13 = vadd.f32 %v2736_v10, %v2652_v12 }
 0x34c   :  { %v2916_v52 = vadd.f32 %v2736_v10, %v2656_v20  ;;  %v2920_v17 = vadd.f32 %v2736_v10, %v2660_v51  ;;  %v2924_v16 = vadd.f32 %v2736_v10, %v2664_v58  ;;  %v2928_v24 = vadd.f32 %v2736_v10, %v2668_v47 }
 0x34d   :  { %v2932_v12 = vadd.f32 %v2736_v10, %v2672_v54  ;;  %v2936_v20 = vadd.f32 %v2736_v10, %v2676_v25  ;;  %v2940_v51 = vadd.f32 %v2736_v10, %v2680_v35  ;;  %v2944_v58 = vadd.f32 %v2736_v10, %v2684_v18 }
 0x34e   :  { %3412 = vst [vmem:[#allocation10_spill] sm:$0xff] %v2928_v24  ;;  %v2948_v47 = vadd.f32 %v2736_v10, %v2688_v29  ;;  %v3417_v24 = vld [vmem:[#allocation7_spill] sm:$0xff]  ;;  %v2968_v29 = vadd.f32 %v2736_v10, %v2708_v11  ;;  %v2988_v11 = vadd.f32 %v2736_v10, %v2728_v15  ;;  %v1429_v15 = vmax.f32 %v2768_v0, 0.0 }
 0x34f   :  { %3413 = vst [vmem:[#allocation12_spill] sm:$0xff] %v2932_v12  ;;  %3414 = vst [vmem:[#allocation16_spill] sm:$0xff] %v2936_v20  ;;  %v2952_v54 = vadd.f32 %v2736_v10, %v3417_v24  ;;  %v3418_v12 = vld [vmem:[#allocation9_spill] sm:$0xff]  ;;  %v3419_v20 = vld [vmem:[#allocation6_spill] sm:$0xff]  ;;  %v1440_v0 = vmax.f32 %v2812_v59, 0.0  ;;  %v1450_v59 = vmax.f32 %v2852_v33, 0.0 }
 0x350   :  { %3415 = vst [vmem:[#allocation18_spill] sm:$0xff] %v2940_v51  ;;  %3416 = vst [vmem:[#allocation15_spill] sm:$0xff] %v2948_v47  ;;  %v2956_v25 = vadd.f32 %v2736_v10, %v3418_v12  ;;  %v2960_v35 = vadd.f32 %v2736_v10, %v3419_v20  ;;  %v3420_v51 = vld [vmem:[#allocation8_spill] sm:$0xff]  ;;  %v3421_v47 = vld [vmem:[#allocation11_spill] sm:$0xff]  ;;  %v2976_v12 = vadd.f32 %v2736_v10, %v2716_v1  ;;  %v1423_v1 = vmax.f32 %v2744_v3, 0.0 }
 0x351   :  { %v2964_v18 = vadd.f32 %v2736_v10, %v3420_v51  ;;  %v2972_v24 = vadd.f32 %v2736_v10, %v3421_v47  ;;  %v2980_v20 = vadd.f32 %v2736_v10, %v2720_v19  ;;  %v2984_v51 = vadd.f32 %v2736_v10, %v2724_v56  ;;  %3426 = vst [vmem:[#allocation14_spill] sm:$0xff] %v2988_v11 }
 0x352   :  { %3423 = vst [vmem:[#allocation23_spill] sm:$0xff] %v2976_v12  ;;  %v2992_v47 = vadd.f32 %v2736_v10, %v2732_v37  ;;  %v1424_v12 = vmax.f32 %v2748_v14, 0.0  ;;  %v1425_v19 = vmax.f32 %v2752_v28, 0.0  ;;  %v1427_v56 = vmax.f32 %v2760_v32, 0.0  ;;  %1487 = vst.msk [vmem:[%s3320_s6 + $0x8] sm:$0xff] %vm648_vm3, %v1423_v1 }
 0x353   :  { %3422 = vst [vmem:[#allocation17_spill] sm:$0xff] %v2972_v24  ;;  %3424 = vst [vmem:[#allocation24_spill] sm:$0xff] %v2980_v20  ;;  %v1422_v24 = vmax.f32 %v2740_v22, 0.0  ;;  %v1426_v20 = vmax.f32 %v2756_v48, 0.0  ;;  %v1430_v11 = vmax.f32 %v2772_v27, 0.0  ;;  %v1431_v37 = vmax.f32 %v2776_v6, 0.0 }
 0x354   :  { %3425 = vst [vmem:[#allocation21_spill] sm:$0xff] %v2984_v51  ;;  %v1428_v51 = vmax.f32 %v2764_v40, 0.0  ;;  %v1432_v10 = vmax.f32 %v2780_v39, 0.0  ;;  %v1433_v22 = vmax.f32 %v2784_v42, 0.0  ;;  %1488 = vst.msk [vmem:[%s3320_s6 + $0x10] sm:$0xff] %vm648_vm3, %v1424_v12  ;;  %v1434_v3 = vmax.f32 %v2788_v45, 0.0 }
 0x355   :  { %1486 = vst.msk [vmem:[%s3320_s6] sm:$0xff] %vm648_vm3, %v1422_v24  ;;  %1489 = vst.msk [vmem:[%s3320_s6 + $0x18] sm:$0xff] %vm648_vm3, %v1425_v19  ;;  %v1435_v14 = vmax.f32 %v2792_v41, 0.0  ;;  %v1436_v28 = vmax.f32 %v2796_v49, 0.0  ;;  %v1437_v48 = vmax.f32 %v2800_v44, 0.0  ;;  %v1438_v32 = vmax.f32 %v2804_v61, 0.0 }
 0x356   :  { %1490 = vst.msk [vmem:[%s3320_s6 + $0x20] sm:$0xff] %vm648_vm3, %v1426_v20  ;;  %1491 = vst.msk [vmem:[%s3320_s6 + $0x28] sm:$0xff] %vm648_vm3, %v1427_v56  ;;  %v1439_v40 = vmax.f32 %v2808_v5, 0.0  ;;  %v1441_v27 = vmax.f32 %v2816_v2, 0.0  ;;  %v1442_v6 = vmax.f32 %v2820_v26, 0.0  ;;  %v1443_v39 = vmax.f32 %v2824_v34, 0.0 }
 0x357   :  { %1492 = vst.msk [vmem:[%s3320_s6 + $0x30] sm:$0xff] %vm648_vm3, %v1428_v51  ;;  %1493 = vst.msk [vmem:[%s3320_s6 + $0x38] sm:$0xff] %vm648_vm3, %v1429_v15  ;;  %v3427_v42 = vld [vmem:[#allocation13_spill] sm:$0xff]  ;;  %v1445_v41 = vmax.f32 %v2832_v31, 0.0  ;;  %v1446_v49 = vmax.f32 %v2836_v62, 0.0  ;;  %v1447_v44 = vmax.f32 %v2840_v57, 0.0 }
 0x358   :  { %1494 = vst.msk [vmem:[%s3320_s6 + $0x40] sm:$0xff] %vm648_vm3, %v1430_v11  ;;  %1495 = vst.msk [vmem:[%s3320_s6 + $0x48] sm:$0xff] %vm648_vm3, %v1431_v37  ;;  %v1444_v45 = vmax.f32 %v3427_v42, 0.0  ;;  %v1448_v61 = vmax.f32 %v2844_v55, 0.0  ;;  %v1449_v5 = vmax.f32 %v2848_v30, 0.0  ;;  %v1451_v2 = vmax.f32 %v2856_v46, 0.0 }
 0x359   :  { %1496 = vst.msk [vmem:[%s3320_s6 + $0x50] sm:$0xff] %vm648_vm3, %v1432_v10  ;;  %1497 = vst.msk [vmem:[%s3320_s6 + $0x58] sm:$0xff] %vm648_vm3, %v1433_v22  ;;  %v1452_v26 = vmax.f32 %v2860_v8, 0.0  ;;  %v1453_v34 = vmax.f32 %v2864_v4, 0.0  ;;  %v1454_v31 = vmax.f32 %v2868_v36, 0.0  ;;  %v1455_v62 = vmax.f32 %v2872_v23, 0.0 }
 0x35a   :  { %1498 = vst.msk [vmem:[%s3320_s6 + $0x60] sm:$0xff] %vm648_vm3, %v1434_v3  ;;  %1499 = vst.msk [vmem:[%s3320_s6 + $0x68] sm:$0xff] %vm648_vm3, %v1435_v14  ;;  %v1456_v57 = vmax.f32 %v2876_v50, 0.0  ;;  %v1457_v55 = vmax.f32 %v2880_v53, 0.0  ;;  %v1458_v30 = vmax.f32 %v2884_v21, 0.0  ;;  %v1459_v33 = vmax.f32 %v2888_v43, 0.0 }
 0x35b   :  { %1500 = vst.msk [vmem:[%s3320_s6 + $0x70] sm:$0xff] %vm648_vm3, %v1436_v28  ;;  %1501 = vst.msk [vmem:[%s3320_s6 + $0x78] sm:$0xff] %vm648_vm3, %v1437_v48  ;;  %v1460_v46 = vmax.f32 %v2892_v38, 0.0  ;;  %v1461_v8 = vmax.f32 %v2896_v7, 0.0  ;;  %v1462_v4 = vmax.f32 %v2900_v9, 0.0  ;;  %v1463_v36 = vmax.f32 %v2904_v60, 0.0 }
 0x35c   :  { %1502 = vst.msk [vmem:[%s3320_s6 + $0x80] sm:$0xff] %vm648_vm3, %v1438_v32  ;;  %1503 = vst.msk [vmem:[%s3320_s6 + $0x88] sm:$0xff] %vm648_vm3, %v1439_v40  ;;  %v1464_v23 = vmax.f32 %v2908_v63, 0.0  ;;  %v1465_v50 = vmax.f32 %v2912_v13, 0.0  ;;  %v1466_v53 = vmax.f32 %v2916_v52, 0.0  ;;  %v1467_v21 = vmax.f32 %v2920_v17, 0.0 }
 0x35d   :  { %1504 = vst.msk [vmem:[%s3320_s6 + $0x90] sm:$0xff] %vm648_vm3, %v1440_v0  ;;  %1505 = vst.msk [vmem:[%s3320_s6 + $0x98] sm:$0xff] %vm648_vm3, %v1441_v27  ;;  %v1468_v43 = vmax.f32 %v2924_v16, 0.0  ;;  %v3428_v38 = vld [vmem:[#allocation10_spill] sm:$0xff]  ;;  %v3429_v9 = vld [vmem:[#allocation12_spill] sm:$0xff]  ;;  %v1473_v16 = vmax.f32 %v2944_v58, 0.0 }
 0x35e   :  { %1506 = vst.msk [vmem:[%s3320_s6 + $0xa0] sm:$0xff] %vm648_vm3, %v1442_v6  ;;  %1507 = vst.msk [vmem:[%s3320_s6 + $0xa8] sm:$0xff] %vm648_vm3, %v1443_v39  ;;  %v1469_v7 = vmax.f32 %v3428_v38, 0.0  ;;  %v1470_v60 = vmax.f32 %v3429_v9, 0.0  ;;  %v3430_v63 = vld [vmem:[#allocation16_spill] sm:$0xff]  ;;  %v3431_v52 = vld [vmem:[#allocation18_spill] sm:$0xff] }
 0x35f   :  { %1508 = vst.msk [vmem:[%s3320_s6 + $0xb0] sm:$0xff] %vm648_vm3, %v1444_v45  ;;  %1509 = vst.msk [vmem:[%s3320_s6 + $0xb8] sm:$0xff] %vm648_vm3, %v1445_v41  ;;  %v1471_v13 = vmax.f32 %v3430_v63, 0.0  ;;  %v1472_v17 = vmax.f32 %v3431_v52, 0.0  ;;  %v3432_v58 = vld [vmem:[#allocation15_spill] sm:$0xff]  ;;  %v1475_v12 = vmax.f32 %v2952_v54, 0.0 }
 0x360   :  { %1510 = vst.msk [vmem:[%s3320_s6 + $0xc0] sm:$0xff] %vm648_vm3, %v1446_v49  ;;  %1511 = vst.msk [vmem:[%s3320_s6 + $0xc8] sm:$0xff] %vm648_vm3, %v1447_v44  ;;  %v1474_v24 = vmax.f32 %v3432_v58, 0.0  ;;  %v1476_v20 = vmax.f32 %v2956_v25, 0.0  ;;  %v1477_v51 = vmax.f32 %v2960_v35, 0.0  ;;  %v1478_v54 = vmax.f32 %v2964_v18, 0.0 }
 0x361   :  { %1512 = vst.msk [vmem:[%s3320_s6 + $0xd0] sm:$0xff] %vm648_vm3, %v1448_v61  ;;  %1513 = vst.msk [vmem:[%s3320_s6 + $0xd8] sm:$0xff] %vm648_vm3, %v1449_v5  ;;  %v1479_v25 = vmax.f32 %v2968_v29, 0.0  ;;  %v3433_v35 = vld [vmem:[#allocation17_spill] sm:$0xff]  ;;  %v3434_v1 = vld [vmem:[#allocation23_spill] sm:$0xff]  ;;  %v1485_v22 = vmax.f32 %v2992_v47, 0.0 }
 0x362   :  { %1514 = vst.msk [vmem:[%s3320_s6 + $0xe0] sm:$0xff] %vm648_vm3, %v1450_v59  ;;  %1515 = vst.msk [vmem:[%s3320_s6 + $0xe8] sm:$0xff] %vm648_vm3, %v1451_v2  ;;  %v1480_v11 = vmax.f32 %v3433_v35, 0.0  ;;  %v1481_v19 = vmax.f32 %v3434_v1, 0.0  ;;  %v3435_v18 = vld [vmem:[#allocation24_spill] sm:$0xff]  ;;  %v3436_v56 = vld [vmem:[#allocation21_spill] sm:$0xff] }
 0x363   :  { %1516 = vst.msk [vmem:[%s3320_s6 + $0xf0] sm:$0xff] %vm648_vm3, %v1452_v26  ;;  %1517 = vst.msk [vmem:[%s3320_s6 + $0xf8] sm:$0xff] %vm648_vm3, %v1453_v34  ;;  %v1482_v29 = vmax.f32 %v3435_v18, 0.0  ;;  %v1483_v15 = vmax.f32 %v3436_v56, 0.0  ;;  %v3437_v37 = vld [vmem:[#allocation14_spill] sm:$0xff] }
 0x364   :  { %1518 = vst.msk [vmem:[%s3320_s6 + $0x100] sm:$0xff] %vm648_vm3, %v1454_v31  ;;  %1519 = vst.msk [vmem:[%s3320_s6 + $0x108] sm:$0xff] %vm648_vm3, %v1455_v62  ;;  %v1484_v10 = vmax.f32 %v3437_v37, 0.0 }
 0x365   :  { %1520 = vst.msk [vmem:[%s3320_s6 + $0x110] sm:$0xff] %vm648_vm3, %v1456_v57  ;;  %1521 = vst.msk [vmem:[%s3320_s6 + $0x118] sm:$0xff] %vm648_vm3, %v1457_v55 }
 0x366   :  { %1522 = vst.msk [vmem:[%s3320_s6 + $0x120] sm:$0xff] %vm648_vm3, %v1458_v30  ;;  %1523 = vst.msk [vmem:[%s3320_s6 + $0x128] sm:$0xff] %vm648_vm3, %v1459_v33 }
 0x367   :  { %1524 = vst.msk [vmem:[%s3320_s6 + $0x130] sm:$0xff] %vm648_vm3, %v1460_v46  ;;  %1525 = vst.msk [vmem:[%s3320_s6 + $0x138] sm:$0xff] %vm648_vm3, %v1461_v8 }
 0x368   :  { %1526 = vst.msk [vmem:[%s3320_s6 + $0x140] sm:$0xff] %vm648_vm3, %v1462_v4  ;;  %1527 = vst.msk [vmem:[%s3320_s6 + $0x148] sm:$0xff] %vm648_vm3, %v1463_v36 }
 0x369   :  { %1528 = vst.msk [vmem:[%s3320_s6 + $0x150] sm:$0xff] %vm648_vm3, %v1464_v23  ;;  %1529 = vst.msk [vmem:[%s3320_s6 + $0x158] sm:$0xff] %vm648_vm3, %v1465_v50 }
 0x36a   :  { %1530 = vst.msk [vmem:[%s3320_s6 + $0x160] sm:$0xff] %vm648_vm3, %v1466_v53  ;;  %1531 = vst.msk [vmem:[%s3320_s6 + $0x168] sm:$0xff] %vm648_vm3, %v1467_v21 }
 0x36b   :  { %1532 = vst.msk [vmem:[%s3320_s6 + $0x170] sm:$0xff] %vm648_vm3, %v1468_v43  ;;  %1533 = vst.msk [vmem:[%s3320_s6 + $0x178] sm:$0xff] %vm648_vm3, %v1469_v7 }
 0x36c   :  { %1534 = vst.msk [vmem:[%s3320_s6 + $0x180] sm:$0xff] %vm648_vm3, %v1470_v60  ;;  %1535 = vst.msk [vmem:[%s3320_s6 + $0x188] sm:$0xff] %vm648_vm3, %v1471_v13 }
 0x36d   :  { %1536 = vst.msk [vmem:[%s3320_s6 + $0x190] sm:$0xff] %vm648_vm3, %v1472_v17  ;;  %1537 = vst.msk [vmem:[%s3320_s6 + $0x198] sm:$0xff] %vm648_vm3, %v1473_v16 }
 0x36e   :  { %1538 = vst.msk [vmem:[%s3320_s6 + $0x1a0] sm:$0xff] %vm648_vm3, %v1474_v24  ;;  %1539 = vst.msk [vmem:[%s3320_s6 + $0x1a8] sm:$0xff] %vm648_vm3, %v1475_v12 }
 0x36f   :  { %1540 = vst.msk [vmem:[%s3320_s6 + $0x1b0] sm:$0xff] %vm648_vm3, %v1476_v20  ;;  %1541 = vst.msk [vmem:[%s3320_s6 + $0x1b8] sm:$0xff] %vm648_vm3, %v1477_v51 }
 0x370   :  { %1542 = vst.msk [vmem:[%s3320_s6 + $0x1c0] sm:$0xff] %vm648_vm3, %v1478_v54  ;;  %1543 = vst.msk [vmem:[%s3320_s6 + $0x1c8] sm:$0xff] %vm648_vm3, %v1479_v25 }
 0x371   :  { %1544 = vst.msk [vmem:[%s3320_s6 + $0x1d0] sm:$0xff] %vm648_vm3, %v1480_v11  ;;  %1545 = vst.msk [vmem:[%s3320_s6 + $0x1d8] sm:$0xff] %vm648_vm3, %v1481_v19 }
 0x372   :  { %1546 = vst.msk [vmem:[%s3320_s6 + $0x1e0] sm:$0xff] %vm648_vm3, %v1482_v29  ;;  %1547 = vst.msk [vmem:[%s3320_s6 + $0x1e8] sm:$0xff] %vm648_vm3, %v1483_v15 }
 0x373   :  { %1548 = vst.msk [vmem:[%s3320_s6 + $0x1f0] sm:$0xff] %vm648_vm3, %v1484_v10  ;;  %1549 = vst.msk [vmem:[%s3320_s6 + $0x1f8] sm:$0xff] %vm648_vm3, %v1485_v22 }

// kernel: vae_forward.11
= control target key start
LH: loop header
LB: loop body
LE: loop exit
PB: predicated region body
PF: predicated region fallthrough
CT: control target
= control target key end

     0   :  { %vm206_vm0 = vcmask 261120   ;;  %v950_v27 = vmov 0.0|0.0   ;;  %vm951_vm1 = vmmov 0   ;;  %v952_v37 = vmov 0.0   ;;  %s1206_s1 = inlined_call_operand.vmem [shape: bf16[288,64], index: 1, kind: input, shape index: {}]   ;;  %s1207_s0 = inlined_call_operand.vmem [shape: bf16[32,288], index: 0, kind: input, shape index: {}]   ;;  %s1208_s2 = inlined_call_operand.vmem [shape: f32[64,64], index: 2, kind: input, shape index: {}]   ;;  %s1209_s3 = inlined_call_operand.vmem [shape: f32[64,64], index: 3, kind: input, shape index: {}]   ;;  %s1210_s4 = inlined_call_operand.vmem [shape: f32[1,64], index: 4, kind: input, shape index: {}]   ;;  %s1211_s5 = inlined_call_operand.vmem [shape: f32[1,64], index: 5, kind: input, shape index: {}]   ;;  %s1212_s6 = inlined_call_operand.vmem [shape: f32[32,64], index: 6, kind: output, shape index: {}]  }
   0x1   :  { %v922_v0 = vld [vmem:[%s1206_s1 + $0x40] sm:$0xff]   ;;  %v924_v2 = vld [vmem:[%s1206_s1 + $0x48] sm:$0xff]   ;;  %v926_v4 = vld [vmem:[%s1206_s1 + $0x50] sm:$0xff]   ;;  %vm311_vm2 = vcmask 523264  }
   0x2   :  { %v923_v1 = vld [vmem:[%s1206_s1] sm:$0xff]   ;;  %719 = vmatprep.subr.bf16.mxu0 %v922_v0  ;;  %v925_v3 = vld [vmem:[%s1206_s1 + $0x8] sm:$0xff]   ;;  %v927_v5 = vld [vmem:[%s1206_s1 + $0x10] sm:$0xff]  }
   0x3   :  { %720 = vmatpush3.bf16.msra.mxu0 %v923_v1  ;;  %v928_v6 = vld [vmem:[%s1206_s1 + $0x58] sm:$0xff]   ;;  %v930_v8 = vld [vmem:[%s1206_s1 + $0x60] sm:$0xff]   ;;  %v932_v11 = vld [vmem:[%s1206_s1 + $0x68] sm:$0xff]  }
   0x4   :  { %721 = vmatprep.subr.bf16.mxu0 %v924_v2  ;;  %v929_v7 = vld [vmem:[%s1206_s1 + $0x18] sm:$0xff]   ;;  %v936_v9 = vld [vmem:[%s1206_s1 + $0x80] sm:$0xff]   ;;  %v933_v12 = vld [vmem:[%s1206_s1 + $0x28] sm:$0xff]  }
   0x5   :  { %v931_v10 = vld [vmem:[%s1206_s1 + $0x20] sm:$0xff]   ;;  %787 = vmatprep.subr.bf16.mxu1 %v936_v9  ;;  %v939_v13 = vld [vmem:[%s1206_s1 + $0x88] sm:$0xff]   ;;  %v934_v14 = vld [vmem:[%s1206_s1 + $0x70] sm:$0xff]  }
   0x6   :  { %788 = vmatpush3.bf16.msra.mxu1 %v936_v9  ;;  %v942_v15 = vld [vmem:[%s1207_s0 + $0x4] ss:$12 sps:$4 sm:$0xff]   ;;  %v943_v16 = vld [vmem:[%s1207_s0 + $0x8] ss:$12 sps:$4 sm:$0xff]   ;;  %v944_v17 = vld [vmem:[%s1207_s0 + $0x20] ss:$12 sps:$4 sm:$0xff]  }
   0x7   :  { %722 = vmatpush3.bf16.msra.mxu0 %v925_v3  ;;  %789 = vmatprep.subr.bf16.mxu1 %v939_v13  ;;  %v935_v18 = vld [vmem:[%s1206_s1 + $0x30] sm:$0xff]   ;;  %v937_v19 = vld [vmem:[%s1206_s1 + $0x78] sm:$0xff]   ;;  %v940_v21 = vld [vmem:[%s1207_s0] ss:$12 sps:$4 sm:$0xff]  }
   0x8   :  { %723 = vmatprep.subr.bf16.mxu0 %v926_v4  ;;  %245 = vmatprep.mubr.bf16.mxu0 %v942_v15  ;;  %v938_v20 = vld [vmem:[%s1206_s1 + $0x38] sm:$0xff]   ;;  %v342_v24 = vld [vmem:[%s1208_s2] sm:$0xff]  ;;  %v343_v25 = vld [vmem:[%s1208_s2 + $0x8] sm:$0xff] }
   0x9   :  { %791 = vmatprep.mubr.msk.bf16.mxu1 %vm206_vm0, %v943_v16  ;;  %v945_v22 = vld [vmem:[%s1207_s0 + $0x1c] ss:$12 sps:$4 sm:$0xff]   ;;  %v947_v23 = vld [vmem:[%s1207_s0 + $0x18] ss:$12 sps:$4 sm:$0xff]   ;;  %v1066_v26 = vpack.c.bf16 %v343_v25, %v342_v24  ;;  %v344_v28 = vld [vmem:[%s1208_s2 + $0x10] sm:$0xff] }
   0xa   :  { %790 = vmatpush3.bf16.msra.mxu1 %v939_v13  ;;  %v345_v29 = vld [vmem:[%s1208_s2 + $0x18] sm:$0xff]  ;;  %v346_v31 = vld [vmem:[%s1208_s2 + $0x20] sm:$0xff]  ;;  %v347_v32 = vld [vmem:[%s1208_s2 + $0x28] sm:$0xff] }
   0xb   :  { %724 = vmatpush3.bf16.msra.mxu0 %v927_v5  ;;  %871 = vmatprep.subr.bf16.mxu1 %v950_v27  ;;  %v1078_v30 = vpack.c.bf16 %v345_v29, %v344_v28  ;;  %v1088_v33 = vpack.c.bf16 %v347_v32, %v346_v31  ;;  %v348_v34 = vld [vmem:[%s1208_s2 + $0x30] sm:$0xff]  ;;  %v349_v35 = vld [vmem:[%s1208_s2 + $0x38] sm:$0xff]  ;;  %v507_v24 = vld [vmem:[%s1209_s3] sm:$0xff] }
   0xc   :  { %725 = vmatprep.subr.bf16.mxu0 %v928_v6  ;;  %v1098_v36 = vpack.c.bf16 %v349_v35, %v348_v34  ;;  %v508_v25 = vld [vmem:[%s1209_s3 + $0x8] sm:$0xff]  ;;  %v509_v28 = vld [vmem:[%s1209_s3 + $0x10] sm:$0xff]  ;;  %v510_v29 = vld [vmem:[%s1209_s3 + $0x18] sm:$0xff] }
   0xd   :  { %792 = vmatmul.mubr.msk.bf16.vlgmr.msra.gmra.mrb[0].mxu1 %vm206_vm0, %v944_v17  ;;  %v511_v31 = vld [vmem:[%s1209_s3 + $0x20] sm:$0xff]  ;;  %v512_v32 = vld [vmem:[%s1209_s3 + $0x28] sm:$0xff]  ;;  %v513_v34 = vld [vmem:[%s1209_s3 + $0x30] sm:$0xff] }
   0xe   :  { %873 = vmatpush3.bf16.msra.mxu1 %v1066_v26  ;;  %811 = vmatprep.mubr.msk.f32.mxu1 %vm951_vm1, %v952_v37  ;;  %v514_v35 = vld [vmem:[%s1209_s3 + $0x38] sm:$0xff] }
   0xf   :  { %726 = vmatpush3.bf16.msra.mxu0 %v929_v7  ;;  %874 = vmatprep.subr.bf16.mxu1 %v950_v27 }
  0x10   :  { %727 = vmatprep.subr.bf16.mxu0 %v930_v8 }
  0x12   :  { %876 = vmatpush3.bf16.msra.mxu1 %v1078_v30 }
  0x13   :  { %728 = vmatpush3.bf16.msra.mxu0 %v931_v10  ;;  %877 = vmatprep.subr.bf16.mxu1 %v950_v27 }
  0x14   :  { %729 = vmatprep.subr.bf16.mxu0 %v932_v11 }
  0x16   :  { %879 = vmatpush3.bf16.msra.mxu1 %v1088_v33 }
  0x17   :  { %730 = vmatpush3.bf16.msra.mxu0 %v933_v12  ;;  %880 = vmatprep.subr.bf16.mxu1 %v950_v27 }
  0x18   :  { %731 = vmatprep.subr.bf16.mxu0 %v934_v14 }
  0x1a   :  { %882 = vmatpush3.bf16.msra.mxu1 %v1098_v36 }
  0x1b   :  { %732 = vmatpush3.bf16.msra.mxu0 %v935_v18  ;;  %883 = vmatprep.subr.bf16.mxu1 %v950_v27 }
  0x1c   :  { %733 = vmatprep.subr.bf16.mxu0 %v937_v19 }
  0x1f   :  { %734 = vmatpush3.bf16.msra.mxu0 %v938_v20 }
  0x20   :  { %895 = vmatprep.subr.bf16.mxu0 %v950_v27 }
  0x22   :  { %246 = vmatmul.mubr.bf16.vlgmr.msra.gmra.mrb[0].mxu0 %v940_v21 }
  0x23   :  { %253 = vmatprep.mubr.bf16.mxu0 %v945_v22 }
  0x2a   :  { %254 = vmatmul.mubr.bf16.gmra.mrb[4].mxu0 %v947_v23 }
  0x2b   :  { %849 = vmatprep.mubr.msk.f32.mxu0 %vm951_vm1, %v952_v37 }
  0xe0   :  { %v793_v38 = vpop.f32.mrb[0].mxu1 }
  0xe1   :  { %v296_v39 = vpop.f32.mrb[1].mxu1 }
  0xe2   :  { %v794_v40 = vpop.f32.mrb[2].mxu1 }
  0xe3   :  { %v299_v41 = vpop.f32.mrb[3].mxu1 }
  0xf5   :  { %v735_v42 = vpop.f32.mrb[0].mxu0 }
  0xf6   :  { %v736_v43 = vpop.f32.mrb[1].mxu0 }
  0xf7   :  { %v737_v44 = vadd.f32 %v736_v43, %v735_v42  ;;  %v738_v45 = vpop.f32.mrb[2].mxu0 }
  0xf8   :  { %v739_v46 = vpop.f32.mrb[3].mxu0 }
  0xf9   :  { %v740_v47 = vadd.f32 %v739_v46, %v738_v45  ;;  %v1106_v48 = vadd.f32 %v737_v44, %v296_v39  ;;  %v500_v46 = vld [vmem:[%s1210_s4] sm:$0x1] }
  0xfb   :  { %v1108_v49 = vadd.f32 %v740_v47, %v299_v41  ;;  %v325_v53 = vmul.f32 %v1106_v48, %v1106_v48  ;;  %v312_v58 = vsel %vm311_vm2, %v1106_v48, 0.0 }
  0xfd   :  { %v326_v50 = vmul.f32 %v1108_v49, %v1108_v49  ;;  %v741_v51 = vpop.f32.mrb[4].mxu0  ;;  %v313_v54 = vsel %vm311_vm2, %v1108_v49, 0.0  ;;  %v329_v63 = vsel %vm311_vm2, %v325_v53, 0.0  ;;  %v661_v53 = vlaneseq }
  0xfe   :  { %v742_v52 = vpop.f32.mrb[5].mxu0  ;;  %v314_v62 = vadd.f32 %v313_v54, %v312_v58 }
  0xff   :  { %v743_v55 = vadd.f32 %v742_v52, %v741_v51  ;;  %v744_v56 = vpop.f32.mrb[6].mxu0  ;;  %v330_v59 = vsel %vm311_vm2, %v326_v50, 0.0  ;;  %v662_v54 = vshrl.u32 %v661_v53, 7 }
 0x100   :  { %v745_v57 = vpop.f32.mrb[7].mxu0  ;;  %v331_v3 = vadd.f32 %v330_v59, %v329_v63 }
 0x101   :  { %v1119_v60 = vadd.f32 %v793_v38, %v743_v55  ;;  %v746_v61 = vadd.f32 %v745_v57, %v744_v56  ;;  %v663_v55 = vsub.s32 0, %v662_v54 }
 0x103   :  { %v315_v0 = vsel %vm311_vm2, %v1119_v60, 0.0  ;;  %v327_v1 = vmul.f32 %v1119_v60, %v1119_v60  ;;  %v1126_v2 = vadd.f32 %v794_v40, %v746_v61 }
 0x104   :  { %v316_v4 = vadd.f32 %v315_v0, %v314_v62 }
 0x105   :  { %v332_v5 = vsel %vm311_vm2, %v327_v1, 0.0  ;;  %v317_v6 = vsel %vm311_vm2, %v1126_v2, 0.0  ;;  %v328_v7 = vmul.f32 %v1126_v2, %v1126_v2 }
 0x106   :  { %v333_v8 = vadd.f32 %v332_v5, %v331_v3  ;;  %v318_v9 = vadd.f32 %v317_v6, %v316_v4 }
 0x107   :  { %v334_v10 = vsel %vm311_vm2, %v328_v7, 0.0 }
 0x108   :  { %v319_v11 = vrot.slane %v318_v9, 4  ;;  %v335_v13 = vadd.f32 %v334_v10, %v333_v8 }
 0x10a   :  { %v320_v12 = vadd.f32 %v319_v11, %v318_v9  ;;  %v336_v16 = vrot.slane %v335_v13, 4 }
 0x10c   :  { %v321_v14 = vrot.slane %v320_v12, 2  ;;  %v337_v18 = vadd.f32 %v336_v16, %v335_v13 }
 0x10e   :  { %v322_v15 = vadd.f32 %v321_v14, %v320_v12  ;;  %v338_v20 = vrot.slane %v337_v18, 2 }
 0x110   :  { %v323_v17 = vrot.slane %v322_v15, 1  ;;  %v339_v21 = vadd.f32 %v338_v20, %v337_v18 }
 0x112   :  { %v324_v19 = vadd.f32 %v323_v17, %v322_v15  ;;  %v340_v22 = vrot.slane %v339_v21, 1 }
 0x114   :  { %812 = vmatmul.mubr.msk.f32.vlgmr.msra.gmra.mrb[4].mxu1 %vm311_vm2, %v324_v19  ;;  %v341_v23 = vadd.f32 %v340_v22, %v339_v21 }
 0x115   :  { %885 = vmatpush3.bf16.msra.mxu1 %v1066_v26  ;;  %830 = vmatprep.mubr.msk.f32.mxu1 %vm951_vm1, %v952_v37  ;;  %v896_v26 = vpack.c.bf16 %v508_v25, %v507_v24 }
 0x116   :  { %886 = vmatprep.subr.bf16.mxu1 %v950_v27 }
 0x117   :  { %897 = vmatpush3.bf16.msra.mxu0 %v896_v26 }
 0x118   :  { %898 = vmatprep.subr.bf16.mxu0 %v950_v27 }
 0x119   :  { %888 = vmatpush3.bf16.msra.mxu1 %v1078_v30  ;;  %v899_v30 = vpack.c.bf16 %v510_v29, %v509_v28 }
 0x11a   :  { %889 = vmatprep.subr.bf16.mxu1 %v950_v27 }
 0x11b   :  { %900 = vmatpush3.bf16.msra.mxu0 %v899_v30 }
 0x11c   :  { %901 = vmatprep.subr.bf16.mxu0 %v950_v27 }
 0x11d   :  { %891 = vmatpush3.bf16.msra.mxu1 %v1088_v33  ;;  %v902_v33 = vpack.c.bf16 %v512_v32, %v511_v31 }
 0x11e   :  { %892 = vmatprep.subr.bf16.mxu1 %v950_v27 }
 0x11f   :  { %903 = vmatpush3.bf16.msra.mxu0 %v902_v33 }
 0x120   :  { %904 = vmatprep.subr.bf16.mxu0 %v950_v27 }
 0x121   :  { %894 = vmatpush3.bf16.msra.mxu1 %v1098_v36  ;;  %v905_v36 = vpack.c.bf16 %v514_v35, %v513_v34 }
 0x122   :  { %907 = vmatprep.subr.bf16.mxu1 %v950_v27 }
 0x123   :  { %906 = vmatpush3.bf16.msra.mxu0 %v905_v36 }
 0x124   :  { %831 = vmatmul.mubr.msk.f32.vlgmr.msra.gmra.mrb[6].mxu1 %vm311_vm2, %v341_v23 }
 0x125   :  { %868 = vmatprep.mubr.msk.f32.mxu1 %vm951_vm1, %v952_v37  ;;  %909 = vmatpush3.bf16.msra.mxu1 %v896_v26 }
 0x126   :  { %910 = vmatprep.subr.bf16.mxu1 %v950_v27 }
 0x129   :  { %912 = vmatpush3.bf16.msra.mxu1 %v899_v30 }
 0x12a   :  { %913 = vmatprep.subr.bf16.mxu1 %v950_v27 }
 0x12d   :  { %915 = vmatpush3.bf16.msra.mxu1 %v902_v33 }
 0x12e   :  { %916 = vmatprep.subr.bf16.mxu1 %v950_v27  ;;  %v504_v27 = vld [vmem:[%s1211_s5] sm:$0x1] }
 0x131   :  { %918 = vmatpush3.bf16.msra.mxu1 %v905_v36 }
 0x1e7   :  { %v419_v37 = vpop.f32.mrb[4].mxu1 }
 0x1e8   :  { %v813_v38 = vpop.f32.mrb[5].mxu1  ;;  %v496_v39 = vmul.f32 0.03125, %v419_v37 }
 0x1ea   :  { %v498_v41 = vmul.f32 %v496_v39, %v496_v39 }
 0x1f7   :  { %v492_v40 = vpop.f32.mrb[6].mxu1 }
 0x1f8   :  { %v497_v42 = vmul.f32 0.03125, %v492_v40  ;;  %v832_v43 = vpop.f32.mrb[7].mxu1 }
 0x1fa   :  { %v499_v44 = vsub.f32 %v497_v42, %v498_v41 }
 0x1fc   :  { %v501_v45 = vadd.f32 1e-05, %v499_v44 }
 0x1fe   :  { %948 = vrsqrt.f32 %v501_v45 }
 0x208   :  { %v949_v47 = vpop.eup %948 }
 0x209   :  { %v503_v50 = vmul.f32 %v949_v47, %v500_v46 }
 0x20b   :  { %850 = vmatmul.mubr.msk.f32.vlgmr.msra.gmra.mrb[8].mxu0 %vm311_vm2, %v503_v50  ;;  %v505_v51 = vmul.f32 %v503_v50, %v496_v39 }
 0x20d   :  { %v506_v52 = vsub.f32 %v504_v27, %v505_v51 }
 0x20f   :  { %869 = vmatmul.mubr.msk.f32.vlgmr.msra.gmra.mrb[8].mxu1 %vm311_vm2, %v506_v52 }
 0x2de   :  { %v584_v56 = vpop.f32.mrb[8].mxu0 }
 0x2df   :  { %v664_v57 = vrot.slane %v584_v56, %v663_v55  ;;  %v851_v58 = vpop.f32.mrb[9].mxu0 }
 0x2e1   :  { %v665_v59 = vmul.f32 %v664_v57, %v1106_v48  ;;  %v666_v62 = vmul.f32 %v664_v57, %v1108_v49  ;;  %v667_v63 = vmul.f32 %v664_v57, %v1119_v60  ;;  %v668_v0 = vmul.f32 %v664_v57, %v1126_v2 }
 0x2e2   :  { %v657_v61 = vpop.f32.mrb[8].mxu1 }
 0x2e3   :  { %v672_v1 = vrot.slane %v657_v61, %v663_v55  ;;  %v870_v3 = vpop.f32.mrb[9].mxu1 }
 0x2e5   :  { %v673_v4 = vadd.f32 %v672_v1, %v665_v59  ;;  %v674_v5 = vadd.f32 %v672_v1, %v666_v62  ;;  %v675_v6 = vadd.f32 %v672_v1, %v667_v63  ;;  %v676_v7 = vadd.f32 %v672_v1, %v668_v0 }
 0x2e7   :  { %v677_v8 = vmax.f32 %v673_v4, 0.0  ;;  %v678_v9 = vmax.f32 %v674_v5, 0.0  ;;  %v679_v10 = vmax.f32 %v675_v6, 0.0  ;;  %v680_v11 = vmax.f32 %v676_v7, 0.0 }
 0x2e9   :  { %681 = vst.msk [vmem:[%s1212_s6] sm:$0xff] %vm311_vm2, %v677_v8  ;;  %682 = vst.msk [vmem:[%s1212_s6 + $0x8] sm:$0xff] %vm311_vm2, %v678_v9 }
 0x2ea   :  { %683 = vst.msk [vmem:[%s1212_s6 + $0x10] sm:$0xff] %vm311_vm2, %v679_v10  ;;  %684 = vst.msk [vmem:[%s1212_s6 + $0x18] sm:$0xff] %vm311_vm2, %v680_v11 }

// kernel: tile.19
= control target key start
LH: loop header
LB: loop body
LE: loop exit
PB: predicated region body
PF: predicated region fallthrough
CT: control target
= control target key end

     0   :  { %vm65_vm0 = vcmask 1043458   ;;  %s105_s6 = smov 3  ;;  %vm70_vm1 = vcmask 1045508   ;;  %vm75_vm2 = vcmask 1047558   ;;  %s108_s9 = smov 12  ;;  %vm4_vm3 = vcmask 1047556   ;;  %s1498_s0 = inlined_call_operand.vmem [shape: f32[16,16,16], index: 0, kind: input, shape index: {}]   ;;  %s1499_s1 = inlined_call_operand.vmem [shape: f32[256,16], index: 1, kind: output, shape index: {}]  }
   0x1   :  { %v726_v0 = vld [vmem:[%s1498_s0 + $0x87] ss:$16 sm:%s105_s6]   ;;  %s113_s10 = smov 48  ;;  %s118_s15 = smov 192  ;;  %vm6_vm4 = vcmask 130048   ;;  %vm79_vm5 = vcmask 1048448  }
   0x2   :  { %v727_v1 = vld [vmem:[%s1498_s0 + $0x87] ss:$16 sm:%s108_s9]   ;;  %s60_s16 = smov 3  ;;  %s63_s21 = smov 12  ;;  %vm170_vm6 = vcmask 917248   ;;  %vm261_vm7 = vcmask 786048  }
   0x3   :  { %v728_v2 = vld [vmem:[%s1498_s0 + $0x87] ss:$16 sm:%s113_s10]   ;;  %v111_v3 = vsel %vm65_vm0, %v727_v1, %v726_v0  ;;  %s68_s22 = smov 48  ;;  %s73_s27 = smov 192  ;;  %vm352_vm8 = vcmask 654848   ;;  %vm443_vm9 = vcmask 523648  }
   0x4   :  { %v729_v4 = vld [vmem:[%s1498_s0 + $0x87] ss:$16 sm:%s118_s15]   ;;  %v116_v6 = vsel %vm70_vm1, %v728_v2, %v111_v3  ;;  %s128_s28 = smov 3  ;;  %s131_s4 = smov 12  ;;  %vm534_vm10 = vcmask 392448   ;;  %vm625_vm11 = vcmask 261248  }
   0x5   :  { %v717_v5 = vld [vmem:[%s1498_s0 + $0x7] ss:$16 sm:%s60_s16]   ;;  %v121_v9 = vsel %vm75_vm2, %v729_v4, %v116_v6  ;;  %v731_v12 = vld [vmem:[%s1498_s0 + $0x8f] ss:$16 sm:%s128_s28]   ;;  %s136_s5 = smov 48  ;;  %s857_s6 = smov 112  }
   0x6   :  { %v718_v7 = vld [vmem:[%s1498_s0 + $0x7] ss:$16 sm:%s63_s21]   ;;  %122 = vrot.lane.b32.xlu1 %v121_v9, %s857_s6  ;;  %s141_s9 = smov 192  ;;  %s82_s10 = smov 3 }
   0x7   :  { %v719_v8 = vld [vmem:[%s1498_s0 + $0x7] ss:$16 sm:%s68_s22]   ;;  %v66_v10 = vsel %vm65_vm0, %v718_v7, %v717_v5  ;;  %v732_v14 = vld [vmem:[%s1498_s0 + $0x8f] ss:$16 sm:%s131_s4]   ;;  %s85_s15 = smov 12  ;;  %s90_s16 = smov 48 }
   0x8   :  { %v720_v11 = vld [vmem:[%s1498_s0 + $0x7] ss:$16 sm:%s73_s27]   ;;  %v71_v13 = vsel %vm70_vm1, %v719_v8, %v66_v10  ;;  %v134_v16 = vsel %vm65_vm0, %v732_v14, %v731_v12  ;;  %v733_v17 = vld [vmem:[%s1498_s0 + $0x8f] ss:$16 sm:%s136_s5]   ;;  %s95_s19 = smov 192  ;;  %s173_s24 = smov 3 }
   0x9   :  { %v76_v15 = vsel %vm75_vm2, %v720_v11, %v71_v13  ;;  %v734_v18 = vld [vmem:[%s1498_s0 + $0x8f] ss:$16 sm:%s141_s9]   ;;  %v139_v19 = vsel %vm70_vm1, %v733_v17, %v134_v16  ;;  %s176_s25 = smov 12  ;;  %s181_s28 = smov 48  ;;  %v740_v27 = vld [vmem:[%s1498_s0 + $0xe] ss:$16 sm:%s173_s24]  }
   0xa   :  { %77 = vrot.lane.b32.xlu0 %v76_v15, %s857_s6  ;;  %v721_v20 = vld [vmem:[%s1498_s0 + $0xf] ss:$16 sm:%s82_s10]   ;;  %v144_v21 = vsel %vm75_vm2, %v734_v18, %v139_v19  ;;  %s186_s29 = smov 192  ;;  %s151_s5 = smov 3 }
   0xb   :  { %v722_v22 = vld [vmem:[%s1498_s0 + $0xf] ss:$16 sm:%s85_s15]   ;;  %145 = vrot.lane.b32.xlu1 %v144_v21, %s857_s6  ;;  %s154_s7 = smov 12  ;;  %s159_s12 = smov 48 }
   0xc   :  { %v723_v23 = vld [vmem:[%s1498_s0 + $0xf] ss:$16 sm:%s90_s16]   ;;  %v88_v24 = vsel %vm65_vm0, %v722_v22, %v721_v20  ;;  %v741_v28 = vld [vmem:[%s1498_s0 + $0xe] ss:$16 sm:%s176_s25]   ;;  %s164_s13 = smov 192  ;;  %s219_s15 = smov 3 }
   0xd   :  { %v724_v25 = vld [vmem:[%s1498_s0 + $0xf] ss:$16 sm:%s95_s19]   ;;  %v93_v26 = vsel %vm70_vm1, %v723_v23, %v88_v24  ;;  %v179_v30 = vsel %vm65_vm0, %v741_v28, %v740_v27  ;;  %v742_v31 = vld [vmem:[%s1498_s0 + $0xe] ss:$16 sm:%s181_s28]   ;;  %s222_s16 = smov 12  ;;  %s227_s21 = smov 48 }
   0xe   :  { %v98_v29 = vsel %vm75_vm2, %v724_v25, %v93_v26  ;;  %v743_v32 = vld [vmem:[%s1498_s0 + $0xe] ss:$16 sm:%s186_s29]   ;;  %v184_v33 = vsel %vm70_vm1, %v742_v31, %v179_v30  ;;  %v736_v34 = vld [vmem:[%s1498_s0 + $0x6] ss:$16 sm:%s151_s5]   ;;  %s232_s22 = smov 192  ;;  %s858_s23 = smov 96  }
   0xf   :  { %99 = vrot.lane.b32.xlu0 %v98_v29, %s857_s6  ;;  %v189_v35 = vsel %vm75_vm2, %v743_v32, %v184_v33  ;;  %v737_v36 = vld [vmem:[%s1498_s0 + $0x6] ss:$16 sm:%s154_s7]   ;;  %s196_s26 = smov 3  ;;  %s199_s2 = smov 12 }
  0x10   :  { %v738_v37 = vld [vmem:[%s1498_s0 + $0x6] ss:$16 sm:%s159_s12]   ;;  %190 = vrot.lane.b32.xlu1 %v189_v35, %s858_s23  ;;  %v157_v38 = vsel %vm65_vm0, %v737_v36, %v736_v34  ;;  %s204_s3 = smov 48  ;;  %s209_s9 = smov 192 }
  0x11   :  { %v739_v39 = vld [vmem:[%s1498_s0 + $0x6] ss:$16 sm:%s164_s13]   ;;  %v162_v40 = vsel %vm70_vm1, %v738_v37, %v157_v38  ;;  %v750_v41 = vld [vmem:[%s1498_s0 + $0x8e] ss:$16 sm:%s219_s15]   ;;  %s264_s12 = smov 3  ;;  %s267_s13 = smov 12 }
  0x12   :  { %v751_v42 = vld [vmem:[%s1498_s0 + $0x8e] ss:$16 sm:%s222_s16]   ;;  %v167_v43 = vsel %vm75_vm2, %v739_v39, %v162_v40  ;;  %v745_v48 = vld [vmem:[%s1498_s0 + $0x86] ss:$16 sm:%s196_s26]   ;;  %s272_s17 = smov 48  ;;  %s277_s18 = smov 192 }
  0x13   :  { %v225_v44 = vsel %vm65_vm0, %v751_v42, %v750_v41  ;;  %v752_v45 = vld [vmem:[%s1498_s0 + $0x8e] ss:$16 sm:%s227_s21]   ;;  %168 = vrot.lane.b32.xlu0 %v167_v43, %s858_s23  ;;  %s242_s21 = smov 3  ;;  %s245_s27 = smov 12 }
  0x14   :  { %v753_v46 = vld [vmem:[%s1498_s0 + $0x8e] ss:$16 sm:%s232_s22]   ;;  %v230_v47 = vsel %vm70_vm1, %v752_v45, %v225_v44  ;;  %v746_v50 = vld [vmem:[%s1498_s0 + $0x86] ss:$16 sm:%s199_s2]   ;;  %s250_s28 = smov 48  ;;  %s255_s4 = smov 192 }
  0x15   :  { %v235_v49 = vsel %vm75_vm2, %v753_v46, %v230_v47  ;;  %v747_v51 = vld [vmem:[%s1498_s0 + $0x86] ss:$16 sm:%s204_s3]   ;;  %v202_v52 = vsel %vm65_vm0, %v746_v50, %v745_v48  ;;  %v759_v55 = vld [vmem:[%s1498_s0 + $0xd] ss:$16 sm:%s264_s12]   ;;  %s310_s7 = smov 3  ;;  %s313_s8 = smov 12 }
  0x16   :  { %236 = vrot.lane.b32.xlu1 %v235_v49, %s858_s23  ;;  %v748_v53 = vld [vmem:[%s1498_s0 + $0x86] ss:$16 sm:%s209_s9]   ;;  %v207_v54 = vsel %vm70_vm1, %v747_v51, %v202_v52  ;;  %s323_s6 = smov 192  ;;  %s859_s14 = smov 80  }
  0x17   :  { %v760_v56 = vld [vmem:[%s1498_s0 + $0xd] ss:$16 sm:%s267_s13]   ;;  %v212_v57 = vsel %vm75_vm2, %v748_v53, %v207_v54  ;;  %v755_v62 = vld [vmem:[%s1498_s0 + $0x5] ss:$16 sm:%s242_s21]   ;;  %s318_s13 = smov 48  ;;  %s290_s22 = smov 12 }
  0x18   :  { %v270_v58 = vsel %vm65_vm0, %v760_v56, %v759_v55  ;;  %v761_v59 = vld [vmem:[%s1498_s0 + $0xd] ss:$16 sm:%s272_s17]   ;;  %213 = vrot.lane.b32.xlu0 %v212_v57, %s858_s23  ;;  %s287_s17 = smov 3  ;;  %s295_s24 = smov 48 }
  0x19   :  { %v762_v60 = vld [vmem:[%s1498_s0 + $0xd] ss:$16 sm:%s277_s18]   ;;  %v275_v61 = vsel %vm70_vm1, %v761_v59, %v270_v58  ;;  %v756_v0 = vld [vmem:[%s1498_s0 + $0x5] ss:$16 sm:%s245_s27]   ;;  %s300_s29 = smov 192  ;;  %s355_s3 = smov 3 }
  0x1a   :  { %v280_v63 = vsel %vm75_vm2, %v762_v60, %v275_v61  ;;  %v757_v1 = vld [vmem:[%s1498_s0 + $0x5] ss:$16 sm:%s250_s28]   ;;  %v248_v2 = vsel %vm65_vm0, %v756_v0, %v755_v62  ;;  %v769_v5 = vld [vmem:[%s1498_s0 + $0x8d] ss:$16 sm:%s310_s7]   ;;  %s363_s9 = smov 48  ;;  %s368_s10 = smov 192 }
  0x1b   :  { %281 = vrot.lane.b32.xlu1 %v280_v63, %s859_s14  ;;  %v758_v3 = vld [vmem:[%s1498_s0 + $0x5] ss:$16 sm:%s255_s4]   ;;  %v253_v4 = vsel %vm70_vm1, %v757_v1, %v248_v2  ;;  %s358_s4 = smov 12  ;;  %s336_s18 = smov 12 }
  0x1c   :  { %v770_v6 = vld [vmem:[%s1498_s0 + $0x8d] ss:$16 sm:%s313_s8]   ;;  %v258_v7 = vsel %vm75_vm2, %v758_v3, %v253_v4  ;;  %v764_v12 = vld [vmem:[%s1498_s0 + $0x85] ss:$16 sm:%s287_s17]   ;;  %s341_s19 = smov 48  ;;  %s346_s25 = smov 192 }
  0x1d   :  { %v316_v8 = vsel %vm65_vm0, %v770_v6, %v769_v5  ;;  %v771_v9 = vld [vmem:[%s1498_s0 + $0x8d] ss:$16 sm:%s318_s13]   ;;  %259 = vrot.lane.b32.xlu0 %v258_v7, %s859_s14  ;;  %s333_s13 = smov 3  ;;  %s401_s27 = smov 3 }
  0x1e   :  { %v772_v10 = vld [vmem:[%s1498_s0 + $0x8d] ss:$16 sm:%s323_s6]   ;;  %v321_v11 = vsel %vm70_vm1, %v771_v9, %v316_v8  ;;  %v765_v14 = vld [vmem:[%s1498_s0 + $0x85] ss:$16 sm:%s290_s22]   ;;  %s404_s28 = smov 12  ;;  %s414_s23 = smov 192 }
  0x1f   :  { %v326_v13 = vsel %vm75_vm2, %v772_v10, %v321_v11  ;;  %v766_v15 = vld [vmem:[%s1498_s0 + $0x85] ss:$16 sm:%s295_s24]   ;;  %v293_v16 = vsel %vm65_vm0, %v765_v14, %v764_v12  ;;  %v778_v19 = vld [vmem:[%s1498_s0 + $0xc] ss:$16 sm:%s355_s3]   ;;  %s860_s5 = smov 64   ;;  %s381_s6 = smov 12 }
  0x20   :  { %327 = vrot.lane.b32.xlu1 %v326_v13, %s859_s14  ;;  %v767_v17 = vld [vmem:[%s1498_s0 + $0x85] ss:$16 sm:%s300_s29]   ;;  %v298_v18 = vsel %vm70_vm1, %v766_v15, %v293_v16  ;;  %s386_s15 = smov 48  ;;  %s391_s20 = smov 192 }
  0x21   :  { %v779_v20 = vld [vmem:[%s1498_s0 + $0xc] ss:$16 sm:%s358_s4]   ;;  %v303_v21 = vsel %vm75_vm2, %v767_v17, %v298_v18  ;;  %v774_v26 = vld [vmem:[%s1498_s0 + $0x4] ss:$16 sm:%s333_s13]   ;;  %s409_s4 = smov 48  ;;  %s446_s24 = smov 3 }
  0x22   :  { %v361_v22 = vsel %vm65_vm0, %v779_v20, %v778_v19  ;;  %v780_v23 = vld [vmem:[%s1498_s0 + $0xc] ss:$16 sm:%s363_s9]   ;;  %304 = vrot.lane.b32.xlu0 %v303_v21, %s859_s14  ;;  %s378_s9 = smov 3  ;;  %s454_s29 = smov 48 }
  0x23   :  { %v781_v24 = vld [vmem:[%s1498_s0 + $0xc] ss:$16 sm:%s368_s10]   ;;  %v366_v25 = vsel %vm70_vm1, %v780_v23, %v361_v22  ;;  %v775_v28 = vld [vmem:[%s1498_s0 + $0x4] ss:$16 sm:%s336_s18]   ;;  %s459_s30 = smov 192  ;;  %s427_s10 = smov 12 }
  0x24   :  { %v371_v27 = vsel %vm75_vm2, %v781_v24, %v366_v25  ;;  %v776_v29 = vld [vmem:[%s1498_s0 + $0x4] ss:$16 sm:%s341_s19]   ;;  %v339_v30 = vsel %vm65_vm0, %v775_v28, %v774_v26  ;;  %v788_v33 = vld [vmem:[%s1498_s0 + $0x8c] ss:$16 sm:%s401_s27]   ;;  %s432_s11 = smov 48  ;;  %s437_s16 = smov 192 }
  0x25   :  { %372 = vrot.lane.b32.xlu1 %v371_v27, %s860_s5  ;;  %v777_v31 = vld [vmem:[%s1498_s0 + $0x4] ss:$16 sm:%s346_s25]   ;;  %v344_v32 = vsel %vm70_vm1, %v776_v29, %v339_v30  ;;  %s449_s25 = smov 12  ;;  %s492_s18 = smov 3 }
  0x26   :  { %v789_v34 = vld [vmem:[%s1498_s0 + $0x8c] ss:$16 sm:%s404_s28]   ;;  %v349_v35 = vsel %vm75_vm2, %v777_v31, %v344_v32  ;;  %v783_v40 = vld [vmem:[%s1498_s0 + $0x84] ss:$16 sm:%s378_s9]   ;;  %s495_s19 = smov 12  ;;  %s505_s14 = smov 192 }
  0x27   :  { %v407_v36 = vsel %vm65_vm0, %v789_v34, %v788_v33  ;;  %v790_v37 = vld [vmem:[%s1498_s0 + $0x8c] ss:$16 sm:%s409_s4]   ;;  %350 = vrot.lane.b32.xlu0 %v349_v35, %s860_s5  ;;  %s424_s4 = smov 3  ;;  %s861_s26 = smov 48  }
  0x28   :  { %v791_v38 = vld [vmem:[%s1498_s0 + $0x8c] ss:$16 sm:%s414_s23]   ;;  %v412_v39 = vsel %vm70_vm1, %v790_v37, %v407_v36  ;;  %v784_v42 = vld [vmem:[%s1498_s0 + $0x84] ss:$16 sm:%s381_s6]   ;;  %s472_s23 = smov 12  ;;  %s477_s7 = smov 48 }
  0x29   :  { %v417_v41 = vsel %vm75_vm2, %v791_v38, %v412_v39  ;;  %v785_v43 = vld [vmem:[%s1498_s0 + $0x84] ss:$16 sm:%s386_s15]   ;;  %v384_v44 = vsel %vm65_vm0, %v784_v42, %v783_v40  ;;  %v797_v47 = vld [vmem:[%s1498_s0 + $0xb] ss:$16 sm:%s446_s24]   ;;  %s482_s12 = smov 192  ;;  %s537_s15 = smov 3 }
  0x2a   :  { %418 = vrot.lane.b32.xlu1 %v417_v41, %s860_s5  ;;  %v786_v45 = vld [vmem:[%s1498_s0 + $0x84] ss:$16 sm:%s391_s20]   ;;  %v389_v46 = vsel %vm70_vm1, %v785_v43, %v384_v44  ;;  %s545_s20 = smov 48  ;;  %s550_s21 = smov 192 }
  0x2b   :  { %v798_v48 = vld [vmem:[%s1498_s0 + $0xb] ss:$16 sm:%s449_s25]   ;;  %v394_v49 = vsel %vm75_vm2, %v786_v45, %v389_v46  ;;  %v793_v54 = vld [vmem:[%s1498_s0 + $0x3] ss:$16 sm:%s424_s4]   ;;  %s500_s25 = smov 48  ;;  %s523_s2 = smov 48 }
  0x2c   :  { %v452_v50 = vsel %vm65_vm0, %v798_v48, %v797_v47  ;;  %v799_v51 = vld [vmem:[%s1498_s0 + $0xb] ss:$16 sm:%s454_s29]   ;;  %395 = vrot.lane.b32.xlu0 %v394_v49, %s860_s5  ;;  %s469_s29 = smov 3  ;;  %s528_s8 = smov 192 }
  0x2d   :  { %v800_v52 = vld [vmem:[%s1498_s0 + $0xb] ss:$16 sm:%s459_s30]   ;;  %v457_v53 = vsel %vm70_vm1, %v799_v51, %v452_v50  ;;  %v794_v56 = vld [vmem:[%s1498_s0 + $0x3] ss:$16 sm:%s427_s10]   ;;  %s518_s30 = smov 12  ;;  %s583_s10 = smov 3 }
  0x2e   :  { %v462_v55 = vsel %vm75_vm2, %v800_v52, %v457_v53  ;;  %v795_v57 = vld [vmem:[%s1498_s0 + $0x3] ss:$16 sm:%s432_s11]   ;;  %v430_v58 = vsel %vm65_vm0, %v794_v56, %v793_v54  ;;  %v807_v61 = vld [vmem:[%s1498_s0 + $0x8b] ss:$16 sm:%s492_s18]   ;;  %s586_s11 = smov 12  ;;  %s596_s5 = smov 192 }
  0x2f   :  { %463 = vrot.lane.b32.xlu1 %v462_v55, %s861_s26  ;;  %v796_v59 = vld [vmem:[%s1498_s0 + $0x3] ss:$16 sm:%s437_s16]   ;;  %v435_v60 = vsel %vm70_vm1, %v795_v57, %v430_v58  ;;  %s540_s16 = smov 12  ;;  %s862_s17 = smov 32  }
  0x30   :  { %v808_v62 = vld [vmem:[%s1498_s0 + $0x8b] ss:$16 sm:%s495_s19]   ;;  %v440_v63 = vsel %vm75_vm2, %v796_v59, %v435_v60  ;;  %v802_v4 = vld [vmem:[%s1498_s0 + $0x83] ss:$16 sm:%s469_s29]   ;;  %s568_s27 = smov 48  ;;  %s573_s3 = smov 192 }
  0x31   :  { %v498_v0 = vsel %vm65_vm0, %v808_v62, %v807_v61  ;;  %v809_v1 = vld [vmem:[%s1498_s0 + $0x8b] ss:$16 sm:%s500_s25]   ;;  %441 = vrot.lane.b32.xlu0 %v440_v63, %s861_s26  ;;  %s515_s25 = smov 3  ;;  %s641_s13 = smov 192 }
  0x32   :  { %v810_v2 = vld [vmem:[%s1498_s0 + $0x8b] ss:$16 sm:%s505_s14]   ;;  %v503_v3 = vsel %vm70_vm1, %v809_v1, %v498_v0  ;;  %v803_v6 = vld [vmem:[%s1498_s0 + $0x83] ss:$16 sm:%s472_s23]   ;;  %s563_s14 = smov 12  ;;  %s609_s24 = smov 12 }
  0x33   :  { %v508_v5 = vsel %vm75_vm2, %v810_v2, %v503_v3  ;;  %v804_v7 = vld [vmem:[%s1498_s0 + $0x83] ss:$16 sm:%s477_s7]   ;;  %v475_v8 = vsel %vm65_vm0, %v803_v6, %v802_v4  ;;  %v816_v11 = vld [vmem:[%s1498_s0 + $0xa] ss:$16 sm:%s537_s15]   ;;  %s628_s7 = smov 3  ;;  %s677_s4 = smov 12 }
  0x34   :  { %509 = vrot.lane.b32.xlu1 %v508_v5, %s861_s26  ;;  %v805_v9 = vld [vmem:[%s1498_s0 + $0x83] ss:$16 sm:%s482_s12]   ;;  %v480_v10 = vsel %vm70_vm1, %v804_v7, %v475_v8  ;;  %s636_s12 = smov 48  ;;  %v2_v38 = vld [vmem:[%s1498_s0] ss:$8 sm:$0xf]  }
  0x35   :  { %v817_v12 = vld [vmem:[%s1498_s0 + $0xa] ss:$16 sm:%s540_s16]   ;;  %v485_v13 = vsel %vm75_vm2, %v805_v9, %v480_v10  ;;  %v812_v18 = vld [vmem:[%s1498_s0 + $0x2] ss:$16 sm:%s515_s25]   ;;  %s591_s16 = smov 48  ;;  %s614_s25 = smov 48 }
  0x36   :  { %v543_v14 = vsel %vm65_vm0, %v817_v12, %v816_v11  ;;  %v818_v15 = vld [vmem:[%s1498_s0 + $0xa] ss:$16 sm:%s545_s20]   ;;  %486 = vrot.lane.b32.xlu0 %v485_v13, %s861_s26  ;;  %s560_s20 = smov 3  ;;  %v3_v48 = vld [vmem:[%s1498_s0] ss:$8 sm:$0xf0]  }
  0x37   :  { %v819_v16 = vld [vmem:[%s1498_s0 + $0xa] ss:$16 sm:%s550_s21]   ;;  %v548_v17 = vsel %vm70_vm1, %v818_v15, %v543_v14  ;;  %v813_v20 = vld [vmem:[%s1498_s0 + $0x2] ss:$16 sm:%s518_s30]   ;;  %s619_s30 = smov 192  ;;  %v5_v52 = vsel %vm4_vm3, %v3_v48, %v2_v38  ;;  %s664_s26 = smov 192 }
  0x38   :  { %v553_v19 = vsel %vm75_vm2, %v819_v16, %v548_v17  ;;  %v814_v21 = vld [vmem:[%s1498_s0 + $0x2] ss:$16 sm:%s523_s2]   ;;  %v521_v22 = vsel %vm65_vm0, %v813_v20, %v812_v18  ;;  %v826_v25 = vld [vmem:[%s1498_s0 + $0x8a] ss:$16 sm:%s583_s10]   ;;  %s674_s2 = smov 3 }
  0x39   :  { %554 = vrot.lane.b32.xlu1 %v553_v19, %s862_s17  ;;  %v815_v23 = vld [vmem:[%s1498_s0 + $0x2] ss:$16 sm:%s528_s8]   ;;  %v526_v24 = vsel %vm70_vm1, %v814_v21, %v521_v22  ;;  %s631_s8 = smov 12  ;;  %7 = vst.msk [vmem:[%s1499_s1] ss:$8 sm:$0x3] %vm6_vm4, %v5_v52  }
  0x3a   :  { %v827_v26 = vld [vmem:[%s1498_s0 + $0x8a] ss:$16 sm:%s586_s11]   ;;  %v531_v27 = vsel %vm75_vm2, %v815_v23, %v526_v24  ;;  %v821_v32 = vld [vmem:[%s1498_s0 + $0x82] ss:$16 sm:%s560_s20]   ;;  %s682_s11 = smov 48 }
  0x3b   :  { %v589_v28 = vsel %vm65_vm0, %v827_v26, %v826_v25  ;;  %v828_v29 = vld [vmem:[%s1498_s0 + $0x8a] ss:$16 sm:%s591_s16]   ;;  %532 = vrot.lane.b32.xlu0 %v531_v27, %s862_s17  ;;  %s606_s16 = smov 3  ;;  %696 = vst.msk [vmem:[%s1499_s1 - $0xf] ss:$8 sm:$0xc] %vm6_vm4, %v5_v52  }
  0x3c   :  { %v829_v30 = vld [vmem:[%s1498_s0 + $0x8a] ss:$16 sm:%s596_s5]   ;;  %v594_v31 = vsel %vm70_vm1, %v828_v29, %v589_v28  ;;  %v822_v34 = vld [vmem:[%s1498_s0 + $0x82] ss:$16 sm:%s563_s14]  }
  0x3d   :  { %v599_v33 = vsel %vm75_vm2, %v829_v30, %v594_v31  ;;  %v823_v35 = vld [vmem:[%s1498_s0 + $0x82] ss:$16 sm:%s568_s27]   ;;  %v566_v36 = vsel %vm65_vm0, %v822_v34, %v821_v32  ;;  %v835_v40 = vld [vmem:[%s1498_s0 + $0x9] ss:$16 sm:%s628_s7]  }
  0x3e   :  { %600 = vrot.lane.b32.xlu1 %v599_v33, %s862_s17  ;;  %v824_v37 = vld [vmem:[%s1498_s0 + $0x82] ss:$16 sm:%s573_s3]   ;;  %v571_v39 = vsel %vm70_vm1, %v823_v35, %v566_v36  ;;  %697 = vst.msk [vmem:[%s1499_s1 - $0x1e] ss:$8 sm:$0x30] %vm6_vm4, %v5_v52   ;;  %s659_s3 = smov 48 }
  0x3f   :  { %v836_v41 = vld [vmem:[%s1498_s0 + $0x9] ss:$16 sm:%s631_s8]   ;;  %v576_v42 = vsel %vm75_vm2, %v824_v37, %v571_v39  ;;  %v831_v47 = vld [vmem:[%s1498_s0 + $0x1] ss:$16 sm:%s606_s16]   ;;  %s651_s16 = smov 3 }
  0x40   :  { %v634_v43 = vsel %vm65_vm0, %v836_v41, %v835_v40  ;;  %v837_v44 = vld [vmem:[%s1498_s0 + $0x9] ss:$16 sm:%s636_s12]   ;;  %577 = vrot.lane.b32.xlu0 %v576_v42, %s862_s17  ;;  %s687_s12 = smov 192  ;;  %698 = vst.msk [vmem:[%s1499_s1 - $0x2d] ss:$8 sm:$0xc0] %vm6_vm4, %v5_v52  }
  0x41   :  { %v838_v45 = vld [vmem:[%s1498_s0 + $0x9] ss:$16 sm:%s641_s13]   ;;  %v639_v46 = vsel %vm70_vm1, %v837_v44, %v634_v43  ;;  %v832_v50 = vld [vmem:[%s1498_s0 + $0x1] ss:$16 sm:%s609_s24]   ;;  %s863_s13 = smov 16   ;;  %s654_s17 = smov 12 }
  0x42   :  { %v644_v49 = vsel %vm75_vm2, %v838_v45, %v639_v46  ;;  %v833_v51 = vld [vmem:[%s1498_s0 + $0x1] ss:$16 sm:%s614_s25]   ;;  %v612_v53 = vsel %vm65_vm0, %v832_v50, %v831_v47  ;;  %v699_v55 = vld [vmem:[%s1498_s0 + $0x40] ss:$8 sm:$0xf]  }
  0x43   :  { %645 = vrot.lane.b32.xlu1 %v644_v49, %s863_s13  ;;  %v834_v54 = vld [vmem:[%s1498_s0 + $0x1] ss:$16 sm:%s619_s30]   ;;  %v617_v56 = vsel %vm70_vm1, %v833_v51, %v612_v53  ;;  %v700_v1 = vld [vmem:[%s1498_s0 + $0x40] ss:$8 sm:$0xf0]  }
  0x44   :  { %v845_v57 = vld [vmem:[%s1498_s0 + $0x89] ss:$16 sm:%s674_s2]   ;;  %v622_v59 = vsel %vm75_vm2, %v834_v54, %v617_v56  ;;  %v840_v0 = vld [vmem:[%s1498_s0 + $0x81] ss:$16 sm:%s651_s16]   ;;  %v19_v5 = vsel %vm4_vm3, %v700_v1, %v699_v55 }
  0x45   :  { %v846_v58 = vld [vmem:[%s1498_s0 + $0x89] ss:$16 sm:%s677_s4]   ;;  %623 = vrot.lane.b32.xlu0 %v622_v59, %s863_s13  ;;  %701 = vst.msk [vmem:[%s1499_s1 + $0x4] ss:$8 sm:$0x3] %vm6_vm4, %v19_v5  }
  0x46   :  { %v680_v60 = vsel %vm65_vm0, %v846_v58, %v845_v57  ;;  %v847_v61 = vld [vmem:[%s1498_s0 + $0x89] ss:$16 sm:%s682_s11]   ;;  %v841_v3 = vld [vmem:[%s1498_s0 + $0x81] ss:$16 sm:%s654_s17]  }
  0x47   :  { %v848_v62 = vld [vmem:[%s1498_s0 + $0x89] ss:$16 sm:%s687_s12]   ;;  %v685_v63 = vsel %vm70_vm1, %v847_v61, %v680_v60  ;;  %v842_v4 = vld [vmem:[%s1498_s0 + $0x81] ss:$16 sm:%s659_s3]   ;;  %v657_v6 = vsel %vm65_vm0, %v841_v3, %v840_v0 }
  0x48   :  { %v690_v2 = vsel %vm75_vm2, %v848_v62, %v685_v63  ;;  %v843_v7 = vld [vmem:[%s1498_s0 + $0x81] ss:$16 sm:%s664_s26]   ;;  %702 = vst.msk [vmem:[%s1499_s1 - $0xb] ss:$8 sm:$0xc] %vm6_vm4, %v19_v5   ;;  %v662_v9 = vsel %vm70_vm1, %v842_v4, %v657_v6 }
  0x49   :  { %691 = vrot.lane.b32.xlu1 %v690_v2, %s863_s13  ;;  %703 = vst.msk [vmem:[%s1499_s1 - $0x1a] ss:$8 sm:$0x30] %vm6_vm4, %v19_v5   ;;  %704 = vst.msk [vmem:[%s1499_s1 - $0x29] ss:$8 sm:$0xc0] %vm6_vm4, %v19_v5   ;;  %v667_v12 = vsel %vm75_vm2, %v843_v7, %v662_v9 }
  0x4a   :  { %v705_v8 = vld [vmem:[%s1498_s0 + $0x80] ss:$8 sm:$0xf]   ;;  %668 = vrot.lane.b32.xlu0 %v667_v12, %s863_s13 }
  0x4b   :  { %v706_v10 = vld [vmem:[%s1498_s0 + $0x80] ss:$8 sm:$0xf0]  }
  0x4c   :  { %v711_v11 = vld [vmem:[%s1498_s0 + $0xc0] ss:$8 sm:$0xf]   ;;  %v34_v13 = vsel %vm4_vm3, %v706_v10, %v705_v8 }
  0x4d   :  { %v712_v14 = vld [vmem:[%s1498_s0 + $0xc0] ss:$8 sm:$0xf0]   ;;  %707 = vst.msk [vmem:[%s1499_s1 + $0x10] ss:$8 sm:$0x3] %vm6_vm4, %v34_v13  }
  0x4e   :  { %708 = vst.msk [vmem:[%s1499_s1 + $0x1] ss:$8 sm:$0xc] %vm6_vm4, %v34_v13   ;;  %709 = vst.msk [vmem:[%s1499_s1 - $0xe] ss:$8 sm:$0x30] %vm6_vm4, %v34_v13   ;;  %v49_v15 = vsel %vm4_vm3, %v712_v14, %v711_v11 }
  0x4f   :  { %710 = vst.msk [vmem:[%s1499_s1 - $0x1d] ss:$8 sm:$0xc0] %vm6_vm4, %v34_v13   ;;  %713 = vst.msk [vmem:[%s1499_s1 + $0x14] ss:$8 sm:$0x3] %vm6_vm4, %v49_v15  }
  0x50   :  { %714 = vst.msk [vmem:[%s1499_s1 + $0x5] ss:$8 sm:$0xc] %vm6_vm4, %v49_v15   ;;  %715 = vst.msk [vmem:[%s1499_s1 - $0xa] ss:$8 sm:$0x30] %vm6_vm4, %v49_v15  }
  0x51   :  { %716 = vst.msk [vmem:[%s1499_s1 - $0x19] ss:$8 sm:$0xc0] %vm6_vm4, %v49_v15  }
  0x78   :  { %v123_v16 = vpop.permute.xlu1 %122  }
  0x79   :  { %730 = vst.msk [vmem:[%s1499_s1 + $0x10] sm:$0xff] %vm79_vm5, %v123_v16  }
  0x7c   :  { %v78_v17 = vpop.permute.xlu0 %77  }
  0x7d   :  { %80 = vst.msk [vmem:[%s1499_s1] sm:$0xff] %vm79_vm5, %v78_v17   ;;  %v146_v18 = vpop.permute.xlu1 %145  }
  0x7e   :  { %735 = vst.msk [vmem:[%s1499_s1 + $0x18] sm:$0xff] %vm79_vm5, %v146_v18  }
  0x81   :  { %v100_v19 = vpop.permute.xlu0 %99  }
  0x82   :  { %725 = vst.msk [vmem:[%s1499_s1 + $0x8] sm:$0xff] %vm79_vm5, %v100_v19   ;;  %v191_v20 = vpop.permute.xlu1 %190  }
  0x83   :  { %744 = vst.msk [vmem:[%s1499_s1 + $0x8] sm:$0xff] %vm170_vm6, %v191_v20  }
  0x85   :  { %v169_v21 = vpop.permute.xlu0 %168  }
  0x86   :  { %171 = vst.msk [vmem:[%s1499_s1] sm:$0xff] %vm170_vm6, %v169_v21  }
  0x88   :  { %v237_v22 = vpop.permute.xlu1 %236  }
  0x89   :  { %754 = vst.msk [vmem:[%s1499_s1 + $0x18] sm:$0xff] %vm170_vm6, %v237_v22  }
  0x8a   :  { %v214_v23 = vpop.permute.xlu0 %213  }
  0x8b   :  { %749 = vst.msk [vmem:[%s1499_s1 + $0x10] sm:$0xff] %vm170_vm6, %v214_v23  }
  0x8d   :  { %v282_v24 = vpop.permute.xlu1 %281  }
  0x8e   :  { %763 = vst.msk [vmem:[%s1499_s1 + $0x8] sm:$0xff] %vm261_vm7, %v282_v24  }
  0x8f   :  { %v260_v25 = vpop.permute.xlu0 %259  }
  0x90   :  { %262 = vst.msk [vmem:[%s1499_s1] sm:$0xff] %vm261_vm7, %v260_v25  }
  0x92   :  { %v328_v26 = vpop.permute.xlu1 %327  }
  0x93   :  { %773 = vst.msk [vmem:[%s1499_s1 + $0x18] sm:$0xff] %vm261_vm7, %v328_v26  }
  0x94   :  { %v305_v27 = vpop.permute.xlu0 %304  }
  0x95   :  { %768 = vst.msk [vmem:[%s1499_s1 + $0x10] sm:$0xff] %vm261_vm7, %v305_v27  }
  0x97   :  { %v373_v28 = vpop.permute.xlu1 %372  }
  0x98   :  { %782 = vst.msk [vmem:[%s1499_s1 + $0x8] sm:$0xff] %vm352_vm8, %v373_v28  }
  0x99   :  { %v351_v29 = vpop.permute.xlu0 %350  }
  0x9a   :  { %353 = vst.msk [vmem:[%s1499_s1] sm:$0xff] %vm352_vm8, %v351_v29  }
  0x9c   :  { %v419_v30 = vpop.permute.xlu1 %418  }
  0x9d   :  { %792 = vst.msk [vmem:[%s1499_s1 + $0x18] sm:$0xff] %vm352_vm8, %v419_v30  }
  0x9e   :  { %v396_v31 = vpop.permute.xlu0 %395  }
  0x9f   :  { %787 = vst.msk [vmem:[%s1499_s1 + $0x10] sm:$0xff] %vm352_vm8, %v396_v31  }
  0xa1   :  { %v464_v32 = vpop.permute.xlu1 %463  }
  0xa2   :  { %801 = vst.msk [vmem:[%s1499_s1 + $0x8] sm:$0xff] %vm443_vm9, %v464_v32  }
  0xa3   :  { %v442_v33 = vpop.permute.xlu0 %441  }
  0xa4   :  { %444 = vst.msk [vmem:[%s1499_s1] sm:$0xff] %vm443_vm9, %v442_v33  }
  0xa6   :  { %v510_v34 = vpop.permute.xlu1 %509  }
  0xa7   :  { %811 = vst.msk [vmem:[%s1499_s1 + $0x18] sm:$0xff] %vm443_vm9, %v510_v34  }
  0xa8   :  { %v487_v35 = vpop.permute.xlu0 %486  }
  0xa9   :  { %806 = vst.msk [vmem:[%s1499_s1 + $0x10] sm:$0xff] %vm443_vm9, %v487_v35  }
  0xab   :  { %v555_v36 = vpop.permute.xlu1 %554  }
  0xac   :  { %820 = vst.msk [vmem:[%s1499_s1 + $0x8] sm:$0xff] %vm534_vm10, %v555_v36  }
  0xad   :  { %v533_v37 = vpop.permute.xlu0 %532  }
  0xae   :  { %535 = vst.msk [vmem:[%s1499_s1] sm:$0xff] %vm534_vm10, %v533_v37  }
  0xb0   :  { %v601_v38 = vpop.permute.xlu1 %600  }
  0xb1   :  { %830 = vst.msk [vmem:[%s1499_s1 + $0x18] sm:$0xff] %vm534_vm10, %v601_v38  }
  0xb2   :  { %v578_v39 = vpop.permute.xlu0 %577  }
  0xb3   :  { %825 = vst.msk [vmem:[%s1499_s1 + $0x10] sm:$0xff] %vm534_vm10, %v578_v39  }
  0xb5   :  { %v646_v40 = vpop.permute.xlu1 %645  }
  0xb6   :  { %839 = vst.msk [vmem:[%s1499_s1 + $0x8] sm:$0xff] %vm625_vm11, %v646_v40  }
  0xb7   :  { %v624_v41 = vpop.permute.xlu0 %623  }
  0xb8   :  { %626 = vst.msk [vmem:[%s1499_s1] sm:$0xff] %vm625_vm11, %v624_v41  }
  0xbb   :  { %v692_v42 = vpop.permute.xlu1 %691  }
  0xbc   :  { %849 = vst.msk [vmem:[%s1499_s1 + $0x18] sm:$0xff] %vm625_vm11, %v692_v42   ;;  %v669_v43 = vpop.permute.xlu0 %668  }
  0xbd   :  { %844 = vst.msk [vmem:[%s1499_s1 + $0x10] sm:$0xff] %vm625_vm11, %v669_v43  }

// kernel: vae_forward.12
= control target key start
LH: loop header
LB: loop body
LE: loop exit
PB: predicated region body
PF: predicated region fallthrough
CT: control target
= control target key end

     0   :  { %vm70_vm0 = vcmask 523264   ;;  %v585_v9 = vmov 0.0|0.0   ;;  %vm586_vm1 = vmmov 0   ;;  %v587_v10 = vmov 0.0   ;;  %s719_s1 = inlined_call_operand.vmem [shape: bf16[64,16], index: 1, kind: input, shape index: {}]   ;;  %s720_s0 = inlined_call_operand.vmem [shape: bf16[32,64], index: 0, kind: input, shape index: {}]   ;;  %s721_s2 = inlined_call_operand.vmem [shape: f32[16,16], index: 2, kind: input, shape index: {}]   ;;  %s722_s3 = inlined_call_operand.vmem [shape: f32[16,16], index: 3, kind: input, shape index: {}]   ;;  %s723_s4 = inlined_call_operand.vmem [shape: f32[1,16], index: 4, kind: input, shape index: {}]   ;;  %s724_s5 = inlined_call_operand.vmem [shape: f32[1,16], index: 5, kind: input, shape index: {}]   ;;  %s725_s6 = inlined_call_operand.vmem [shape: f32[32,16], index: 6, kind: output, shape index: {}]  }
   0x1   :  { %v577_v0 = vld [vmem:[%s719_s1] sm:$0xff]   ;;  %v578_v1 = vld [vmem:[%s719_s1 + $0x8] sm:$0xff]   ;;  %v579_v2 = vld [vmem:[%s719_s1 + $0x10] sm:$0xff]   ;;  %562 = vmatprep.subr.bf16.mxu1 %v585_v9  ;;  %538 = vmatprep.mubr.msk.f32.mxu1 %vm586_vm1, %v587_v10  ;;  %vm126_vm2 = vcmask 130048   ;;  %v464_v63 = vlaneseq }
   0x2   :  { %522 = vmatprep.subr.bf16.mxu0 %v577_v0  ;;  %v581_v3 = vld [vmem:[%s720_s0] sm:$0xff]   ;;  %v580_v4 = vld [vmem:[%s719_s1 + $0x18] sm:$0xff]   ;;  %v582_v5 = vld [vmem:[%s720_s0 + $0x8] sm:$0xff]  }
   0x3   :  { %523 = vmatpush3.bf16.msra.mxu0 %v577_v0  ;;  %530 = vmatprep.mubr.msk.bf16.mxu0 %vm70_vm0, %v581_v3  ;;  %v157_v6 = vld [vmem:[%s721_s2] sm:$0xff]  ;;  %v158_v7 = vld [vmem:[%s721_s2 + $0x8] sm:$0xff]  ;;  %v465_v0 = vshrl.u32 %v464_v63, 7 }
   0x4   :  { %524 = vmatprep.subr.bf16.mxu0 %v578_v1  ;;  %v563_v8 = vpack.c.bf16 %v158_v7, %v157_v6  ;;  %v316_v45 = vld [vmem:[%s722_s3] sm:$0xff]  ;;  %v317_v46 = vld [vmem:[%s722_s3 + $0x8] sm:$0xff] }
   0x5   :  { %v569_v47 = vpack.c.bf16 %v317_v46, %v316_v45  ;;  %v309_v57 = vld [vmem:[%s723_s4] sm:$0x1] }
   0x6   :  { %564 = vmatpush3.bf16.msra.mxu1 %v563_v8  ;;  %v313_v60 = vld [vmem:[%s724_s5] sm:$0x1] }
   0x7   :  { %525 = vmatpush3.bf16.msra.mxu0 %v578_v1  ;;  %565 = vmatprep.subr.bf16.mxu1 %v585_v9  ;;  %v466_v1 = vsub.s32 0, %v465_v0 }
   0x8   :  { %526 = vmatprep.subr.bf16.mxu0 %v579_v2 }
   0xb   :  { %527 = vmatpush3.bf16.msra.mxu0 %v579_v2 }
   0xc   :  { %528 = vmatprep.subr.bf16.mxu0 %v580_v4 }
   0xf   :  { %529 = vmatpush3.bf16.msra.mxu0 %v580_v4 }
  0x12   :  { %531 = vmatmul.mubr.msk.bf16.vlgmr.msra.gmra.mrb[0].mxu0 %vm70_vm0, %v582_v5 }
  0xe5   :  { %v649_v11 = vpop.f32.mrb[0].mxu0 }
  0xe6   :  { %v651_v12 = vpop.f32.mrb[1].mxu0  ;;  %v142_v16 = vmul.f32 %v649_v11, %v649_v11  ;;  %v130_v21 = vsel %vm126_vm2, %v649_v11, 0.0 }
  0xe7   :  { %v140_v13 = vmul.f32 %v651_v12, %v651_v12  ;;  %v655_v14 = vpop.f32.mrb[2].mxu0  ;;  %v127_v17 = vsel %vm126_vm2, %v651_v12, 0.0 }
  0xe8   :  { %v657_v15 = vpop.f32.mrb[3].mxu0  ;;  %v143_v23 = vmul.f32 %v655_v14, %v655_v14  ;;  %v147_v27 = vsel %vm126_vm2, %v142_v16, 0.0  ;;  %v132_v28 = vsel %vm126_vm2, %v655_v14, 0.0 }
  0xe9   :  { %v128_v18 = vsel %vm126_vm2, %v657_v15, 0.0  ;;  %v141_v19 = vmul.f32 %v657_v15, %v657_v15  ;;  %v144_v22 = vsel %vm126_vm2, %v140_v13, 0.0 }
  0xea   :  { %v129_v20 = vadd.f32 %v128_v18, %v127_v17  ;;  %v149_v31 = vsel %vm126_vm2, %v143_v23, 0.0 }
  0xeb   :  { %v145_v24 = vsel %vm126_vm2, %v141_v19, 0.0 }
  0xec   :  { %v131_v25 = vadd.f32 %v130_v21, %v129_v20  ;;  %v146_v26 = vadd.f32 %v145_v24, %v144_v22 }
  0xee   :  { %v133_v29 = vadd.f32 %v132_v28, %v131_v25  ;;  %v148_v30 = vadd.f32 %v147_v27, %v146_v26 }
  0xf0   :  { %v134_v32 = vrot.slane %v133_v29, 4  ;;  %v150_v33 = vadd.f32 %v149_v31, %v148_v30 }
  0xf2   :  { %v135_v34 = vadd.f32 %v134_v32, %v133_v29  ;;  %v151_v35 = vrot.slane %v150_v33, 4 }
  0xf4   :  { %v136_v36 = vrot.slane %v135_v34, 2  ;;  %v152_v37 = vadd.f32 %v151_v35, %v150_v33 }
  0xf6   :  { %v153_v38 = vrot.slane %v152_v37, 2  ;;  %v137_v39 = vadd.f32 %v136_v36, %v135_v34 }
  0xf8   :  { %v154_v40 = vadd.f32 %v153_v38, %v152_v37  ;;  %v138_v41 = vrot.slane %v137_v39, 1 }
  0xfa   :  { %v139_v42 = vadd.f32 %v138_v41, %v137_v39  ;;  %v155_v43 = vrot.slane %v154_v40, 1 }
  0xfc   :  { %539 = vmatmul.mubr.msk.f32.vlgmr.msra.gmra.mrb[0].mxu1 %vm126_vm2, %v139_v42  ;;  %v156_v44 = vadd.f32 %v155_v43, %v154_v40 }
  0xfd   :  { %567 = vmatpush3.bf16.msra.mxu1 %v563_v8  ;;  %545 = vmatprep.mubr.msk.f32.mxu1 %vm586_vm1, %v587_v10 }
  0xfe   :  { %568 = vmatprep.subr.bf16.mxu1 %v585_v9 }
 0x100   :  { %546 = vmatmul.mubr.msk.f32.vlgmr.msra.gmra.mrb[2].mxu1 %vm126_vm2, %v156_v44 }
 0x101   :  { %552 = vmatprep.mubr.msk.f32.mxu1 %vm586_vm1, %v587_v10  ;;  %570 = vmatpush3.bf16.msra.mxu1 %v569_v47 }
 0x102   :  { %571 = vmatprep.subr.bf16.mxu1 %v585_v9 }
 0x1cf   :  { %v228_v48 = vpop.f32.mrb[0].mxu1 }
 0x1d0   :  { %v305_v49 = vmul.f32 0.03125, %v228_v48  ;;  %v540_v50 = vpop.f32.mrb[1].mxu1 }
 0x1d2   :  { %v307_v52 = vmul.f32 %v305_v49, %v305_v49 }
 0x1d3   :  { %v301_v51 = vpop.f32.mrb[2].mxu1 }
 0x1d4   :  { %v306_v53 = vmul.f32 0.03125, %v301_v51  ;;  %v547_v54 = vpop.f32.mrb[3].mxu1 }
 0x1d6   :  { %v308_v55 = vsub.f32 %v306_v53, %v307_v52 }
 0x1d8   :  { %v310_v56 = vadd.f32 1e-05, %v308_v55 }
 0x1da   :  { %583 = vrsqrt.f32 %v310_v56 }
 0x1e4   :  { %v584_v58 = vpop.eup %583 }
 0x1e5   :  { %v312_v59 = vmul.f32 %v584_v58, %v309_v57 }
 0x1e7   :  { %553 = vmatmul.mubr.msk.f32.vlgmr.msra.gmra.mrb[4].mxu1 %vm126_vm2, %v312_v59  ;;  %v314_v61 = vmul.f32 %v312_v59, %v305_v49 }
 0x1e8   :  { %573 = vmatpush3.bf16.msra.mxu1 %v569_v47  ;;  %559 = vmatprep.mubr.msk.f32.mxu1 %vm586_vm1, %v587_v10 }
 0x1e9   :  { %v315_v62 = vsub.f32 %v313_v60, %v314_v61 }
 0x1eb   :  { %560 = vmatmul.mubr.msk.f32.vlgmr.msra.gmra.mrb[6].mxu1 %vm126_vm2, %v315_v62 }
 0x2ba   :  { %v387_v2 = vpop.f32.mrb[4].mxu1 }
 0x2bb   :  { %v467_v3 = vrot.slane %v387_v2, %v466_v1  ;;  %v554_v4 = vpop.f32.mrb[5].mxu1 }
 0x2bd   :  { %v468_v5 = vmul.f32 %v467_v3, %v651_v12  ;;  %v469_v6 = vmul.f32 %v467_v3, %v657_v15  ;;  %v470_v7 = vmul.f32 %v649_v11, %v467_v3  ;;  %v471_v8 = vmul.f32 %v655_v14, %v467_v3 }
 0x2be   :  { %v460_v9 = vpop.f32.mrb[6].mxu1 }
 0x2bf   :  { %v475_v13 = vrot.slane %v460_v9, %v466_v1  ;;  %v561_v10 = vpop.f32.mrb[7].mxu1 }
 0x2c1   :  { %v476_v16 = vadd.f32 %v475_v13, %v468_v5  ;;  %v477_v17 = vadd.f32 %v475_v13, %v469_v6  ;;  %v478_v18 = vadd.f32 %v475_v13, %v470_v7  ;;  %v479_v19 = vadd.f32 %v475_v13, %v471_v8 }
 0x2c3   :  { %v480_v20 = vmax.f32 %v476_v16, 0.0  ;;  %v481_v21 = vmax.f32 %v477_v17, 0.0  ;;  %v482_v22 = vmax.f32 %v478_v18, 0.0  ;;  %v483_v23 = vmax.f32 %v479_v19, 0.0 }
 0x2c5   :  { %484 = vst.msk [vmem:[%s725_s6] sm:$0xff] %vm126_vm2, %v480_v20  ;;  %485 = vst.msk [vmem:[%s725_s6 + $0x8] sm:$0xff] %vm126_vm2, %v481_v21 }
 0x2c6   :  { %486 = vst.msk [vmem:[%s725_s6 + $0x10] sm:$0xff] %vm126_vm2, %v482_v22  ;;  %487 = vst.msk [vmem:[%s725_s6 + $0x18] sm:$0xff] %vm126_vm2, %v483_v23 }

// kernel: tile.24
= control target key start
LH: loop header
LB: loop body
LE: loop exit
PB: predicated region body
PF: predicated region fallthrough
CT: control target
= control target key end

     0   :  { %vm162_vm0 = vcmask 1047556   ;;  %s398_s10 = smov 96   ;;  %vm164_vm1 = vcmask 261120   ;;  %s400_s21 = smov 32   ;;  %vm201_vm2 = vcmask 1048320   ;;  %vm244_vm3 = vcmask 785920   ;;  %s579_s0 = inlined_call_operand.vmem [shape: f32[4,32,32], index: 0, kind: input, shape index: {}]   ;;  %s580_s1 = inlined_call_operand.vmem [shape: f32[128,32], index: 1, kind: output, shape index: {}]  }
   0x1   :  { %v376_v0 = vld [vmem:[%s579_s0 + $0x1c] sm:$0xf]  ;;  %v377_v1 = vld [vmem:[%s579_s0 + $0x18] sm:$0xf]  ;;  %v378_v2 = vld [vmem:[%s579_s0 + $0x14] sm:$0xf] }
   0x2   :  { %128 = vst [vmem:[#allocation0 + $0x38] sm:$0xf] %v376_v0  ;;  %133 = vst [vmem:[#allocation0 + $0x30] sm:$0xf] %v377_v1  ;;  %v379_v3 = vld [vmem:[%s579_s0 + $0x10] sm:$0xf] }
   0x3   :  { %138 = vst [vmem:[#allocation0 + $0x28] sm:$0xf] %v378_v2  ;;  %v380_v4 = vld [vmem:[%s579_s0 + $0xc] sm:$0xf]  ;;  %v381_v5 = vld [vmem:[%s579_s0 + $0x8] sm:$0xf] }
   0x4   :  { %143 = vst [vmem:[#allocation0 + $0x20] sm:$0xf] %v379_v3  ;;  %148 = vst [vmem:[#allocation0 + $0x18] sm:$0xf] %v380_v4  ;;  %v382_v6 = vld [vmem:[%s579_s0 + $0x4] sm:$0xf] }
   0x5   :  { %153 = vst [vmem:[#allocation0 + $0x10] sm:$0xf] %v381_v5  ;;  %v158_v7 = vld [vmem:[%s579_s0] sm:$0xf]  ;;  %157 = vst [vmem:[#allocation0 + $0x8] sm:$0xf] %v382_v6 }
   0x6   :  { %159 = vst [vmem:[#allocation0] sm:$0xf] %v158_v7  ;;  %v360_v8 = vld [vmem:[%s579_s0 + $0x5c] sm:$0xf]  ;;  %v361_v9 = vld [vmem:[%s579_s0 + $0x58] sm:$0xf] }
   0x7   :  { %v362_v10 = vld [vmem:[%s579_s0 + $0x54] sm:$0xf]  ;;  %48 = vst [vmem:[#allocation0 + $0xb8] sm:$0xf] %v360_v8  ;;  %53 = vst [vmem:[#allocation0 + $0xb0] sm:$0xf] %v361_v9 }
   0x8   :  { %58 = vst [vmem:[#allocation0 + $0xa8] sm:$0xf] %v362_v10  ;;  %v363_v11 = vld [vmem:[%s579_s0 + $0x50] sm:$0xf]  ;;  %v364_v12 = vld [vmem:[%s579_s0 + $0x4c] sm:$0xf] }
   0x9   :  { %v365_v13 = vld [vmem:[%s579_s0 + $0x48] sm:$0xf]  ;;  %63 = vst [vmem:[#allocation0 + $0xa0] sm:$0xf] %v363_v11  ;;  %68 = vst [vmem:[#allocation0 + $0x98] sm:$0xf] %v364_v12 }
   0xa   :  { %73 = vst [vmem:[#allocation0 + $0x90] sm:$0xf] %v365_v13  ;;  %v366_v14 = vld [vmem:[%s579_s0 + $0x44] sm:$0xf]  ;;  %v367_v15 = vld [vmem:[%s579_s0 + $0x40] sm:$0xf] }
   0xb   :  { %v368_v16 = vld [vmem:[%s579_s0 + $0x3c] sm:$0xf]  ;;  %78 = vst [vmem:[#allocation0 + $0x88] sm:$0xf] %v366_v14  ;;  %83 = vst [vmem:[#allocation0 + $0x80] sm:$0xf] %v367_v15 }
   0xc   :  { %88 = vst [vmem:[#allocation0 + $0x78] sm:$0xf] %v368_v16  ;;  %v369_v17 = vld [vmem:[%s579_s0 + $0x38] sm:$0xf]  ;;  %v370_v18 = vld [vmem:[%s579_s0 + $0x34] sm:$0xf] }
   0xd   :  { %v371_v19 = vld [vmem:[%s579_s0 + $0x30] sm:$0xf]  ;;  %93 = vst [vmem:[#allocation0 + $0x70] sm:$0xf] %v369_v17  ;;  %98 = vst [vmem:[#allocation0 + $0x68] sm:$0xf] %v370_v18 }
   0xe   :  { %103 = vst [vmem:[#allocation0 + $0x60] sm:$0xf] %v371_v19  ;;  %v372_v20 = vld [vmem:[%s579_s0 + $0x2c] sm:$0xf]  ;;  %v373_v21 = vld [vmem:[%s579_s0 + $0x28] sm:$0xf] }
   0xf   :  { %v374_v22 = vld [vmem:[%s579_s0 + $0x24] sm:$0xf]  ;;  %108 = vst [vmem:[#allocation0 + $0x58] sm:$0xf] %v372_v20  ;;  %113 = vst [vmem:[#allocation0 + $0x50] sm:$0xf] %v373_v21 }
  0x10   :  { %118 = vst [vmem:[#allocation0 + $0x48] sm:$0xf] %v374_v22  ;;  %v375_v23 = vld [vmem:[%s579_s0 + $0x20] sm:$0xf]  ;;  %v352_v24 = vld [vmem:[%s579_s0 + $0x7c] sm:$0xf] }
  0x11   :  { %v353_v25 = vld [vmem:[%s579_s0 + $0x78] sm:$0xf]  ;;  %123 = vst [vmem:[#allocation0 + $0x40] sm:$0xf] %v375_v23  ;;  %8 = vst [vmem:[#allocation0 + $0xf8] sm:$0xf] %v352_v24 }
  0x12   :  { %v196_v26 = vld [vmem:[#allocation0 + $0x3] ss:$8 sm:$0xf0]   ;;  %13 = vst [vmem:[#allocation0 + $0xf0] sm:$0xf] %v353_v25  ;;  %vm287_vm4 = vcmask 523520  }
  0x13   :  { %v354_v27 = vld [vmem:[%s579_s0 + $0x74] sm:$0xf]  ;;  %v194_v28 = vld [vmem:[#allocation0 + $0x3] ss:$8 sm:$0xf]  }
  0x14   :  { %18 = vst [vmem:[#allocation0 + $0xe8] sm:$0xf] %v354_v27  ;;  %v355_v29 = vld [vmem:[%s579_s0 + $0x70] sm:$0xf]  ;;  %v198_v30 = vsel %vm162_vm0, %v196_v26, %v194_v28  ;;  %v356_v31 = vld [vmem:[%s579_s0 + $0x6c] sm:$0xf] }
  0x15   :  { %23 = vst [vmem:[#allocation0 + $0xe0] sm:$0xf] %v355_v29  ;;  %v357_v32 = vld [vmem:[%s579_s0 + $0x68] sm:$0xf]  ;;  %v358_v33 = vld [vmem:[%s579_s0 + $0x64] sm:$0xf]  ;;  %199 = vrot.lane.b32.xlu0 %v198_v30, %s398_s10 }
  0x16   :  { %v217_v34 = vld [vmem:[#allocation0 + $0x83] ss:$8 sm:$0xf0]   ;;  %28 = vst [vmem:[#allocation0 + $0xd8] sm:$0xf] %v356_v31 }
  0x17   :  { %33 = vst [vmem:[#allocation0 + $0xd0] sm:$0xf] %v357_v32  ;;  %38 = vst [vmem:[#allocation0 + $0xc8] sm:$0xf] %v358_v33  ;;  %v359_v35 = vld [vmem:[%s579_s0 + $0x60] sm:$0xf] }
  0x18   :  { %v215_v36 = vld [vmem:[#allocation0 + $0x83] ss:$8 sm:$0xf]   ;;  %43 = vst [vmem:[#allocation0 + $0xc0] sm:$0xf] %v359_v35  ;;  %s399_s0 = smov 64  }
  0x19   :  { %v219_v37 = vsel %vm162_vm0, %v217_v34, %v215_v36  ;;  %v206_v38 = vld [vmem:[#allocation0 + $0x43] ss:$8 sm:$0xf0]   ;;  %v237_v39 = vld [vmem:[#allocation0 + $0x2] ss:$8 sm:$0xf]  }
  0x1a   :  { %220 = vrot.lane.b32.xlu1 %v219_v37, %s398_s10  ;;  %v204_v40 = vld [vmem:[#allocation0 + $0x43] ss:$8 sm:$0xf]   ;;  %v239_v41 = vld [vmem:[#allocation0 + $0x2] ss:$8 sm:$0xf0]  }
  0x1b   :  { %v208_v42 = vsel %vm162_vm0, %v206_v38, %v204_v40  ;;  %v249_v44 = vld [vmem:[#allocation0 + $0x42] ss:$8 sm:$0xf0]   ;;  %v241_v45 = vsel %vm162_vm0, %v239_v41, %v237_v39  ;;  %v280_v52 = vld [vmem:[#allocation0 + $0x1] ss:$8 sm:$0xf]  }
  0x1c   :  { %209 = vrot.lane.b32.xlu0 %v208_v42, %s398_s10  ;;  %v228_v43 = vld [vmem:[#allocation0 + $0xc3] ss:$8 sm:$0xf0]   ;;  %v247_v46 = vld [vmem:[#allocation0 + $0x42] ss:$8 sm:$0xf]  }
  0x1d   :  { %v258_v47 = vld [vmem:[#allocation0 + $0x82] ss:$8 sm:$0xf]   ;;  %v251_v53 = vsel %vm162_vm0, %v249_v44, %v247_v46  ;;  %v282_v55 = vld [vmem:[#allocation0 + $0x1] ss:$8 sm:$0xf0]  }
  0x1e   :  { %v260_v49 = vld [vmem:[#allocation0 + $0x82] ss:$8 sm:$0xf0]   ;;  %v160_v56 = vld [vmem:[#allocation0] ss:$8 sm:$0xf]   ;;  %v284_v4 = vsel %vm162_vm0, %v282_v55, %v280_v52 }
  0x1f   :  { %v226_v48 = vld [vmem:[#allocation0 + $0xc3] ss:$8 sm:$0xf]   ;;  %v271_v51 = vld [vmem:[#allocation0 + $0xc2] ss:$8 sm:$0xf0]   ;;  %v262_v54 = vsel %vm162_vm0, %v260_v49, %v258_v47 }
  0x20   :  { %v230_v50 = vsel %vm162_vm0, %v228_v43, %v226_v48  ;;  %242 = vrot.lane.b32.xlu0 %v241_v45, %s399_s0  ;;  %v269_v57 = vld [vmem:[#allocation0 + $0xc2] ss:$8 sm:$0xf]   ;;  %v161_v58 = vld [vmem:[#allocation0] ss:$8 sm:$0xf0]  }
  0x21   :  { %231 = vrot.lane.b32.xlu1 %v230_v50, %s398_s10  ;;  %v163_v59 = vsel %vm162_vm0, %v161_v58, %v160_v56  ;;  %v176_v60 = vld [vmem:[#allocation0 + $0x80] ss:$8 sm:$0xf]   ;;  %v290_v62 = vld [vmem:[#allocation0 + $0x41] ss:$8 sm:$0xf]   ;;  %v273_v3 = vsel %vm162_vm0, %v271_v51, %v269_v57 }
  0x22   :  { %v178_v61 = vld [vmem:[#allocation0 + $0x80] ss:$8 sm:$0xf0]   ;;  %v292_v63 = vld [vmem:[#allocation0 + $0x41] ss:$8 sm:$0xf0]  }
  0x23   :  { %165 = vst.msk [vmem:[%s580_s1] sm:$0xff] %vm164_vm1, %v163_v59   ;;  %v180_v0 = vsel %vm162_vm0, %v178_v61, %v176_v60  ;;  %v167_v1 = vld [vmem:[#allocation0 + $0x40] ss:$8 sm:$0xf]   ;;  %v294_v11 = vsel %vm162_vm0, %v292_v63, %v290_v62 }
  0x24   :  { %263 = vrot.lane.b32.xlu0 %v262_v54, %s399_s0  ;;  %v169_v2 = vld [vmem:[#allocation0 + $0x40] ss:$8 sm:$0xf0]   ;;  %384 = vst.msk [vmem:[%s580_s1 + $0x10] sm:$0xff] %vm164_vm1, %v180_v0  }
  0x25   :  { %252 = vrot.lane.b32.xlu1 %v251_v53, %s399_s0  ;;  %v171_v5 = vsel %vm162_vm0, %v169_v2, %v167_v1  ;;  %v185_v6 = vld [vmem:[#allocation0 + $0xc0] ss:$8 sm:$0xf]   ;;  %v301_v8 = vld [vmem:[#allocation0 + $0x81] ss:$8 sm:$0xf]  }
  0x26   :  { %v187_v7 = vld [vmem:[#allocation0 + $0xc0] ss:$8 sm:$0xf0]   ;;  %v303_v9 = vld [vmem:[#allocation0 + $0x81] ss:$8 sm:$0xf0]  }
  0x27   :  { %383 = vst.msk [vmem:[%s580_s1 + $0x8] sm:$0xff] %vm164_vm1, %v171_v5   ;;  %v189_v10 = vsel %vm162_vm0, %v187_v7, %v185_v6  ;;  %v305_v12 = vsel %vm162_vm0, %v303_v9, %v301_v8  ;;  %v312_v13 = vld [vmem:[#allocation0 + $0xc1] ss:$8 sm:$0xf]  }
  0x28   :  { %385 = vst.msk [vmem:[%s580_s1 + $0x18] sm:$0xff] %vm164_vm1, %v189_v10   ;;  %285 = vrot.lane.b32.xlu0 %v284_v4, %s400_s21  ;;  %v314_v14 = vld [vmem:[#allocation0 + $0xc1] ss:$8 sm:$0xf0]  }
  0x29   :  { %274 = vrot.lane.b32.xlu1 %v273_v3, %s399_s0  ;;  %v316_v15 = vsel %vm162_vm0, %v314_v14, %v312_v13 }
  0x2c   :  { %306 = vrot.lane.b32.xlu0 %v305_v12, %s400_s21 }
  0x2d   :  { %295 = vrot.lane.b32.xlu1 %v294_v11, %s400_s21 }
  0x31   :  { %317 = vrot.lane.b32.xlu1 %v316_v15, %s400_s21 }
  0x87   :  { %v200_v16 = vpop.permute.xlu0 %199  }
  0x88   :  { %202 = vst.msk [vmem:[%s580_s1] sm:$0xff] %vm201_vm2, %v200_v16  }
  0x8c   :  { %v221_v17 = vpop.permute.xlu1 %220  }
  0x8d   :  { %387 = vst.msk [vmem:[%s580_s1 + $0x10] sm:$0xff] %vm201_vm2, %v221_v17  }
  0x8e   :  { %v210_v18 = vpop.permute.xlu0 %209  }
  0x8f   :  { %386 = vst.msk [vmem:[%s580_s1 + $0x8] sm:$0xff] %vm201_vm2, %v210_v18  }
  0x92   :  { %v243_v20 = vpop.permute.xlu0 %242  }
  0x93   :  { %v232_v19 = vpop.permute.xlu1 %231   ;;  %245 = vst.msk [vmem:[%s580_s1] sm:$0xff] %vm244_vm3, %v243_v20  }
  0x94   :  { %388 = vst.msk [vmem:[%s580_s1 + $0x18] sm:$0xff] %vm201_vm2, %v232_v19  }
  0x96   :  { %v264_v22 = vpop.permute.xlu0 %263  }
  0x97   :  { %v253_v21 = vpop.permute.xlu1 %252   ;;  %390 = vst.msk [vmem:[%s580_s1 + $0x10] sm:$0xff] %vm244_vm3, %v264_v22  }
  0x98   :  { %389 = vst.msk [vmem:[%s580_s1 + $0x8] sm:$0xff] %vm244_vm3, %v253_v21  }
  0x9a   :  { %v286_v24 = vpop.permute.xlu0 %285  }
  0x9b   :  { %v275_v23 = vpop.permute.xlu1 %274   ;;  %288 = vst.msk [vmem:[%s580_s1] sm:$0xff] %vm287_vm4, %v286_v24  }
  0x9c   :  { %391 = vst.msk [vmem:[%s580_s1 + $0x18] sm:$0xff] %vm244_vm3, %v275_v23  }
  0x9e   :  { %v307_v26 = vpop.permute.xlu0 %306  }
  0x9f   :  { %v296_v25 = vpop.permute.xlu1 %295   ;;  %393 = vst.msk [vmem:[%s580_s1 + $0x10] sm:$0xff] %vm287_vm4, %v307_v26  }
  0xa0   :  { %392 = vst.msk [vmem:[%s580_s1 + $0x8] sm:$0xff] %vm287_vm4, %v296_v25  }
  0xa3   :  { %v318_v27 = vpop.permute.xlu1 %317  }
  0xa4   :  { %394 = vst.msk [vmem:[%s580_s1 + $0x18] sm:$0xff] %vm287_vm4, %v318_v27  }

// kernel: vae_forward.13
= control target key start
LH: loop header
LB: loop body
LE: loop exit
PB: predicated region body
PF: predicated region fallthrough
CT: control target
= control target key end

     0   :  { %v94_v20 = vlaneseq  ;;  %v1312_v23 = vmov 1966171168   ;;  %vm909_vm0 = vcmask 1041408   ;;  %vm910_vm1 = vcmask 1043458   ;;  %s1721_s1 = inlined_call_operand.vmem [shape: bf16[256,320], index: 1, kind: input, shape index: {}]   ;;  %s1722_s0 = inlined_call_operand.vmem [shape: bf16[2,256], index: 0, kind: input, shape index: {}]   ;;  %s1723_s3 = inlined_call_operand.vmem [shape: bf16[256,320], index: 3, kind: input, shape index: {}]   ;;  %s1724_s2 = inlined_call_operand.vmem [shape: f32[1,320], index: 2, kind: input, shape index: {}]   ;;  %s1725_s6 = inlined_call_operand.vmem [shape: f32[2,320], index: 6, kind: output, shape index: {0}]   ;;  %s1726_s4 = inlined_call_operand.vmem [shape: f32[1,320], index: 4, kind: input, shape index: {}]   ;;  %s1727_s5 = inlined_call_operand.vmem [shape: f32[2,320], index: 5, kind: input, shape index: {}]   ;;  %s1728_s7 = inlined_call_operand.vmem [shape: f32[2,320], index: 7, kind: output, shape index: {1}]   ;;  %s1729_s8 = inlined_call_operand.vmem [shape: f32[2,320], index: 8, kind: output, shape index: {2}]  }
   0x1   :  { %v1172_v0 = vld [vmem:[%s1721_s1 + $0x4] ss:$12 sps:$4 sm:$0xff]   ;;  %v1174_v1 = vld [vmem:[%s1721_s1 + $0xc8] ss:$12 sps:$4 sm:$0xff]   ;;  %v1175_v2 = vld [vmem:[%s1721_s1] ss:$12 sps:$4 sm:$0xff]   ;;  %v119_v24 = vunpack.c.l.s4 %v1312_v23 }
   0x2   :  { %390 = vmatprep.subr.bf16.mxu0 %v1172_v0  ;;  %1126 = vmatprep.subr.bf16.mxu1 %v1174_v1  ;;  %v1176_v3 = vld [vmem:[%s1721_s1 + $0x8] ss:$12 sps:$4 sm:$0xff]   ;;  %v1179_v5 = vld [vmem:[%s1721_s1 + $0xe0] ss:$12 sps:$4 sm:$0xff]   ;;  %v1180_v6 = vld [vmem:[%s1721_s1 + $0x18] ss:$12 sps:$4 sm:$0xff]  }
   0x3   :  { %391 = vmatpush1.bf16.msra.mxu0 %v1175_v2  ;;  %v1177_v4 = vld [vmem:[%s1721_s1 + $0x1c] ss:$12 sps:$4 sm:$0xff]   ;;  %1127 = vmatpush3.bf16.msra.mxu1 %v1176_v3  ;;  %v1181_v7 = vld [vmem:[%s1721_s1 + $0x20] ss:$12 sps:$4 sm:$0xff]   ;;  %v1184_v9 = vld [vmem:[%s1721_s1 + $0xf8] ss:$12 sps:$4 sm:$0xff]   ;;  %v120_v30 = vunpack.c.0.s8 %v119_v24 }
   0x4   :  { %392 = vmatprep.subr.bf16.mxu0 %v1177_v4  ;;  %1128 = vmatprep.subr.bf16.mxu1 %v1179_v5  ;;  %v1182_v8 = vld [vmem:[%s1721_s1 + $0x34] ss:$12 sps:$4 sm:$0xff]   ;;  %v1185_v10 = vld [vmem:[%s1721_s1 + $0x30] ss:$12 sps:$4 sm:$0xff]   ;;  %v1186_v11 = vld [vmem:[%s1721_s1 + $0x38] ss:$12 sps:$4 sm:$0xff]  }
   0x5   :  { %v1187_v12 = vld [vmem:[%s1721_s1 + $0x4c] ss:$12 sps:$4 sm:$0xff]   ;;  %v1189_v13 = vld [vmem:[%s1721_s1 + $0x110] ss:$12 sps:$4 sm:$0xff]   ;;  %v1190_v14 = vld [vmem:[%s1721_s1 + $0x48] ss:$12 sps:$4 sm:$0xff]  }
   0x6   :  { %v1191_v15 = vld [vmem:[%s1721_s1 + $0x50] ss:$12 sps:$4 sm:$0xff]   ;;  %v1194_v17 = vld [vmem:[%s1721_s1 + $0x128] ss:$12 sps:$4 sm:$0xff]   ;;  %v1195_v18 = vld [vmem:[%s1721_s1 + $0x60] ss:$12 sps:$4 sm:$0xff]  }
   0x7   :  { %393 = vmatpush1.bf16.msra.mxu0 %v1180_v6  ;;  %1129 = vmatpush3.bf16.msra.mxu1 %v1181_v7  ;;  %v1192_v16 = vld [vmem:[%s1721_s1 + $0x64] ss:$12 sps:$4 sm:$0xff]   ;;  %v1196_v19 = vld [vmem:[%s1721_s1 + $0x68] ss:$12 sps:$4 sm:$0xff]   ;;  %v1199_v22 = vld [vmem:[%s1721_s1 + $0x140] ss:$12 sps:$4 sm:$0xff]  }
   0x8   :  { %394 = vmatprep.subr.bf16.mxu0 %v1182_v8  ;;  %1130 = vmatprep.subr.bf16.mxu1 %v1184_v9  ;;  %v1197_v21 = vld [vmem:[%s1721_s1 + $0x7c] ss:$12 sps:$4 sm:$0xff]   ;;  %v1200_v25 = vld [vmem:[%s1721_s1 + $0x78] ss:$12 sps:$4 sm:$0xff]   ;;  %v1201_v26 = vld [vmem:[%s1721_s1 + $0x80] ss:$12 sps:$4 sm:$0xff]  }
   0x9   :  { %v1431_v27 = vshrl.u32 %v94_v20, 7  ;;  %v1202_v28 = vld [vmem:[%s1721_s1 + $0x94] ss:$12 sps:$4 sm:$0xff]   ;;  %v1204_v29 = vld [vmem:[%s1721_s1 + $0x158] ss:$12 sps:$4 sm:$0xff]   ;;  %vm911_vm2 = vmor %vm910_vm1, %vm909_vm0  ;;  %vm912_vm3 = vcmask 521220  }
   0xa   :  { %v1205_v31 = vld [vmem:[%s1721_s1 + $0x90] ss:$12 sps:$4 sm:$0xff]   ;;  %v1206_v32 = vld [vmem:[%s1721_s1 + $0x98] ss:$12 sps:$4 sm:$0xff]   ;;  %v1210_v37 = vld [vmem:[%s1721_s1 + $0xa8] ss:$12 sps:$4 sm:$0xff]  }
   0xb   :  { %395 = vmatpush1.bf16.msra.mxu0 %v1185_v10  ;;  %1131 = vmatpush3.bf16.msra.mxu1 %v1186_v11  ;;  %v1207_v33 = vld [vmem:[%s1721_s1 + $0xac] ss:$12 sps:$4 sm:$0xff]   ;;  %v1209_v34 = vld [vmem:[%s1721_s1 + $0x170] ss:$12 sps:$4 sm:$0xff]   ;;  %v123_v35 = vsub.s32 %v120_v30, %v1431_v27  ;;  %v1224_v50 = vld [vmem:[%s1721_s1 + $0xf4] ss:$12 sps:$4 sm:$0xff]  }
   0xc   :  { %396 = vmatprep.subr.bf16.mxu0 %v1187_v12  ;;  %1132 = vmatprep.subr.bf16.mxu1 %v1189_v13  ;;  %v1029_v36 = vld.sshfl [vmem:[%s1722_s0] sm:$0x11 pattern:$0x75316420]  ;;  %v1211_v39 = vld [vmem:[%s1721_s1 + $0xb0] ss:$12 sps:$4 sm:$0xff]   ;;  %vm1685_vm4 = vmor %vm912_vm3, %vm911_vm2 }
   0xd   :  { %v117_v38 = vcombine.high %v1029_v36, %v1029_v36  ;;  %v1212_v40 = vld [vmem:[%s1721_s1 + $0xc4] ss:$12 sps:$4 sm:$0xff]   ;;  %v1214_v43 = vld [vmem:[%s1723_s3] ss:$12 sps:$4 sm:$0xff]   ;;  %v1473_v44 = vrot.slane %v1029_v36, %v123_v35  ;;  %v1218_v46 = vld [vmem:[%s1721_s1 + $0xdc] ss:$12 sps:$4 sm:$0xff]  }
   0xe   :  { %v1216_v42 = vld [vmem:[%s1723_s3 + $0x4] ss:$12 sps:$4 sm:$0xff]   ;;  %v1217_v45 = vld [vmem:[%s1721_s1 + $0xc0] ss:$12 sps:$4 sm:$0xff]   ;;  %v1222_v47 = vld [vmem:[%s1723_s3 + $0x1c] ss:$12 sps:$4 sm:$0xff]  }
   0xf   :  { %397 = vmatpush1.bf16.msra.mxu0 %v1190_v14  ;;  %1133 = vmatpush3.bf16.msra.mxu1 %v1191_v15  ;;  %v1464_v41 = vrot.slane %v117_v38, %v123_v35  ;;  %v1223_v48 = vld [vmem:[%s1721_s1 + $0xd8] ss:$12 sps:$4 sm:$0xff]   ;;  %v1228_v51 = vld [vmem:[%s1723_s3 + $0x34] ss:$12 sps:$4 sm:$0xff]   ;;  %v1226_v52 = vld [vmem:[%s1723_s3 + $0x30] ss:$12 sps:$4 sm:$0xff]  }
  0x10   :  { %398 = vmatprep.subr.bf16.mxu0 %v1192_v16  ;;  %1134 = vmatprep.subr.bf16.mxu1 %v1194_v17  ;;  %v1220_v49 = vld [vmem:[%s1723_s3 + $0x18] ss:$12 sps:$4 sm:$0xff]   ;;  %v1229_v53 = vld [vmem:[%s1721_s1 + $0xf0] ss:$12 sps:$4 sm:$0xff]   ;;  %v1235_v56 = vld [vmem:[%s1721_s1 + $0x108] ss:$12 sps:$4 sm:$0xff]  }
  0x11   :  { %463 = vmatprep.mubr.bf16.mxu1 %v1464_v41  ;;  %422 = vmatprep.mubr.bf16.mxu0 %v1464_v41  ;;  %v1230_v54 = vld [vmem:[%s1721_s1 + $0x10c] ss:$12 sps:$4 sm:$0xff]   ;;  %v1232_v57 = vld [vmem:[%s1723_s3 + $0x48] ss:$12 sps:$4 sm:$0xff]   ;;  %v1236_v58 = vld [vmem:[%s1721_s1 + $0x124] ss:$12 sps:$4 sm:$0xff]  }
  0x12   :  { %v1234_v55 = vld [vmem:[%s1723_s3 + $0x4c] ss:$12 sps:$4 sm:$0xff]   ;;  %v1240_v59 = vld [vmem:[%s1723_s3 + $0x64] ss:$12 sps:$4 sm:$0xff]   ;;  %v1242_v62 = vld [vmem:[%s1721_s1 + $0x13c] ss:$12 sps:$4 sm:$0xff]  }
  0x13   :  { %399 = vmatpush1.bf16.msra.mxu0 %v1195_v18  ;;  %1135 = vmatpush3.bf16.msra.mxu1 %v1196_v19  ;;  %v1241_v60 = vld [vmem:[%s1721_s1 + $0x120] ss:$12 sps:$4 sm:$0xff]   ;;  %v1246_v63 = vld [vmem:[%s1723_s3 + $0x7c] ss:$12 sps:$4 sm:$0xff]   ;;  %v1244_v0 = vld [vmem:[%s1723_s3 + $0x78] ss:$12 sps:$4 sm:$0xff]  }
  0x14   :  { %400 = vmatprep.subr.bf16.mxu0 %v1197_v21  ;;  %1136 = vmatprep.subr.bf16.mxu1 %v1199_v22  ;;  %v1238_v61 = vld [vmem:[%s1723_s3 + $0x60] ss:$12 sps:$4 sm:$0xff]   ;;  %v1247_v1 = vld [vmem:[%s1721_s1 + $0x138] ss:$12 sps:$4 sm:$0xff]   ;;  %v1250_v4 = vld [vmem:[%s1723_s3 + $0x90] ss:$12 sps:$4 sm:$0xff]  }
  0x15   :  { %v1248_v2 = vld [vmem:[%s1721_s1 + $0x154] ss:$12 sps:$4 sm:$0xff]   ;;  %v1253_v5 = vld [vmem:[%s1721_s1 + $0x150] ss:$12 sps:$4 sm:$0xff]   ;;  %v1254_v6 = vld [vmem:[%s1721_s1 + $0x16c] ss:$12 sps:$4 sm:$0xff]  }
  0x16   :  { %v1252_v3 = vld [vmem:[%s1723_s3 + $0x94] ss:$12 sps:$4 sm:$0xff]   ;;  %v1258_v7 = vld [vmem:[%s1723_s3 + $0xac] ss:$12 sps:$4 sm:$0xff]   ;;  %v1262_v11 = vld [vmem:[%s1723_s3 + $0xc4] ss:$12 sps:$4 sm:$0xff]  }
  0x17   :  { %401 = vmatpush1.bf16.msra.mxu0 %v1200_v25  ;;  %1137 = vmatpush3.bf16.msra.mxu1 %v1201_v26  ;;  %v1256_v8 = vld [vmem:[%s1723_s3 + $0xa8] ss:$12 sps:$4 sm:$0xff]   ;;  %v1260_v12 = vld [vmem:[%s1723_s3 + $0xc0] ss:$12 sps:$4 sm:$0xff]   ;;  %v1265_v17 = vld [vmem:[%s1723_s3 + $0xd8] ss:$12 sps:$4 sm:$0xff]  }
  0x18   :  { %402 = vmatprep.subr.bf16.mxu0 %v1202_v28  ;;  %1138 = vmatprep.subr.bf16.mxu1 %v1204_v29  ;;  %v1259_v9 = vld [vmem:[%s1721_s1 + $0x168] ss:$12 sps:$4 sm:$0xff]   ;;  %v1268_v14 = vld [vmem:[%s1723_s3 + $0xe0] ss:$12 sps:$4 sm:$0xff]   ;;  %v1273_v18 = vld [vmem:[%s1723_s3 + $0xf8] ss:$12 sps:$4 sm:$0xff]  }
  0x19   :  { %v1263_v10 = vld [vmem:[%s1723_s3 + $0xc8] ss:$12 sps:$4 sm:$0xff]   ;;  %v1269_v16 = vld [vmem:[%s1723_s3 + $0x20] ss:$12 sps:$4 sm:$0xff]   ;;  %v1270_v20 = vld [vmem:[%s1723_s3 + $0xf0] ss:$12 sps:$4 sm:$0xff]  }
  0x1a   :  { %v1264_v13 = vld [vmem:[%s1723_s3 + $0x8] ss:$12 sps:$4 sm:$0xff]   ;;  %v1274_v21 = vld [vmem:[%s1723_s3 + $0x38] ss:$12 sps:$4 sm:$0xff]   ;;  %v1278_v22 = vld [vmem:[%s1723_s3 + $0x110] ss:$12 sps:$4 sm:$0xff]  }
  0x1b   :  { %403 = vmatpush1.bf16.msra.mxu0 %v1205_v31  ;;  %1139 = vmatpush3.bf16.msra.mxu1 %v1206_v32  ;;  %v1267_v15 = vld [vmem:[%s1723_s3 + $0xdc] ss:$12 sps:$4 sm:$0xff]   ;;  %v1272_v19 = vld [vmem:[%s1723_s3 + $0xf4] ss:$12 sps:$4 sm:$0xff]   ;;  %v1277_v23 = vld [vmem:[%s1723_s3 + $0x10c] ss:$12 sps:$4 sm:$0xff]  }
  0x1c   :  { %404 = vmatprep.subr.bf16.mxu0 %v1207_v33  ;;  %1140 = vmatprep.subr.bf16.mxu1 %v1209_v34  ;;  %v1279_v24 = vld [vmem:[%s1723_s3 + $0x50] ss:$12 sps:$4 sm:$0xff]   ;;  %v1275_v25 = vld [vmem:[%s1723_s3 + $0x108] ss:$12 sps:$4 sm:$0xff]   ;;  %v1280_v30 = vld [vmem:[%s1723_s3 + $0x120] ss:$12 sps:$4 sm:$0xff]  }
  0x1d   :  { %v1283_v26 = vld [vmem:[%s1723_s3 + $0x128] ss:$12 sps:$4 sm:$0xff]   ;;  %v1282_v28 = vld [vmem:[%s1723_s3 + $0x124] ss:$12 sps:$4 sm:$0xff]   ;;  %v1288_v31 = vld [vmem:[%s1723_s3 + $0x140] ss:$12 sps:$4 sm:$0xff]  }
  0x1e   :  { %v1284_v29 = vld [vmem:[%s1723_s3 + $0x68] ss:$12 sps:$4 sm:$0xff]   ;;  %v1289_v33 = vld [vmem:[%s1723_s3 + $0x80] ss:$12 sps:$4 sm:$0xff]   ;;  %v1285_v34 = vld [vmem:[%s1723_s3 + $0x138] ss:$12 sps:$4 sm:$0xff]  }
  0x1f   :  { %405 = vmatpush1.bf16.msra.mxu0 %v1210_v37  ;;  %1141 = vmatpush3.bf16.msra.mxu1 %v1211_v39  ;;  %v1287_v32 = vld [vmem:[%s1723_s3 + $0x13c] ss:$12 sps:$4 sm:$0xff]   ;;  %v1293_v35 = vld [vmem:[%s1723_s3 + $0x158] ss:$12 sps:$4 sm:$0xff]   ;;  %v1292_v36 = vld [vmem:[%s1723_s3 + $0x154] ss:$12 sps:$4 sm:$0xff]  }
  0x20   :  { %406 = vmatprep.subr.bf16.mxu0 %v1212_v40  ;;  %808 = vmatprep.subr.bf16.mxu1 %v1216_v42  ;;  %v1294_v37 = vld [vmem:[%s1723_s3 + $0x98] ss:$12 sps:$4 sm:$0xff]   ;;  %v1290_v38 = vld [vmem:[%s1723_s3 + $0x150] ss:$12 sps:$4 sm:$0xff]   ;;  %v1295_v42 = vld [vmem:[%s1723_s3 + $0x168] ss:$12 sps:$4 sm:$0xff]  }
  0x21   :  { %v1298_v39 = vld [vmem:[%s1723_s3 + $0x170] ss:$12 sps:$4 sm:$0xff]   ;;  %v1297_v40 = vld [vmem:[%s1723_s3 + $0x16c] ss:$12 sps:$4 sm:$0xff]  }
  0x22   :  { %464 = vmatmul.mubr.bf16.vlgmr.msra.gmra.mrb[0].mxu1 %v1473_v44 }
  0x23   :  { %407 = vmatpush1.bf16.msra.mxu0 %v1217_v45  ;;  %809 = vmatpush1.bf16.msra.mxu1 %v1214_v43 }
  0x24   :  { %408 = vmatprep.subr.bf16.mxu0 %v1218_v46  ;;  %810 = vmatprep.subr.bf16.mxu1 %v1222_v47 }
  0x25   :  { %840 = vmatprep.mubr.bf16.mxu1 %v1464_v41 }
  0x27   :  { %409 = vmatpush1.bf16.msra.mxu0 %v1223_v48  ;;  %811 = vmatpush1.bf16.msra.mxu1 %v1220_v49  ;;  %v96_v49 = vsub.s32 0, %v1431_v27 }
  0x28   :  { %410 = vmatprep.subr.bf16.mxu0 %v1224_v50  ;;  %812 = vmatprep.subr.bf16.mxu1 %v1228_v51  ;;  %v1313_v50 = vmov 1983009808  }
  0x29   :  { %v894_v51 = vunpack.c.l.s4 %v1313_v50 }
  0x2b   :  { %411 = vmatpush1.bf16.msra.mxu0 %v1229_v53  ;;  %813 = vmatpush1.bf16.msra.mxu1 %v1226_v52  ;;  %v104_v52 = vsub.s32 2, %v1431_v27  ;;  %v100_v53 = vsub.s32 1, %v1431_v27 }
  0x2c   :  { %412 = vmatprep.subr.bf16.mxu0 %v1230_v54  ;;  %814 = vmatprep.subr.bf16.mxu1 %v1234_v55  ;;  %v92_v54 = vld [vmem:[%s1724_s2] sm:$0x7] }
  0x2d   :  { %v97_v55 = vrot.slane %v92_v54, %v96_v49 }
  0x2f   :  { %413 = vmatpush1.bf16.msra.mxu0 %v1235_v56  ;;  %815 = vmatpush1.bf16.msra.mxu1 %v1232_v57  ;;  %v895_v56 = vunpack.c.0.s8 %v894_v51  ;;  %v101_v57 = vrot.slane %v92_v54, %v100_v53 }
  0x30   :  { %414 = vmatprep.subr.bf16.mxu0 %v1236_v58  ;;  %816 = vmatprep.subr.bf16.mxu1 %v1240_v59 }
  0x33   :  { %415 = vmatpush1.bf16.msra.mxu0 %v1241_v60  ;;  %817 = vmatpush1.bf16.msra.mxu1 %v1238_v61  ;;  %v1674_v61 = vsub.s32 %v895_v56, %v1431_v27 }
  0x34   :  { %416 = vmatprep.subr.bf16.mxu0 %v1242_v62  ;;  %818 = vmatprep.subr.bf16.mxu1 %v1246_v63 }
  0x37   :  { %417 = vmatpush1.bf16.msra.mxu0 %v1247_v1  ;;  %819 = vmatpush1.bf16.msra.mxu1 %v1244_v0 }
  0x38   :  { %418 = vmatprep.subr.bf16.mxu0 %v1248_v2  ;;  %820 = vmatprep.subr.bf16.mxu1 %v1252_v3 }
  0x3b   :  { %419 = vmatpush1.bf16.msra.mxu0 %v1253_v5  ;;  %821 = vmatpush1.bf16.msra.mxu1 %v1250_v4 }
  0x3c   :  { %420 = vmatprep.subr.bf16.mxu0 %v1254_v6  ;;  %822 = vmatprep.subr.bf16.mxu1 %v1258_v7  ;;  %v535_v6 = vld [vmem:[%s1726_s4] sm:$0x7] }
  0x3d   :  { %v540_v7 = vrot.slane %v535_v6, %v96_v49 }
  0x3f   :  { %421 = vmatpush1.bf16.msra.mxu0 %v1259_v9  ;;  %823 = vmatpush1.bf16.msra.mxu1 %v1256_v8  ;;  %v544_v8 = vrot.slane %v535_v6, %v100_v53 }
  0x40   :  { %1148 = vmatprep.subr.bf16.mxu0 %v1263_v10  ;;  %824 = vmatprep.subr.bf16.mxu1 %v1262_v11  ;;  %v548_v10 = vrot.slane %v535_v6, %v104_v52 }
  0x42   :  { %423 = vmatmul.mubr.bf16.vlgmr.msra.gmra.mrb[0].mxu0 %v1473_v44 }
  0x43   :  { %1149 = vmatpush3.bf16.msra.mxu0 %v1264_v13  ;;  %881 = vmatprep.mubr.bf16.mxu0 %v1464_v41  ;;  %v1299_v41 = vld [vmem:[%s1723_s3 + $0xb0] ss:$12 sps:$4 sm:$0xff]  }
  0x44   :  { %825 = vmatpush1.bf16.msra.mxu1 %v1260_v12  ;;  %1150 = vmatprep.subr.bf16.mxu0 %v1268_v14 }
  0x45   :  { %826 = vmatprep.subr.bf16.mxu1 %v1267_v15 }
  0x47   :  { %1151 = vmatpush3.bf16.msra.mxu0 %v1269_v16 }
  0x48   :  { %827 = vmatpush1.bf16.msra.mxu1 %v1265_v17  ;;  %1152 = vmatprep.subr.bf16.mxu0 %v1273_v18 }
  0x49   :  { %828 = vmatprep.subr.bf16.mxu1 %v1272_v19 }
  0x4b   :  { %1153 = vmatpush3.bf16.msra.mxu0 %v1274_v21 }
  0x4c   :  { %829 = vmatpush1.bf16.msra.mxu1 %v1270_v20  ;;  %1154 = vmatprep.subr.bf16.mxu0 %v1278_v22 }
  0x4d   :  { %830 = vmatprep.subr.bf16.mxu1 %v1277_v23 }
  0x4f   :  { %1155 = vmatpush3.bf16.msra.mxu0 %v1279_v24 }
  0x50   :  { %831 = vmatpush1.bf16.msra.mxu1 %v1275_v25  ;;  %1156 = vmatprep.subr.bf16.mxu0 %v1283_v26 }
  0x51   :  { %832 = vmatprep.subr.bf16.mxu1 %v1282_v28 }
  0x53   :  { %1157 = vmatpush3.bf16.msra.mxu0 %v1284_v29 }
  0x54   :  { %833 = vmatpush1.bf16.msra.mxu1 %v1280_v30  ;;  %1158 = vmatprep.subr.bf16.mxu0 %v1288_v31 }
  0x55   :  { %834 = vmatprep.subr.bf16.mxu1 %v1287_v32 }
  0x57   :  { %1159 = vmatpush3.bf16.msra.mxu0 %v1289_v33 }
  0x58   :  { %835 = vmatpush1.bf16.msra.mxu1 %v1285_v34  ;;  %1160 = vmatprep.subr.bf16.mxu0 %v1293_v35 }
  0x59   :  { %836 = vmatprep.subr.bf16.mxu1 %v1292_v36 }
  0x5b   :  { %1161 = vmatpush3.bf16.msra.mxu0 %v1294_v37 }
  0x5c   :  { %837 = vmatpush1.bf16.msra.mxu1 %v1290_v38  ;;  %1162 = vmatprep.subr.bf16.mxu0 %v1298_v39 }
  0x5d   :  { %838 = vmatprep.subr.bf16.mxu1 %v1297_v40 }
  0x5f   :  { %1163 = vmatpush3.bf16.msra.mxu0 %v1299_v41 }
  0x60   :  { %839 = vmatpush1.bf16.msra.mxu1 %v1295_v42 }
  0x62   :  { %882 = vmatmul.mubr.bf16.vlgmr.msra.gmra.mrb[4].mxu0 %v1473_v44 }
  0x63   :  { %841 = vmatmul.mubr.bf16.vlgmr.msra.gmra.mrb[4].mxu1 %v1473_v44  ;;  %v105_v44 = vrot.slane %v92_v54, %v104_v52 }
  0xf5   :  { %v1142_v43 = vpop.f32.mrb[0].mxu1 }
  0xf6   :  { %v1143_v45 = vpop.f32.mrb[1].mxu1 }
  0xf7   :  { %v1144_v46 = vadd.f32 %v1143_v45, %v1142_v43  ;;  %v1145_v47 = vpop.f32.mrb[2].mxu1 }
  0xf8   :  { %v1146_v48 = vpop.f32.mrb[3].mxu1 }
  0xf9   :  { %v1676_v62 = vadd.f32 %v1144_v46, %v105_v44  ;;  %v942_v46 = vld [vmem:[%s1727_s5] sm:$0x3f] }
  0xfb   :  { %v906_v3 = vrot.slane %v1676_v62, %v1674_v61 }
 0x115   :  { %v424_v58 = vpop.f32.mrb[0].mxu0 }
 0x116   :  { %v1671_v59 = vadd.f32 %v424_v58, %v97_v55  ;;  %v426_v60 = vpop.f32.mrb[1].mxu0 }
 0x117   :  { %v1678_v63 = vadd.f32 %v426_v60, %v101_v57  ;;  %v428_v0 = vpop.f32.mrb[2].mxu0 }
 0x118   :  { %v429_v1 = vpop.f32.mrb[3].mxu0 }
 0x119   :  { %v892_v2 = vcombine.low %v1671_v59, %v1678_v63 }
 0x11b   :  { %v899_v4 = vrot.slane %v892_v2, %v1674_v61 }
 0x11d   :  { %v907_v27 = vcombine.low %v899_v4, %v906_v3 }
 0x11f   :  { %914 = vst.msk [vmem:[%s1725_s6] sm:$0x3f] %vm1685_vm4, %v907_v27 }
 0x135   :  { %v1164_v9 = vpop.f32.mrb[4].mxu0 }
 0x136   :  { %v842_v11 = vpop.f32.mrb[4].mxu1  ;;  %v1165_v12 = vpop.f32.mrb[5].mxu0 }
 0x137   :  { %v843_v13 = vadd.f32 %v842_v11, %v540_v7  ;;  %v844_v14 = vpop.f32.mrb[5].mxu1  ;;  %v1166_v15 = vadd.f32 %v1165_v12, %v1164_v9  ;;  %v1167_v16 = vpop.f32.mrb[6].mxu0 }
 0x138   :  { %v845_v17 = vadd.f32 %v844_v14, %v544_v8  ;;  %v846_v18 = vpop.f32.mrb[6].mxu1  ;;  %v1168_v19 = vpop.f32.mrb[7].mxu0 }
 0x139   :  { %v915_v20 = vmul.f32 1.442695, %v843_v13  ;;  %v943_v21 = vmul.f32 0.5, %v843_v13  ;;  %v884_v22 = vadd.f32 %v1166_v15, %v548_v10  ;;  %v847_v23 = vpop.f32.mrb[7].mxu1 }
 0x13a   :  { %v917_v24 = vmul.f32 1.442695, %v845_v17  ;;  %v944_v25 = vmul.f32 0.5, %v845_v17 }
 0x13b   :  { %1300 = vpow2.f32 %v915_v20  ;;  %v946_v26 = vmul.f32 1.442695, %v943_v21  ;;  %v919_v28 = vmul.f32 1.442695, %v884_v22  ;;  %v945_v29 = vmul.f32 0.5, %v884_v22 }
 0x13c   :  { %1302 = vpow2.f32 %v917_v24  ;;  %v948_v30 = vmul.f32 1.442695, %v944_v25 }
 0x13d   :  { %1304 = vpow2.f32 %v946_v26  ;;  %v950_v31 = vmul.f32 1.442695, %v945_v29 }
 0x13e   :  { %1306 = vpow2.f32 %v948_v30 }
 0x13f   :  { %1308 = vpow2.f32 %v919_v28 }
 0x140   :  { %1310 = vpow2.f32 %v950_v31 }
 0x145   :  { %v1301_v32 = vpop.eup %1300 }
 0x146   :  { %v1303_v33 = vpop.eup %1302 }
 0x147   :  { %v1305_v34 = vpop.eup %1304  ;;  %v924_v35 = vcombine.low %v1301_v32, %v1303_v33 }
 0x148   :  { %v1307_v36 = vpop.eup %1306 }
 0x149   :  { %v1309_v37 = vpop.eup %1308  ;;  %v931_v38 = vrot.slane %v924_v35, %v1674_v61  ;;  %v955_v39 = vcombine.low %v1305_v34, %v1307_v36 }
 0x14a   :  { %v1311_v40 = vpop.eup %1310  ;;  %v938_v41 = vrot.slane %v1309_v37, %v1674_v61 }
 0x14b   :  { %v962_v42 = vrot.slane %v955_v39, %v1674_v61  ;;  %v969_v43 = vrot.slane %v1311_v40, %v1674_v61 }
 0x14c   :  { %v939_v45 = vcombine.low %v931_v38, %v938_v41 }
 0x14d   :  { %v970_v47 = vcombine.low %v962_v42, %v969_v43 }
 0x14e   :  { %941 = vst.msk [vmem:[%s1728_s7] sm:$0x3f] %vm1685_vm4, %v939_v45 }
 0x14f   :  { %v972_v48 = vmul.f32 %v970_v47, %v942_v46 }
 0x151   :  { %v974_v49 = vcombine.high %v972_v48, %v972_v48  ;;  %v981_v50 = vrot.slane %v972_v48, %v1674_v61 }
 0x153   :  { %v988_v51 = vrot.slane %v974_v49, %v1674_v61  ;;  %v989_v52 = vcombine.high %v981_v50, %v981_v50  ;;  %v993_v53 = vadd.f32 %v981_v50, %v1671_v59 }
 0x155   :  { %v994_v54 = vadd.f32 %v989_v52, %v1678_v63  ;;  %v995_v55 = vadd.f32 %v988_v51, %v1676_v62 }
 0x157   :  { %v999_v56 = vcombine.low %v993_v53, %v994_v54  ;;  %v1013_v57 = vrot.slane %v995_v55, %v1674_v61 }
 0x159   :  { %v1006_v44 = vrot.slane %v999_v56, %v1674_v61 }
 0x15b   :  { %v1014_v58 = vcombine.low %v1006_v44, %v1013_v57 }
 0x15d   :  { %1016 = vst.msk [vmem:[%s1729_s8] sm:$0x3f] %vm1685_vm4, %v1014_v58 }

// kernel: vae_forward.14
= control target key start
LH: loop header
LB: loop body
LE: loop exit
PB: predicated region body
PF: predicated region fallthrough
CT: control target
= control target key end

     0   :  { %v1042_v9 = vmov 1966171168   ;;  %v77_v11 = vlaneseq  ;;  %vm291_vm0 = vcmask 523264   ;;  %vm377_vm1 = vcmask 1041408   ;;  %s1397_s1 = inlined_call_operand.vmem [shape: bf16[320,256], index: 1, kind: input, shape index: {}]   ;;  %s1398_s0 = inlined_call_operand.vmem [shape: bf16[2,320], index: 0, kind: input, shape index: {}]   ;;  %s1399_s2 = inlined_call_operand.vmem [shape: f32[256,16], index: 2, kind: input, shape index: {}]   ;;  %s1400_s3 = inlined_call_operand.vmem [shape: f32[16,256], index: 3, kind: input, shape index: {}]   ;;  %s1401_s4 = inlined_call_operand.vmem [shape: f32[1,16], index: 4, kind: input, shape index: {}]   ;;  %s1402_s5 = inlined_call_operand.vmem [shape: f32[1,16], index: 5, kind: input, shape index: {}]   ;;  %s1403_s6 = inlined_call_operand.vmem [shape: f32[2,256], index: 6, kind: output, shape index: {}]  }
   0x1   :  { %v980_v0 = vld [vmem:[%s1397_s1 + $0x4] ss:$8 sps:$4 sm:$0xff]   ;;  %v982_v1 = vld [vmem:[%s1397_s1] ss:$8 sps:$4 sm:$0xff]   ;;  %v983_v2 = vld [vmem:[%s1397_s1 + $0x14] ss:$8 sps:$4 sm:$0xff]   ;;  %v75_v10 = vunpack.c.l.s4 %v1042_v9 }
   0x2   :  { %295 = vmatprep.subr.bf16.mxu0 %v980_v0  ;;  %v985_v3 = vld [vmem:[%s1397_s1 + $0x10] ss:$8 sps:$4 sm:$0xff]   ;;  %v986_v4 = vld [vmem:[%s1397_s1 + $0x24] ss:$8 sps:$4 sm:$0xff]   ;;  %v988_v5 = vld [vmem:[%s1397_s1 + $0x20] ss:$8 sps:$4 sm:$0xff]  }
   0x3   :  { %296 = vmatpush1.bf16.msra.mxu0 %v982_v1  ;;  %v989_v6 = vld [vmem:[%s1397_s1 + $0x34] ss:$8 sps:$4 sm:$0xff]   ;;  %v991_v7 = vld [vmem:[%s1397_s1 + $0x30] ss:$8 sps:$4 sm:$0xff]   ;;  %v992_v8 = vld [vmem:[%s1397_s1 + $0x44] ss:$8 sps:$4 sm:$0xff]   ;;  %v76_v14 = vunpack.c.0.s8 %v75_v10 }
   0x4   :  { %297 = vmatprep.subr.bf16.mxu0 %v983_v2  ;;  %v994_v12 = vld [vmem:[%s1397_s1 + $0x40] ss:$8 sps:$4 sm:$0xff]   ;;  %v995_v13 = vld [vmem:[%s1397_s1 + $0x54] ss:$8 sps:$4 sm:$0xff]   ;;  %v1113_v15 = vshrl.u32 %v77_v11, 7  ;;  %v1043_v9 = vmov 0  }
   0x5   :  { %v997_v16 = vld [vmem:[%s1397_s1 + $0x50] ss:$8 sps:$4 sm:$0xff]   ;;  %v998_v17 = vld [vmem:[%s1397_s1 + $0x64] ss:$8 sps:$4 sm:$0xff]   ;;  %v1000_v21 = vld [vmem:[%s1397_s1 + $0x60] ss:$8 sps:$4 sm:$0xff]  }
   0x6   :  { %v1122_v18 = vsub.s32 %v76_v14, %v1113_v15  ;;  %v1127_v19 = vld.sshfl [vmem:[%s1398_s0] sm:$0x13 pattern:$0x75316420]  ;;  %v1001_v22 = vld [vmem:[%s1397_s1 + $0x74] ss:$8 sps:$4 sm:$0xff]  }
   0x7   :  { %298 = vmatpush1.bf16.msra.mxu0 %v985_v3  ;;  %v73_v20 = vcombine.high %v1127_v19, %v1127_v19  ;;  %v1003_v24 = vld [vmem:[%s1397_s1 + $0x70] ss:$8 sps:$4 sm:$0xff]   ;;  %v1004_v25 = vld [vmem:[%s1397_s1 + $0x84] ss:$8 sps:$4 sm:$0xff]   ;;  %v1006_v39 = vld [vmem:[%s1397_s1 + $0x80] ss:$8 sps:$4 sm:$0xff]  }
   0x8   :  { %299 = vmatprep.subr.bf16.mxu0 %v986_v4  ;;  %v424_v26 = vld [vmem:[%s1399_s2 + $0x80] sm:$0xff]  ;;  %v425_v27 = vld [vmem:[%s1399_s2 + $0x88] sm:$0xff]  ;;  %v426_v31 = vld [vmem:[%s1399_s2 + $0x90] sm:$0xff]  ;;  %vm595_vm2 = vcmask 130048  }
   0x9   :  { %v87_v23 = vrot.slane %v73_v20, %v1122_v18  ;;  %v1150_v28 = vpack.c.bf16 %v425_v27, %v424_v26  ;;  %v408_v29 = vld [vmem:[%s1399_s2] sm:$0xff]  ;;  %v409_v30 = vld [vmem:[%s1399_s2 + $0x8] sm:$0xff]  ;;  %v427_v33 = vld [vmem:[%s1399_s2 + $0x98] sm:$0xff] }
   0xa   :  { %v1161_v32 = vpack.c.bf16 %v409_v30, %v408_v29  ;;  %v410_v34 = vld [vmem:[%s1399_s2 + $0x10] sm:$0xff]  ;;  %v411_v35 = vld [vmem:[%s1399_s2 + $0x18] sm:$0xff]  ;;  %v1173_v36 = vpack.c.bf16 %v427_v33, %v426_v31  ;;  %v428_v37 = vld [vmem:[%s1399_s2 + $0xa0] sm:$0xff] }
   0xb   :  { %300 = vmatpush1.bf16.msra.mxu0 %v988_v5  ;;  %327 = vmatprep.mubr.bf16.mxu0 %v87_v23  ;;  %v429_v38 = vld [vmem:[%s1399_s2 + $0xa8] sm:$0xff]  ;;  %v1185_v40 = vpack.c.bf16 %v411_v35, %v410_v34  ;;  %v1007_v41 = vld [vmem:[%s1397_s1 + $0x94] ss:$8 sps:$4 sm:$0xff]   ;;  %v412_v43 = vld [vmem:[%s1399_s2 + $0x20] sm:$0xff]  ;;  %v80_v5 = vrot.slane %v1127_v19, %v1122_v18 }
   0xc   :  { %301 = vmatprep.subr.bf16.mxu0 %v989_v6  ;;  %902 = vmatprep.subr.bf16.mxu1 %v1150_v28  ;;  %v1191_v42 = vpack.c.bf16 %v429_v38, %v428_v37  ;;  %v413_v44 = vld [vmem:[%s1399_s2 + $0x28] sm:$0xff]  ;;  %v430_v45 = vld [vmem:[%s1399_s2 + $0xb0] sm:$0xff]  ;;  %v431_v46 = vld [vmem:[%s1399_s2 + $0xb8] sm:$0xff] }
   0xd   :  { %904 = vmatpush3.bf16.msra.mxu1 %v1161_v32  ;;  %v1009_v47 = vld [vmem:[%s1397_s1 + $0x90] ss:$8 sps:$4 sm:$0xff]   ;;  %v1209_v48 = vpack.c.bf16 %v413_v44, %v412_v43  ;;  %v1010_v49 = vld [vmem:[%s1397_s1 + $0xa4] ss:$8 sps:$4 sm:$0xff]   ;;  %v1215_v50 = vpack.c.bf16 %v431_v46, %v430_v45  ;;  %v1012_v55 = vld [vmem:[%s1397_s1 + $0xa0] ss:$8 sps:$4 sm:$0xff]   ;;  %v88_v14 = vcombine.high %v80_v5, %v80_v5 }
   0xe   :  { %906 = vmatprep.subr.bf16.mxu1 %v1173_v36  ;;  %v414_v51 = vld [vmem:[%s1399_s2 + $0x30] sm:$0xff]  ;;  %v415_v52 = vld [vmem:[%s1399_s2 + $0x38] sm:$0xff]  ;;  %v432_v53 = vld [vmem:[%s1399_s2 + $0xc0] sm:$0xff] }
   0xf   :  { %302 = vmatpush1.bf16.msra.mxu0 %v991_v7  ;;  %v433_v54 = vld [vmem:[%s1399_s2 + $0xc8] sm:$0xff]  ;;  %v1233_v56 = vpack.c.bf16 %v415_v52, %v414_v51  ;;  %v1013_v57 = vld [vmem:[%s1397_s1 + $0xb4] ss:$8 sps:$4 sm:$0xff]   ;;  %v1015_v59 = vld [vmem:[%s1397_s1 + $0xb0] ss:$8 sps:$4 sm:$0xff]  }
  0x10   :  { %303 = vmatprep.subr.bf16.mxu0 %v992_v8  ;;  %v1239_v58 = vpack.c.bf16 %v433_v54, %v432_v53  ;;  %v1016_v60 = vld [vmem:[%s1397_s1 + $0xc4] ss:$8 sps:$4 sm:$0xff]   ;;  %v1018_v61 = vld [vmem:[%s1397_s1 + $0xc0] ss:$8 sps:$4 sm:$0xff]   ;;  %v1019_v62 = vld [vmem:[%s1397_s1 + $0xd4] ss:$8 sps:$4 sm:$0xff]  }
  0x11   :  { %908 = vmatpush3.bf16.msra.mxu1 %v1185_v40  ;;  %v1021_v63 = vld [vmem:[%s1397_s1 + $0xd0] ss:$8 sps:$4 sm:$0xff]   ;;  %v1022_v0 = vld [vmem:[%s1397_s1 + $0xe4] ss:$8 sps:$4 sm:$0xff]   ;;  %v1024_v1 = vld [vmem:[%s1397_s1 + $0xe0] ss:$8 sps:$4 sm:$0xff]  }
  0x12   :  { %910 = vmatprep.subr.bf16.mxu1 %v1191_v42  ;;  %v1025_v2 = vld [vmem:[%s1397_s1 + $0xf4] ss:$8 sps:$4 sm:$0xff]   ;;  %v1027_v3 = vld [vmem:[%s1397_s1 + $0xf0] ss:$8 sps:$4 sm:$0xff]   ;;  %v1030_v4 = vld [vmem:[%s1397_s1 + $0x104] ss:$8 sps:$4 sm:$0xff]  }
  0x13   :  { %304 = vmatpush1.bf16.msra.mxu0 %v994_v12  ;;  %v1028_v6 = vld [vmem:[%s1397_s1 + $0x100] ss:$8 sps:$4 sm:$0xff]   ;;  %v1033_v7 = vld [vmem:[%s1397_s1 + $0x114] ss:$8 sps:$4 sm:$0xff]   ;;  %v1031_v8 = vld [vmem:[%s1397_s1 + $0x110] ss:$8 sps:$4 sm:$0xff]  }
  0x14   :  { %305 = vmatprep.subr.bf16.mxu0 %v995_v13  ;;  %v1036_v10 = vld [vmem:[%s1397_s1 + $0x124] ss:$8 sps:$4 sm:$0xff]   ;;  %v1034_v11 = vld [vmem:[%s1397_s1 + $0x120] ss:$8 sps:$4 sm:$0xff]   ;;  %v1039_v12 = vld [vmem:[%s1397_s1 + $0x134] ss:$8 sps:$4 sm:$0xff]  }
  0x15   :  { %912 = vmatpush3.bf16.msra.mxu1 %v1209_v48  ;;  %v1037_v13 = vld [vmem:[%s1397_s1 + $0x130] ss:$8 sps:$4 sm:$0xff]   ;;  %v437_v26 = vld [vmem:[%s1399_s2 + $0xe8] sm:$0xff]  ;;  %v420_v29 = vld [vmem:[%s1399_s2 + $0x60] sm:$0xff] }
  0x16   :  { %914 = vmatprep.subr.bf16.mxu1 %v1215_v50  ;;  %v434_v19 = vld [vmem:[%s1399_s2 + $0xd0] sm:$0xff]  ;;  %v435_v20 = vld [vmem:[%s1399_s2 + $0xd8] sm:$0xff]  ;;  %v421_v30 = vld [vmem:[%s1399_s2 + $0x68] sm:$0xff] }
  0x17   :  { %306 = vmatpush1.bf16.msra.mxu0 %v997_v16  ;;  %v416_v16 = vld [vmem:[%s1399_s2 + $0x40] sm:$0xff]  ;;  %v419_v23 = vld [vmem:[%s1399_s2 + $0x58] sm:$0xff]  ;;  %v927_v31 = vpack.c.bf16 %v421_v30, %v420_v29  ;;  %v438_v33 = vld [vmem:[%s1399_s2 + $0xf0] sm:$0xff] }
  0x18   :  { %307 = vmatprep.subr.bf16.mxu0 %v998_v17  ;;  %v417_v17 = vld [vmem:[%s1399_s2 + $0x48] sm:$0xff]  ;;  %v439_v34 = vld [vmem:[%s1399_s2 + $0xf8] sm:$0xff]  ;;  %v422_v37 = vld [vmem:[%s1399_s2 + $0x70] sm:$0xff] }
  0x19   :  { %916 = vmatpush3.bf16.msra.mxu1 %v1233_v56  ;;  %v1302_v18 = vpack.c.bf16 %v417_v17, %v416_v16  ;;  %v929_v35 = vpack.c.bf16 %v439_v34, %v438_v33  ;;  %v423_v38 = vld [vmem:[%s1399_s2 + $0x78] sm:$0xff]  ;;  %v588_v30 = vld [vmem:[%s1402_s5] sm:$0x1]  ;;  %v746_v34 = vsub.s32 0, %v1113_v15 }
  0x1a   :  { %918 = vmatprep.subr.bf16.mxu1 %v1239_v58 }
  0x1b   :  { %308 = vmatpush1.bf16.msra.mxu0 %v1000_v21  ;;  %v1311_v21 = vpack.c.bf16 %v435_v20, %v434_v19 }
  0x1c   :  { %309 = vmatprep.subr.bf16.mxu0 %v1001_v22  ;;  %v418_v22 = vld [vmem:[%s1399_s2 + $0x50] sm:$0xff] }
  0x1d   :  { %920 = vmatpush3.bf16.msra.mxu1 %v1302_v18 }
  0x1e   :  { %922 = vmatprep.subr.bf16.mxu1 %v1311_v21 }
  0x1f   :  { %310 = vmatpush1.bf16.msra.mxu0 %v1003_v24  ;;  %v1319_v24 = vpack.c.bf16 %v419_v23, %v418_v22 }
  0x20   :  { %311 = vmatprep.subr.bf16.mxu0 %v1004_v25  ;;  %v436_v25 = vld [vmem:[%s1399_s2 + $0xe0] sm:$0xff] }
  0x21   :  { %924 = vmatpush3.bf16.msra.mxu1 %v1319_v24  ;;  %v925_v27 = vpack.c.bf16 %v437_v26, %v436_v25  ;;  %v584_v26 = vld [vmem:[%s1401_s4] sm:$0x1] }
  0x23   :  { %312 = vmatpush1.bf16.msra.mxu0 %v1006_v39  ;;  %926 = vmatprep.subr.bf16.mxu1 %v925_v27  ;;  %v931_v39 = vpack.c.bf16 %v423_v38, %v422_v37 }
  0x24   :  { %313 = vmatprep.subr.bf16.mxu0 %v1007_v41 }
  0x25   :  { %928 = vmatpush3.bf16.msra.mxu1 %v927_v31 }
  0x26   :  { %930 = vmatprep.subr.bf16.mxu1 %v929_v35 }
  0x27   :  { %314 = vmatpush1.bf16.msra.mxu0 %v1009_v47 }
  0x28   :  { %315 = vmatprep.subr.bf16.mxu0 %v1010_v49 }
  0x29   :  { %932 = vmatpush3.bf16.msra.mxu1 %v931_v39 }
  0x2a   :  { %934 = vmatprep.subr.bf16.mxu1 %v1150_v28 }
  0x2b   :  { %316 = vmatpush1.bf16.msra.mxu0 %v1012_v55 }
  0x2c   :  { %317 = vmatprep.subr.bf16.mxu0 %v1013_v57 }
  0x2f   :  { %318 = vmatpush1.bf16.msra.mxu0 %v1015_v59 }
  0x30   :  { %319 = vmatprep.subr.bf16.mxu0 %v1016_v60 }
  0x33   :  { %320 = vmatpush1.bf16.msra.mxu0 %v1018_v61 }
  0x34   :  { %321 = vmatprep.subr.bf16.mxu0 %v1019_v62 }
  0x37   :  { %322 = vmatpush1.bf16.msra.mxu0 %v1021_v63 }
  0x38   :  { %323 = vmatprep.subr.bf16.mxu0 %v1022_v0 }
  0x3b   :  { %324 = vmatpush1.bf16.msra.mxu0 %v1024_v1 }
  0x3c   :  { %325 = vmatprep.subr.bf16.mxu0 %v1025_v2 }
  0x3f   :  { %326 = vmatpush1.bf16.msra.mxu0 %v1027_v3 }
  0x40   :  { %336 = vmatprep.subr.bf16.mxu0 %v1030_v4 }
  0x42   :  { %328 = vmatmul.mubr.bf16.vlgmr.msra.gmra.mrb[0].mxu0 %v80_v5 }
  0x43   :  { %337 = vmatpush1.bf16.msra.mxu0 %v1028_v6  ;;  %368 = vmatprep.mubr.bf16.mxu0 %v1043_v9 }
  0x44   :  { %338 = vmatprep.subr.bf16.mxu0 %v1033_v7 }
  0x47   :  { %339 = vmatpush1.bf16.msra.mxu0 %v1031_v8 }
  0x48   :  { %340 = vmatprep.subr.bf16.mxu0 %v1036_v10  ;;  %v1044_v10 = vmov 0.0  }
  0x4b   :  { %341 = vmatpush1.bf16.msra.mxu0 %v1034_v11 }
  0x4c   :  { %342 = vmatprep.subr.bf16.mxu0 %v1039_v12  ;;  %v593_v12 = vld [vmem:[%s1400_s3 + $0x10] sm:$0xff] }
  0x4f   :  { %343 = vmatpush1.bf16.msra.mxu0 %v1037_v13 }
  0x52   :  { %827 = vmatmul.mubr.msk.bf16.vlgmr.msra.gmra.mrb[0].mxu0 %vm291_vm0, %v88_v14 }
 0x125   :  { %v1348_v41 = vpop.f32.mrb[0].mxu0 }
 0x126   :  { %v378_v43 = vsel %vm377_vm1, %v1348_v41, 0.0  ;;  %v1352_v44 = vpop.f32.mrb[1].mxu0  ;;  %v392_v7 = vmul.f32 %v1348_v41, %v1348_v41 }
 0x127   :  { %v379_v45 = vrot.slane %v378_v43, 4  ;;  %v385_v46 = vsel %vm377_vm1, %v1352_v44, 0.0  ;;  %v393_v47 = vmul.f32 %v1352_v44, %v1352_v44  ;;  %v374_v49 = vpop.f32.mrb[2].mxu0 }
 0x128   :  { %v386_v51 = vrot.slane %v385_v46, 4  ;;  %v375_v52 = vpop.f32.mrb[3].mxu0  ;;  %v394_v8 = vsel %vm377_vm1, %v392_v7, 0.0 }
 0x129   :  { %v380_v53 = vadd.f32 %v379_v45, %v378_v43  ;;  %v401_v28 = vsel %vm377_vm1, %v393_v47, 0.0  ;;  %v395_v9 = vrot.slane %v394_v8, 4 }
 0x12a   :  { %v402_v54 = vrot.slane %v401_v28, 4  ;;  %v387_v55 = vadd.f32 %v386_v51, %v385_v46 }
 0x12b   :  { %v381_v57 = vrot.slane %v380_v53, 2 }
 0x12c   :  { %v403_v59 = vadd.f32 %v402_v54, %v401_v28  ;;  %v388_v60 = vrot.slane %v387_v55, 2 }
 0x12d   :  { %v382_v61 = vadd.f32 %v381_v57, %v380_v53 }
 0x12e   :  { %v389_v62 = vadd.f32 %v388_v60, %v387_v55  ;;  %v404_v63 = vrot.slane %v403_v59, 2 }
 0x12f   :  { %v383_v0 = vrot.slane %v382_v61, 1 }
 0x130   :  { %v390_v1 = vrot.slane %v389_v62, 1  ;;  %v405_v2 = vadd.f32 %v404_v63, %v403_v59 }
 0x131   :  { %v384_v5 = vadd.f32 %v383_v0, %v382_v61 }
 0x132   :  { %v391_v3 = vadd.f32 %v390_v1, %v389_v62  ;;  %v406_v4 = vrot.slane %v405_v2, 1 }
 0x134   :  { %504 = vmatprep.mubr.f32.mxu1 %v391_v3  ;;  %v407_v6 = vadd.f32 %v406_v4, %v405_v2 }
 0x135   :  { %505 = vmatmul.mubr.f32.vlgmr.msra.gmra.mrb[0].mxu1 %v384_v5 }
 0x136   :  { %936 = vmatpush3.bf16.msra.mxu1 %v1161_v32  ;;  %574 = vmatprep.mubr.f32.mxu1 %v407_v6  ;;  %v396_v32 = vadd.f32 %v395_v9, %v394_v8 }
 0x137   :  { %938 = vmatprep.subr.bf16.mxu1 %v1173_v36 }
 0x138   :  { %v397_v36 = vrot.slane %v396_v32, 2 }
 0x13a   :  { %940 = vmatpush3.bf16.msra.mxu1 %v1185_v40  ;;  %v398_v40 = vadd.f32 %v397_v36, %v396_v32 }
 0x13b   :  { %942 = vmatprep.subr.bf16.mxu1 %v1191_v42 }
 0x13c   :  { %v399_v42 = vrot.slane %v398_v40, 1 }
 0x13e   :  { %944 = vmatpush3.bf16.msra.mxu1 %v1209_v48  ;;  %v400_v48 = vadd.f32 %v399_v42, %v398_v40 }
 0x13f   :  { %946 = vmatprep.subr.bf16.mxu1 %v1215_v50  ;;  %v592_v50 = vld [vmem:[%s1400_s3 + $0x8] sm:$0xff] }
 0x142   :  { %948 = vmatpush3.bf16.msra.mxu1 %v1233_v56  ;;  %v594_v56 = vld [vmem:[%s1400_s3 + $0x18] sm:$0xff] }
 0x143   :  { %950 = vmatprep.subr.bf16.mxu1 %v1239_v58  ;;  %v591_v58 = vld [vmem:[%s1400_s3] sm:$0xff]  ;;  %v965_v11 = vpack.c.bf16 %v594_v56, %v592_v50 }
 0x144   :  { %v967_v13 = vpack.c.bf16 %v593_v12, %v591_v58 }
 0x146   :  { %952 = vmatpush3.bf16.msra.mxu1 %v1302_v18 }
 0x147   :  { %954 = vmatprep.subr.bf16.mxu1 %v1311_v21 }
 0x14a   :  { %956 = vmatpush3.bf16.msra.mxu1 %v1319_v24 }
 0x14b   :  { %958 = vmatprep.subr.bf16.mxu1 %v925_v27 }
 0x14e   :  { %960 = vmatpush3.bf16.msra.mxu1 %v927_v31 }
 0x14f   :  { %962 = vmatprep.subr.bf16.mxu1 %v929_v35 }
 0x152   :  { %964 = vmatpush3.bf16.msra.mxu1 %v931_v39 }
 0x153   :  { %966 = vmatprep.subr.bf16.mxu1 %v965_v11 }
 0x155   :  { %575 = vmatmul.mubr.f32.vlgmr.msra.gmra.mrb[2].mxu1 %v400_v48 }
 0x156   :  { %663 = vmatprep.mubr.f32.mxu1 %v1044_v10  ;;  %968 = vmatpush1.bf16.msra.mxu1 %v967_v13 }
 0x157   :  { %970 = vmatprep.subr.bf16.mxu1 %v965_v11 }
 0x208   :  { %v863_v14 = vpop.f32.mrb[0].mxu1 }
 0x209   :  { %v864_v16 = vpop.f32.mrb[1].mxu1 }
 0x20a   :  { %v865_v17 = vadd.f32 %v864_v16, %v863_v14 }
 0x20c   :  { %v580_v18 = vmul.f32 0.03125, %v865_v17 }
 0x20e   :  { %v582_v22 = vmul.f32 %v580_v18, %v580_v18 }
 0x228   :  { %v898_v19 = vpop.f32.mrb[2].mxu1 }
 0x229   :  { %v899_v20 = vpop.f32.mrb[3].mxu1 }
 0x22a   :  { %v900_v21 = vadd.f32 %v899_v20, %v898_v19 }
 0x22c   :  { %v581_v23 = vmul.f32 0.03125, %v900_v21 }
 0x22e   :  { %v583_v24 = vsub.f32 %v581_v23, %v582_v22 }
 0x230   :  { %v585_v25 = vadd.f32 1e-05, %v583_v24 }
 0x232   :  { %1040 = vrsqrt.f32 %v585_v25 }
 0x23c   :  { %v1041_v27 = vpop.eup %1040 }
 0x23d   :  { %v587_v29 = vmul.f32 %v1041_v27, %v584_v26 }
 0x23f   :  { %828 = vmatmul.mubr.msk.f32.vlgmr.msra.gmra.mrb[4].mxu1 %vm595_vm2, %v587_v29  ;;  %v589_v31 = vmul.f32 %v587_v29, %v580_v18 }
 0x240   :  { %972 = vmatpush1.bf16.msra.mxu1 %v967_v13  ;;  %737 = vmatprep.mubr.f32.mxu1 %v1044_v10 }
 0x241   :  { %v590_v33 = vsub.f32 %v588_v30, %v589_v31 }
 0x243   :  { %829 = vmatmul.mubr.msk.f32.vlgmr.msra.gmra.mrb[6].mxu1 %vm595_vm2, %v590_v33 }
 0x312   :  { %v665_v35 = vpop.f32.mrb[4].mxu1 }
 0x313   :  { %v747_v37 = vrot.slane %v665_v35, %v746_v34  ;;  %v667_v38 = vpop.f32.mrb[5].mxu1 }
 0x314   :  { %v751_v39 = vrot.slane %v667_v38, %v746_v34 }
 0x315   :  { %v752_v43 = vmul.f32 %v747_v37, %v1348_v41 }
 0x316   :  { %v753_v45 = vmul.f32 %v751_v39, %v1352_v44  ;;  %v739_v46 = vpop.f32.mrb[6].mxu1 }
 0x317   :  { %v757_v47 = vrot.slane %v739_v46, %v746_v34  ;;  %v741_v49 = vpop.f32.mrb[7].mxu1 }
 0x318   :  { %v761_v51 = vrot.slane %v741_v49, %v746_v34 }
 0x319   :  { %v762_v52 = vadd.f32 %v757_v47, %v752_v43 }
 0x31a   :  { %v763_v53 = vadd.f32 %v761_v51, %v753_v45 }
 0x31b   :  { %vm764_vm3 = vcmp.ge.f32.partialorder %v762_v52, 0.0  ;;  %v766_v28 = vmul.f32 0.2, %v762_v52 }
 0x31c   :  { %vm765_vm4 = vcmp.ge.f32.partialorder %v763_v53, 0.0  ;;  %v767_v54 = vmul.f32 0.2, %v763_v53 }
 0x31d   :  { %v768_v55 = vsel %vm764_vm3, %v762_v52, %v766_v28 }
 0x31e   :  { %v769_v15 = vsel %vm765_vm4, %v763_v53, %v767_v54 }
 0x31f   :  { %v772_v57 = vcombine.low %v768_v55, %v769_v15 }
 0x321   :  { %830 = vst.sshfl [vmem:[%s1403_s6] sm:$0x33 pattern:$0x76325410] %v772_v57 }

// kernel: tile.29
= control target key start
LH: loop header
LB: loop body
LE: loop exit
PB: predicated region body
PF: predicated region fallthrough
CT: control target
= control target key end

     0   :  { %vm82_vm0 = vcmask 1047556   ;;  %vm84_vm1 = vcmask 130048   ;;  %s195_s9 = smov 48   ;;  %s196_s14 = smov 16   ;;  %vm103_vm2 = vcmask 523648   ;;  %vm124_vm3 = vcmask 392448   ;;  %s289_s0 = inlined_call_operand.vmem [shape: f32[4,16,16], index: 0, kind: input, shape index: {}]   ;;  %s290_s1 = inlined_call_operand.vmem [shape: f32[64,16], index: 1, kind: output, shape index: {}]  }
   0x1   :  { %v180_v0 = vld [vmem:[%s289_s0 + $0x1c] sm:$0xf]  ;;  %v181_v1 = vld [vmem:[%s289_s0 + $0x18] sm:$0xf]  ;;  %v182_v2 = vld [vmem:[%s289_s0 + $0x14] sm:$0xf] }
   0x2   :  { %48 = vst [vmem:[#allocation0 + $0x38] sm:$0xf] %v180_v0  ;;  %53 = vst [vmem:[#allocation0 + $0x30] sm:$0xf] %v181_v1  ;;  %v183_v3 = vld [vmem:[%s289_s0 + $0x10] sm:$0xf] }
   0x3   :  { %58 = vst [vmem:[#allocation0 + $0x28] sm:$0xf] %v182_v2  ;;  %v184_v4 = vld [vmem:[%s289_s0 + $0xc] sm:$0xf]  ;;  %v185_v5 = vld [vmem:[%s289_s0 + $0x8] sm:$0xf] }
   0x4   :  { %63 = vst [vmem:[#allocation0 + $0x20] sm:$0xf] %v183_v3  ;;  %68 = vst [vmem:[#allocation0 + $0x18] sm:$0xf] %v184_v4  ;;  %v186_v6 = vld [vmem:[%s289_s0 + $0x4] sm:$0xf] }
   0x5   :  { %73 = vst [vmem:[#allocation0 + $0x10] sm:$0xf] %v185_v5  ;;  %v78_v7 = vld [vmem:[%s289_s0] sm:$0xf]  ;;  %77 = vst [vmem:[#allocation0 + $0x8] sm:$0xf] %v186_v6 }
   0x6   :  { %79 = vst [vmem:[#allocation0] sm:$0xf] %v78_v7  ;;  %v172_v8 = vld [vmem:[%s289_s0 + $0x3c] sm:$0xf]  ;;  %v173_v9 = vld [vmem:[%s289_s0 + $0x38] sm:$0xf] }
   0x7   :  { %8 = vst [vmem:[#allocation0 + $0x78] sm:$0xf] %v172_v8  ;;  %13 = vst [vmem:[#allocation0 + $0x70] sm:$0xf] %v173_v9  ;;  %v174_v10 = vld [vmem:[%s289_s0 + $0x34] sm:$0xf] }
   0x8   :  { %v175_v11 = vld [vmem:[%s289_s0 + $0x30] sm:$0xf]  ;;  %v176_v12 = vld [vmem:[%s289_s0 + $0x2c] sm:$0xf]  ;;  %18 = vst [vmem:[#allocation0 + $0x68] sm:$0xf] %v174_v10 }
   0x9   :  { %23 = vst [vmem:[#allocation0 + $0x60] sm:$0xf] %v175_v11  ;;  %28 = vst [vmem:[#allocation0 + $0x58] sm:$0xf] %v176_v12  ;;  %v177_v13 = vld [vmem:[%s289_s0 + $0x28] sm:$0xf] }
   0xa   :  { %v178_v14 = vld [vmem:[%s289_s0 + $0x24] sm:$0xf]  ;;  %v179_v15 = vld [vmem:[%s289_s0 + $0x20] sm:$0xf]  ;;  %33 = vst [vmem:[#allocation0 + $0x50] sm:$0xf] %v177_v13 }
   0xb   :  { %38 = vst [vmem:[#allocation0 + $0x48] sm:$0xf] %v178_v14  ;;  %43 = vst [vmem:[#allocation0 + $0x40] sm:$0xf] %v179_v15  ;;  %s194_s0 = smov 32   ;;  %vm145_vm4 = vcmask 261248  }
   0xc   :  { %v119_v16 = vld [vmem:[#allocation0 + $0x2] ss:$8 sm:$0xf0]   ;;  %v98_v17 = vld [vmem:[#allocation0 + $0x3] ss:$8 sm:$0xf0]  }
   0xd   :  { %v117_v18 = vld [vmem:[#allocation0 + $0x2] ss:$8 sm:$0xf]   ;;  %v96_v19 = vld [vmem:[#allocation0 + $0x3] ss:$8 sm:$0xf]  }
   0xe   :  { %v121_v20 = vsel %vm82_vm0, %v119_v16, %v117_v18  ;;  %v100_v21 = vsel %vm82_vm0, %v98_v17, %v96_v19  ;;  %v138_v24 = vld [vmem:[#allocation0 + $0x1] ss:$8 sm:$0xf]   ;;  %v80_v32 = vld [vmem:[#allocation0] ss:$8 sm:$0xf]  }
   0xf   :  { %122 = vrot.lane.b32.xlu1 %v121_v20, %s194_s0  ;;  %101 = vrot.lane.b32.xlu0 %v100_v21, %s195_s9  ;;  %v140_v25 = vld [vmem:[#allocation0 + $0x1] ss:$8 sm:$0xf0]   ;;  %v81_v33 = vld [vmem:[#allocation0] ss:$8 sm:$0xf0]  }
  0x10   :  { %v129_v22 = vld [vmem:[#allocation0 + $0x42] ss:$8 sm:$0xf0]   ;;  %v108_v23 = vld [vmem:[#allocation0 + $0x43] ss:$8 sm:$0xf0]   ;;  %v83_v34 = vsel %vm82_vm0, %v81_v33, %v80_v32  ;;  %v142_v38 = vsel %vm82_vm0, %v140_v25, %v138_v24 }
  0x11   :  { %v150_v31 = vld [vmem:[#allocation0 + $0x41] ss:$8 sm:$0xf0]   ;;  %v89_v36 = vld [vmem:[#allocation0 + $0x40] ss:$8 sm:$0xf0]  }
  0x12   :  { %v127_v26 = vld [vmem:[#allocation0 + $0x42] ss:$8 sm:$0xf]   ;;  %v106_v27 = vld [vmem:[#allocation0 + $0x43] ss:$8 sm:$0xf]  }
  0x13   :  { %v131_v28 = vsel %vm82_vm0, %v129_v22, %v127_v26  ;;  %v110_v29 = vsel %vm82_vm0, %v108_v23, %v106_v27  ;;  %v148_v30 = vld [vmem:[#allocation0 + $0x41] ss:$8 sm:$0xf]   ;;  %v87_v35 = vld [vmem:[#allocation0 + $0x40] ss:$8 sm:$0xf]  }
  0x14   :  { %132 = vrot.lane.b32.xlu1 %v131_v28, %s194_s0  ;;  %111 = vrot.lane.b32.xlu0 %v110_v29, %s195_s9  ;;  %v152_v37 = vsel %vm82_vm0, %v150_v31, %v148_v30  ;;  %85 = vst.msk [vmem:[%s290_s1] sm:$0xff] %vm84_vm1, %v83_v34   ;;  %v91_v39 = vsel %vm82_vm0, %v89_v36, %v87_v35 }
  0x15   :  { %187 = vst.msk [vmem:[%s290_s1 + $0x8] sm:$0xff] %vm84_vm1, %v91_v39  }
  0x18   :  { %153 = vrot.lane.b32.xlu1 %v152_v37, %s196_s14  ;;  %143 = vrot.lane.b32.xlu0 %v142_v38, %s196_s14 }
  0x81   :  { %v123_v40 = vpop.permute.xlu1 %122   ;;  %v102_v41 = vpop.permute.xlu0 %101  }
  0x82   :  { %104 = vst.msk [vmem:[%s290_s1] sm:$0xff] %vm103_vm2, %v102_v41  }
  0x83   :  { %125 = vst.msk [vmem:[%s290_s1] sm:$0xff] %vm124_vm3, %v123_v40  }
  0x86   :  { %v133_v42 = vpop.permute.xlu1 %132   ;;  %v112_v43 = vpop.permute.xlu0 %111  }
  0x87   :  { %188 = vst.msk [vmem:[%s290_s1 + $0x8] sm:$0xff] %vm103_vm2, %v112_v43  }
  0x88   :  { %189 = vst.msk [vmem:[%s290_s1 + $0x8] sm:$0xff] %vm124_vm3, %v133_v42  }
  0x8a   :  { %v154_v44 = vpop.permute.xlu1 %153   ;;  %v144_v45 = vpop.permute.xlu0 %143  }
  0x8b   :  { %190 = vst.msk [vmem:[%s290_s1 + $0x8] sm:$0xff] %vm145_vm4, %v154_v44   ;;  %146 = vst.msk [vmem:[%s290_s1] sm:$0xff] %vm145_vm4, %v144_v45  }

// kernel: vae_forward.15
= control target key start
LH: loop header
LB: loop body
LE: loop exit
PB: predicated region body
PF: predicated region fallthrough
CT: control target
= control target key end

     0   :  { %v784_v0 = vmov 0   ;;  %v785_v2 = vmov 0.0|0.0   ;;  %vm118_vm0 = vcmask 130048   ;;  %vm786_vm1 = vmmov 0   ;;  %s1002_s1 = inlined_call_operand.vmem [shape: bf16[144,128], index: 1, kind: input, shape index: {}]   ;;  %s1003_s0 = inlined_call_operand.vmem [shape: bf16[32,144], index: 0, kind: input, shape index: {}]   ;;  %s1004_s2 = inlined_call_operand.vmem [shape: f32[128,32], index: 2, kind: input, shape index: {}]   ;;  %s1005_s3 = inlined_call_operand.vmem [shape: f32[32,128], index: 3, kind: input, shape index: {}]   ;;  %s1006_s4 = inlined_call_operand.vmem [shape: f32[1,32], index: 4, kind: input, shape index: {}]   ;;  %s1007_s5 = inlined_call_operand.vmem [shape: f32[1,32], index: 5, kind: input, shape index: {}]   ;;  %s1008_s6 = inlined_call_operand.vmem [shape: f32[32,128], index: 6, kind: output, shape index: {}]  }
   0x1   :  { %125 = vmatprep.subr.bf16.mxu0 %v784_v0  ;;  %v767_v1 = vld [vmem:[%s1002_s1] sm:$0xff]   ;;  %703 = vmatprep.subr.bf16.mxu1 %v785_v2  ;;  %v768_v3 = vld [vmem:[%s1002_s1 + $0x8] sm:$0xff]   ;;  %v769_v4 = vld [vmem:[%s1002_s1 + $0x10] sm:$0xff]   ;;  %v787_v39 = vmov 0.0   ;;  %vm367_vm2 = vcmask 261120  }
   0x2   :  { %126 = vmatpush1.bf16.msra.mxu0 %v767_v1  ;;  %v770_v5 = vld [vmem:[%s1002_s1 + $0x18] sm:$0xff]   ;;  %v778_v6 = vld [vmem:[%s1003_s0 + $0x4] ss:$8 sps:$4 sm:$0xff]   ;;  %v198_v9 = vld [vmem:[%s1004_s2 + $0x10] sm:$0xff]  ;;  %643 = vmatprep.mubr.msk.f32.mxu1 %vm786_vm1, %v787_v39 }
   0x3   :  { %127 = vmatprep.subr.bf16.mxu0 %v784_v0  ;;  %v196_v7 = vld [vmem:[%s1004_s2] sm:$0xff]  ;;  %563 = vmatprep.mubr.msk.bf16.mxu0 %vm118_vm0, %v778_v6  ;;  %v197_v8 = vld [vmem:[%s1004_s2 + $0x8] sm:$0xff]  ;;  %v199_v10 = vld [vmem:[%s1004_s2 + $0x18] sm:$0xff] }
   0x4   :  { %v852_v11 = vpack.c.bf16 %v197_v8, %v196_v7  ;;  %v771_v12 = vld [vmem:[%s1002_s1 + $0x20] sm:$0xff]   ;;  %v858_v13 = vpack.c.bf16 %v199_v10, %v198_v9  ;;  %v772_v14 = vld [vmem:[%s1002_s1 + $0x28] sm:$0xff]   ;;  %v773_v15 = vld [vmem:[%s1002_s1 + $0x30] sm:$0xff]  }
   0x5   :  { %v774_v16 = vld [vmem:[%s1002_s1 + $0x38] sm:$0xff]   ;;  %v775_v17 = vld [vmem:[%s1002_s1 + $0x40] sm:$0xff]   ;;  %v201_v22 = vld [vmem:[%s1004_s2 + $0x28] sm:$0xff] }
   0x6   :  { %128 = vmatpush1.bf16.msra.mxu0 %v768_v3  ;;  %705 = vmatpush3.bf16.msra.mxu1 %v852_v11  ;;  %v776_v18 = vld [vmem:[%s1003_s0] ss:$8 sps:$4 sm:$0xff]   ;;  %v779_v19 = vld [vmem:[%s1003_s0 + $0x14] ss:$8 sps:$4 sm:$0xff]   ;;  %v781_v20 = vld [vmem:[%s1003_s0 + $0x10] ss:$8 sps:$4 sm:$0xff]  }
   0x7   :  { %129 = vmatprep.subr.bf16.mxu0 %v784_v0  ;;  %706 = vmatprep.subr.bf16.mxu1 %v785_v2  ;;  %v200_v21 = vld [vmem:[%s1004_s2 + $0x20] sm:$0xff]  ;;  %v202_v24 = vld [vmem:[%s1004_s2 + $0x30] sm:$0xff]  ;;  %v203_v25 = vld [vmem:[%s1004_s2 + $0x38] sm:$0xff] }
   0x8   :  { %v710_v23 = vpack.c.bf16 %v201_v22, %v200_v21  ;;  %v713_v26 = vpack.c.bf16 %v203_v25, %v202_v24  ;;  %v204_v27 = vld [vmem:[%s1004_s2 + $0x40] sm:$0xff]  ;;  %v205_v28 = vld [vmem:[%s1004_s2 + $0x48] sm:$0xff]  ;;  %v206_v30 = vld [vmem:[%s1004_s2 + $0x50] sm:$0xff] }
   0x9   :  { %v716_v29 = vpack.c.bf16 %v205_v28, %v204_v27  ;;  %v207_v31 = vld [vmem:[%s1004_s2 + $0x58] sm:$0xff]  ;;  %v208_v33 = vld [vmem:[%s1004_s2 + $0x60] sm:$0xff]  ;;  %v209_v34 = vld [vmem:[%s1004_s2 + $0x68] sm:$0xff]  ;;  %v514_v28 = vlaneseq }
   0xa   :  { %130 = vmatpush1.bf16.msra.mxu0 %v769_v4  ;;  %708 = vmatpush3.bf16.msra.mxu1 %v858_v13  ;;  %v719_v32 = vpack.c.bf16 %v207_v31, %v206_v30  ;;  %v722_v35 = vpack.c.bf16 %v209_v34, %v208_v33  ;;  %v210_v36 = vld [vmem:[%s1004_s2 + $0x70] sm:$0xff]  ;;  %v211_v37 = vld [vmem:[%s1004_s2 + $0x78] sm:$0xff]  ;;  %v363_v7 = vld [vmem:[%s1005_s3] sm:$0xff] }
   0xb   :  { %131 = vmatprep.subr.bf16.mxu0 %v784_v0  ;;  %709 = vmatprep.subr.bf16.mxu1 %v785_v2  ;;  %v725_v38 = vpack.c.bf16 %v211_v37, %v210_v36  ;;  %v364_v8 = vld [vmem:[%s1005_s3 + $0x8] sm:$0xff]  ;;  %v365_v10 = vld [vmem:[%s1005_s3 + $0x10] sm:$0xff]  ;;  %v356_v22 = vld [vmem:[%s1006_s4] sm:$0x1] }
   0xc   :  { %v752_v9 = vpack.c.bf16 %v364_v8, %v363_v7 }
   0xe   :  { %132 = vmatpush1.bf16.msra.mxu0 %v770_v5  ;;  %711 = vmatpush3.bf16.msra.mxu1 %v710_v23 }
   0xf   :  { %133 = vmatprep.subr.bf16.mxu0 %v784_v0  ;;  %712 = vmatprep.subr.bf16.mxu1 %v785_v2 }
  0x12   :  { %134 = vmatpush1.bf16.msra.mxu0 %v771_v12  ;;  %714 = vmatpush3.bf16.msra.mxu1 %v713_v26 }
  0x13   :  { %135 = vmatprep.subr.bf16.mxu0 %v784_v0  ;;  %715 = vmatprep.subr.bf16.mxu1 %v785_v2 }
  0x16   :  { %136 = vmatpush1.bf16.msra.mxu0 %v772_v14  ;;  %717 = vmatpush3.bf16.msra.mxu1 %v716_v29 }
  0x17   :  { %137 = vmatprep.subr.bf16.mxu0 %v784_v0  ;;  %718 = vmatprep.subr.bf16.mxu1 %v785_v2 }
  0x1a   :  { %138 = vmatpush1.bf16.msra.mxu0 %v773_v15  ;;  %720 = vmatpush3.bf16.msra.mxu1 %v719_v32 }
  0x1b   :  { %139 = vmatprep.subr.bf16.mxu0 %v784_v0  ;;  %721 = vmatprep.subr.bf16.mxu1 %v785_v2 }
  0x1e   :  { %140 = vmatpush1.bf16.msra.mxu0 %v774_v16  ;;  %723 = vmatpush3.bf16.msra.mxu1 %v722_v35 }
  0x1f   :  { %141 = vmatprep.subr.bf16.mxu0 %v784_v0  ;;  %724 = vmatprep.subr.bf16.mxu1 %v785_v2 }
  0x22   :  { %142 = vmatpush1.bf16.msra.mxu0 %v775_v17  ;;  %726 = vmatpush3.bf16.msra.mxu1 %v725_v38 }
  0x23   :  { %751 = vmatprep.subr.bf16.mxu0 %v785_v2  ;;  %727 = vmatprep.subr.bf16.mxu1 %v785_v2 }
  0x25   :  { %158 = vmatmul.mubr.bf16.vlgmr.msra.gmra.mrb[0].mxu0 %v776_v18 }
  0x26   :  { %564 = vmatprep.mubr.msk.bf16.mxu0 %vm118_vm0, %v779_v19  ;;  %753 = vmatpush3.bf16.msra.mxu0 %v752_v9 }
  0x27   :  { %754 = vmatprep.subr.bf16.mxu0 %v785_v2 }
  0x2d   :  { %166 = vmatmul.mubr.bf16.gmra.mrb[4].mxu0 %v781_v20 }
  0x2e   :  { %689 = vmatprep.mubr.msk.f32.mxu0 %vm786_vm1, %v787_v39 }
  0xf8   :  { %v932_v40 = vpop.f32.mrb[0].mxu0 }
  0xf9   :  { %v161_v41 = vpop.f32.mrb[1].mxu0  ;;  %v183_v43 = vmul.f32 %v932_v40, %v932_v40 }
  0xfa   :  { %v934_v42 = vpop.f32.mrb[2].mxu0 }
  0xfb   :  { %v174_v44 = vadd.f32 %v934_v42, %v932_v40  ;;  %v184_v45 = vmul.f32 %v934_v42, %v934_v42  ;;  %v164_v46 = vpop.f32.mrb[3].mxu0 }
  0xfd   :  { %v187_v47 = vadd.f32 %v184_v45, %v183_v43 }
 0x100   :  { %v942_v48 = vpop.f32.mrb[4].mxu0 }
 0x101   :  { %v175_v49 = vadd.f32 %v174_v44, %v942_v48  ;;  %v185_v50 = vmul.f32 %v942_v48, %v942_v48  ;;  %v169_v51 = vpop.f32.mrb[5].mxu0 }
 0x102   :  { %v947_v52 = vpop.f32.mrb[6].mxu0 }
 0x103   :  { %v188_v53 = vadd.f32 %v187_v47, %v185_v50  ;;  %v176_v54 = vadd.f32 %v175_v49, %v947_v52  ;;  %v186_v55 = vmul.f32 %v947_v52, %v947_v52  ;;  %v172_v56 = vpop.f32.mrb[7].mxu0 }
 0x105   :  { %v177_v57 = vrot.slane %v176_v54, 4  ;;  %v189_v58 = vadd.f32 %v188_v53, %v186_v55 }
 0x107   :  { %v178_v59 = vadd.f32 %v177_v57, %v176_v54  ;;  %v190_v0 = vrot.slane %v189_v58, 4 }
 0x109   :  { %v179_v60 = vrot.slane %v178_v59, 2  ;;  %v191_v1 = vadd.f32 %v190_v0, %v189_v58 }
 0x10b   :  { %v180_v61 = vadd.f32 %v179_v60, %v178_v59  ;;  %v192_v3 = vrot.slane %v191_v1, 2 }
 0x10d   :  { %v181_v62 = vrot.slane %v180_v61, 1  ;;  %v193_v4 = vadd.f32 %v192_v3, %v191_v1 }
 0x10f   :  { %v182_v63 = vadd.f32 %v181_v62, %v180_v61  ;;  %v194_v5 = vrot.slane %v193_v4, 1 }
 0x111   :  { %644 = vmatmul.mubr.f32.vlgmr.msra.gmra.mrb[0].mxu1 %v182_v63  ;;  %v195_v6 = vadd.f32 %v194_v5, %v193_v4 }
 0x112   :  { %729 = vmatpush3.bf16.msra.mxu1 %v852_v11  ;;  %678 = vmatprep.mubr.msk.f32.mxu1 %vm786_vm1, %v787_v39  ;;  %v366_v11 = vld [vmem:[%s1005_s3 + $0x18] sm:$0xff] }
 0x113   :  { %730 = vmatprep.subr.bf16.mxu1 %v785_v2  ;;  %v755_v12 = vpack.c.bf16 %v366_v11, %v365_v10 }
 0x115   :  { %756 = vmatpush3.bf16.msra.mxu0 %v755_v12 }
 0x116   :  { %732 = vmatpush3.bf16.msra.mxu1 %v858_v13  ;;  %757 = vmatprep.subr.bf16.mxu0 %v785_v2 }
 0x117   :  { %733 = vmatprep.subr.bf16.mxu1 %v785_v2 }
 0x11a   :  { %735 = vmatpush3.bf16.msra.mxu1 %v710_v23 }
 0x11b   :  { %736 = vmatprep.subr.bf16.mxu1 %v785_v2 }
 0x11e   :  { %738 = vmatpush3.bf16.msra.mxu1 %v713_v26  ;;  %v360_v26 = vld [vmem:[%s1007_s5] sm:$0x1] }
 0x11f   :  { %739 = vmatprep.subr.bf16.mxu1 %v785_v2 }
 0x122   :  { %741 = vmatpush3.bf16.msra.mxu1 %v716_v29  ;;  %v515_v29 = vshrl.u32 %v514_v28, 7 }
 0x123   :  { %742 = vmatprep.subr.bf16.mxu1 %v785_v2 }
 0x124   :  { %v516_v30 = vsub.s32 0, %v515_v29 }
 0x126   :  { %744 = vmatpush3.bf16.msra.mxu1 %v719_v32 }
 0x127   :  { %745 = vmatprep.subr.bf16.mxu1 %v785_v2 }
 0x12a   :  { %747 = vmatpush3.bf16.msra.mxu1 %v722_v35 }
 0x12b   :  { %748 = vmatprep.subr.bf16.mxu1 %v785_v2 }
 0x12e   :  { %750 = vmatpush3.bf16.msra.mxu1 %v725_v38 }
 0x131   :  { %679 = vmatmul.mubr.f32.vlgmr.msra.gmra.mrb[2].mxu1 %v195_v6 }
 0x1e4   :  { %v278_v13 = vpop.f32.mrb[0].mxu1 }
 0x1e5   :  { %v645_v14 = vpop.f32.mrb[1].mxu1  ;;  %v352_v15 = vmul.f32 0.0078125, %v278_v13 }
 0x1e7   :  { %v354_v17 = vmul.f32 %v352_v15, %v352_v15 }
 0x204   :  { %v348_v16 = vpop.f32.mrb[2].mxu1 }
 0x205   :  { %v353_v18 = vmul.f32 0.0078125, %v348_v16  ;;  %v680_v19 = vpop.f32.mrb[3].mxu1 }
 0x207   :  { %v355_v20 = vsub.f32 %v353_v18, %v354_v17 }
 0x209   :  { %v357_v21 = vadd.f32 1e-05, %v355_v20 }
 0x20b   :  { %782 = vrsqrt.f32 %v357_v21 }
 0x215   :  { %v783_v23 = vpop.eup %782 }
 0x216   :  { %v359_v24 = vmul.f32 %v783_v23, %v356_v22 }
 0x218   :  { %690 = vmatmul.mubr.msk.f32.vlgmr.msra.gmra.mrb[8].mxu0 %vm367_vm2, %v359_v24  ;;  %v361_v25 = vmul.f32 %v359_v24, %v352_v15 }
 0x219   :  { %759 = vmatpush3.bf16.msra.mxu0 %v752_v9  ;;  %700 = vmatprep.mubr.msk.f32.mxu0 %vm786_vm1, %v787_v39 }
 0x21a   :  { %760 = vmatprep.subr.bf16.mxu0 %v785_v2  ;;  %v362_v27 = vsub.f32 %v360_v26, %v361_v25 }
 0x21d   :  { %762 = vmatpush3.bf16.msra.mxu0 %v755_v12 }
 0x220   :  { %701 = vmatmul.mubr.msk.f32.vlgmr.msra.gmra.mrb[10].mxu0 %vm367_vm2, %v362_v27 }
 0x2eb   :  { %v437_v31 = vpop.f32.mrb[8].mxu0 }
 0x2ec   :  { %v517_v32 = vrot.slane %v437_v31, %v516_v30  ;;  %v691_v33 = vpop.f32.mrb[9].mxu0 }
 0x2ee   :  { %v518_v34 = vmul.f32 %v517_v32, %v932_v40  ;;  %v519_v35 = vmul.f32 %v517_v32, %v934_v42  ;;  %v520_v36 = vmul.f32 %v517_v32, %v942_v48  ;;  %v521_v2 = vmul.f32 %v517_v32, %v947_v52 }
 0x2f3   :  { %v510_v37 = vpop.f32.mrb[10].mxu0 }
 0x2f4   :  { %v525_v38 = vrot.slane %v510_v37, %v516_v30  ;;  %v702_v39 = vpop.f32.mrb[11].mxu0 }
 0x2f6   :  { %v526_v41 = vadd.f32 %v525_v38, %v518_v34  ;;  %v527_v43 = vadd.f32 %v525_v38, %v519_v35  ;;  %v528_v44 = vadd.f32 %v525_v38, %v520_v36  ;;  %v529_v45 = vadd.f32 %v525_v38, %v521_v2 }
 0x2f8   :  { %vm530_vm3 = vcmp.ge.f32.partialorder %v526_v41, 0.0  ;;  %vm531_vm4 = vcmp.ge.f32.partialorder %v527_v43, 0.0  ;;  %vm532_vm5 = vcmp.ge.f32.partialorder %v528_v44, 0.0  ;;  %vm533_vm6 = vcmp.ge.f32.partialorder %v529_v45, 0.0 }
 0x2f9   :  { %v534_v46 = vmul.f32 0.2, %v526_v41  ;;  %v535_v47 = vmul.f32 0.2, %v527_v43  ;;  %v536_v40 = vmul.f32 0.2, %v528_v44 }
 0x2fa   :  { %v537_v49 = vmul.f32 0.2, %v529_v45 }
 0x2fb   :  { %v538_v42 = vsel %vm530_vm3, %v526_v41, %v534_v46  ;;  %v539_v50 = vsel %vm531_vm4, %v527_v43, %v535_v47  ;;  %v540_v48 = vsel %vm532_vm5, %v528_v44, %v536_v40 }
 0x2fc   :  { %v541_v51 = vsel %vm533_vm6, %v529_v45, %v537_v49  ;;  %542 = vst [vmem:[%s1008_s6] sm:$0xff] %v538_v42  ;;  %543 = vst [vmem:[%s1008_s6 + $0x8] sm:$0xff] %v539_v50 }
 0x2fd   :  { %544 = vst [vmem:[%s1008_s6 + $0x10] sm:$0xff] %v540_v48  ;;  %545 = vst [vmem:[%s1008_s6 + $0x18] sm:$0xff] %v541_v51 }

// kernel: vae_forward.16
= control target key start
LH: loop header
LB: loop body
LE: loop exit
PB: predicated region body
PF: predicated region fallthrough
CT: control target
= control target key end

     0   :  { %vm320_vm0 = vcmask 261120   ;;  %v1361_v42 = vmov 0.0|0.0   ;;  %vm1362_vm1 = vmmov 0   ;;  %v1363_v55 = vmov 0.0   ;;  %s1837_s1 = inlined_call_operand.vmem [shape: bf16[288,64], index: 1, kind: input, shape index: {}]   ;;  %s1838_s0 = inlined_call_operand.vmem [shape: bf16[128,288], index: 0, kind: input, shape index: {}]   ;;  %s1839_s2 = inlined_call_operand.vmem [shape: f32[64,16], index: 2, kind: input, shape index: {}]   ;;  %s1840_s3 = inlined_call_operand.vmem [shape: f32[16,64], index: 3, kind: input, shape index: {}]   ;;  %s1841_s4 = inlined_call_operand.vmem [shape: f32[1,16], index: 4, kind: input, shape index: {}]   ;;  %s1842_s5 = inlined_call_operand.vmem [shape: f32[1,16], index: 5, kind: input, shape index: {}]   ;;  %s1843_s6 = inlined_call_operand.vmem [shape: f32[128,64], index: 6, kind: output, shape index: {}]  }
   0x1   :  { %v1309_v0 = vld [vmem:[%s1837_s1 + $0x40] sm:$0xff]   ;;  %v1311_v2 = vld [vmem:[%s1837_s1 + $0x48] sm:$0xff]   ;;  %v1313_v4 = vld [vmem:[%s1837_s1 + $0x50] sm:$0xff]   ;;  %vm1844_vm2 = vcmask 523264   ;;  %vm797_vm3 = vcmask 130048  }
   0x2   :  { %v1310_v1 = vld [vmem:[%s1837_s1] sm:$0xff]   ;;  %1106 = vmatprep.subr.bf16.mxu0 %v1309_v0  ;;  %v1312_v3 = vld [vmem:[%s1837_s1 + $0x8] sm:$0xff]   ;;  %v1314_v5 = vld [vmem:[%s1837_s1 + $0x10] sm:$0xff]  }
   0x3   :  { %1107 = vmatpush3.bf16.msra.mxu0 %v1310_v1  ;;  %v1315_v6 = vld [vmem:[%s1837_s1 + $0x58] sm:$0xff]   ;;  %v1317_v8 = vld [vmem:[%s1837_s1 + $0x60] sm:$0xff]   ;;  %v1319_v11 = vld [vmem:[%s1837_s1 + $0x68] sm:$0xff]  }
   0x4   :  { %1108 = vmatprep.subr.bf16.mxu0 %v1311_v2  ;;  %v1316_v7 = vld [vmem:[%s1837_s1 + $0x18] sm:$0xff]   ;;  %v1323_v9 = vld [vmem:[%s1837_s1 + $0x80] sm:$0xff]   ;;  %v1320_v12 = vld [vmem:[%s1837_s1 + $0x28] sm:$0xff]  }
   0x5   :  { %v1318_v10 = vld [vmem:[%s1837_s1 + $0x20] sm:$0xff]   ;;  %1204 = vmatprep.subr.bf16.mxu1 %v1323_v9  ;;  %v1326_v13 = vld [vmem:[%s1837_s1 + $0x88] sm:$0xff]   ;;  %v1321_v14 = vld [vmem:[%s1837_s1 + $0x70] sm:$0xff]  }
   0x6   :  { %1205 = vmatpush3.bf16.msra.mxu1 %v1323_v9  ;;  %v1329_v15 = vld [vmem:[%s1838_s0 + $0x4] ss:$12 sps:$4 sm:$0xff]   ;;  %v1330_v16 = vld [vmem:[%s1838_s0 + $0x8] ss:$12 sps:$4 sm:$0xff]   ;;  %v1331_v17 = vld [vmem:[%s1838_s0 + $0x20] ss:$12 sps:$4 sm:$0xff]  }
   0x7   :  { %1109 = vmatpush3.bf16.msra.mxu0 %v1312_v3  ;;  %1206 = vmatprep.subr.bf16.mxu1 %v1326_v13  ;;  %v1322_v18 = vld [vmem:[%s1837_s1 + $0x30] sm:$0xff]   ;;  %v1324_v19 = vld [vmem:[%s1837_s1 + $0x78] sm:$0xff]   ;;  %v1327_v24 = vld [vmem:[%s1838_s0] ss:$12 sps:$4 sm:$0xff]  }
   0x8   :  { %1110 = vmatprep.subr.bf16.mxu0 %v1313_v4  ;;  %377 = vmatprep.mubr.bf16.mxu0 %v1329_v15  ;;  %v1338_v20 = vld [vmem:[%s1838_s0 + $0x38] ss:$12 sps:$4 sm:$0xff]   ;;  %v1339_v22 = vld [vmem:[%s1838_s0 + $0x50] ss:$12 sps:$4 sm:$0xff]   ;;  %v1346_v23 = vld [vmem:[%s1838_s0 + $0x68] ss:$12 sps:$4 sm:$0xff]  }
   0x9   :  { %1208 = vmatprep.mubr.msk.bf16.mxu1 %vm320_vm0, %v1330_v16  ;;  %v1325_v21 = vld [vmem:[%s1837_s1 + $0x38] sm:$0xff]   ;;  %v1347_v26 = vld [vmem:[%s1838_s0 + $0x80] ss:$12 sps:$4 sm:$0xff]   ;;  %v1342_v33 = vld [vmem:[%s1838_s0 + $0x48] ss:$12 sps:$4 sm:$0xff]  }
   0xa   :  { %1207 = vmatpush3.bf16.msra.mxu1 %v1326_v13  ;;  %v1332_v25 = vld [vmem:[%s1838_s0 + $0x1c] ss:$12 sps:$4 sm:$0xff]   ;;  %v1354_v27 = vld [vmem:[%s1838_s0 + $0x98] ss:$12 sps:$4 sm:$0xff]   ;;  %v1335_v29 = vld [vmem:[%s1838_s0 + $0x34] ss:$12 sps:$4 sm:$0xff]  }
   0xb   :  { %1111 = vmatpush3.bf16.msra.mxu0 %v1314_v5  ;;  %v1334_v28 = vld [vmem:[%s1838_s0 + $0x18] ss:$12 sps:$4 sm:$0xff]   ;;  %v1355_v30 = vld [vmem:[%s1838_s0 + $0xb0] ss:$12 sps:$4 sm:$0xff]   ;;  %v1345_v35 = vld [vmem:[%s1838_s0 + $0x60] ss:$12 sps:$4 sm:$0xff]   ;;  %1276 = vmatprep.subr.bf16.mxu1 %v1361_v42 }
   0xc   :  { %1112 = vmatprep.subr.bf16.mxu0 %v1315_v6  ;;  %v1337_v31 = vld [vmem:[%s1838_s0 + $0x30] ss:$12 sps:$4 sm:$0xff]   ;;  %v1340_v32 = vld [vmem:[%s1838_s0 + $0x4c] ss:$12 sps:$4 sm:$0xff]   ;;  %v1351_v38 = vld [vmem:[%s1838_s0 + $0x94] ss:$12 sps:$4 sm:$0xff]  }
   0xd   :  { %1209 = vmatmul.mubr.msk.bf16.vlgmr.msra.gmra.mrb[0].mxu1 %vm320_vm0, %v1331_v17  ;;  %v1343_v34 = vld [vmem:[%s1838_s0 + $0x64] ss:$12 sps:$4 sm:$0xff]   ;;  %v1348_v36 = vld [vmem:[%s1838_s0 + $0x7c] ss:$12 sps:$4 sm:$0xff]   ;;  %v1356_v40 = vld [vmem:[%s1838_s0 + $0xac] ss:$12 sps:$4 sm:$0xff]  }
   0xe   :  { %1212 = vmatprep.mubr.msk.bf16.mxu1 %vm320_vm0, %v1338_v20  ;;  %v1350_v37 = vld [vmem:[%s1838_s0 + $0x78] ss:$12 sps:$4 sm:$0xff]   ;;  %v1353_v39 = vld [vmem:[%s1838_s0 + $0x90] ss:$12 sps:$4 sm:$0xff]   ;;  %v1358_v41 = vld [vmem:[%s1838_s0 + $0xa8] ss:$12 sps:$4 sm:$0xff]  }
   0xf   :  { %1113 = vmatpush3.bf16.msra.mxu0 %v1316_v7  ;;  %v630_v43 = vld [vmem:[%s1839_s2] sm:$0xff]  ;;  %v631_v44 = vld [vmem:[%s1839_s2 + $0x8] sm:$0xff]  ;;  %v632_v46 = vld [vmem:[%s1839_s2 + $0x10] sm:$0xff] }
  0x10   :  { %1114 = vmatprep.subr.bf16.mxu0 %v1317_v8  ;;  %v1540_v45 = vpack.c.bf16 %v631_v44, %v630_v43  ;;  %v633_v47 = vld [vmem:[%s1839_s2 + $0x18] sm:$0xff]  ;;  %v634_v49 = vld [vmem:[%s1839_s2 + $0x20] sm:$0xff]  ;;  %v635_v50 = vld [vmem:[%s1839_s2 + $0x28] sm:$0xff] }
  0x11   :  { %v1550_v48 = vpack.c.bf16 %v633_v47, %v632_v46  ;;  %v1560_v51 = vpack.c.bf16 %v635_v50, %v634_v49  ;;  %v636_v52 = vld [vmem:[%s1839_s2 + $0x30] sm:$0xff]  ;;  %v637_v53 = vld [vmem:[%s1839_s2 + $0x38] sm:$0xff] }
  0x12   :  { %1278 = vmatpush3.bf16.msra.mxu1 %v1540_v45  ;;  %v1570_v54 = vpack.c.bf16 %v637_v53, %v636_v52 }
  0x13   :  { %1115 = vmatpush3.bf16.msra.mxu0 %v1318_v10  ;;  %1279 = vmatprep.subr.bf16.mxu1 %v1361_v42 }
  0x14   :  { %1116 = vmatprep.subr.bf16.mxu0 %v1319_v11 }
  0x15   :  { %1213 = vmatmul.mubr.msk.bf16.gmra.mrb[4].mxu1 %vm320_vm0, %v1339_v22 }
  0x16   :  { %1216 = vmatprep.mubr.msk.bf16.mxu1 %vm320_vm0, %v1346_v23  ;;  %1281 = vmatpush3.bf16.msra.mxu1 %v1550_v48 }
  0x17   :  { %1117 = vmatpush3.bf16.msra.mxu0 %v1320_v12  ;;  %1282 = vmatprep.subr.bf16.mxu1 %v1361_v42 }
  0x18   :  { %1118 = vmatprep.subr.bf16.mxu0 %v1321_v14 }
  0x1a   :  { %1284 = vmatpush3.bf16.msra.mxu1 %v1560_v51 }
  0x1b   :  { %1119 = vmatpush3.bf16.msra.mxu0 %v1322_v18  ;;  %1285 = vmatprep.subr.bf16.mxu1 %v1361_v42 }
  0x1c   :  { %1120 = vmatprep.subr.bf16.mxu0 %v1324_v19 }
  0x1d   :  { %1217 = vmatmul.mubr.msk.bf16.gmra.mrb[8].mxu1 %vm320_vm0, %v1347_v26 }
  0x1e   :  { %1220 = vmatprep.mubr.msk.bf16.mxu1 %vm320_vm0, %v1354_v27  ;;  %1287 = vmatpush3.bf16.msra.mxu1 %v1570_v54 }
  0x1f   :  { %1121 = vmatpush3.bf16.msra.mxu0 %v1325_v21  ;;  %1288 = vmatprep.subr.bf16.mxu1 %v1361_v42 }
  0x22   :  { %378 = vmatmul.mubr.bf16.vlgmr.msra.gmra.mrb[0].mxu0 %v1327_v24 }
  0x23   :  { %385 = vmatprep.mubr.bf16.mxu0 %v1332_v25 }
  0x25   :  { %1221 = vmatmul.mubr.msk.bf16.gmra.mrb[12].mxu1 %vm320_vm0, %v1355_v30  ;;  %vm1845_vm0 = vcmask 523264  }
  0x26   :  { %1240 = vmatprep.mubr.msk.f32.mxu1 %vm1362_vm1, %v1363_v55 }
  0x2a   :  { %386 = vmatmul.mubr.bf16.gmra.mrb[4].mxu0 %v1334_v28 }
  0x2b   :  { %393 = vmatprep.mubr.bf16.mxu0 %v1335_v29 }
  0x32   :  { %394 = vmatmul.mubr.bf16.gmra.mrb[8].mxu0 %v1337_v31 }
  0x33   :  { %401 = vmatprep.mubr.bf16.mxu0 %v1340_v32 }
  0x3a   :  { %402 = vmatmul.mubr.bf16.gmra.mrb[12].mxu0 %v1342_v33 }
  0x3b   :  { %409 = vmatprep.mubr.bf16.mxu0 %v1343_v34 }
  0x42   :  { %410 = vmatmul.mubr.bf16.gmra.mrb[16].mxu0 %v1345_v35 }
  0x43   :  { %417 = vmatprep.mubr.bf16.mxu0 %v1348_v36 }
  0x4a   :  { %418 = vmatmul.mubr.bf16.gmra.mrb[20].mxu0 %v1350_v37 }
  0x4b   :  { %425 = vmatprep.mubr.bf16.mxu0 %v1351_v38 }
  0x52   :  { %426 = vmatmul.mubr.bf16.gmra.mrb[24].mxu0 %v1353_v39 }
  0x53   :  { %433 = vmatprep.mubr.bf16.mxu0 %v1356_v40 }
  0x5a   :  { %434 = vmatmul.mubr.bf16.gmra.mrb[28].mxu0 %v1358_v41 }
  0xe0   :  { %v1210_v56 = vpop.f32.mrb[0].mxu1 }
  0xe1   :  { %v476_v57 = vpop.f32.mrb[1].mxu1 }
  0xe2   :  { %v1211_v58 = vpop.f32.mrb[2].mxu1 }
  0xe3   :  { %v479_v59 = vpop.f32.mrb[3].mxu1 }
  0xe8   :  { %v1214_v60 = vpop.f32.mrb[4].mxu1 }
  0xe9   :  { %v492_v61 = vpop.f32.mrb[5].mxu1 }
  0xea   :  { %v1215_v63 = vpop.f32.mrb[6].mxu1 }
  0xeb   :  { %v495_v1 = vpop.f32.mrb[7].mxu1 }
  0xf0   :  { %v1580_v8 = vpop.f32.mrb[8].mxu1 }
  0xf1   :  { %v1582_v9 = vpop.f32.mrb[9].mxu1 }
  0xf2   :  { %v1584_v11 = vpop.f32.mrb[10].mxu1 }
  0xf3   :  { %v1586_v13 = vpop.f32.mrb[11].mxu1 }
  0xf5   :  { %v1122_v62 = vpop.f32.mrb[0].mxu0 }
  0xf6   :  { %v1123_v0 = vpop.f32.mrb[1].mxu0 }
  0xf7   :  { %v1124_v2 = vadd.f32 %v1123_v0, %v1122_v62  ;;  %v1125_v3 = vpop.f32.mrb[2].mxu0 }
  0xf8   :  { %v1126_v4 = vpop.f32.mrb[3].mxu0  ;;  %v1592_v20 = vpop.f32.mrb[12].mxu1 }
  0xf9   :  { %v1127_v5 = vadd.f32 %v1126_v4, %v1125_v3  ;;  %v1576_v6 = vadd.f32 %v1124_v2, %v476_v57  ;;  %v1594_v21 = vpop.f32.mrb[13].mxu1 }
  0xfa   :  { %v1596_v23 = vpop.f32.mrb[14].mxu1 }
  0xfb   :  { %v1578_v7 = vadd.f32 %v1127_v5, %v479_v59  ;;  %v1598_v25 = vpop.f32.mrb[15].mxu1  ;;  %v577_v32 = vmul.f32 %v1576_v6, %v1576_v6  ;;  %v540_v36 = vsel %vm1844_vm2, %v1576_v6, 0.0 }
  0xfd   :  { %v1128_v10 = vpop.f32.mrb[4].mxu0  ;;  %v578_v29 = vmul.f32 %v1578_v7, %v1578_v7  ;;  %v541_v33 = vsel %vm1844_vm2, %v1578_v7, 0.0  ;;  %v593_v43 = vsel %vm1844_vm2, %v577_v32, 0.0 }
  0xfe   :  { %v1129_v12 = vpop.f32.mrb[5].mxu0  ;;  %v542_v40 = vadd.f32 %v541_v33, %v540_v36 }
  0xff   :  { %v1130_v14 = vadd.f32 %v1129_v12, %v1128_v10  ;;  %v1131_v15 = vpop.f32.mrb[6].mxu0  ;;  %v594_v37 = vsel %vm1844_vm2, %v578_v29, 0.0 }
 0x100   :  { %v1132_v16 = vpop.f32.mrb[7].mxu0  ;;  %v595_v50 = vadd.f32 %v594_v37, %v593_v43 }
 0x101   :  { %v1588_v17 = vadd.f32 %v1210_v56, %v1130_v14  ;;  %v1133_v18 = vadd.f32 %v1132_v16, %v1131_v15 }
 0x103   :  { %v1590_v19 = vadd.f32 %v1211_v58, %v1133_v18  ;;  %v579_v34 = vmul.f32 %v1588_v17, %v1588_v17  ;;  %v543_v38 = vsel %vm1844_vm2, %v1588_v17, 0.0 }
 0x104   :  { %v544_v52 = vadd.f32 %v543_v38, %v542_v40 }
 0x105   :  { %v1134_v22 = vpop.f32.mrb[8].mxu0  ;;  %v596_v44 = vsel %vm1844_vm2, %v579_v34, 0.0  ;;  %v580_v46 = vmul.f32 %v1590_v19, %v1590_v19  ;;  %v545_v56 = vsel %vm1844_vm2, %v1590_v19, 0.0 }
 0x106   :  { %v1135_v24 = vpop.f32.mrb[9].mxu0  ;;  %v546_v2 = vadd.f32 %v545_v56, %v544_v52 }
 0x107   :  { %v1136_v26 = vadd.f32 %v1135_v24, %v1134_v22  ;;  %v1137_v27 = vpop.f32.mrb[10].mxu0  ;;  %v598_v62 = vsel %vm1844_vm2, %v580_v46, 0.0 }
 0x108   :  { %v1138_v28 = vpop.f32.mrb[11].mxu0 }
 0x109   :  { %v1139_v30 = vadd.f32 %v1138_v28, %v1137_v27  ;;  %v1602_v31 = vadd.f32 %v1136_v26, %v492_v61  ;;  %v597_v61 = vadd.f32 %v596_v44, %v595_v50 }
 0x10b   :  { %v1610_v35 = vadd.f32 %v1139_v30, %v495_v1  ;;  %v581_v57 = vmul.f32 %v1602_v31, %v1602_v31  ;;  %v547_v0 = vsel %vm1844_vm2, %v1602_v31, 0.0  ;;  %v599_v12 = vadd.f32 %v598_v62, %v597_v61 }
 0x10c   :  { %v548_v10 = vadd.f32 %v547_v0, %v546_v2 }
 0x10d   :  { %v1140_v39 = vpop.f32.mrb[12].mxu0  ;;  %v600_v3 = vsel %vm1844_vm2, %v581_v57, 0.0  ;;  %v582_v4 = vmul.f32 %v1610_v35, %v1610_v35  ;;  %v549_v14 = vsel %vm1844_vm2, %v1610_v35, 0.0 }
 0x10e   :  { %v1141_v41 = vpop.f32.mrb[13].mxu0  ;;  %v550_v29 = vadd.f32 %v549_v14, %v548_v10 }
 0x10f   :  { %v1142_v47 = vadd.f32 %v1141_v41, %v1140_v39  ;;  %v1143_v49 = vpop.f32.mrb[14].mxu0  ;;  %v602_v24 = vsel %vm1844_vm2, %v582_v4, 0.0 }
 0x110   :  { %v1144_v53 = vpop.f32.mrb[15].mxu0 }
 0x111   :  { %v1625_v58 = vadd.f32 %v1214_v60, %v1142_v47  ;;  %v1145_v59 = vadd.f32 %v1144_v53, %v1143_v49 }
 0x113   :  { %v1630_v1 = vadd.f32 %v1215_v63, %v1145_v59  ;;  %v583_v15 = vmul.f32 %v1625_v58, %v1625_v58  ;;  %v601_v63 = vadd.f32 %v600_v3, %v599_v12  ;;  %v551_v26 = vsel %vm1844_vm2, %v1625_v58, 0.0 }
 0x114   :  { %v552_v36 = vadd.f32 %v551_v26, %v550_v29 }
 0x115   :  { %v1146_v5 = vpop.f32.mrb[16].mxu0  ;;  %v604_v30 = vsel %vm1844_vm2, %v583_v15, 0.0  ;;  %v584_v32 = vmul.f32 %v1630_v1, %v1630_v1  ;;  %v603_v34 = vadd.f32 %v602_v24, %v601_v63  ;;  %v553_v37 = vsel %vm1844_vm2, %v1630_v1, 0.0 }
 0x116   :  { %v1147_v60 = vpop.f32.mrb[17].mxu0 }
 0x117   :  { %v1148_v16 = vadd.f32 %v1147_v60, %v1146_v5  ;;  %v1149_v18 = vpop.f32.mrb[18].mxu0  ;;  %v606_v41 = vsel %vm1844_vm2, %v584_v32, 0.0 }
 0x118   :  { %v1150_v22 = vpop.f32.mrb[19].mxu0 }
 0x119   :  { %v1151_v27 = vadd.f32 %v1150_v22, %v1149_v18  ;;  %v1643_v28 = vadd.f32 %v1148_v16, %v1582_v9  ;;  %v605_v9 = vadd.f32 %v604_v30, %v603_v34 }
 0x11b   :  { %v1649_v33 = vadd.f32 %v1151_v27, %v1586_v13  ;;  %v585_v38 = vmul.f32 %v1643_v28, %v1643_v28  ;;  %v555_v43 = vsel %vm1844_vm2, %v1643_v28, 0.0  ;;  %v554_v13 = vadd.f32 %v553_v37, %v552_v36 }
 0x11c   :  { %v607_v57 = vadd.f32 %v606_v41, %v605_v9 }
 0x11d   :  { %v1152_v39 = vpop.f32.mrb[20].mxu0  ;;  %v608_v49 = vsel %vm1844_vm2, %v585_v38, 0.0  ;;  %v586_v50 = vmul.f32 %v1649_v33, %v1649_v33  ;;  %v556_v56 = vadd.f32 %v555_v43, %v554_v13  ;;  %v557_v59 = vsel %vm1844_vm2, %v1649_v33, 0.0 }
 0x11e   :  { %v1153_v40 = vpop.f32.mrb[21].mxu0  ;;  %v609_v0 = vadd.f32 %v608_v49, %v607_v57 }
 0x11f   :  { %v1154_v44 = vadd.f32 %v1153_v40, %v1152_v39  ;;  %v1155_v46 = vpop.f32.mrb[22].mxu0  ;;  %v610_v2 = vsel %vm1844_vm2, %v586_v50, 0.0  ;;  %v558_v4 = vadd.f32 %v557_v59, %v556_v56 }
 0x120   :  { %v1156_v47 = vpop.f32.mrb[23].mxu0  ;;  %v611_v15 = vadd.f32 %v610_v2, %v609_v0 }
 0x121   :  { %v1662_v52 = vadd.f32 %v1580_v8, %v1154_v44  ;;  %v1157_v53 = vadd.f32 %v1156_v47, %v1155_v46 }
 0x123   :  { %v587_v61 = vmul.f32 %v1662_v52, %v1662_v52  ;;  %v1669_v62 = vadd.f32 %v1584_v11, %v1157_v53  ;;  %v559_v3 = vsel %vm1844_vm2, %v1662_v52, 0.0 }
 0x124   :  { %v560_v16 = vadd.f32 %v559_v3, %v558_v4 }
 0x125   :  { %v1158_v8 = vpop.f32.mrb[24].mxu0  ;;  %v612_v10 = vsel %vm1844_vm2, %v587_v61, 0.0  ;;  %v588_v12 = vmul.f32 %v1669_v62, %v1669_v62  ;;  %v561_v18 = vsel %vm1844_vm2, %v1669_v62, 0.0 }
 0x126   :  { %v1159_v5 = vpop.f32.mrb[25].mxu0  ;;  %v613_v24 = vadd.f32 %v612_v10, %v611_v15  ;;  %v562_v32 = vadd.f32 %v561_v18, %v560_v16 }
 0x127   :  { %v1160_v60 = vadd.f32 %v1159_v5, %v1158_v8  ;;  %v1161_v14 = vpop.f32.mrb[26].mxu0  ;;  %v614_v26 = vsel %vm1844_vm2, %v588_v12, 0.0 }
 0x128   :  { %v1162_v11 = vpop.f32.mrb[27].mxu0  ;;  %v615_v38 = vadd.f32 %v614_v26, %v613_v24 }
 0x129   :  { %v1163_v63 = vadd.f32 %v1162_v11, %v1161_v14  ;;  %v1680_v22 = vadd.f32 %v1160_v60, %v1594_v21 }
 0x12b   :  { %v563_v27 = vsel %vm1844_vm2, %v1680_v22, 0.0  ;;  %v589_v29 = vmul.f32 %v1680_v22, %v1680_v22  ;;  %v1688_v30 = vadd.f32 %v1163_v63, %v1598_v25 }
 0x12c   :  { %v564_v37 = vadd.f32 %v563_v27, %v562_v32 }
 0x12d   :  { %v616_v34 = vsel %vm1844_vm2, %v589_v29, 0.0  ;;  %v590_v36 = vmul.f32 %v1688_v30, %v1688_v30  ;;  %v1164_v21 = vpop.f32.mrb[28].mxu0  ;;  %v565_v9 = vsel %vm1844_vm2, %v1688_v30, 0.0 }
 0x12e   :  { %v1165_v39 = vpop.f32.mrb[29].mxu0  ;;  %v617_v43 = vadd.f32 %v616_v34, %v615_v38  ;;  %v566_v47 = vadd.f32 %v565_v9, %v564_v37  ;;  %v788_v37 = vld [vmem:[%s1841_s4] sm:$0x1] }
 0x12f   :  { %v1166_v40 = vadd.f32 %v1165_v39, %v1164_v21  ;;  %v1167_v41 = vpop.f32.mrb[30].mxu0  ;;  %v618_v25 = vsel %vm1844_vm2, %v590_v36, 0.0 }
 0x130   :  { %v1168_v44 = vpop.f32.mrb[31].mxu0  ;;  %v619_v56 = vadd.f32 %v618_v25, %v617_v43 }
 0x131   :  { %v1697_v46 = vadd.f32 %v1592_v20, %v1166_v40  ;;  %v1169_v13 = vadd.f32 %v1168_v44, %v1167_v41  ;;  %v944_v41 = vlaneseq }
 0x133   :  { %v567_v49 = vsel %vm1844_vm2, %v1697_v46, 0.0  ;;  %v591_v50 = vmul.f32 %v1697_v46, %v1697_v46  ;;  %v1704_v53 = vadd.f32 %v1596_v23, %v1169_v13  ;;  %v945_v43 = vshrl.u32 %v944_v41, 7 }
 0x134   :  { %v568_v57 = vadd.f32 %v567_v49, %v566_v47 }
 0x135   :  { %v620_v59 = vsel %vm1844_vm2, %v591_v50, 0.0  ;;  %v569_v61 = vsel %vm1844_vm2, %v1704_v53, 0.0  ;;  %v592_v20 = vmul.f32 %v1704_v53, %v1704_v53  ;;  %v946_v44 = vsub.s32 0, %v945_v43 }
 0x136   :  { %v621_v0 = vadd.f32 %v620_v59, %v619_v56  ;;  %v570_v2 = vadd.f32 %v569_v61, %v568_v57 }
 0x137   :  { %v622_v3 = vsel %vm1844_vm2, %v592_v20, 0.0 }
 0x138   :  { %v571_v8 = vrot.slane %v570_v2, 4  ;;  %v623_v5 = vadd.f32 %v622_v3, %v621_v0 }
 0x13a   :  { %v572_v4 = vadd.f32 %v571_v8, %v570_v2  ;;  %v624_v12 = vrot.slane %v623_v5, 4 }
 0x13c   :  { %v573_v10 = vrot.slane %v572_v4, 2  ;;  %v625_v15 = vadd.f32 %v624_v12, %v623_v5 }
 0x13e   :  { %v574_v23 = vadd.f32 %v573_v10, %v572_v4  ;;  %v626_v16 = vrot.slane %v625_v15, 2 }
 0x140   :  { %v575_v60 = vrot.slane %v574_v23, 1  ;;  %v627_v11 = vadd.f32 %v626_v16, %v625_v15 }
 0x142   :  { %v576_v14 = vadd.f32 %v575_v60, %v574_v23  ;;  %v628_v18 = vrot.slane %v627_v11, 1 }
 0x144   :  { %1241 = vmatmul.mubr.msk.f32.vlgmr.msra.gmra.mrb[16].mxu1 %vm1844_vm2, %v576_v14  ;;  %v629_v63 = vadd.f32 %v628_v18, %v627_v11 }
 0x145   :  { %1290 = vmatpush3.bf16.msra.mxu1 %v1540_v45  ;;  %1259 = vmatprep.mubr.msk.f32.mxu1 %vm1362_vm1, %v1363_v55  ;;  %v795_v45 = vld [vmem:[%s1840_s3] sm:$0xff] }
 0x146   :  { %1291 = vmatprep.subr.bf16.mxu1 %v1361_v42 }
 0x149   :  { %1293 = vmatpush3.bf16.msra.mxu1 %v1550_v48  ;;  %v796_v48 = vld [vmem:[%s1840_s3 + $0x8] sm:$0xff] }
 0x14a   :  { %1294 = vmatprep.subr.bf16.mxu1 %v1361_v42 }
 0x14d   :  { %1296 = vmatpush3.bf16.msra.mxu1 %v1560_v51  ;;  %v1301_v51 = vpack.c.bf16 %v796_v48, %v795_v45 }
 0x14e   :  { %1297 = vmatprep.subr.bf16.mxu1 %v1361_v42 }
 0x151   :  { %1299 = vmatpush3.bf16.msra.mxu1 %v1570_v54 }
 0x152   :  { %1300 = vmatprep.subr.bf16.mxu1 %v1361_v42 }
 0x154   :  { %1260 = vmatmul.mubr.msk.f32.vlgmr.msra.gmra.mrb[18].mxu1 %vm1844_vm2, %v629_v63  ;;  %vm1846_vm2 = vmmov %vm1845_vm0 }
 0x155   :  { %1266 = vmatprep.mubr.msk.f32.mxu1 %vm1362_vm1, %v1363_v55  ;;  %1302 = vmatpush3.bf16.msra.mxu1 %v1301_v51 }
 0x156   :  { %1303 = vmatprep.subr.bf16.mxu1 %v1361_v42  ;;  %v792_v42 = vld [vmem:[%s1842_s5] sm:$0x1] }
 0x217   :  { %v707_v54 = vpop.f32.mrb[16].mxu1 }
 0x218   :  { %v1242_v24 = vpop.f32.mrb[17].mxu1  ;;  %v784_v26 = vmul.f32 0.001953125, %v707_v54 }
 0x21a   :  { %v786_v29 = vmul.f32 %v784_v26, %v784_v26 }
 0x227   :  { %v780_v27 = vpop.f32.mrb[18].mxu1 }
 0x228   :  { %v785_v32 = vmul.f32 0.001953125, %v780_v27  ;;  %v1261_v34 = vpop.f32.mrb[19].mxu1 }
 0x22a   :  { %v787_v36 = vsub.f32 %v785_v32, %v786_v29 }
 0x22c   :  { %v789_v21 = vadd.f32 1e-05, %v787_v36 }
 0x22e   :  { %1359 = vrsqrt.f32 %v789_v21 }
 0x238   :  { %v1360_v38 = vpop.eup %1359 }
 0x239   :  { %v791_v39 = vmul.f32 %v1360_v38, %v788_v37 }
 0x23b   :  { %1267 = vmatmul.mubr.msk.f32.vlgmr.msra.gmra.mrb[20].mxu1 %vm797_vm3, %v791_v39  ;;  %v793_v9 = vmul.f32 %v791_v39, %v784_v26 }
 0x23c   :  { %1305 = vmatpush3.bf16.msra.mxu1 %v1301_v51  ;;  %1273 = vmatprep.mubr.msk.f32.mxu1 %vm1362_vm1, %v1363_v55 }
 0x23d   :  { %v794_v40 = vsub.f32 %v792_v42, %v793_v9 }
 0x23f   :  { %1274 = vmatmul.mubr.msk.f32.vlgmr.msra.gmra.mrb[22].mxu1 %vm797_vm3, %v794_v40 }
 0x30e   :  { %v867_v25 = vpop.f32.mrb[20].mxu1 }
 0x30f   :  { %v947_v13 = vrot.slane %v867_v25, %v946_v44  ;;  %v1268_v47 = vpop.f32.mrb[21].mxu1 }
 0x311   :  { %v948_v49 = vmul.f32 %v947_v13, %v1576_v6  ;;  %v949_v56 = vmul.f32 %v947_v13, %v1578_v7  ;;  %v950_v57 = vmul.f32 %v947_v13, %v1588_v17  ;;  %v951_v59 = vmul.f32 %v947_v13, %v1590_v19 }
 0x312   :  { %v940_v50 = vpop.f32.mrb[22].mxu1  ;;  %v952_v61 = vmul.f32 %v947_v13, %v1602_v31  ;;  %v953_v20 = vmul.f32 %v947_v13, %v1610_v35  ;;  %v954_v0 = vmul.f32 %v947_v13, %v1625_v58  ;;  %v955_v2 = vmul.f32 %v947_v13, %v1630_v1 }
 0x313   :  { %v1275_v55 = vpop.f32.mrb[23].mxu1  ;;  %v956_v3 = vmul.f32 %v947_v13, %v1643_v28  ;;  %v957_v6 = vmul.f32 %v947_v13, %v1649_v33  ;;  %v958_v8 = vmul.f32 %v947_v13, %v1662_v52  ;;  %v959_v7 = vmul.f32 %v947_v13, %v1669_v62 }
 0x314   :  { %v967_v17 = vrot.slane %v940_v50, %v946_v44  ;;  %v960_v19 = vmul.f32 %v947_v13, %v1680_v22  ;;  %v961_v31 = vmul.f32 %v947_v13, %v1688_v30  ;;  %v962_v4 = vmul.f32 %v947_v13, %v1697_v46 }
 0x315   :  { %v963_v35 = vmul.f32 %v947_v13, %v1704_v53 }
 0x316   :  { %v968_v58 = vadd.f32 %v967_v17, %v948_v49  ;;  %v969_v5 = vadd.f32 %v967_v17, %v949_v56  ;;  %v970_v1 = vadd.f32 %v967_v17, %v950_v57  ;;  %v971_v10 = vadd.f32 %v967_v17, %v951_v59 }
 0x317   :  { %v972_v28 = vadd.f32 %v967_v17, %v952_v61  ;;  %v973_v23 = vadd.f32 %v967_v17, %v953_v20  ;;  %v974_v33 = vadd.f32 %v967_v17, %v954_v0  ;;  %v975_v12 = vadd.f32 %v967_v17, %v955_v2 }
 0x318   :  { %v976_v52 = vadd.f32 %v967_v17, %v956_v3  ;;  %v977_v60 = vadd.f32 %v967_v17, %v957_v6  ;;  %v978_v62 = vadd.f32 %v967_v17, %v958_v8  ;;  %v979_v14 = vadd.f32 %v967_v17, %v959_v7 }
 0x319   :  { %v980_v15 = vadd.f32 %v967_v17, %v960_v19  ;;  %v981_v22 = vadd.f32 %v967_v17, %v961_v31  ;;  %v982_v16 = vadd.f32 %v967_v17, %v962_v4  ;;  %v983_v30 = vadd.f32 %v967_v17, %v963_v35 }
 0x31a   :  { %vm984_vm4 = vcmp.ge.f32.partialorder %v968_v58, 0.0  ;;  %vm985_vm5 = vcmp.ge.f32.partialorder %v969_v5, 0.0  ;;  %vm986_vm6 = vcmp.ge.f32.partialorder %v970_v1, 0.0  ;;  %vm987_vm7 = vcmp.ge.f32.partialorder %v971_v10, 0.0 }
 0x31b   :  { %vm988_vm8 = vcmp.ge.f32.partialorder %v972_v28, 0.0  ;;  %vm989_vm9 = vcmp.ge.f32.partialorder %v973_v23, 0.0  ;;  %vm990_vm10 = vcmp.ge.f32.partialorder %v974_v33, 0.0  ;;  %vm991_vm11 = vcmp.ge.f32.partialorder %v975_v12, 0.0 }
 0x31c   :  { %vm992_vm12 = vcmp.ge.f32.partialorder %v976_v52, 0.0  ;;  %vm993_vm13 = vcmp.ge.f32.partialorder %v977_v60, 0.0  ;;  %vm994_vm14 = vcmp.ge.f32.partialorder %v978_v62, 0.0  ;;  %vm995_vm15 = vcmp.ge.f32.partialorder %v979_v14, 0.0 }
 0x31d   :  { %vm997_vm1 = vcmp.ge.f32.partialorder %v981_v22, 0.0  ;;  %vm998_vm3 = vcmp.ge.f32.partialorder %v982_v16, 0.0  ;;  %v1000_v46 = vmul.f32 0.2, %v968_v58  ;;  %v1001_v53 = vmul.f32 0.2, %v969_v5 }
 0x31e   :  { %v1002_v11 = vmul.f32 0.2, %v970_v1  ;;  %v1003_v18 = vmul.f32 0.2, %v971_v10  ;;  %v1004_v63 = vmul.f32 0.2, %v972_v28 }
 0x31f   :  { %v1005_v45 = vmul.f32 0.2, %v973_v23  ;;  %v1006_v48 = vmul.f32 0.2, %v974_v33  ;;  %v1007_v51 = vmul.f32 0.2, %v975_v12  ;;  %v1016_v24 = vsel %vm984_vm4, %v968_v58, %v1000_v46  ;;  %vm1847_vm4 = vmmov %vm1845_vm0 }
 0x320   :  { %v1008_v54 = vmul.f32 0.2, %v976_v52  ;;  %v1009_v26 = vmul.f32 0.2, %v977_v60  ;;  %v1010_v27 = vmul.f32 0.2, %v978_v62  ;;  %v1017_v32 = vsel %vm985_vm5, %v969_v5, %v1001_v53  ;;  %vm1849_vm5 = vmmov %vm1845_vm0 }
 0x321   :  { %v1011_v29 = vmul.f32 0.2, %v979_v14  ;;  %1032 = vst.msk [vmem:[%s1843_s6] sm:$0xff] %vm1845_vm0, %v1016_v24  ;;  %v1012_v34 = vmul.f32 0.2, %v980_v15  ;;  %v1018_v37 = vsel %vm986_vm6, %v970_v1, %v1002_v11  ;;  %v1019_v39 = vsel %vm987_vm7, %v971_v10, %v1003_v18  ;;  %vm1850_vm6 = vmmov %vm1845_vm0 }
 0x322   :  { %v1013_v36 = vmul.f32 0.2, %v981_v22  ;;  %v1014_v21 = vmul.f32 0.2, %v982_v16  ;;  %1033 = vst.msk [vmem:[%s1843_s6 + $0x8] sm:$0xff] %vm1846_vm2, %v1017_v32  ;;  %v1020_v42 = vsel %vm988_vm8, %v972_v28, %v1004_v63  ;;  %v1021_v9 = vsel %vm989_vm9, %v973_v23, %v1005_v45  ;;  %vm1848_vm2 = vmmov %vm1845_vm0 }
 0x323   :  { %v1015_v38 = vmul.f32 0.2, %v983_v30  ;;  %1034 = vst.msk [vmem:[%s1843_s6 + $0x10] sm:$0xff] %vm1847_vm4, %v1018_v37  ;;  %v1022_v40 = vsel %vm990_vm10, %v974_v33, %v1006_v48  ;;  %v1023_v41 = vsel %vm991_vm11, %v975_v12, %v1007_v51  ;;  %v1024_v43 = vsel %vm992_vm12, %v976_v52, %v1008_v54  ;;  %vm1852_vm8 = vmmov %vm1845_vm0 }
 0x324   :  { %v1025_v44 = vsel %vm993_vm13, %v977_v60, %v1009_v26  ;;  %1035 = vst.msk [vmem:[%s1843_s6 + $0x18] sm:$0xff] %vm1848_vm2, %v1019_v39  ;;  %v1026_v25 = vsel %vm994_vm14, %v978_v62, %v1010_v27  ;;  %v1027_v13 = vsel %vm995_vm15, %v979_v14, %v1011_v29  ;;  %vm1851_vm7 = vcmp.ge.f32.partialorder %v980_v15, 0.0  ;;  %vm1853_vm9 = vmmov %vm1845_vm0 }
 0x325   :  { %1036 = vst.msk [vmem:[%s1843_s6 + $0x20] sm:$0xff] %vm1849_vm5, %v1020_v42  ;;  %v1028_v47 = vsel %vm1851_vm7, %v980_v15, %v1012_v34  ;;  %v1029_v49 = vsel %vm997_vm1, %v981_v22, %v1013_v36  ;;  %vm1854_vm10 = vmmov %vm1845_vm0  ;;  %v1030_v50 = vsel %vm998_vm3, %v982_v16, %v1014_v21  ;;  %vm1856_vm12 = vcmp.ge.f32.partialorder %v983_v30, 0.0 }
 0x326   :  { %1037 = vst.msk [vmem:[%s1843_s6 + $0x28] sm:$0xff] %vm1850_vm6, %v1021_v9  ;;  %vm1855_vm11 = vmmov %vm1845_vm0  ;;  %v1031_v56 = vsel %vm1856_vm12, %v983_v30, %v1015_v38 }
 0x327   :  { %1038 = vst.msk [vmem:[%s1843_s6 + $0x30] sm:$0xff] %vm1852_vm8, %v1022_v40  ;;  %vm1857_vm13 = vmmov %vm1845_vm0 }
 0x328   :  { %1039 = vst.msk [vmem:[%s1843_s6 + $0x38] sm:$0xff] %vm1853_vm9, %v1023_v41  ;;  %vm1858_vm14 = vmmov %vm1845_vm0 }
 0x329   :  { %1040 = vst.msk [vmem:[%s1843_s6 + $0x40] sm:$0xff] %vm1854_vm10, %v1024_v43  ;;  %vm1859_vm15 = vmmov %vm1845_vm0 }
 0x32a   :  { %1041 = vst.msk [vmem:[%s1843_s6 + $0x48] sm:$0xff] %vm1855_vm11, %v1025_v44  ;;  %vm1860_vm1 = vmmov %vm1845_vm0 }
 0x32b   :  { %1042 = vst.msk [vmem:[%s1843_s6 + $0x50] sm:$0xff] %vm1857_vm13, %v1026_v25  ;;  %vm1861_vm3 = vmmov %vm1845_vm0 }
 0x32c   :  { %1043 = vst.msk [vmem:[%s1843_s6 + $0x58] sm:$0xff] %vm1858_vm14, %v1027_v13 }
 0x32d   :  { %1044 = vst.msk [vmem:[%s1843_s6 + $0x60] sm:$0xff] %vm1859_vm15, %v1028_v47 }
 0x32e   :  { %1045 = vst.msk [vmem:[%s1843_s6 + $0x68] sm:$0xff] %vm1845_vm0, %v1029_v49 }
 0x32f   :  { %1046 = vst.msk [vmem:[%s1843_s6 + $0x70] sm:$0xff] %vm1860_vm1, %v1030_v50 }
 0x330   :  { %1047 = vst.msk [vmem:[%s1843_s6 + $0x78] sm:$0xff] %vm1861_vm3, %v1031_v56 }

// kernel: vae_forward.17
= control target key start
LH: loop header
LB: loop body
LE: loop exit
PB: predicated region body
PF: predicated region fallthrough
CT: control target
= control target key end

     0   :  { %v1323_v0 = vmov 0   ;;  %vm446_vm0 = vcmask 130048   ;;  %vm896_vm1 = vcmask 31744   ;;  %s1920_s1 = inlined_call_operand.vmem [shape: bf16[144,4], index: 1, kind: input, shape index: {}]   ;;  %s1921_s0 = inlined_call_operand.vmem [shape: bf16[512,144], index: 0, kind: input, shape index: {}]   ;;  %s1922_s2 = inlined_call_operand.vmem [shape: f32[1,4], index: 2, kind: input, shape index: {}]   ;;  %s1923_s3 = inlined_call_operand.vmem [shape: f32[512,4], index: 3, kind: output, shape index: {}]  }
   0x1   :  { %543 = vmatprep.subr.bf16.mxu0 %v1323_v0  ;;  %1071 = vmatprep.subr.bf16.mxu1 %v1323_v0  ;;  %v1090_v1 = vld [vmem:[%s1920_s1] sm:$0xff]   ;;  %v1091_v2 = vld [vmem:[%s1920_s1 + $0x8] sm:$0xff]   ;;  %v1092_v3 = vld [vmem:[%s1920_s1 + $0x10] sm:$0xff]  }
   0x2   :  { %544 = vmatpush1.bf16.msra.mxu0 %v1090_v1  ;;  %1080 = vmatpush1.bf16.msra.mxu1 %v1090_v1  ;;  %v1093_v4 = vld [vmem:[%s1920_s1 + $0x18] sm:$0xff]   ;;  %v1101_v5 = vld [vmem:[%s1921_s0 + $0x4] ss:$8 sps:$4 sm:$0xff]   ;;  %v1096_v9 = vld [vmem:[%s1920_s1 + $0x30] sm:$0xff]  }
   0x3   :  { %545 = vmatprep.subr.bf16.mxu0 %v1323_v0  ;;  %1072 = vmatprep.subr.bf16.mxu1 %v1323_v0  ;;  %v1104_v6 = vld [vmem:[%s1921_s0 + $0x104] ss:$8 sps:$4 sm:$0xff]   ;;  %v1097_v10 = vld [vmem:[%s1920_s1 + $0x38] sm:$0xff]   ;;  %v1099_v12 = vld [vmem:[%s1921_s0] ss:$8 sps:$4 sm:$0xff]  }
   0x4   :  { %1039 = vmatprep.mubr.msk.bf16.mxu0 %vm446_vm0, %v1101_v5  ;;  %1055 = vmatprep.mubr.msk.bf16.mxu1 %vm446_vm0, %v1104_v6  ;;  %v1094_v7 = vld [vmem:[%s1920_s1 + $0x20] sm:$0xff]   ;;  %v1095_v8 = vld [vmem:[%s1920_s1 + $0x28] sm:$0xff]   ;;  %v1105_v14 = vld [vmem:[%s1921_s0 + $0x14] ss:$8 sps:$4 sm:$0xff]  }
   0x5   :  { %v1098_v11 = vld [vmem:[%s1920_s1 + $0x40] sm:$0xff]   ;;  %v1107_v15 = vld [vmem:[%s1921_s0 + $0x114] ss:$8 sps:$4 sm:$0xff]   ;;  %v1109_v16 = vld [vmem:[%s1921_s0 + $0x10] ss:$8 sps:$4 sm:$0xff]  }
   0x6   :  { %546 = vmatpush1.bf16.msra.mxu0 %v1091_v2  ;;  %1081 = vmatpush1.bf16.msra.mxu1 %v1091_v2  ;;  %v1102_v13 = vld [vmem:[%s1921_s0 + $0x100] ss:$8 sps:$4 sm:$0xff]   ;;  %v1110_v17 = vld [vmem:[%s1921_s0 + $0x110] ss:$8 sps:$4 sm:$0xff]   ;;  %v1111_v18 = vld [vmem:[%s1921_s0 + $0x24] ss:$8 sps:$4 sm:$0xff]  }
   0x7   :  { %547 = vmatprep.subr.bf16.mxu0 %v1323_v0  ;;  %1073 = vmatprep.subr.bf16.mxu1 %v1323_v0  ;;  %v1113_v19 = vld [vmem:[%s1921_s0 + $0x124] ss:$8 sps:$4 sm:$0xff]   ;;  %v1115_v20 = vld [vmem:[%s1921_s0 + $0x20] ss:$8 sps:$4 sm:$0xff]   ;;  %v1117_v22 = vld [vmem:[%s1921_s0 + $0x34] ss:$8 sps:$4 sm:$0xff]  }
   0x8   :  { %v1116_v21 = vld [vmem:[%s1921_s0 + $0x120] ss:$8 sps:$4 sm:$0xff]   ;;  %v1119_v23 = vld [vmem:[%s1921_s0 + $0x134] ss:$8 sps:$4 sm:$0xff]   ;;  %v1121_v24 = vld [vmem:[%s1921_s0 + $0x30] ss:$8 sps:$4 sm:$0xff]  }
   0x9   :  { %v1122_v25 = vld [vmem:[%s1921_s0 + $0x130] ss:$8 sps:$4 sm:$0xff]   ;;  %v1123_v26 = vld [vmem:[%s1921_s0 + $0x44] ss:$8 sps:$4 sm:$0xff]   ;;  %v1127_v28 = vld [vmem:[%s1921_s0 + $0x40] ss:$8 sps:$4 sm:$0xff]  }
   0xa   :  { %548 = vmatpush1.bf16.msra.mxu0 %v1092_v3  ;;  %1082 = vmatpush1.bf16.msra.mxu1 %v1092_v3  ;;  %v1125_v27 = vld [vmem:[%s1921_s0 + $0x144] ss:$8 sps:$4 sm:$0xff]   ;;  %v1128_v29 = vld [vmem:[%s1921_s0 + $0x140] ss:$8 sps:$4 sm:$0xff]   ;;  %v1129_v30 = vld [vmem:[%s1921_s0 + $0x54] ss:$8 sps:$4 sm:$0xff]  }
   0xb   :  { %549 = vmatprep.subr.bf16.mxu0 %v1323_v0  ;;  %1074 = vmatprep.subr.bf16.mxu1 %v1323_v0  ;;  %v1131_v31 = vld [vmem:[%s1921_s0 + $0x154] ss:$8 sps:$4 sm:$0xff]   ;;  %v1133_v32 = vld [vmem:[%s1921_s0 + $0x50] ss:$8 sps:$4 sm:$0xff]   ;;  %v1135_v34 = vld [vmem:[%s1921_s0 + $0x64] ss:$8 sps:$4 sm:$0xff]  }
   0xc   :  { %v1134_v33 = vld [vmem:[%s1921_s0 + $0x150] ss:$8 sps:$4 sm:$0xff]   ;;  %v1137_v35 = vld [vmem:[%s1921_s0 + $0x164] ss:$8 sps:$4 sm:$0xff]   ;;  %v1139_v36 = vld [vmem:[%s1921_s0 + $0x60] ss:$8 sps:$4 sm:$0xff]  }
   0xd   :  { %v1140_v37 = vld [vmem:[%s1921_s0 + $0x160] ss:$8 sps:$4 sm:$0xff]   ;;  %v1141_v38 = vld [vmem:[%s1921_s0 + $0x74] ss:$8 sps:$4 sm:$0xff]   ;;  %v1145_v40 = vld [vmem:[%s1921_s0 + $0x70] ss:$8 sps:$4 sm:$0xff]  }
   0xe   :  { %550 = vmatpush1.bf16.msra.mxu0 %v1093_v4  ;;  %1083 = vmatpush1.bf16.msra.mxu1 %v1093_v4  ;;  %v1143_v39 = vld [vmem:[%s1921_s0 + $0x174] ss:$8 sps:$4 sm:$0xff]   ;;  %v1146_v41 = vld [vmem:[%s1921_s0 + $0x170] ss:$8 sps:$4 sm:$0xff]   ;;  %v1147_v42 = vld [vmem:[%s1921_s0 + $0x84] ss:$8 sps:$4 sm:$0xff]  }
   0xf   :  { %551 = vmatprep.subr.bf16.mxu0 %v1323_v0  ;;  %1075 = vmatprep.subr.bf16.mxu1 %v1323_v0  ;;  %v1149_v43 = vld [vmem:[%s1921_s0 + $0x184] ss:$8 sps:$4 sm:$0xff]   ;;  %v1151_v44 = vld [vmem:[%s1921_s0 + $0x80] ss:$8 sps:$4 sm:$0xff]   ;;  %v1153_v46 = vld [vmem:[%s1921_s0 + $0x94] ss:$8 sps:$4 sm:$0xff]  }
  0x10   :  { %v1152_v45 = vld [vmem:[%s1921_s0 + $0x180] ss:$8 sps:$4 sm:$0xff]   ;;  %v1155_v47 = vld [vmem:[%s1921_s0 + $0x194] ss:$8 sps:$4 sm:$0xff]   ;;  %v1157_v48 = vld [vmem:[%s1921_s0 + $0x90] ss:$8 sps:$4 sm:$0xff]  }
  0x11   :  { %v1158_v49 = vld [vmem:[%s1921_s0 + $0x190] ss:$8 sps:$4 sm:$0xff]   ;;  %v1159_v50 = vld [vmem:[%s1921_s0 + $0xa4] ss:$8 sps:$4 sm:$0xff]   ;;  %v1163_v52 = vld [vmem:[%s1921_s0 + $0xa0] ss:$8 sps:$4 sm:$0xff]  }
  0x12   :  { %552 = vmatpush1.bf16.msra.mxu0 %v1094_v7  ;;  %1084 = vmatpush1.bf16.msra.mxu1 %v1094_v7  ;;  %v1161_v51 = vld [vmem:[%s1921_s0 + $0x1a4] ss:$8 sps:$4 sm:$0xff]   ;;  %v1164_v53 = vld [vmem:[%s1921_s0 + $0x1a0] ss:$8 sps:$4 sm:$0xff]   ;;  %v1165_v54 = vld [vmem:[%s1921_s0 + $0xb4] ss:$8 sps:$4 sm:$0xff]  }
  0x13   :  { %553 = vmatprep.subr.bf16.mxu0 %v1323_v0  ;;  %1076 = vmatprep.subr.bf16.mxu1 %v1323_v0  ;;  %v1167_v55 = vld [vmem:[%s1921_s0 + $0x1b4] ss:$8 sps:$4 sm:$0xff]   ;;  %v1169_v56 = vld [vmem:[%s1921_s0 + $0xb0] ss:$8 sps:$4 sm:$0xff]   ;;  %v1171_v58 = vld [vmem:[%s1921_s0 + $0xc4] ss:$8 sps:$4 sm:$0xff]  }
  0x14   :  { %v1170_v57 = vld [vmem:[%s1921_s0 + $0x1b0] ss:$8 sps:$4 sm:$0xff]   ;;  %v1173_v59 = vld [vmem:[%s1921_s0 + $0x1c4] ss:$8 sps:$4 sm:$0xff]   ;;  %v1175_v60 = vld [vmem:[%s1921_s0 + $0xc0] ss:$8 sps:$4 sm:$0xff]  }
  0x15   :  { %v1176_v61 = vld [vmem:[%s1921_s0 + $0x1c0] ss:$8 sps:$4 sm:$0xff]   ;;  %v1177_v62 = vld [vmem:[%s1921_s0 + $0xd4] ss:$8 sps:$4 sm:$0xff]   ;;  %v1182_v1 = vld [vmem:[%s1921_s0 + $0x1d0] ss:$8 sps:$4 sm:$0xff]  }
  0x16   :  { %554 = vmatpush1.bf16.msra.mxu0 %v1095_v8  ;;  %1085 = vmatpush1.bf16.msra.mxu1 %v1095_v8  ;;  %v1179_v63 = vld [vmem:[%s1921_s0 + $0x1d4] ss:$8 sps:$4 sm:$0xff]   ;;  %v1183_v2 = vld [vmem:[%s1921_s0 + $0xe4] ss:$8 sps:$4 sm:$0xff]   ;;  %v1187_v4 = vld [vmem:[%s1921_s0 + $0xe0] ss:$8 sps:$4 sm:$0xff]  }
  0x17   :  { %555 = vmatprep.subr.bf16.mxu0 %v1323_v0  ;;  %1077 = vmatprep.subr.bf16.mxu1 %v1323_v0  ;;  %v1185_v3 = vld [vmem:[%s1921_s0 + $0x1e4] ss:$8 sps:$4 sm:$0xff]   ;;  %v1188_v5 = vld [vmem:[%s1921_s0 + $0x1e0] ss:$8 sps:$4 sm:$0xff]   ;;  %v1189_v6 = vld [vmem:[%s1921_s0 + $0xf4] ss:$8 sps:$4 sm:$0xff]  }
  0x18   :  { %v1191_v7 = vld [vmem:[%s1921_s0 + $0x1f4] ss:$8 sps:$4 sm:$0xff]   ;;  %v1193_v8 = vld [vmem:[%s1921_s0 + $0xf0] ss:$8 sps:$4 sm:$0xff]  }
  0x1a   :  { %556 = vmatpush1.bf16.msra.mxu0 %v1096_v9  ;;  %1086 = vmatpush1.bf16.msra.mxu1 %v1096_v9  ;;  %v1194_v9 = vld [vmem:[%s1921_s0 + $0x1f0] ss:$8 sps:$4 sm:$0xff]  }
  0x1b   :  { %557 = vmatprep.subr.bf16.mxu0 %v1323_v0  ;;  %1078 = vmatprep.subr.bf16.mxu1 %v1323_v0 }
  0x1e   :  { %558 = vmatpush1.bf16.msra.mxu0 %v1097_v10  ;;  %1087 = vmatpush1.bf16.msra.mxu1 %v1097_v10  ;;  %v1598_v10 = vld [vmem:[%s1922_s2] ss:$0 sm:$0xff] }
  0x1f   :  { %559 = vmatprep.subr.bf16.mxu0 %v1323_v0  ;;  %1079 = vmatprep.subr.bf16.mxu1 %v1323_v0  ;;  %v1181_v0 = vld [vmem:[%s1921_s0 + $0xd0] ss:$8 sps:$4 sm:$0xff]  }
  0x22   :  { %560 = vmatpush1.bf16.msra.mxu0 %v1098_v11  ;;  %1088 = vmatpush1.bf16.msra.mxu1 %v1098_v11 }
  0x25   :  { %576 = vmatmul.mubr.bf16.vlgmr.msra.gmra.mrb[0].mxu0 %v1099_v12  ;;  %704 = vmatmul.mubr.bf16.vlgmr.msra.gmra.mrb[0].mxu1 %v1102_v13 }
  0x26   :  { %1040 = vmatprep.mubr.msk.bf16.mxu0 %vm446_vm0, %v1105_v14  ;;  %1056 = vmatprep.mubr.msk.bf16.mxu1 %vm446_vm0, %v1107_v15 }
  0x2d   :  { %584 = vmatmul.mubr.bf16.gmra.mrb[4].mxu0 %v1109_v16  ;;  %712 = vmatmul.mubr.bf16.gmra.mrb[4].mxu1 %v1110_v17 }
  0x2e   :  { %1041 = vmatprep.mubr.msk.bf16.mxu0 %vm446_vm0, %v1111_v18  ;;  %1057 = vmatprep.mubr.msk.bf16.mxu1 %vm446_vm0, %v1113_v19 }
  0x35   :  { %592 = vmatmul.mubr.bf16.gmra.mrb[8].mxu0 %v1115_v20  ;;  %720 = vmatmul.mubr.bf16.gmra.mrb[8].mxu1 %v1116_v21 }
  0x36   :  { %1042 = vmatprep.mubr.msk.bf16.mxu0 %vm446_vm0, %v1117_v22  ;;  %1058 = vmatprep.mubr.msk.bf16.mxu1 %vm446_vm0, %v1119_v23 }
  0x3d   :  { %600 = vmatmul.mubr.bf16.gmra.mrb[12].mxu0 %v1121_v24  ;;  %728 = vmatmul.mubr.bf16.gmra.mrb[12].mxu1 %v1122_v25 }
  0x3e   :  { %1043 = vmatprep.mubr.msk.bf16.mxu0 %vm446_vm0, %v1123_v26  ;;  %1059 = vmatprep.mubr.msk.bf16.mxu1 %vm446_vm0, %v1125_v27 }
  0x45   :  { %608 = vmatmul.mubr.bf16.gmra.mrb[16].mxu0 %v1127_v28  ;;  %736 = vmatmul.mubr.bf16.gmra.mrb[16].mxu1 %v1128_v29 }
  0x46   :  { %1044 = vmatprep.mubr.msk.bf16.mxu0 %vm446_vm0, %v1129_v30  ;;  %1060 = vmatprep.mubr.msk.bf16.mxu1 %vm446_vm0, %v1131_v31 }
  0x4d   :  { %616 = vmatmul.mubr.bf16.gmra.mrb[20].mxu0 %v1133_v32  ;;  %744 = vmatmul.mubr.bf16.gmra.mrb[20].mxu1 %v1134_v33 }
  0x4e   :  { %1045 = vmatprep.mubr.msk.bf16.mxu0 %vm446_vm0, %v1135_v34  ;;  %1061 = vmatprep.mubr.msk.bf16.mxu1 %vm446_vm0, %v1137_v35 }
  0x55   :  { %624 = vmatmul.mubr.bf16.gmra.mrb[24].mxu0 %v1139_v36  ;;  %752 = vmatmul.mubr.bf16.gmra.mrb[24].mxu1 %v1140_v37 }
  0x56   :  { %1046 = vmatprep.mubr.msk.bf16.mxu0 %vm446_vm0, %v1141_v38  ;;  %1062 = vmatprep.mubr.msk.bf16.mxu1 %vm446_vm0, %v1143_v39 }
  0x5d   :  { %632 = vmatmul.mubr.bf16.gmra.mrb[28].mxu0 %v1145_v40  ;;  %760 = vmatmul.mubr.bf16.gmra.mrb[28].mxu1 %v1146_v41 }
  0x5e   :  { %1047 = vmatprep.mubr.msk.bf16.mxu0 %vm446_vm0, %v1147_v42  ;;  %1063 = vmatprep.mubr.msk.bf16.mxu1 %vm446_vm0, %v1149_v43 }
  0x65   :  { %640 = vmatmul.mubr.bf16.gmra.mrb[32].mxu0 %v1151_v44  ;;  %768 = vmatmul.mubr.bf16.gmra.mrb[32].mxu1 %v1152_v45 }
  0x66   :  { %1048 = vmatprep.mubr.msk.bf16.mxu0 %vm446_vm0, %v1153_v46  ;;  %1064 = vmatprep.mubr.msk.bf16.mxu1 %vm446_vm0, %v1155_v47 }
  0x6d   :  { %648 = vmatmul.mubr.bf16.gmra.mrb[36].mxu0 %v1157_v48  ;;  %776 = vmatmul.mubr.bf16.gmra.mrb[36].mxu1 %v1158_v49 }
  0x6e   :  { %1049 = vmatprep.mubr.msk.bf16.mxu0 %vm446_vm0, %v1159_v50  ;;  %1065 = vmatprep.mubr.msk.bf16.mxu1 %vm446_vm0, %v1161_v51 }
  0x75   :  { %656 = vmatmul.mubr.bf16.gmra.mrb[40].mxu0 %v1163_v52  ;;  %784 = vmatmul.mubr.bf16.gmra.mrb[40].mxu1 %v1164_v53 }
  0x76   :  { %1050 = vmatprep.mubr.msk.bf16.mxu0 %vm446_vm0, %v1165_v54  ;;  %1066 = vmatprep.mubr.msk.bf16.mxu1 %vm446_vm0, %v1167_v55 }
  0x7d   :  { %664 = vmatmul.mubr.bf16.gmra.mrb[44].mxu0 %v1169_v56  ;;  %792 = vmatmul.mubr.bf16.gmra.mrb[44].mxu1 %v1170_v57 }
  0x7e   :  { %1051 = vmatprep.mubr.msk.bf16.mxu0 %vm446_vm0, %v1171_v58  ;;  %1067 = vmatprep.mubr.msk.bf16.mxu1 %vm446_vm0, %v1173_v59 }
  0x85   :  { %672 = vmatmul.mubr.bf16.gmra.mrb[48].mxu0 %v1175_v60  ;;  %800 = vmatmul.mubr.bf16.gmra.mrb[48].mxu1 %v1176_v61 }
  0x86   :  { %1052 = vmatprep.mubr.msk.bf16.mxu0 %vm446_vm0, %v1177_v62  ;;  %1068 = vmatprep.mubr.msk.bf16.mxu1 %vm446_vm0, %v1179_v63 }
  0x8d   :  { %680 = vmatmul.mubr.bf16.gmra.mrb[52].mxu0 %v1181_v0  ;;  %808 = vmatmul.mubr.bf16.gmra.mrb[52].mxu1 %v1182_v1 }
  0x8e   :  { %1053 = vmatprep.mubr.msk.bf16.mxu0 %vm446_vm0, %v1183_v2  ;;  %1069 = vmatprep.mubr.msk.bf16.mxu1 %vm446_vm0, %v1185_v3 }
  0x95   :  { %688 = vmatmul.mubr.bf16.gmra.mrb[56].mxu0 %v1187_v4  ;;  %816 = vmatmul.mubr.bf16.gmra.mrb[56].mxu1 %v1188_v5 }
  0x96   :  { %1054 = vmatprep.mubr.msk.bf16.mxu0 %vm446_vm0, %v1189_v6  ;;  %1070 = vmatprep.mubr.msk.bf16.mxu1 %vm446_vm0, %v1191_v7 }
  0x9d   :  { %696 = vmatmul.mubr.bf16.gmra.mrb[60].mxu0 %v1193_v8  ;;  %824 = vmatmul.mubr.bf16.gmra.mrb[60].mxu1 %v1194_v9 }
  0xf8   :  { %v577_v11 = vpop.f32.mrb[0].mxu0  ;;  %v705_v12 = vpop.f32.mrb[0].mxu1 }
  0xf9   :  { %v578_v13 = vadd.f32 %v1598_v10, %v577_v11  ;;  %v706_v14 = vadd.f32 %v1598_v10, %v705_v12  ;;  %v579_v15 = vpop.f32.mrb[1].mxu0  ;;  %v707_v16 = vpop.f32.mrb[1].mxu1 }
  0xfa   :  { %v580_v17 = vpop.f32.mrb[2].mxu0  ;;  %v708_v18 = vpop.f32.mrb[2].mxu1 }
  0xfb   :  { %1195 = vtanh.f32 %v578_v13  ;;  %v581_v19 = vadd.f32 %v1598_v10, %v580_v17  ;;  %v709_v20 = vadd.f32 %v1598_v10, %v708_v18  ;;  %v582_v21 = vpop.f32.mrb[3].mxu0  ;;  %v710_v22 = vpop.f32.mrb[3].mxu1 }
  0xfc   :  { %1197 = vtanh.f32 %v706_v14 }
  0xfd   :  { %1199 = vtanh.f32 %v581_v19 }
  0xfe   :  { %1201 = vtanh.f32 %v709_v20 }
 0x100   :  { %v585_v23 = vpop.f32.mrb[4].mxu0  ;;  %v713_v24 = vpop.f32.mrb[4].mxu1 }
 0x101   :  { %v586_v25 = vadd.f32 %v1598_v10, %v585_v23  ;;  %v714_v26 = vadd.f32 %v1598_v10, %v713_v24  ;;  %v587_v27 = vpop.f32.mrb[5].mxu0  ;;  %v715_v28 = vpop.f32.mrb[5].mxu1 }
 0x102   :  { %v588_v29 = vpop.f32.mrb[6].mxu0  ;;  %v716_v30 = vpop.f32.mrb[6].mxu1 }
 0x103   :  { %1203 = vtanh.f32 %v586_v25  ;;  %v589_v31 = vadd.f32 %v1598_v10, %v588_v29  ;;  %v717_v32 = vadd.f32 %v1598_v10, %v716_v30  ;;  %v590_v33 = vpop.f32.mrb[7].mxu0  ;;  %v718_v34 = vpop.f32.mrb[7].mxu1 }
 0x104   :  { %1205 = vtanh.f32 %v714_v26 }
 0x105   :  { %v1196_v35 = vpop.eup %1195  ;;  %1207 = vtanh.f32 %v589_v31 }
 0x106   :  { %v1198_v36 = vpop.eup %1197  ;;  %897 = vst.msk [vmem:[%s1923_s3] sm:$0xff] %vm896_vm1, %v1196_v35  ;;  %1209 = vtanh.f32 %v717_v32 }
 0x107   :  { %v1200_v37 = vpop.eup %1199  ;;  %929 = vst.msk [vmem:[%s1923_s3 + $0x100] sm:$0xff] %vm896_vm1, %v1198_v36 }
 0x108   :  { %v1202_v38 = vpop.eup %1201  ;;  %898 = vst.msk [vmem:[%s1923_s3 + $0x8] sm:$0xff] %vm896_vm1, %v1200_v37  ;;  %v593_v39 = vpop.f32.mrb[8].mxu0 }
 0x109   :  { %v721_v40 = vpop.f32.mrb[8].mxu1  ;;  %930 = vst.msk [vmem:[%s1923_s3 + $0x108] sm:$0xff] %vm896_vm1, %v1202_v38  ;;  %v594_v41 = vadd.f32 %v1598_v10, %v593_v39  ;;  %v595_v43 = vpop.f32.mrb[9].mxu0 }
 0x10a   :  { %v722_v42 = vadd.f32 %v1598_v10, %v721_v40  ;;  %v723_v44 = vpop.f32.mrb[9].mxu1  ;;  %v596_v45 = vpop.f32.mrb[10].mxu0 }
 0x10b   :  { %v724_v46 = vpop.f32.mrb[10].mxu1  ;;  %1211 = vtanh.f32 %v594_v41  ;;  %v597_v47 = vadd.f32 %v1598_v10, %v596_v45  ;;  %v598_v49 = vpop.f32.mrb[11].mxu0 }
 0x10c   :  { %v725_v48 = vadd.f32 %v1598_v10, %v724_v46  ;;  %v726_v50 = vpop.f32.mrb[11].mxu1  ;;  %1213 = vtanh.f32 %v722_v42 }
 0x10d   :  { %v1204_v51 = vpop.eup %1203  ;;  %1215 = vtanh.f32 %v597_v47 }
 0x10e   :  { %v1206_v52 = vpop.eup %1205  ;;  %899 = vst.msk [vmem:[%s1923_s3 + $0x10] sm:$0xff] %vm896_vm1, %v1204_v51  ;;  %1217 = vtanh.f32 %v725_v48 }
 0x10f   :  { %v1208_v53 = vpop.eup %1207  ;;  %931 = vst.msk [vmem:[%s1923_s3 + $0x110] sm:$0xff] %vm896_vm1, %v1206_v52 }
 0x110   :  { %v1210_v54 = vpop.eup %1209  ;;  %900 = vst.msk [vmem:[%s1923_s3 + $0x18] sm:$0xff] %vm896_vm1, %v1208_v53  ;;  %v601_v55 = vpop.f32.mrb[12].mxu0 }
 0x111   :  { %v729_v56 = vpop.f32.mrb[12].mxu1  ;;  %932 = vst.msk [vmem:[%s1923_s3 + $0x118] sm:$0xff] %vm896_vm1, %v1210_v54  ;;  %v602_v57 = vadd.f32 %v1598_v10, %v601_v55  ;;  %v603_v59 = vpop.f32.mrb[13].mxu0 }
 0x112   :  { %v730_v58 = vadd.f32 %v1598_v10, %v729_v56  ;;  %v731_v60 = vpop.f32.mrb[13].mxu1  ;;  %v604_v61 = vpop.f32.mrb[14].mxu0 }
 0x113   :  { %v732_v62 = vpop.f32.mrb[14].mxu1  ;;  %1219 = vtanh.f32 %v602_v57  ;;  %v605_v63 = vadd.f32 %v1598_v10, %v604_v61  ;;  %v606_v1 = vpop.f32.mrb[15].mxu0 }
 0x114   :  { %v733_v0 = vadd.f32 %v1598_v10, %v732_v62  ;;  %v734_v2 = vpop.f32.mrb[15].mxu1  ;;  %1221 = vtanh.f32 %v730_v58 }
 0x115   :  { %v1212_v3 = vpop.eup %1211  ;;  %1223 = vtanh.f32 %v605_v63 }
 0x116   :  { %v1214_v4 = vpop.eup %1213  ;;  %901 = vst.msk [vmem:[%s1923_s3 + $0x20] sm:$0xff] %vm896_vm1, %v1212_v3  ;;  %1225 = vtanh.f32 %v733_v0 }
 0x117   :  { %v1216_v5 = vpop.eup %1215  ;;  %933 = vst.msk [vmem:[%s1923_s3 + $0x120] sm:$0xff] %vm896_vm1, %v1214_v4 }
 0x118   :  { %v1218_v6 = vpop.eup %1217  ;;  %902 = vst.msk [vmem:[%s1923_s3 + $0x28] sm:$0xff] %vm896_vm1, %v1216_v5  ;;  %v609_v7 = vpop.f32.mrb[16].mxu0 }
 0x119   :  { %v737_v8 = vpop.f32.mrb[16].mxu1  ;;  %934 = vst.msk [vmem:[%s1923_s3 + $0x128] sm:$0xff] %vm896_vm1, %v1218_v6  ;;  %v610_v9 = vadd.f32 %v1598_v10, %v609_v7  ;;  %v611_v12 = vpop.f32.mrb[17].mxu0 }
 0x11a   :  { %v738_v11 = vadd.f32 %v1598_v10, %v737_v8  ;;  %v739_v13 = vpop.f32.mrb[17].mxu1  ;;  %v612_v14 = vpop.f32.mrb[18].mxu0 }
 0x11b   :  { %v740_v15 = vpop.f32.mrb[18].mxu1  ;;  %1227 = vtanh.f32 %v610_v9  ;;  %v613_v16 = vadd.f32 %v1598_v10, %v612_v14  ;;  %v614_v18 = vpop.f32.mrb[19].mxu0 }
 0x11c   :  { %v741_v17 = vadd.f32 %v1598_v10, %v740_v15  ;;  %v742_v19 = vpop.f32.mrb[19].mxu1  ;;  %1229 = vtanh.f32 %v738_v11 }
 0x11d   :  { %v1220_v20 = vpop.eup %1219  ;;  %1231 = vtanh.f32 %v613_v16 }
 0x11e   :  { %v1222_v21 = vpop.eup %1221  ;;  %903 = vst.msk [vmem:[%s1923_s3 + $0x30] sm:$0xff] %vm896_vm1, %v1220_v20  ;;  %1233 = vtanh.f32 %v741_v17 }
 0x11f   :  { %v1224_v22 = vpop.eup %1223  ;;  %935 = vst.msk [vmem:[%s1923_s3 + $0x130] sm:$0xff] %vm896_vm1, %v1222_v21 }
 0x120   :  { %v1226_v23 = vpop.eup %1225  ;;  %904 = vst.msk [vmem:[%s1923_s3 + $0x38] sm:$0xff] %vm896_vm1, %v1224_v22  ;;  %v617_v24 = vpop.f32.mrb[20].mxu0 }
 0x121   :  { %v745_v25 = vpop.f32.mrb[20].mxu1  ;;  %936 = vst.msk [vmem:[%s1923_s3 + $0x138] sm:$0xff] %vm896_vm1, %v1226_v23  ;;  %v618_v26 = vadd.f32 %v1598_v10, %v617_v24  ;;  %v619_v28 = vpop.f32.mrb[21].mxu0 }
 0x122   :  { %v746_v27 = vadd.f32 %v1598_v10, %v745_v25  ;;  %v747_v29 = vpop.f32.mrb[21].mxu1  ;;  %v620_v30 = vpop.f32.mrb[22].mxu0 }
 0x123   :  { %v748_v31 = vpop.f32.mrb[22].mxu1  ;;  %1235 = vtanh.f32 %v618_v26  ;;  %v621_v32 = vadd.f32 %v1598_v10, %v620_v30  ;;  %v622_v34 = vpop.f32.mrb[23].mxu0 }
 0x124   :  { %v749_v33 = vadd.f32 %v1598_v10, %v748_v31  ;;  %v750_v35 = vpop.f32.mrb[23].mxu1  ;;  %1237 = vtanh.f32 %v746_v27 }
 0x125   :  { %v1228_v36 = vpop.eup %1227  ;;  %1239 = vtanh.f32 %v621_v32 }
 0x126   :  { %v1230_v37 = vpop.eup %1229  ;;  %905 = vst.msk [vmem:[%s1923_s3 + $0x40] sm:$0xff] %vm896_vm1, %v1228_v36  ;;  %1241 = vtanh.f32 %v749_v33 }
 0x127   :  { %v1232_v38 = vpop.eup %1231  ;;  %937 = vst.msk [vmem:[%s1923_s3 + $0x140] sm:$0xff] %vm896_vm1, %v1230_v37 }
 0x128   :  { %v1234_v39 = vpop.eup %1233  ;;  %906 = vst.msk [vmem:[%s1923_s3 + $0x48] sm:$0xff] %vm896_vm1, %v1232_v38  ;;  %v625_v40 = vpop.f32.mrb[24].mxu0 }
 0x129   :  { %v753_v41 = vpop.f32.mrb[24].mxu1  ;;  %938 = vst.msk [vmem:[%s1923_s3 + $0x148] sm:$0xff] %vm896_vm1, %v1234_v39  ;;  %v626_v42 = vadd.f32 %v1598_v10, %v625_v40  ;;  %v627_v44 = vpop.f32.mrb[25].mxu0 }
 0x12a   :  { %v754_v43 = vadd.f32 %v1598_v10, %v753_v41  ;;  %v755_v45 = vpop.f32.mrb[25].mxu1  ;;  %v628_v46 = vpop.f32.mrb[26].mxu0 }
 0x12b   :  { %v756_v47 = vpop.f32.mrb[26].mxu1  ;;  %1243 = vtanh.f32 %v626_v42  ;;  %v629_v48 = vadd.f32 %v1598_v10, %v628_v46  ;;  %v630_v50 = vpop.f32.mrb[27].mxu0 }
 0x12c   :  { %v757_v49 = vadd.f32 %v1598_v10, %v756_v47  ;;  %v758_v51 = vpop.f32.mrb[27].mxu1  ;;  %1245 = vtanh.f32 %v754_v43 }
 0x12d   :  { %v1236_v52 = vpop.eup %1235  ;;  %1247 = vtanh.f32 %v629_v48 }
 0x12e   :  { %v1238_v53 = vpop.eup %1237  ;;  %907 = vst.msk [vmem:[%s1923_s3 + $0x50] sm:$0xff] %vm896_vm1, %v1236_v52  ;;  %1249 = vtanh.f32 %v757_v49 }
 0x12f   :  { %v1240_v54 = vpop.eup %1239  ;;  %939 = vst.msk [vmem:[%s1923_s3 + $0x150] sm:$0xff] %vm896_vm1, %v1238_v53 }
 0x130   :  { %v1242_v55 = vpop.eup %1241  ;;  %908 = vst.msk [vmem:[%s1923_s3 + $0x58] sm:$0xff] %vm896_vm1, %v1240_v54  ;;  %v633_v56 = vpop.f32.mrb[28].mxu0 }
 0x131   :  { %v761_v57 = vpop.f32.mrb[28].mxu1  ;;  %940 = vst.msk [vmem:[%s1923_s3 + $0x158] sm:$0xff] %vm896_vm1, %v1242_v55  ;;  %v634_v58 = vadd.f32 %v1598_v10, %v633_v56  ;;  %v635_v60 = vpop.f32.mrb[29].mxu0 }
 0x132   :  { %v762_v59 = vadd.f32 %v1598_v10, %v761_v57  ;;  %v763_v61 = vpop.f32.mrb[29].mxu1  ;;  %v636_v62 = vpop.f32.mrb[30].mxu0 }
 0x133   :  { %v764_v63 = vpop.f32.mrb[30].mxu1  ;;  %1251 = vtanh.f32 %v634_v58  ;;  %v637_v0 = vadd.f32 %v1598_v10, %v636_v62  ;;  %v638_v2 = vpop.f32.mrb[31].mxu0 }
 0x134   :  { %v765_v1 = vadd.f32 %v1598_v10, %v764_v63  ;;  %v766_v3 = vpop.f32.mrb[31].mxu1  ;;  %1253 = vtanh.f32 %v762_v59 }
 0x135   :  { %v1244_v4 = vpop.eup %1243  ;;  %1255 = vtanh.f32 %v637_v0 }
 0x136   :  { %v1246_v5 = vpop.eup %1245  ;;  %909 = vst.msk [vmem:[%s1923_s3 + $0x60] sm:$0xff] %vm896_vm1, %v1244_v4  ;;  %1257 = vtanh.f32 %v765_v1 }
 0x137   :  { %v1248_v6 = vpop.eup %1247  ;;  %941 = vst.msk [vmem:[%s1923_s3 + $0x160] sm:$0xff] %vm896_vm1, %v1246_v5 }
 0x138   :  { %v1250_v7 = vpop.eup %1249  ;;  %910 = vst.msk [vmem:[%s1923_s3 + $0x68] sm:$0xff] %vm896_vm1, %v1248_v6  ;;  %v641_v8 = vpop.f32.mrb[32].mxu0 }
 0x139   :  { %v769_v9 = vpop.f32.mrb[32].mxu1  ;;  %942 = vst.msk [vmem:[%s1923_s3 + $0x168] sm:$0xff] %vm896_vm1, %v1250_v7  ;;  %v642_v11 = vadd.f32 %v1598_v10, %v641_v8  ;;  %v643_v13 = vpop.f32.mrb[33].mxu0 }
 0x13a   :  { %v770_v12 = vadd.f32 %v1598_v10, %v769_v9  ;;  %v771_v14 = vpop.f32.mrb[33].mxu1  ;;  %v644_v15 = vpop.f32.mrb[34].mxu0 }
 0x13b   :  { %v772_v16 = vpop.f32.mrb[34].mxu1  ;;  %1259 = vtanh.f32 %v642_v11  ;;  %v645_v17 = vadd.f32 %v1598_v10, %v644_v15  ;;  %v646_v19 = vpop.f32.mrb[35].mxu0 }
 0x13c   :  { %v773_v18 = vadd.f32 %v1598_v10, %v772_v16  ;;  %v774_v20 = vpop.f32.mrb[35].mxu1  ;;  %1261 = vtanh.f32 %v770_v12 }
 0x13d   :  { %v1252_v21 = vpop.eup %1251  ;;  %1263 = vtanh.f32 %v645_v17 }
 0x13e   :  { %v1254_v22 = vpop.eup %1253  ;;  %911 = vst.msk [vmem:[%s1923_s3 + $0x70] sm:$0xff] %vm896_vm1, %v1252_v21  ;;  %1265 = vtanh.f32 %v773_v18 }
 0x13f   :  { %v1256_v23 = vpop.eup %1255  ;;  %943 = vst.msk [vmem:[%s1923_s3 + $0x170] sm:$0xff] %vm896_vm1, %v1254_v22 }
 0x140   :  { %v1258_v24 = vpop.eup %1257  ;;  %912 = vst.msk [vmem:[%s1923_s3 + $0x78] sm:$0xff] %vm896_vm1, %v1256_v23  ;;  %v649_v25 = vpop.f32.mrb[36].mxu0 }
 0x141   :  { %v777_v26 = vpop.f32.mrb[36].mxu1  ;;  %944 = vst.msk [vmem:[%s1923_s3 + $0x178] sm:$0xff] %vm896_vm1, %v1258_v24  ;;  %v650_v27 = vadd.f32 %v1598_v10, %v649_v25  ;;  %v651_v29 = vpop.f32.mrb[37].mxu0 }
 0x142   :  { %v778_v28 = vadd.f32 %v1598_v10, %v777_v26  ;;  %v779_v30 = vpop.f32.mrb[37].mxu1  ;;  %v652_v31 = vpop.f32.mrb[38].mxu0 }
 0x143   :  { %v780_v32 = vpop.f32.mrb[38].mxu1  ;;  %1267 = vtanh.f32 %v650_v27  ;;  %v653_v33 = vadd.f32 %v1598_v10, %v652_v31  ;;  %v654_v35 = vpop.f32.mrb[39].mxu0 }
 0x144   :  { %v781_v34 = vadd.f32 %v1598_v10, %v780_v32  ;;  %v782_v36 = vpop.f32.mrb[39].mxu1  ;;  %1269 = vtanh.f32 %v778_v28 }
 0x145   :  { %v1260_v37 = vpop.eup %1259  ;;  %1271 = vtanh.f32 %v653_v33 }
 0x146   :  { %v1262_v38 = vpop.eup %1261  ;;  %913 = vst.msk [vmem:[%s1923_s3 + $0x80] sm:$0xff] %vm896_vm1, %v1260_v37  ;;  %1273 = vtanh.f32 %v781_v34 }
 0x147   :  { %v1264_v39 = vpop.eup %1263  ;;  %945 = vst.msk [vmem:[%s1923_s3 + $0x180] sm:$0xff] %vm896_vm1, %v1262_v38 }
 0x148   :  { %v1266_v40 = vpop.eup %1265  ;;  %914 = vst.msk [vmem:[%s1923_s3 + $0x88] sm:$0xff] %vm896_vm1, %v1264_v39  ;;  %v657_v41 = vpop.f32.mrb[40].mxu0 }
 0x149   :  { %v785_v42 = vpop.f32.mrb[40].mxu1  ;;  %946 = vst.msk [vmem:[%s1923_s3 + $0x188] sm:$0xff] %vm896_vm1, %v1266_v40  ;;  %v658_v43 = vadd.f32 %v1598_v10, %v657_v41  ;;  %v659_v45 = vpop.f32.mrb[41].mxu0 }
 0x14a   :  { %v786_v44 = vadd.f32 %v1598_v10, %v785_v42  ;;  %v787_v46 = vpop.f32.mrb[41].mxu1  ;;  %v660_v47 = vpop.f32.mrb[42].mxu0 }
 0x14b   :  { %v788_v48 = vpop.f32.mrb[42].mxu1  ;;  %1275 = vtanh.f32 %v658_v43  ;;  %v661_v49 = vadd.f32 %v1598_v10, %v660_v47  ;;  %v662_v51 = vpop.f32.mrb[43].mxu0 }
 0x14c   :  { %v789_v50 = vadd.f32 %v1598_v10, %v788_v48  ;;  %v790_v52 = vpop.f32.mrb[43].mxu1  ;;  %1277 = vtanh.f32 %v786_v44 }
 0x14d   :  { %v1268_v53 = vpop.eup %1267  ;;  %1279 = vtanh.f32 %v661_v49 }
 0x14e   :  { %v1270_v54 = vpop.eup %1269  ;;  %915 = vst.msk [vmem:[%s1923_s3 + $0x90] sm:$0xff] %vm896_vm1, %v1268_v53  ;;  %1281 = vtanh.f32 %v789_v50 }
 0x14f   :  { %v1272_v55 = vpop.eup %1271  ;;  %947 = vst.msk [vmem:[%s1923_s3 + $0x190] sm:$0xff] %vm896_vm1, %v1270_v54 }
 0x150   :  { %v1274_v56 = vpop.eup %1273  ;;  %916 = vst.msk [vmem:[%s1923_s3 + $0x98] sm:$0xff] %vm896_vm1, %v1272_v55  ;;  %v665_v57 = vpop.f32.mrb[44].mxu0 }
 0x151   :  { %v793_v58 = vpop.f32.mrb[44].mxu1  ;;  %948 = vst.msk [vmem:[%s1923_s3 + $0x198] sm:$0xff] %vm896_vm1, %v1274_v56  ;;  %v666_v59 = vadd.f32 %v1598_v10, %v665_v57  ;;  %v667_v61 = vpop.f32.mrb[45].mxu0 }
 0x152   :  { %v794_v60 = vadd.f32 %v1598_v10, %v793_v58  ;;  %v795_v62 = vpop.f32.mrb[45].mxu1  ;;  %v668_v63 = vpop.f32.mrb[46].mxu0 }
 0x153   :  { %v796_v0 = vpop.f32.mrb[46].mxu1  ;;  %1283 = vtanh.f32 %v666_v59  ;;  %v669_v1 = vadd.f32 %v1598_v10, %v668_v63  ;;  %v670_v3 = vpop.f32.mrb[47].mxu0 }
 0x154   :  { %v797_v2 = vadd.f32 %v1598_v10, %v796_v0  ;;  %v798_v4 = vpop.f32.mrb[47].mxu1  ;;  %1285 = vtanh.f32 %v794_v60 }
 0x155   :  { %v1276_v5 = vpop.eup %1275  ;;  %1287 = vtanh.f32 %v669_v1 }
 0x156   :  { %v1278_v6 = vpop.eup %1277  ;;  %917 = vst.msk [vmem:[%s1923_s3 + $0xa0] sm:$0xff] %vm896_vm1, %v1276_v5  ;;  %1289 = vtanh.f32 %v797_v2 }
 0x157   :  { %v1280_v7 = vpop.eup %1279  ;;  %949 = vst.msk [vmem:[%s1923_s3 + $0x1a0] sm:$0xff] %vm896_vm1, %v1278_v6 }
 0x158   :  { %v1282_v8 = vpop.eup %1281  ;;  %918 = vst.msk [vmem:[%s1923_s3 + $0xa8] sm:$0xff] %vm896_vm1, %v1280_v7  ;;  %v673_v9 = vpop.f32.mrb[48].mxu0 }
 0x159   :  { %v801_v11 = vpop.f32.mrb[48].mxu1  ;;  %950 = vst.msk [vmem:[%s1923_s3 + $0x1a8] sm:$0xff] %vm896_vm1, %v1282_v8  ;;  %v674_v12 = vadd.f32 %v1598_v10, %v673_v9  ;;  %v675_v14 = vpop.f32.mrb[49].mxu0 }
 0x15a   :  { %v802_v13 = vadd.f32 %v1598_v10, %v801_v11  ;;  %v803_v15 = vpop.f32.mrb[49].mxu1  ;;  %v676_v16 = vpop.f32.mrb[50].mxu0 }
 0x15b   :  { %v804_v17 = vpop.f32.mrb[50].mxu1  ;;  %1291 = vtanh.f32 %v674_v12  ;;  %v677_v18 = vadd.f32 %v1598_v10, %v676_v16  ;;  %v678_v20 = vpop.f32.mrb[51].mxu0 }
 0x15c   :  { %v805_v19 = vadd.f32 %v1598_v10, %v804_v17  ;;  %v806_v21 = vpop.f32.mrb[51].mxu1  ;;  %1293 = vtanh.f32 %v802_v13 }
 0x15d   :  { %v1284_v22 = vpop.eup %1283  ;;  %1295 = vtanh.f32 %v677_v18 }
 0x15e   :  { %v1286_v23 = vpop.eup %1285  ;;  %919 = vst.msk [vmem:[%s1923_s3 + $0xb0] sm:$0xff] %vm896_vm1, %v1284_v22  ;;  %1297 = vtanh.f32 %v805_v19 }
 0x15f   :  { %v1288_v24 = vpop.eup %1287  ;;  %951 = vst.msk [vmem:[%s1923_s3 + $0x1b0] sm:$0xff] %vm896_vm1, %v1286_v23 }
 0x160   :  { %v1290_v25 = vpop.eup %1289  ;;  %920 = vst.msk [vmem:[%s1923_s3 + $0xb8] sm:$0xff] %vm896_vm1, %v1288_v24  ;;  %v681_v26 = vpop.f32.mrb[52].mxu0 }
 0x161   :  { %v809_v27 = vpop.f32.mrb[52].mxu1  ;;  %952 = vst.msk [vmem:[%s1923_s3 + $0x1b8] sm:$0xff] %vm896_vm1, %v1290_v25  ;;  %v682_v28 = vadd.f32 %v1598_v10, %v681_v26  ;;  %v683_v30 = vpop.f32.mrb[53].mxu0 }
 0x162   :  { %v810_v29 = vadd.f32 %v1598_v10, %v809_v27  ;;  %v811_v31 = vpop.f32.mrb[53].mxu1  ;;  %v684_v32 = vpop.f32.mrb[54].mxu0 }
 0x163   :  { %v812_v33 = vpop.f32.mrb[54].mxu1  ;;  %1299 = vtanh.f32 %v682_v28  ;;  %v685_v34 = vadd.f32 %v1598_v10, %v684_v32  ;;  %v686_v36 = vpop.f32.mrb[55].mxu0 }
 0x164   :  { %v813_v35 = vadd.f32 %v1598_v10, %v812_v33  ;;  %v814_v37 = vpop.f32.mrb[55].mxu1  ;;  %1301 = vtanh.f32 %v810_v29 }
 0x165   :  { %v1292_v38 = vpop.eup %1291  ;;  %1303 = vtanh.f32 %v685_v34 }
 0x166   :  { %v1294_v39 = vpop.eup %1293  ;;  %921 = vst.msk [vmem:[%s1923_s3 + $0xc0] sm:$0xff] %vm896_vm1, %v1292_v38  ;;  %1305 = vtanh.f32 %v813_v35 }
 0x167   :  { %v1296_v40 = vpop.eup %1295  ;;  %953 = vst.msk [vmem:[%s1923_s3 + $0x1c0] sm:$0xff] %vm896_vm1, %v1294_v39 }
 0x168   :  { %v1298_v41 = vpop.eup %1297  ;;  %922 = vst.msk [vmem:[%s1923_s3 + $0xc8] sm:$0xff] %vm896_vm1, %v1296_v40  ;;  %v689_v42 = vpop.f32.mrb[56].mxu0 }
 0x169   :  { %v817_v43 = vpop.f32.mrb[56].mxu1  ;;  %954 = vst.msk [vmem:[%s1923_s3 + $0x1c8] sm:$0xff] %vm896_vm1, %v1298_v41  ;;  %v690_v44 = vadd.f32 %v1598_v10, %v689_v42  ;;  %v691_v46 = vpop.f32.mrb[57].mxu0 }
 0x16a   :  { %v818_v45 = vadd.f32 %v1598_v10, %v817_v43  ;;  %v819_v47 = vpop.f32.mrb[57].mxu1  ;;  %v692_v48 = vpop.f32.mrb[58].mxu0 }
 0x16b   :  { %v820_v49 = vpop.f32.mrb[58].mxu1  ;;  %1307 = vtanh.f32 %v690_v44  ;;  %v693_v50 = vadd.f32 %v1598_v10, %v692_v48  ;;  %v694_v52 = vpop.f32.mrb[59].mxu0 }
 0x16c   :  { %v821_v51 = vadd.f32 %v1598_v10, %v820_v49  ;;  %v822_v53 = vpop.f32.mrb[59].mxu1  ;;  %1309 = vtanh.f32 %v818_v45 }
 0x16d   :  { %v1300_v54 = vpop.eup %1299  ;;  %1311 = vtanh.f32 %v693_v50 }
 0x16e   :  { %v1302_v55 = vpop.eup %1301  ;;  %923 = vst.msk [vmem:[%s1923_s3 + $0xd0] sm:$0xff] %vm896_vm1, %v1300_v54  ;;  %1313 = vtanh.f32 %v821_v51 }
 0x16f   :  { %v1304_v56 = vpop.eup %1303  ;;  %955 = vst.msk [vmem:[%s1923_s3 + $0x1d0] sm:$0xff] %vm896_vm1, %v1302_v55 }
 0x170   :  { %v1306_v57 = vpop.eup %1305  ;;  %924 = vst.msk [vmem:[%s1923_s3 + $0xd8] sm:$0xff] %vm896_vm1, %v1304_v56  ;;  %v697_v58 = vpop.f32.mrb[60].mxu0 }
 0x171   :  { %v825_v59 = vpop.f32.mrb[60].mxu1  ;;  %956 = vst.msk [vmem:[%s1923_s3 + $0x1d8] sm:$0xff] %vm896_vm1, %v1306_v57  ;;  %v698_v60 = vadd.f32 %v1598_v10, %v697_v58  ;;  %v699_v62 = vpop.f32.mrb[61].mxu0 }
 0x172   :  { %v826_v61 = vadd.f32 %v1598_v10, %v825_v59  ;;  %v827_v63 = vpop.f32.mrb[61].mxu1  ;;  %v700_v0 = vpop.f32.mrb[62].mxu0 }
 0x173   :  { %v828_v1 = vpop.f32.mrb[62].mxu1  ;;  %1315 = vtanh.f32 %v698_v60  ;;  %v701_v2 = vadd.f32 %v1598_v10, %v700_v0  ;;  %v702_v4 = vpop.f32.mrb[63].mxu0 }
 0x174   :  { %v829_v3 = vadd.f32 %v1598_v10, %v828_v1  ;;  %v830_v5 = vpop.f32.mrb[63].mxu1  ;;  %1317 = vtanh.f32 %v826_v61 }
 0x175   :  { %v1308_v6 = vpop.eup %1307  ;;  %1319 = vtanh.f32 %v701_v2 }
 0x176   :  { %v1310_v7 = vpop.eup %1309  ;;  %925 = vst.msk [vmem:[%s1923_s3 + $0xe0] sm:$0xff] %vm896_vm1, %v1308_v6  ;;  %1321 = vtanh.f32 %v829_v3 }
 0x177   :  { %v1312_v8 = vpop.eup %1311  ;;  %957 = vst.msk [vmem:[%s1923_s3 + $0x1e0] sm:$0xff] %vm896_vm1, %v1310_v7 }
 0x178   :  { %v1314_v9 = vpop.eup %1313  ;;  %926 = vst.msk [vmem:[%s1923_s3 + $0xe8] sm:$0xff] %vm896_vm1, %v1312_v8 }
 0x179   :  { %958 = vst.msk [vmem:[%s1923_s3 + $0x1e8] sm:$0xff] %vm896_vm1, %v1314_v9 }
 0x17d   :  { %v1316_v10 = vpop.eup %1315 }
 0x17e   :  { %v1318_v11 = vpop.eup %1317  ;;  %927 = vst.msk [vmem:[%s1923_s3 + $0xf0] sm:$0xff] %vm896_vm1, %v1316_v10 }
 0x17f   :  { %v1320_v12 = vpop.eup %1319  ;;  %959 = vst.msk [vmem:[%s1923_s3 + $0x1f0] sm:$0xff] %vm896_vm1, %v1318_v11 }
 0x180   :  { %v1322_v13 = vpop.eup %1321  ;;  %928 = vst.msk [vmem:[%s1923_s3 + $0xf8] sm:$0xff] %vm896_vm1, %v1320_v12 }
 0x181   :  { %960 = vst.msk [vmem:[%s1923_s3 + $0x1f8] sm:$0xff] %vm896_vm1, %v1322_v13 }

</bundles_post_ra>
